<compile_context>
chip_gen: v7x
topology: tpu7x:2x2x1
jax: 0.10.0
libtpu: 0.0.40
codegen_flags: <defaults>
</compile_context>

<pallas_src>
import functools

import jax
import jax.numpy as jnp
from jax.experimental import pallas as pl
from jax.experimental.pallas import tpu as pltpu

NEG_INF = -1e30  # finite stand-in for -inf (exp underflows to exactly 0)


# ------------------------------- kernel ------------------------------------

def _rcca_kernel(x_ref, wq_ref, wk_ref, wv_ref, bq_ref, bk_ref, bv_ref,
                 ph2w_ref, pw2h_ref, mask_ref, gamma_ref, y_ref, *, recurrence):
    x0 = x_ref[0]                                # (H, W, C)
    H, W, C = x0.shape
    HW = H * W

    wq = wq_ref[...]                             # (C, Cq)
    wk = wk_ref[...]                             # (C, Cq)
    wv = wv_ref[...]                             # (C, C)
    bq = bq_ref[...]                             # (1, Cq)
    bk = bk_ref[...]                             # (1, Cq)
    bv = bv_ref[...]                             # (1, C)
    p_h2w = ph2w_ref[...]                        # (W*H, H*W) row perm: h-major -> w-major
    p_w2h = pw2h_ref[...]                        # (H*W, W*H) row perm: w-major -> h-major
    diag_mask = mask_ref[...]                    # (H, H): 0 off-diag, NEG_INF on diag
    gamma = gamma_ref[0]                         # scalar (SMEM)
    Cq = wq.shape[1]

    f32 = jnp.float32
    x_flat = x0.reshape(HW, C).astype(f32)       # h-major rows: r = h*W + w

    # recurrence is static -> Python loop is unrolled; activations stay in VMEM.
    for _ in range(recurrence):
        # --- 1x1 convs as a single flat matmul each (computed once per view) ---
        q = jnp.dot(x_flat, wq, preferred_element_type=f32) + bq       # (HW, Cq)
        k = jnp.dot(x_flat, wk, preferred_element_type=f32) + bk       # (HW, Cq)
        v = jnp.dot(x_flat, wv, preferred_element_type=f32) + bv       # (HW, C)

        # --- H-direction (column) operands derived in-kernel via MXU row-permute ---
        qh = jnp.dot(p_h2w, q, preferred_element_type=f32).reshape(W, H, Cq)
        kh = jnp.dot(p_h2w, k, preferred_element_type=f32).reshape(W, H, Cq)
        vh = jnp.dot(p_h2w, v, preferred_element_type=f32).reshape(W, H, C)

        q3 = q.reshape(H, W, Cq)
        k3 = k.reshape(H, W, Cq)
        v3 = v.reshape(H, W, C)

        # --- energies (batch-leading batched matmuls) ---
        # e_h[w,h,g] = sum_c q[h,w,c] * k[g,w,c]  (+ diagonal -inf mask)
        e_h = jnp.einsum('whc,wgc->whg', qh, kh,
                         preferred_element_type=f32) + diag_mask        # (W, H, H)
        # e_w[h,w,v] = sum_c q[h,w,c] * k[h,v,c]
        e_w = jnp.einsum('hwc,hvc->hwv', q3, k3,
                         preferred_element_type=f32)                    # (H, W, W)

        # --- joint softmax over the concatenated (H + W) axis; stats in (H,W) ---
        m = jnp.maximum(jnp.max(e_h, axis=2).T, jnp.max(e_w, axis=2))   # (H, W)
        p_h = jnp.exp(e_h - m.T[:, :, None])                            # (W, H, H)
        p_w = jnp.exp(e_w - m[:, :, None])                              # (H, W, W)
        denom = jnp.sum(p_h, axis=2).T + jnp.sum(p_w, axis=2)           # (H, W)
        inv = pl.reciprocal(denom, approx=True)                         # EUP slot
        inv = inv * (2.0 - denom * inv)                                 # 1 Newton step -> f32 accuracy

        # --- attention-weighted values (unnormalized; normalize once below) ---
        o_h = jnp.einsum('whg,wgc->whc', p_h, vh,
                         preferred_element_type=f32)                    # (W, H, C)
        o_w = jnp.einsum('hwv,hvc->hwc', p_w, v3,
                         preferred_element_type=f32)                    # (H, W, C)

        # --- bring out_H back to row-major, combine, scale, residual (all fused) ---
        o_h_rm = jnp.dot(p_w2h, o_h.reshape(W * H, C),
                         preferred_element_type=f32).reshape(H, W, C)
        out = (o_h_rm + o_w) * inv[:, :, None]                          # (H, W, C)
        x_flat = x_flat + gamma * out.reshape(HW, C)

    y_ref[0] = x_flat.reshape(H, W, C).astype(y_ref.dtype)              # single store


# ------------------------------- wrapper ------------------------------------

def _make_constants(H, W, dtype=jnp.float32):
    """Precomputed helpers: row-permutation matrices and the -inf diagonal mask."""
    r = jnp.arange(H * W, dtype=jnp.int32)              # h-major index r = h*W + w
    s_of_r = (r % W) * H + (r // W)                     # matching w-major index
    p_h2w = (jnp.arange(W * H, dtype=jnp.int32)[:, None] == s_of_r[None, :]).astype(dtype)
    p_w2h = p_h2w.T                                     # permutation inverse
    diag_mask = jnp.where(jnp.eye(H, dtype=bool), NEG_INF, 0.0).astype(dtype)
    return p_h2w, p_w2h, diag_mask


@functools.partial(jax.jit, static_argnames=("recurrence",))
def rcca_forward(x_nchw, params, recurrence=2):
    """RCCA.forward: `recurrence` applications of the shared-parameter CC_module,
    fused into a single pallas_call (grid over the batch dimension)."""
    wq, bq, wk, bk, wv, bv, gamma = params
    B, C, H, W = x_nchw.shape
    Cq = wq.shape[1]
    HW = H * W

    x_nhwc = jnp.transpose(x_nchw, (0, 2, 3, 1))        # NCHW -> NHWC (boundary only)
    p_h2w, p_w2h, diag_mask = _make_constants(H, W, jnp.float32)

    kernel = functools.partial(_rcca_kernel, recurrence=recurrence)
    y_nhwc = pl.pallas_call(
        kernel,
        out_shape=jax.ShapeDtypeStruct((B, H, W, C), x_nhwc.dtype),
        grid=(B,),
        in_specs=[
            pl.BlockSpec((1, H, W, C), lambda b: (b, 0, 0, 0)),   # x (single view)
            pl.BlockSpec((C, Cq), lambda b: (0, 0)),              # wq
            pl.BlockSpec((C, Cq), lambda b: (0, 0)),              # wk
            pl.BlockSpec((C, C), lambda b: (0, 0)),               # wv
            pl.BlockSpec((1, Cq), lambda b: (0, 0)),              # bq
            pl.BlockSpec((1, Cq), lambda b: (0, 0)),              # bk
            pl.BlockSpec((1, C), lambda b: (0, 0)),               # bv
            pl.BlockSpec((HW, HW), lambda b: (0, 0)),             # perm h-major -> w-major
            pl.BlockSpec((HW, HW), lambda b: (0, 0)),             # perm w-major -> h-major
            pl.BlockSpec((H, H), lambda b: (0, 0)),               # additive diagonal mask
            pl.BlockSpec(memory_space=pltpu.MemorySpace.SMEM),    # gamma scalar
        ],
        out_specs=pl.BlockSpec((1, H, W, C), lambda b: (b, 0, 0, 0)),
        compiler_params=pltpu.CompilerParams(dimension_semantics=("parallel",)),
    )(x_nhwc, wq, wk, wv, bq, bk, bv, p_h2w, p_w2h, diag_mask, gamma)

    return jnp.transpose(y_nhwc, (0, 3, 1, 2))          # NHWC -> NCHW


# ----------------------------- parameters ---------------------------------

def init_rcca_params(key, in_channels):
    cq = in_channels // 8
    ks = jax.random.split(key, 6)
    scale = 0.05
    wq = scale * jax.random.normal(ks[0], (in_channels, cq), jnp.float32)
    bq = scale * jax.random.normal(ks[1], (1, cq), jnp.float32)
    wk = scale * jax.random.normal(ks[2], (in_channels, cq), jnp.float32)
    bk = scale * jax.random.normal(ks[3], (1, cq), jnp.float32)
    wv = scale * jax.random.normal(ks[4], (in_channels, in_channels), jnp.float32)
    bv = scale * jax.random.normal(ks[5], (1, in_channels), jnp.float32)
    # PyTorch inits gamma = 0 (forward becomes identity); use a nonzero value so
    # the attention path is actually exercised by the test.
    gamma = jnp.array([0.5], jnp.float32)
    return (wq, bq, wk, bk, wv, bv, gamma)


# ------------------------ pure-JAX reference (NCHW) ------------------------

def _cc_ref_nchw(x, params):
    wq, bq, wk, bk, wv, bv, gamma = params
    B, C, H, W = x.shape

    def conv(xx, w, b):                                 # w: (C, O), b: (1, O)
        return jnp.einsum('bchw,co->bohw', xx, w) + b[0][None, :, None, None]

    q = conv(x, wq, bq)
    k = conv(x, wk, bk)
    v = conv(x, wv, bv)
    e_h = jnp.einsum('bchw,bcgw->bhwg', q, k)
    diag = jnp.eye(H, dtype=bool)[None, :, None, :]
    e_h = jnp.where(diag, -jnp.inf, e_h)
    e_w = jnp.einsum('bchw,bchv->bhwv', q, k)
    concat = jax.nn.softmax(jnp.concatenate([e_h, e_w], axis=3), axis=3)
    att_h = concat[..., :H]
    att_w = concat[..., H:]
    out_h = jnp.einsum('bcgw,bhwg->bchw', v, att_h)
    out_w = jnp.einsum('bchv,bhwv->bchw', v, att_w)
    return gamma[0] * (out_h + out_w) + x


def rcca_ref(x, params, recurrence=2):
    for _ in range(recurrence):
        x = _cc_ref_nchw(x, params)
    return x


# --------------------------------- main ------------------------------------

if __name__ == "__main__":
    key = jax.random.PRNGKey(0)
    kx, kp = jax.random.split(key)

    B, C, H, W = 2, 64, 16, 16          # in_channels must be divisible by 8
    x = jax.random.normal(kx, (B, C, H, W), jnp.float32)
    params = init_rcca_params(kp, C)

    out = rcca_forward(x, params, recurrence=2)
    out = jax.block_until_ready(out)

    ref = rcca_ref(x, params, recurrence=2)
    assert out.shape == x.shape and out.dtype == x.dtype
    # Both sides run their matmuls at the backend's default f32 matmul precision,
    # so allow ~1e-3-level slack; semantic errors would be orders of magnitude larger.
    err = float(jnp.max(jnp.abs(out - ref)))
    if not err < 3e-3:
        raise AssertionError(f"mismatch vs reference: max abs err = {err}")
    print("KERNEL_OK")
</pallas_src>

<mosaic_0001>
module attributes {stable_mosaic.version = 11 : i64} {
  func.func @_rcca_kernel(%arg0: i32, %arg1: memref<1x16x16x64xf32, #tpu.memory_space<vmem>>, %arg2: memref<64x8xf32, #tpu.memory_space<vmem>>, %arg3: memref<64x8xf32, #tpu.memory_space<vmem>>, %arg4: memref<64x64xf32, #tpu.memory_space<vmem>>, %arg5: memref<1x8xf32, #tpu.memory_space<vmem>>, %arg6: memref<1x8xf32, #tpu.memory_space<vmem>>, %arg7: memref<1x64xf32, #tpu.memory_space<vmem>>, %arg8: memref<256x256xf32, #tpu.memory_space<vmem>>, %arg9: memref<256x256xf32, #tpu.memory_space<vmem>>, %arg10: memref<16x16xf32, #tpu.memory_space<vmem>>, %arg11: memref<1xf32, #tpu.memory_space<smem>>, %arg12: memref<1x16x16x64xf32, #tpu.memory_space<vmem>>) attributes {dimension_semantics = [#tpu.dimension_semantics<parallel>], iteration_bounds = array<i64: 2>, scalar_prefetch = 0 : i64, scratch_operands = 0 : i64, tpu.core_type = #tpu.core_type<tc>, window_params = [{transform_indices = @transform_0, window_bounds = array<i64: 1, 16, 16, 64>}, {pipeline_mode = #tpu.pipeline_mode<synchronous>, transform_indices = @transform_1, window_bounds = array<i64: 64, 8>}, {pipeline_mode = #tpu.pipeline_mode<synchronous>, transform_indices = @transform_2, window_bounds = array<i64: 64, 8>}, {pipeline_mode = #tpu.pipeline_mode<synchronous>, transform_indices = @transform_3, window_bounds = array<i64: 64, 64>}, {pipeline_mode = #tpu.pipeline_mode<synchronous>, transform_indices = @transform_4, window_bounds = array<i64: 1, 8>}, {pipeline_mode = #tpu.pipeline_mode<synchronous>, transform_indices = @transform_5, window_bounds = array<i64: 1, 8>}, {pipeline_mode = #tpu.pipeline_mode<synchronous>, transform_indices = @transform_6, window_bounds = array<i64: 1, 64>}, {pipeline_mode = #tpu.pipeline_mode<synchronous>, transform_indices = @transform_7, window_bounds = array<i64: 256, 256>}, {pipeline_mode = #tpu.pipeline_mode<synchronous>, transform_indices = @transform_8, window_bounds = array<i64: 256, 256>}, {pipeline_mode = #tpu.pipeline_mode<synchronous>, transform_indices = @transform_9, window_bounds = array<i64: 16, 16>}, {transform_indices = @transform_10, window_bounds = array<i64: 1>}, {transform_indices = @transform_11, window_bounds = array<i64: 1, 16, 16, 64>}]} {
    %c0 = arith.constant 0 : index
    %c0_0 = arith.constant 0 : index
    %c0_1 = arith.constant 0 : index
    %c0_2 = arith.constant 0 : index
    %0 = vector.load %arg1[%c0, %c0_0, %c0_1, %c0_2] : memref<1x16x16x64xf32, #tpu.memory_space<vmem>>, vector<1x16x16x64xf32>
    %1 = vector.shape_cast %0 : vector<1x16x16x64xf32> to vector<16x16x64xf32>
    %c0_3 = arith.constant 0 : index
    %c0_4 = arith.constant 0 : index
    %2 = vector.load %arg2[%c0_3, %c0_4] : memref<64x8xf32, #tpu.memory_space<vmem>>, vector<64x8xf32>
    %c0_5 = arith.constant 0 : index
    %c0_6 = arith.constant 0 : index
    %3 = vector.load %arg3[%c0_5, %c0_6] : memref<64x8xf32, #tpu.memory_space<vmem>>, vector<64x8xf32>
    %c0_7 = arith.constant 0 : index
    %c0_8 = arith.constant 0 : index
    %4 = vector.load %arg4[%c0_7, %c0_8] : memref<64x64xf32, #tpu.memory_space<vmem>>, vector<64x64xf32>
    %c0_9 = arith.constant 0 : index
    %c0_10 = arith.constant 0 : index
    %5 = vector.load %arg5[%c0_9, %c0_10] : memref<1x8xf32, #tpu.memory_space<vmem>>, vector<1x8xf32>
    %c0_11 = arith.constant 0 : index
    %c0_12 = arith.constant 0 : index
    %6 = vector.load %arg6[%c0_11, %c0_12] : memref<1x8xf32, #tpu.memory_space<vmem>>, vector<1x8xf32>
    %c0_13 = arith.constant 0 : index
    %c0_14 = arith.constant 0 : index
    %7 = vector.load %arg7[%c0_13, %c0_14] : memref<1x64xf32, #tpu.memory_space<vmem>>, vector<1x64xf32>
    %c0_15 = arith.constant 0 : index
    %c0_16 = arith.constant 0 : index
    %8 = vector.load %arg8[%c0_15, %c0_16] : memref<256x256xf32, #tpu.memory_space<vmem>>, vector<256x256xf32>
    %c0_17 = arith.constant 0 : index
    %c0_18 = arith.constant 0 : index
    %9 = vector.load %arg9[%c0_17, %c0_18] : memref<256x256xf32, #tpu.memory_space<vmem>>, vector<256x256xf32>
    %c0_19 = arith.constant 0 : index
    %c0_20 = arith.constant 0 : index
    %10 = vector.load %arg10[%c0_19, %c0_20] : memref<16x16xf32, #tpu.memory_space<vmem>>, vector<16x16xf32>
    %c0_21 = arith.constant 0 : index
    %11 = memref.load %arg11[%c0_21] : memref<1xf32, #tpu.memory_space<smem>>
    %12 = vector.shape_cast %1 : vector<16x16x64xf32> to vector<256x64xf32>
    %cst = arith.constant dense<0.000000e+00> : vector<256x8xf32>
    %13 = tpu.matmul %12, %2, %cst {dimension_numbers = #tpu.dot_dimension_numbers<[1], [0], [0], [1], [0, 0, 1, 1], [], []>} : vector<256x64xf32>, vector<64x8xf32>, vector<256x8xf32> -> vector<256x8xf32>
    %14 = vector.broadcast %5 : vector<1x8xf32> to vector<256x8xf32>
    %15 = arith.addf %13, %14 : vector<256x8xf32>
    %cst_22 = arith.constant dense<0.000000e+00> : vector<256x8xf32>
    %16 = tpu.matmul %12, %3, %cst_22 {dimension_numbers = #tpu.dot_dimension_numbers<[1], [0], [0], [1], [0, 0, 1, 1], [], []>} : vector<256x64xf32>, vector<64x8xf32>, vector<256x8xf32> -> vector<256x8xf32>
    %17 = vector.broadcast %6 : vector<1x8xf32> to vector<256x8xf32>
    %18 = arith.addf %16, %17 : vector<256x8xf32>
    %cst_23 = arith.constant dense<0.000000e+00> : vector<256x64xf32>
    %19 = tpu.matmul %12, %4, %cst_23 {dimension_numbers = #tpu.dot_dimension_numbers<[1], [0], [0], [1], [0, 0, 1, 1], [], []>} : vector<256x64xf32>, vector<64x64xf32>, vector<256x64xf32> -> vector<256x64xf32>
    %20 = vector.broadcast %7 : vector<1x64xf32> to vector<256x64xf32>
    %21 = arith.addf %19, %20 : vector<256x64xf32>
    %cst_24 = arith.constant dense<0.000000e+00> : vector<256x8xf32>
    %22 = tpu.matmul %8, %15, %cst_24 {dimension_numbers = #tpu.dot_dimension_numbers<[1], [0], [0], [1], [0, 0, 1, 1], [], []>} : vector<256x256xf32>, vector<256x8xf32>, vector<256x8xf32> -> vector<256x8xf32>
    %23 = vector.shape_cast %22 : vector<256x8xf32> to vector<16x16x8xf32>
    %cst_25 = arith.constant dense<0.000000e+00> : vector<256x8xf32>
    %24 = tpu.matmul %8, %18, %cst_25 {dimension_numbers = #tpu.dot_dimension_numbers<[1], [0], [0], [1], [0, 0, 1, 1], [], []>} : vector<256x256xf32>, vector<256x8xf32>, vector<256x8xf32> -> vector<256x8xf32>
    %25 = vector.shape_cast %24 : vector<256x8xf32> to vector<16x16x8xf32>
    %cst_26 = arith.constant dense<0.000000e+00> : vector<256x64xf32>
    %26 = tpu.matmul %8, %21, %cst_26 {dimension_numbers = #tpu.dot_dimension_numbers<[1], [0], [0], [1], [0, 0, 1, 1], [], []>} : vector<256x256xf32>, vector<256x64xf32>, vector<256x64xf32> -> vector<256x64xf32>
    %27 = vector.shape_cast %26 : vector<256x64xf32> to vector<16x16x64xf32>
    %28 = vector.shape_cast %15 : vector<256x8xf32> to vector<16x16x8xf32>
    %29 = vector.shape_cast %18 : vector<256x8xf32> to vector<16x16x8xf32>
    %30 = vector.shape_cast %21 : vector<256x64xf32> to vector<16x16x64xf32>
    "tpu.trace_start"() <{level = 10 : i32, message = "whc,wgc->whg"}> : () -> ()
    %cst_27 = arith.constant dense<0.000000e+00> : vector<16x16x16xf32>
    %31 = tpu.matmul %23, %25, %cst_27 {dimension_numbers = #tpu.dot_dimension_numbers<[2], [2], [1], [1], [0, 0, 0, 1, 1, 1], [0], [0]>} : vector<16x16x8xf32>, vector<16x16x8xf32>, vector<16x16x16xf32> -> vector<16x16x16xf32>
    "tpu.trace_stop"() : () -> ()
    %32 = vector.shape_cast %10 : vector<16x16xf32> to vector<1x16x16xf32>
    %33 = vector.broadcast %32 : vector<1x16x16xf32> to vector<16x16x16xf32>
    %34 = arith.addf %31, %33 : vector<16x16x16xf32>
    "tpu.trace_start"() <{level = 10 : i32, message = "hwc,hvc->hwv"}> : () -> ()
    %cst_28 = arith.constant dense<0.000000e+00> : vector<16x16x16xf32>
    %35 = tpu.matmul %28, %29, %cst_28 {dimension_numbers = #tpu.dot_dimension_numbers<[2], [2], [1], [1], [0, 0, 0, 1, 1, 1], [0], [0]>} : vector<16x16x8xf32>, vector<16x16x8xf32>, vector<16x16x16xf32> -> vector<16x16x16xf32>
    "tpu.trace_stop"() : () -> ()
    %cst_29 = arith.constant dense<0xFF800000> : vector<16x16xf32>
    %36 = vector.multi_reduction <maximumf>, %34, %cst_29 [2] : vector<16x16x16xf32> to vector<16x16xf32>
    %37 = tpu.transpose %36, [1, 0] : vector<16x16xf32> -> vector<16x16xf32>
    %cst_30 = arith.constant dense<0xFF800000> : vector<16x16xf32>
    %38 = vector.multi_reduction <maximumf>, %35, %cst_30 [2] : vector<16x16x16xf32> to vector<16x16xf32>
    %39 = arith.maximumf %37, %38 : vector<16x16xf32>
    %40 = tpu.transpose %39, [1, 0] : vector<16x16xf32> -> vector<16x16xf32>
    %41 = vector.shape_cast %40 : vector<16x16xf32> to vector<16x16x1xf32>
    %42 = vector.broadcast %41 : vector<16x16x1xf32> to vector<16x16x16xf32>
    %43 = arith.subf %34, %42 : vector<16x16x16xf32>
    %44 = math.exp %43 : vector<16x16x16xf32>
    %45 = vector.shape_cast %39 : vector<16x16xf32> to vector<16x16x1xf32>
    %46 = vector.broadcast %45 : vector<16x16x1xf32> to vector<16x16x16xf32>
    %47 = arith.subf %35, %46 : vector<16x16x16xf32>
    %48 = math.exp %47 : vector<16x16x16xf32>
    %cst_31 = arith.constant dense<0.000000e+00> : vector<16x16xf32>
    %49 = vector.multi_reduction <add>, %44, %cst_31 [2] : vector<16x16x16xf32> to vector<16x16xf32>
    %50 = tpu.transpose %49, [1, 0] : vector<16x16xf32> -> vector<16x16xf32>
    %cst_32 = arith.constant dense<0.000000e+00> : vector<16x16xf32>
    %51 = vector.multi_reduction <add>, %48, %cst_32 [2] : vector<16x16x16xf32> to vector<16x16xf32>
    %52 = arith.addf %50, %51 : vector<16x16xf32>
    %53 = tpu.reciprocal %52 {approx = true} : vector<16x16xf32> -> vector<16x16xf32>
    %54 = arith.mulf %52, %53 : vector<16x16xf32>
    %cst_33 = arith.constant 2.000000e+00 : f32
    %55 = vector.broadcast %cst_33 : f32 to vector<16x16xf32>
    %56 = arith.subf %55, %54 : vector<16x16xf32>
    %57 = arith.mulf %53, %56 : vector<16x16xf32>
    "tpu.trace_start"() <{level = 10 : i32, message = "whg,wgc->whc"}> : () -> ()
    %cst_34 = arith.constant dense<0.000000e+00> : vector<16x16x64xf32>
    %58 = tpu.matmul %44, %27, %cst_34 {dimension_numbers = #tpu.dot_dimension_numbers<[2], [1], [1], [2], [0, 0, 0, 1, 1, 2], [0], [0]>} : vector<16x16x16xf32>, vector<16x16x64xf32>, vector<16x16x64xf32> -> vector<16x16x64xf32>
    "tpu.trace_stop"() : () -> ()
    "tpu.trace_start"() <{level = 10 : i32, message = "hwv,hvc->hwc"}> : () -> ()
    %cst_35 = arith.constant dense<0.000000e+00> : vector<16x16x64xf32>
    %59 = tpu.matmul %48, %30, %cst_35 {dimension_numbers = #tpu.dot_dimension_numbers<[2], [1], [1], [2], [0, 0, 0, 1, 1, 2], [0], [0]>} : vector<16x16x16xf32>, vector<16x16x64xf32>, vector<16x16x64xf32> -> vector<16x16x64xf32>
    "tpu.trace_stop"() : () -> ()
    %60 = vector.shape_cast %58 : vector<16x16x64xf32> to vector<256x64xf32>
    %cst_36 = arith.constant dense<0.000000e+00> : vector<256x64xf32>
    %61 = tpu.matmul %9, %60, %cst_36 {dimension_numbers = #tpu.dot_dimension_numbers<[1], [0], [0], [1], [0, 0, 1, 1], [], []>} : vector<256x256xf32>, vector<256x64xf32>, vector<256x64xf32> -> vector<256x64xf32>
    %62 = vector.shape_cast %61 : vector<256x64xf32> to vector<16x16x64xf32>
    %63 = arith.addf %62, %59 : vector<16x16x64xf32>
    %64 = vector.shape_cast %57 : vector<16x16xf32> to vector<16x16x1xf32>
    %65 = vector.broadcast %64 : vector<16x16x1xf32> to vector<16x16x64xf32>
    %66 = arith.mulf %63, %65 : vector<16x16x64xf32>
    %67 = vector.shape_cast %66 : vector<16x16x64xf32> to vector<256x64xf32>
    %68 = vector.broadcast %11 : f32 to vector<256x64xf32>
    %69 = arith.mulf %68, %67 : vector<256x64xf32>
    %70 = arith.addf %12, %69 : vector<256x64xf32>
    %cst_37 = arith.constant dense<0.000000e+00> : vector<256x8xf32>
    %71 = tpu.matmul %70, %2, %cst_37 {dimension_numbers = #tpu.dot_dimension_numbers<[1], [0], [0], [1], [0, 0, 1, 1], [], []>} : vector<256x64xf32>, vector<64x8xf32>, vector<256x8xf32> -> vector<256x8xf32>
    %72 = vector.broadcast %5 : vector<1x8xf32> to vector<256x8xf32>
    %73 = arith.addf %71, %72 : vector<256x8xf32>
    %cst_38 = arith.constant dense<0.000000e+00> : vector<256x8xf32>
    %74 = tpu.matmul %70, %3, %cst_38 {dimension_numbers = #tpu.dot_dimension_numbers<[1], [0], [0], [1], [0, 0, 1, 1], [], []>} : vector<256x64xf32>, vector<64x8xf32>, vector<256x8xf32> -> vector<256x8xf32>
    %75 = vector.broadcast %6 : vector<1x8xf32> to vector<256x8xf32>
    %76 = arith.addf %74, %75 : vector<256x8xf32>
    %cst_39 = arith.constant dense<0.000000e+00> : vector<256x64xf32>
    %77 = tpu.matmul %70, %4, %cst_39 {dimension_numbers = #tpu.dot_dimension_numbers<[1], [0], [0], [1], [0, 0, 1, 1], [], []>} : vector<256x64xf32>, vector<64x64xf32>, vector<256x64xf32> -> vector<256x64xf32>
    %78 = vector.broadcast %7 : vector<1x64xf32> to vector<256x64xf32>
    %79 = arith.addf %77, %78 : vector<256x64xf32>
    %cst_40 = arith.constant dense<0.000000e+00> : vector<256x8xf32>
    %80 = tpu.matmul %8, %73, %cst_40 {dimension_numbers = #tpu.dot_dimension_numbers<[1], [0], [0], [1], [0, 0, 1, 1], [], []>} : vector<256x256xf32>, vector<256x8xf32>, vector<256x8xf32> -> vector<256x8xf32>
    %81 = vector.shape_cast %80 : vector<256x8xf32> to vector<16x16x8xf32>
    %cst_41 = arith.constant dense<0.000000e+00> : vector<256x8xf32>
    %82 = tpu.matmul %8, %76, %cst_41 {dimension_numbers = #tpu.dot_dimension_numbers<[1], [0], [0], [1], [0, 0, 1, 1], [], []>} : vector<256x256xf32>, vector<256x8xf32>, vector<256x8xf32> -> vector<256x8xf32>
    %83 = vector.shape_cast %82 : vector<256x8xf32> to vector<16x16x8xf32>
    %cst_42 = arith.constant dense<0.000000e+00> : vector<256x64xf32>
    %84 = tpu.matmul %8, %79, %cst_42 {dimension_numbers = #tpu.dot_dimension_numbers<[1], [0], [0], [1], [0, 0, 1, 1], [], []>} : vector<256x256xf32>, vector<256x64xf32>, vector<256x64xf32> -> vector<256x64xf32>
    %85 = vector.shape_cast %84 : vector<256x64xf32> to vector<16x16x64xf32>
    %86 = vector.shape_cast %73 : vector<256x8xf32> to vector<16x16x8xf32>
    %87 = vector.shape_cast %76 : vector<256x8xf32> to vector<16x16x8xf32>
    %88 = vector.shape_cast %79 : vector<256x64xf32> to vector<16x16x64xf32>
    "tpu.trace_start"() <{level = 10 : i32, message = "whc,wgc->whg"}> : () -> ()
    %cst_43 = arith.constant dense<0.000000e+00> : vector<16x16x16xf32>
    %89 = tpu.matmul %81, %83, %cst_43 {dimension_numbers = #tpu.dot_dimension_numbers<[2], [2], [1], [1], [0, 0, 0, 1, 1, 1], [0], [0]>} : vector<16x16x8xf32>, vector<16x16x8xf32>, vector<16x16x16xf32> -> vector<16x16x16xf32>
    "tpu.trace_stop"() : () -> ()
    %90 = vector.shape_cast %10 : vector<16x16xf32> to vector<1x16x16xf32>
    %91 = vector.broadcast %90 : vector<1x16x16xf32> to vector<16x16x16xf32>
    %92 = arith.addf %89, %91 : vector<16x16x16xf32>
    "tpu.trace_start"() <{level = 10 : i32, message = "hwc,hvc->hwv"}> : () -> ()
    %cst_44 = arith.constant dense<0.000000e+00> : vector<16x16x16xf32>
    %93 = tpu.matmul %86, %87, %cst_44 {dimension_numbers = #tpu.dot_dimension_numbers<[2], [2], [1], [1], [0, 0, 0, 1, 1, 1], [0], [0]>} : vector<16x16x8xf32>, vector<16x16x8xf32>, vector<16x16x16xf32> -> vector<16x16x16xf32>
    "tpu.trace_stop"() : () -> ()
    %cst_45 = arith.constant dense<0xFF800000> : vector<16x16xf32>
    %94 = vector.multi_reduction <maximumf>, %92, %cst_45 [2] : vector<16x16x16xf32> to vector<16x16xf32>
    %95 = tpu.transpose %94, [1, 0] : vector<16x16xf32> -> vector<16x16xf32>
    %cst_46 = arith.constant dense<0xFF800000> : vector<16x16xf32>
    %96 = vector.multi_reduction <maximumf>, %93, %cst_46 [2] : vector<16x16x16xf32> to vector<16x16xf32>
    %97 = arith.maximumf %95, %96 : vector<16x16xf32>
    %98 = tpu.transpose %97, [1, 0] : vector<16x16xf32> -> vector<16x16xf32>
    %99 = vector.shape_cast %98 : vector<16x16xf32> to vector<16x16x1xf32>
    %100 = vector.broadcast %99 : vector<16x16x1xf32> to vector<16x16x16xf32>
    %101 = arith.subf %92, %100 : vector<16x16x16xf32>
    %102 = math.exp %101 : vector<16x16x16xf32>
    %103 = vector.shape_cast %97 : vector<16x16xf32> to vector<16x16x1xf32>
    %104 = vector.broadcast %103 : vector<16x16x1xf32> to vector<16x16x16xf32>
    %105 = arith.subf %93, %104 : vector<16x16x16xf32>
    %106 = math.exp %105 : vector<16x16x16xf32>
    %cst_47 = arith.constant dense<0.000000e+00> : vector<16x16xf32>
    %107 = vector.multi_reduction <add>, %102, %cst_47 [2] : vector<16x16x16xf32> to vector<16x16xf32>
    %108 = tpu.transpose %107, [1, 0] : vector<16x16xf32> -> vector<16x16xf32>
    %cst_48 = arith.constant dense<0.000000e+00> : vector<16x16xf32>
    %109 = vector.multi_reduction <add>, %106, %cst_48 [2] : vector<16x16x16xf32> to vector<16x16xf32>
    %110 = arith.addf %108, %109 : vector<16x16xf32>
    %111 = tpu.reciprocal %110 {approx = true} : vector<16x16xf32> -> vector<16x16xf32>
    %112 = arith.mulf %110, %111 : vector<16x16xf32>
    %cst_49 = arith.constant 2.000000e+00 : f32
    %113 = vector.broadcast %cst_49 : f32 to vector<16x16xf32>
    %114 = arith.subf %113, %112 : vector<16x16xf32>
    %115 = arith.mulf %111, %114 : vector<16x16xf32>
    "tpu.trace_start"() <{level = 10 : i32, message = "whg,wgc->whc"}> : () -> ()
    %cst_50 = arith.constant dense<0.000000e+00> : vector<16x16x64xf32>
    %116 = tpu.matmul %102, %85, %cst_50 {dimension_numbers = #tpu.dot_dimension_numbers<[2], [1], [1], [2], [0, 0, 0, 1, 1, 2], [0], [0]>} : vector<16x16x16xf32>, vector<16x16x64xf32>, vector<16x16x64xf32> -> vector<16x16x64xf32>
    "tpu.trace_stop"() : () -> ()
    "tpu.trace_start"() <{level = 10 : i32, message = "hwv,hvc->hwc"}> : () -> ()
    %cst_51 = arith.constant dense<0.000000e+00> : vector<16x16x64xf32>
    %117 = tpu.matmul %106, %88, %cst_51 {dimension_numbers = #tpu.dot_dimension_numbers<[2], [1], [1], [2], [0, 0, 0, 1, 1, 2], [0], [0]>} : vector<16x16x16xf32>, vector<16x16x64xf32>, vector<16x16x64xf32> -> vector<16x16x64xf32>
    "tpu.trace_stop"() : () -> ()
    %118 = vector.shape_cast %116 : vector<16x16x64xf32> to vector<256x64xf32>
    %cst_52 = arith.constant dense<0.000000e+00> : vector<256x64xf32>
    %119 = tpu.matmul %9, %118, %cst_52 {dimension_numbers = #tpu.dot_dimension_numbers<[1], [0], [0], [1], [0, 0, 1, 1], [], []>} : vector<256x256xf32>, vector<256x64xf32>, vector<256x64xf32> -> vector<256x64xf32>
    %120 = vector.shape_cast %119 : vector<256x64xf32> to vector<16x16x64xf32>
    %121 = arith.addf %120, %117 : vector<16x16x64xf32>
    %122 = vector.shape_cast %115 : vector<16x16xf32> to vector<16x16x1xf32>
    %123 = vector.broadcast %122 : vector<16x16x1xf32> to vector<16x16x64xf32>
    %124 = arith.mulf %121, %123 : vector<16x16x64xf32>
    %125 = vector.shape_cast %124 : vector<16x16x64xf32> to vector<256x64xf32>
    %126 = vector.broadcast %11 : f32 to vector<256x64xf32>
    %127 = arith.mulf %126, %125 : vector<256x64xf32>
    %128 = arith.addf %70, %127 : vector<256x64xf32>
    %129 = vector.shape_cast %128 : vector<256x64xf32> to vector<16x16x64xf32>
    %c0_53 = arith.constant 0 : index
    %c0_54 = arith.constant 0 : index
    %c0_55 = arith.constant 0 : index
    %c0_56 = arith.constant 0 : index
    %130 = vector.load %arg12[%c0_53, %c0_54, %c0_55, %c0_56] : memref<1x16x16x64xf32, #tpu.memory_space<vmem>>, vector<1x16x16x64xf32>
    %131 = vector.shape_cast %130 : vector<1x16x16x64xf32> to vector<16x16x64xf32>
    %132 = vector.shape_cast %129 : vector<16x16x64xf32> to vector<1x16x16x64xf32>
    tpu.vector_store %arg12[%c0_53, %c0_54, %c0_55, %c0_56], %132 {strides = array<i32>} : memref<1x16x16x64xf32, #tpu.memory_space<vmem>>, vector<1x16x16x64xf32>,
    return
  }
  func.func @transform_0(%arg0: i32) -> (i32, i32, i32, i32) {
    %c0_i32 = arith.constant 0 : i32
    %c0_i32_0 = arith.constant 0 : i32
    %c0_i32_1 = arith.constant 0 : i32
    %c0_i32_2 = arith.constant 0 : i32
    return %arg0, %c0_i32, %c0_i32_0, %c0_i32_1 : i32, i32, i32, i32
  }
  func.func @transform_1(%arg0: i32) -> (i32, i32) {
    %c0_i32 = arith.constant 0 : i32
    %c0_i32_0 = arith.constant 0 : i32
    %c0_i32_1 = arith.constant 0 : i32
    return %c0_i32, %c0_i32_0 : i32, i32
  }
  func.func @transform_2(%arg0: i32) -> (i32, i32) {
    %c0_i32 = arith.constant 0 : i32
    %c0_i32_0 = arith.constant 0 : i32
    %c0_i32_1 = arith.constant 0 : i32
    return %c0_i32, %c0_i32_0 : i32, i32
  }
  func.func @transform_3(%arg0: i32) -> (i32, i32) {
    %c0_i32 = arith.constant 0 : i32
    %c0_i32_0 = arith.constant 0 : i32
    %c0_i32_1 = arith.constant 0 : i32
    return %c0_i32, %c0_i32_0 : i32, i32
  }
  func.func @transform_4(%arg0: i32) -> (i32, i32) {
    %c0_i32 = arith.constant 0 : i32
    %c0_i32_0 = arith.constant 0 : i32
    %c0_i32_1 = arith.constant 0 : i32
    return %c0_i32, %c0_i32_0 : i32, i32
  }
  func.func @transform_5(%arg0: i32) -> (i32, i32) {
    %c0_i32 = arith.constant 0 : i32
    %c0_i32_0 = arith.constant 0 : i32
    %c0_i32_1 = arith.constant 0 : i32
    return %c0_i32, %c0_i32_0 : i32, i32
  }
  func.func @transform_6(%arg0: i32) -> (i32, i32) {
    %c0_i32 = arith.constant 0 : i32
    %c0_i32_0 = arith.constant 0 : i32
    %c0_i32_1 = arith.constant 0 : i32
    return %c0_i32, %c0_i32_0 : i32, i32
  }
  func.func @transform_7(%arg0: i32) -> (i32, i32) {
    %c0_i32 = arith.constant 0 : i32
    %c0_i32_0 = arith.constant 0 : i32
    %c0_i32_1 = arith.constant 0 : i32
    return %c0_i32, %c0_i32_0 : i32, i32
  }
  func.func @transform_8(%arg0: i32) -> (i32, i32) {
    %c0_i32 = arith.constant 0 : i32
    %c0_i32_0 = arith.constant 0 : i32
    %c0_i32_1 = arith.constant 0 : i32
    return %c0_i32, %c0_i32_0 : i32, i32
  }
  func.func @transform_9(%arg0: i32) -> (i32, i32) {
    %c0_i32 = arith.constant 0 : i32
    %c0_i32_0 = arith.constant 0 : i32
    %c0_i32_1 = arith.constant 0 : i32
    return %c0_i32, %c0_i32_0 : i32, i32
  }
  func.func @transform_10(%arg0: i32) -> i32 {
    %c0_i32 = arith.constant 0 : i32
    %c0_i32_0 = arith.constant 0 : i32
    return %c0_i32 : i32
  }
  func.func @transform_11(%arg0: i32) -> (i32, i32, i32, i32) {
    %c0_i32 = arith.constant 0 : i32
    %c0_i32_0 = arith.constant 0 : i32
    %c0_i32_1 = arith.constant 0 : i32
    %c0_i32_2 = arith.constant 0 : i32
    return %arg0, %c0_i32, %c0_i32_0, %c0_i32_1 : i32, i32, i32, i32
  }
}

</mosaic_0001>

<bundles_post_ra>
// kernel: rcca_forward.1
= control target key start
LH: loop header
LB: loop body
LE: loop exit
PB: predicated region body
PF: predicated region fallthrough
CT: control target
= control target key end

     0   :  { %s30097_s0 = inlined_call_operand.vmem [shape: f32[2,16,16,64], index: 0, kind: input, shape index: {}]   ;;  %s30098_s1 = inlined_call_operand.vmem [shape: f32[64,8], index: 1, kind: input, shape index: {}]   ;;  %s30099_s2 = inlined_call_operand.vmem [shape: f32[64,8], index: 2, kind: input, shape index: {}]   ;;  %s30100_s3 = inlined_call_operand.vmem [shape: f32[64,64], index: 3, kind: input, shape index: {}]   ;;  %s30101_s4 = inlined_call_operand.vmem [shape: f32[1,8], index: 4, kind: input, shape index: {}]   ;;  %s30102_s5 = inlined_call_operand.vmem [shape: f32[1,8], index: 5, kind: input, shape index: {}]   ;;  %s30103_s6 = inlined_call_operand.vmem [shape: f32[1,64], index: 6, kind: input, shape index: {}]   ;;  %s30104_s7 = inlined_call_operand.vmem [shape: f32[256,256], index: 7, kind: input, shape index: {}]   ;;  %s30105_s8 = inlined_call_operand.vmem [shape: f32[256,256], index: 8, kind: input, shape index: {}]   ;;  %s30106_s9 = inlined_call_operand.vmem [shape: f32[16,16], index: 9, kind: input, shape index: {}]   ;;  %s30107_s10 = inlined_call_operand.<no memory space> [shape: f32[1], index: 10, kind: input, shape index: {}]   ;;  %s30108_s11 = inlined_call_operand.hbm [shape: f32[2,16,16,64], index: 11, kind: output, shape index: {}]  }
   0x1   :  { %16 = sst [smem:[#allocation2]] %s30107_s10 }
   0x2   :  { %17 = vsyncpa [#allocation4], 0 }
   0x3   :  { %19 = vsyncpa [#allocation4 + $0x1], 0  ;;  %s23409_s19 = smov 0   ;;  %s23411_s20 = smov 0  }
   0x4   :  { %s23413_s21 = smov 0   ;;  %s23415_s22 = smov 0  }
   0x5 LB: > { %s23430_s10 = sadd.s32 4294967295, %s23340_s22   ;;  %s19027_s23 = sadd.s32 4294967294, %s23340_s22   ;;  %s23340_s22 = sphi %s23415_s22, %s31211_s22   ;;  %s23336_s21 = sphi %s23413_s21, %s31210_s21   ;;  %s23332_s20 = sphi %s23411_s20, %s31209_s20   ;;  %s23328_s19 = sphi %s23409_s19, %s31208_s19  }
   0x6   : > { %s23434_s24 = sadd.s32 1, %s23340_s22   ;;  %s268_s25 = sadd.s32 1, %s23336_s21 }
   0x7   : > { %s265_s26 = ssub.s32 %s23340_s22, %s23434_s24  ;;  %p278_p0 = scmp.ne.s32.totalorder %s23336_s21, %s23332_s20 }
   0x8   : > { %p266_p1 = scmp.eq.s32.totalorder %s265_s26, 0  ;;  %p279_p2 = scmp.eq.s32.totalorder %s23430_s10, 1 }
   0x9   : > { %p284_p3 = scmp.ne.s32.totalorder %s23332_s20, %s23328_s19  ;;  %p285_p4 = scmp.eq.s32.totalorder %s19027_s23, 1 }
   0xa   : > { %s23445_s27 = scalar_select %p266_p1, %s23336_s21, %s268_s25  }
   0xb   : > { %p23447_p5 = por %p279_p2, %p278_p0  ;;  %p23451_p6 = por %p285_p4, %p284_p3 }
   0xc   : > { %p19030_p7 = scmp.ge.s32.totalorder %s23340_s22, 1  ;;  %p341_p8 = scmp.lt.s32.totalorder %s23340_s22, 3 }
   0xe   : > { %p342_p9 = pnand %p19030_p7, %p341_p8 }
  0x10   : > { %345 = sbr.rel (%p342_p9) target bundleno = 4285 (0x10bd), region = 64 }
  0x17   : > { %v418_v0 = vld [vmem:[%s30098_s1] sm:$0xff]  ;;  %v419_v1 = vld [vmem:[%s30098_s1 + $0x8] sm:$0xff]  ;;  %p381_p10 = scmp.lt.s32.totalorder %s23430_s10, 1  ;;  %v420_v5 = vld [vmem:[%s30098_s1 + $0x10] sm:$0xff]  ;;  %vm582_vm0 = vcmask 523264   ;;  %vm2041_vm1 = vcmask 64512  }
  0x18   : > { %v426_v2 = vld [vmem:[%s30099_s2] sm:$0xff]  ;;  %v23467_v3 = vpack.c.bf16 %v419_v1, %v418_v0  ;;  %v427_v4 = vld [vmem:[%s30099_s2 + $0x8] sm:$0xff]  ;;  %v421_v6 = vld [vmem:[%s30098_s1 + $0x18] sm:$0xff]  ;;  %vm4826_vm3 = vcmask 130048   ;;  %vm4966_vm4 = vcmask 130112   ;;  %vm5103_vm5 = vcmask 1041409  }
  0x19   : > { %v23478_v7 = vpack.c.bf16 %v427_v4, %v426_v2  ;;  %v23480_v8 = vpack.c.bf16 %v421_v6, %v420_v5  ;;  %v428_v9 = vld [vmem:[%s30099_s2 + $0x10] sm:$0xff]  ;;  %v429_v10 = vld [vmem:[%s30099_s2 + $0x18] sm:$0xff]  ;;  %v422_v11 = vld [vmem:[%s30098_s1 + $0x20] sm:$0xff]  ;;  %s382_s18 = scalar_select %p381_p10, %s23430_s10, 1  ;;  %v30134_v5 = vmov 0.0|0.0   ;;  %vm5105_vm6 = vcmask 1042434  }
  0x1a   : > { %30531 = vst [vmem:[#allocation6_spill] sm:$0xff] %v23467_v3  ;;  %21653 = vmatprep.subr.bf16.mxu0 %v23467_v3  ;;  %v23493_v12 = vpack.c.bf16 %v429_v10, %v428_v9  ;;  %v423_v13 = vld [vmem:[%s30098_s1 + $0x28] sm:$0xff]  ;;  %v430_v14 = vld [vmem:[%s30099_s2 + $0x20] sm:$0xff]  ;;  %v424_v18 = vld [vmem:[%s30098_s1 + $0x30] sm:$0xff]  ;;  %vm5107_vm7 = vcmask 1043459   ;;  %vm5109_vm8 = vcmask 1044484  }
  0x1b   : > { %30532 = vst [vmem:[#allocation7_spill] sm:$0xff] %v23478_v7  ;;  %30533 = vst [vmem:[#allocation8_spill] sm:$0xff] %v23480_v8  ;;  %v431_v15 = vld [vmem:[%s30099_s2 + $0x28] sm:$0xff]  ;;  %21669 = vmatprep.subr.bf16.mxu1 %v23478_v7  ;;  %21655 = vmatpush3.bf16.msra.mxu0 %v23467_v3  ;;  %s19618_s14 = sshll.u32 %s382_s18, 8  ;;  %v23508_v16 = vpack.c.bf16 %v423_v13, %v422_v11  ;;  %v425_v19 = vld [vmem:[%s30098_s1 + $0x38] sm:$0xff]  ;;  %vm5111_vm9 = vcmask 1045509  }
  0x1c   : > { %30534 = vst [vmem:[#allocation9_spill] sm:$0xff] %v23493_v12  ;;  %21671 = vmatpush3.bf16.msra.mxu1 %v23478_v7  ;;  %21657 = vmatprep.subr.bf16.mxu0 %v23480_v8  ;;  %s23513_s17 = scalar_lea.vmem %s30097_s0, %s19618_s14  ;;  %v23516_v17 = vpack.c.bf16 %v431_v15, %v430_v14  ;;  %v432_v21 = vld [vmem:[%s30099_s2 + $0x30] sm:$0xff]  ;;  %v433_v22 = vld [vmem:[%s30099_s2 + $0x38] sm:$0xff]  ;;  %v23540_v23 = vpack.c.bf16 %v425_v19, %v424_v18  ;;  %v434_v25 = vld [vmem:[%s30100_s3] sm:$0xff]  ;;  %vm5113_vm10 = vcmask 1046534   ;;  %vm5115_vm11 = vcmask 1047559  }
  0x1d   : > { %30535 = vst [vmem:[#allocation10_spill] sm:$0xff] %v23508_v16  ;;  %21673 = vmatprep.subr.bf16.mxu1 %v23493_v12  ;;  %v23525_v20 = vld [vmem:[%s23513_s17] sm:$0xff]  ;;  %v23543_v24 = vpack.c.bf16 %v433_v22, %v432_v21  ;;  %v435_v26 = vld [vmem:[%s30100_s3 + $0x8] sm:$0xff]  ;;  %v436_v29 = vld [vmem:[%s30100_s3 + $0x10] sm:$0xff]  ;;  %s575_s30 = sld [smem:[#allocation2]]  ;;  %s378_s13 = sand.u32 1, %s23332_s20  }
  0x1e   : > { %30536 = vst [vmem:[#allocation11_spill] sm:$0xff] %v23516_v17  ;;  %20388 = vmatprep.mubr.msk.f32.mxu0 %vm582_vm0, %v23525_v20  ;;  %20452 = vmatprep.mubr.msk.f32.mxu1 %vm582_vm0, %v23525_v20  ;;  %30537 = vst [vmem:[#allocation12_spill] sm:$0xff] %v23540_v23  ;;  %v23554_v27 = vpack.c.bf16 %v435_v26, %v434_v25  ;;  %v23559_v28 = vld [vmem:[%s23513_s17 + $0x8] sm:$0xff]  ;;  %v23566_v30 = vld [vmem:[%s23513_s17 + $0x10] sm:$0xff]  ;;  %s19031_s14 = sshll.u32 %s378_s13, 8  ;;  %s19619_s16 = sshll.u32 %s23430_s10, 12 }
  0x1f   : > { %21659 = vmatpush3.bf16.msra.mxu0 %v23480_v8  ;;  %30538 = vst [vmem:[#allocation13_spill] sm:$0xff] %v23543_v24  ;;  %v437_v31 = vld [vmem:[%s30100_s3 + $0x18] sm:$0xff]  ;;  %v438_v33 = vld [vmem:[%s30100_s3 + $0x20] sm:$0xff]  ;;  %v439_v34 = vld [vmem:[%s30100_s3 + $0x28] sm:$0xff]  ;;  %s29891_s15 = scalar_lea.vmem [#allocation3], %s19031_s14  ;;  %s30047_s26 = scalar_lea.hbm %s30108_s11, %s19619_s16 }
  0x20   : > { %21675 = vmatpush3.bf16.msra.mxu1 %v23493_v12  ;;  %21661 = vmatprep.subr.bf16.mxu0 %v23508_v16  ;;  %30539 = vst [vmem:[#allocation14_spill] sm:$0xff] %v23554_v27  ;;  %v23572_v32 = vpack.c.bf16 %v437_v31, %v436_v29  ;;  %v23587_v35 = vld [vmem:[%s23513_s17 + $0x18] sm:$0xff]  ;;  %v23592_v36 = vld [vmem:[%s23513_s17 + $0x20] sm:$0xff]  ;;  %v23596_v37 = vpack.c.bf16 %v439_v34, %v438_v33  ;;  %v23605_v38 = vld [vmem:[%s23513_s17 + $0x28] sm:$0xff]  ;;  %s18965_s23 = sshll.u32 %s29891_s15, 4  ;;  %s30056_s10 = scalar_lea.sflag [#allocation4], %s378_s13  ;;  %s30049_s23 = int_to_ptr.vmem [resolvable:$true] %s18965_s23 }
  0x21   : > { %21677 = vmatprep.subr.bf16.mxu1 %v23516_v17  ;;  %v23610_v39 = vld [vmem:[%s23513_s17 + $0x30] sm:$0xff]  ;;  %v23621_v40 = vld [vmem:[%s23513_s17 + $0x38] sm:$0xff]  ;;  %v23626_v41 = vld [vmem:[%s23513_s17 + $0x40] sm:$0xff] }
  0x22   : > { %30540 = vst [vmem:[#allocation15_spill] sm:$0xff] %v23572_v32  ;;  %30541 = vst [vmem:[#allocation16_spill] sm:$0xff] %v23596_v37  ;;  %v23636_v42 = vld [vmem:[%s23513_s17 + $0x48] sm:$0xff]  ;;  %v23641_v43 = vld [vmem:[%s23513_s17 + $0x50] sm:$0xff] }
  0x23   : > { %21663 = vmatpush3.bf16.msra.mxu0 %v23508_v16  ;;  %v23650_v44 = vld [vmem:[%s23513_s17 + $0x58] sm:$0xff]  ;;  %v23655_v45 = vld [vmem:[%s23513_s17 + $0x60] sm:$0xff]  ;;  %v23664_v46 = vld [vmem:[%s23513_s17 + $0x68] sm:$0xff] }
  0x24   : > { %21679 = vmatpush3.bf16.msra.mxu1 %v23516_v17  ;;  %21665 = vmatprep.subr.bf16.mxu0 %v23540_v23  ;;  %v23669_v47 = vld [vmem:[%s23513_s17 + $0x70] sm:$0xff]  ;;  %v23678_v48 = vld [vmem:[%s23513_s17 + $0x78] sm:$0xff]  ;;  %v23683_v49 = vld [vmem:[%s23513_s17 + $0x80] sm:$0xff] }
  0x25   : > { %21681 = vmatprep.subr.bf16.mxu1 %v23543_v24  ;;  %v23692_v50 = vld [vmem:[%s23513_s17 + $0x88] sm:$0xff]  ;;  %v23697_v51 = vld [vmem:[%s23513_s17 + $0x90] sm:$0xff]  ;;  %v23706_v52 = vld [vmem:[%s23513_s17 + $0x98] sm:$0xff] }
  0x26   : > { %v23711_v53 = vld [vmem:[%s23513_s17 + $0xa0] sm:$0xff]  ;;  %v23720_v54 = vld [vmem:[%s23513_s17 + $0xa8] sm:$0xff]  ;;  %v408_v55 = vld [vmem:[%s23513_s17 + $0xb0] sm:$0xff] }
  0x27   : > { %21667 = vmatpush3.bf16.msra.mxu0 %v23540_v23  ;;  %v409_v56 = vld [vmem:[%s23513_s17 + $0xb8] sm:$0xff]  ;;  %v410_v57 = vld [vmem:[%s23513_s17 + $0xc0] sm:$0xff]  ;;  %v411_v58 = vld [vmem:[%s23513_s17 + $0xc8] sm:$0xff] }
  0x28   : > { %21683 = vmatpush3.bf16.msra.mxu1 %v23543_v24  ;;  %21685 = vmatprep.subr.bf16.mxu0 %v23554_v27  ;;  %v412_v59 = vld [vmem:[%s23513_s17 + $0xd0] sm:$0xff]  ;;  %v413_v60 = vld [vmem:[%s23513_s17 + $0xd8] sm:$0xff]  ;;  %v414_v61 = vld [vmem:[%s23513_s17 + $0xe0] sm:$0xff] }
  0x29   : > { %v415_v62 = vld [vmem:[%s23513_s17 + $0xe8] sm:$0xff]  ;;  %v416_v63 = vld [vmem:[%s23513_s17 + $0xf0] sm:$0xff]  ;;  %v417_v0 = vld [vmem:[%s23513_s17 + $0xf8] sm:$0xff]  ;;  %21700 = vmatprep.subr.bf16.mxu1 %v30134_v5 }
  0x2a   : > { %20389 = vmatmul.mubr.msk.f32.vlgmr.msra.gmra.mrb[0].mxu0 %vm582_vm0, %v23559_v28  ;;  %v440_v1 = vld [vmem:[%s30100_s3 + $0x30] sm:$0xff]  ;;  %v441_v2 = vld [vmem:[%s30100_s3 + $0x38] sm:$0xff]  ;;  %v446_v6 = vld [vmem:[%s30104_s7 + $0x8] sm:$0xff] }
  0x2b   : > { %20453 = vmatmul.mubr.msk.f32.vlgmr.msra.gmra.mrb[0].mxu1 %vm582_vm0, %v23559_v28  ;;  %20391 = vmatprep.mubr.msk.f32.mxu0 %vm582_vm0, %v23566_v30  ;;  %v23766_v4 = vpack.c.bf16 %v441_v2, %v440_v1  ;;  %v23830_v9 = vld [vmem:[%s30101_s4] ss:$0 sm:$0xff]  ;;  %v24156_v7 = vld [vmem:[%s30104_s7 + $0x50] sm:$0xff]  ;;  %v24162_v23 = vld [vmem:[%s30104_s7 + $0x68] sm:$0xff] }
  0x2c   : > { %20455 = vmatprep.mubr.msk.f32.mxu1 %vm582_vm0, %v23566_v30  ;;  %21687 = vmatpush3.bf16.msra.mxu0 %v23554_v27  ;;  %v23835_v10 = vld [vmem:[%s30102_s5] ss:$0 sm:$0xff]  ;;  %30600 = vst [vmem:[#allocation75_spill] sm:$0xff] %v24156_v7  ;;  %30601 = vst [vmem:[#allocation76_spill] sm:$0xff] %v24162_v23 }
  0x2d   : > { %21689 = vmatprep.subr.bf16.mxu0 %v23572_v32  ;;  %30542 = vst [vmem:[#allocation17_spill] sm:$0xff] %v23766_v4  ;;  %v24170_v8 = vld [vmem:[%s30103_s6] ss:$0 sm:$0xff]  ;;  %vm24652_vm2 = vmpackc.low %vm2041_vm1, %vm2041_vm1 }
  0x2e   : > { %20392 = vmatmul.mubr.msk.f32.gmra.mrb[2].mxu0 %vm582_vm0, %v23587_v35  ;;  %v24177_v3 = vld [vmem:[%s30104_s7 + $0x60] sm:$0xff] }
  0x2f   : > { %20456 = vmatmul.mubr.msk.f32.gmra.mrb[2].mxu1 %vm582_vm0, %v23587_v35  ;;  %20394 = vmatprep.mubr.msk.f32.mxu0 %vm582_vm0, %v23592_v36  ;;  %30602 = vst [vmem:[#allocation77_spill] sm:$0xff] %v24177_v3 }
  0x30   : > { %20458 = vmatprep.mubr.msk.f32.mxu1 %vm582_vm0, %v23592_v36  ;;  %21691 = vmatpush3.bf16.msra.mxu0 %v23572_v32 }
  0x31   : > { %21693 = vmatprep.subr.bf16.mxu0 %v23596_v37 }
  0x32   : > { %20395 = vmatmul.mubr.msk.f32.gmra.mrb[4].mxu0 %vm582_vm0, %v23605_v38 }
  0x33   : > { %20459 = vmatmul.mubr.msk.f32.gmra.mrb[4].mxu1 %vm582_vm0, %v23605_v38  ;;  %20397 = vmatprep.mubr.msk.f32.mxu0 %vm582_vm0, %v23610_v39 }
  0x34   : > { %20461 = vmatprep.mubr.msk.f32.mxu1 %vm582_vm0, %v23610_v39  ;;  %21695 = vmatpush3.bf16.msra.mxu0 %v23596_v37 }
  0x35   : > { %21697 = vmatprep.subr.bf16.mxu0 %v23766_v4 }
  0x36   : > { %20398 = vmatmul.mubr.msk.f32.gmra.mrb[6].mxu0 %vm582_vm0, %v23621_v40 }
  0x37   : > { %20462 = vmatmul.mubr.msk.f32.gmra.mrb[6].mxu1 %vm582_vm0, %v23621_v40  ;;  %20400 = vmatprep.mubr.msk.f32.mxu0 %vm582_vm0, %v23626_v41 }
  0x38   : > { %20464 = vmatprep.mubr.msk.f32.mxu1 %vm582_vm0, %v23626_v41  ;;  %21699 = vmatpush3.bf16.msra.mxu0 %v23766_v4 }
  0x39   : > { %21748 = vmatprep.subr.bf16.mxu0 %v30134_v5 }
  0x3a   : > { %20401 = vmatmul.mubr.msk.f32.gmra.mrb[8].mxu0 %vm582_vm0, %v23636_v42 }
  0x3b   : > { %20465 = vmatmul.mubr.msk.f32.gmra.mrb[8].mxu1 %vm582_vm0, %v23636_v42  ;;  %20403 = vmatprep.mubr.msk.f32.mxu0 %vm582_vm0, %v23641_v43 }
  0x3c   : > { %20467 = vmatprep.mubr.msk.f32.mxu1 %vm582_vm0, %v23641_v43 }
  0x3e   : > { %20404 = vmatmul.mubr.msk.f32.gmra.mrb[10].mxu0 %vm582_vm0, %v23650_v44 }
  0x3f   : > { %20468 = vmatmul.mubr.msk.f32.gmra.mrb[10].mxu1 %vm582_vm0, %v23650_v44  ;;  %20406 = vmatprep.mubr.msk.f32.mxu0 %vm582_vm0, %v23655_v45 }
  0x40   : > { %20470 = vmatprep.mubr.msk.f32.mxu1 %vm582_vm0, %v23655_v45 }
  0x42   : > { %20407 = vmatmul.mubr.msk.f32.gmra.mrb[12].mxu0 %vm582_vm0, %v23664_v46 }
  0x43   : > { %20471 = vmatmul.mubr.msk.f32.gmra.mrb[12].mxu1 %vm582_vm0, %v23664_v46  ;;  %20409 = vmatprep.mubr.msk.f32.mxu0 %vm582_vm0, %v23669_v47 }
  0x44   : > { %20473 = vmatprep.mubr.msk.f32.mxu1 %vm582_vm0, %v23669_v47 }
  0x46   : > { %20410 = vmatmul.mubr.msk.f32.gmra.mrb[14].mxu0 %vm582_vm0, %v23678_v48 }
  0x47   : > { %20474 = vmatmul.mubr.msk.f32.gmra.mrb[14].mxu1 %vm582_vm0, %v23678_v48  ;;  %20412 = vmatprep.mubr.msk.f32.mxu0 %vm582_vm0, %v23683_v49 }
  0x48   : > { %20476 = vmatprep.mubr.msk.f32.mxu1 %vm582_vm0, %v23683_v49 }
  0x4a   : > { %20413 = vmatmul.mubr.msk.f32.gmra.mrb[16].mxu0 %vm582_vm0, %v23692_v50 }
  0x4b   : > { %20477 = vmatmul.mubr.msk.f32.gmra.mrb[16].mxu1 %vm582_vm0, %v23692_v50  ;;  %20415 = vmatprep.mubr.msk.f32.mxu0 %vm582_vm0, %v23697_v51 }
  0x4c   : > { %20479 = vmatprep.mubr.msk.f32.mxu1 %vm582_vm0, %v23697_v51 }
  0x4e   : > { %20416 = vmatmul.mubr.msk.f32.gmra.mrb[18].mxu0 %vm582_vm0, %v23706_v52 }
  0x4f   : > { %20480 = vmatmul.mubr.msk.f32.gmra.mrb[18].mxu1 %vm582_vm0, %v23706_v52  ;;  %20418 = vmatprep.mubr.msk.f32.mxu0 %vm582_vm0, %v23711_v53 }
  0x50   : > { %20482 = vmatprep.mubr.msk.f32.mxu1 %vm582_vm0, %v23711_v53 }
  0x52   : > { %20419 = vmatmul.mubr.msk.f32.gmra.mrb[20].mxu0 %vm582_vm0, %v23720_v54 }
  0x53   : > { %20483 = vmatmul.mubr.msk.f32.gmra.mrb[20].mxu1 %vm582_vm0, %v23720_v54  ;;  %20421 = vmatprep.mubr.msk.f32.mxu0 %vm582_vm0, %v408_v55 }
  0x54   : > { %20485 = vmatprep.mubr.msk.f32.mxu1 %vm582_vm0, %v408_v55 }
  0x56   : > { %20422 = vmatmul.mubr.msk.f32.gmra.mrb[22].mxu0 %vm582_vm0, %v409_v56 }
  0x57   : > { %20486 = vmatmul.mubr.msk.f32.gmra.mrb[22].mxu1 %vm582_vm0, %v409_v56  ;;  %20424 = vmatprep.mubr.msk.f32.mxu0 %vm582_vm0, %v410_v57 }
  0x58   : > { %20488 = vmatprep.mubr.msk.f32.mxu1 %vm582_vm0, %v410_v57 }
  0x5a   : > { %20425 = vmatmul.mubr.msk.f32.gmra.mrb[24].mxu0 %vm582_vm0, %v411_v58 }
  0x5b   : > { %20489 = vmatmul.mubr.msk.f32.gmra.mrb[24].mxu1 %vm582_vm0, %v411_v58  ;;  %20427 = vmatprep.mubr.msk.f32.mxu0 %vm582_vm0, %v412_v59 }
  0x5c   : > { %20491 = vmatprep.mubr.msk.f32.mxu1 %vm582_vm0, %v412_v59 }
  0x5e   : > { %20428 = vmatmul.mubr.msk.f32.gmra.mrb[26].mxu0 %vm582_vm0, %v413_v60 }
  0x5f   : > { %20492 = vmatmul.mubr.msk.f32.gmra.mrb[26].mxu1 %vm582_vm0, %v413_v60  ;;  %20430 = vmatprep.mubr.msk.f32.mxu0 %vm582_vm0, %v414_v61 }
  0x60   : > { %20494 = vmatprep.mubr.msk.f32.mxu1 %vm582_vm0, %v414_v61 }
  0x62   : > { %20431 = vmatmul.mubr.msk.f32.gmra.mrb[28].mxu0 %vm582_vm0, %v415_v62 }
  0x63   : > { %20495 = vmatmul.mubr.msk.f32.gmra.mrb[28].mxu1 %vm582_vm0, %v415_v62  ;;  %20433 = vmatprep.mubr.msk.f32.mxu0 %vm582_vm0, %v416_v63 }
  0x64   : > { %20497 = vmatprep.mubr.msk.f32.mxu1 %vm582_vm0, %v416_v63 }
  0x66   : > { %20434 = vmatmul.mubr.msk.f32.gmra.mrb[30].mxu0 %vm582_vm0, %v417_v0 }
  0x67   : > { %20498 = vmatmul.mubr.msk.f32.gmra.mrb[30].mxu1 %vm582_vm0, %v417_v0  ;;  %20516 = vmatprep.mubr.msk.f32.mxu0 %vm582_vm0, %v23525_v20 }
  0x68   : > { %1430 = vmatprep.mubr.f32.mxu1 %v446_v6 }
  0x6a   : > { %20517 = vmatmul.mubr.msk.f32.vlgmr.msra.gmra.mrb[32].mxu0 %vm582_vm0, %v23559_v28 }
  0x6b   : > { %20519 = vmatprep.mubr.msk.f32.mxu0 %vm582_vm0, %v23566_v30 }
  0x6e   : > { %20520 = vmatmul.mubr.msk.f32.gmra.mrb[34].mxu0 %vm582_vm0, %v23587_v35 }
  0x6f   : > { %20522 = vmatprep.mubr.msk.f32.mxu0 %vm582_vm0, %v23592_v36 }
  0x72   : > { %20523 = vmatmul.mubr.msk.f32.gmra.mrb[36].mxu0 %vm582_vm0, %v23605_v38 }
  0x73   : > { %20525 = vmatprep.mubr.msk.f32.mxu0 %vm582_vm0, %v23610_v39 }
  0x76   : > { %20526 = vmatmul.mubr.msk.f32.gmra.mrb[38].mxu0 %vm582_vm0, %v23621_v40 }
  0x77   : > { %20528 = vmatprep.mubr.msk.f32.mxu0 %vm582_vm0, %v23626_v41 }
  0x7a   : > { %20529 = vmatmul.mubr.msk.f32.gmra.mrb[40].mxu0 %vm582_vm0, %v23636_v42 }
  0x7b   : > { %20531 = vmatprep.mubr.msk.f32.mxu0 %vm582_vm0, %v23641_v43 }
  0x7e   : > { %20532 = vmatmul.mubr.msk.f32.gmra.mrb[42].mxu0 %vm582_vm0, %v23650_v44 }
  0x7f   : > { %20534 = vmatprep.mubr.msk.f32.mxu0 %vm582_vm0, %v23655_v45 }
  0x82   : > { %20535 = vmatmul.mubr.msk.f32.gmra.mrb[44].mxu0 %vm582_vm0, %v23664_v46 }
  0x83   : > { %20537 = vmatprep.mubr.msk.f32.mxu0 %vm582_vm0, %v23669_v47 }
  0x86   : > { %20538 = vmatmul.mubr.msk.f32.gmra.mrb[46].mxu0 %vm582_vm0, %v23678_v48 }
  0x87   : > { %20540 = vmatprep.mubr.msk.f32.mxu0 %vm582_vm0, %v23683_v49 }
  0x8a   : > { %20541 = vmatmul.mubr.msk.f32.gmra.mrb[48].mxu0 %vm582_vm0, %v23692_v50 }
  0x8b   : > { %20543 = vmatprep.mubr.msk.f32.mxu0 %vm582_vm0, %v23697_v51 }
  0x8e   : > { %20544 = vmatmul.mubr.msk.f32.gmra.mrb[50].mxu0 %vm582_vm0, %v23706_v52 }
  0x8f   : > { %20546 = vmatprep.mubr.msk.f32.mxu0 %vm582_vm0, %v23711_v53 }
  0x92   : > { %20547 = vmatmul.mubr.msk.f32.gmra.mrb[52].mxu0 %vm582_vm0, %v23720_v54 }
  0x93   : > { %20549 = vmatprep.mubr.msk.f32.mxu0 %vm582_vm0, %v408_v55 }
  0x96   : > { %20550 = vmatmul.mubr.msk.f32.gmra.mrb[54].mxu0 %vm582_vm0, %v409_v56 }
  0x97   : > { %20552 = vmatprep.mubr.msk.f32.mxu0 %vm582_vm0, %v410_v57 }
  0x9a   : > { %20553 = vmatmul.mubr.msk.f32.gmra.mrb[56].mxu0 %vm582_vm0, %v411_v58 }
  0x9b   : > { %20555 = vmatprep.mubr.msk.f32.mxu0 %vm582_vm0, %v412_v59 }
  0x9e   : > { %20556 = vmatmul.mubr.msk.f32.gmra.mrb[58].mxu0 %vm582_vm0, %v413_v60 }
  0x9f   : > { %20558 = vmatprep.mubr.msk.f32.mxu0 %vm582_vm0, %v414_v61 }
  0xa2   : > { %20559 = vmatmul.mubr.msk.f32.gmra.mrb[60].mxu0 %vm582_vm0, %v415_v62 }
  0xa3   : > { %20561 = vmatprep.mubr.msk.f32.mxu0 %vm582_vm0, %v416_v63 }
  0xa6   : > { %20562 = vmatmul.mubr.msk.f32.gmra.mrb[62].mxu0 %vm582_vm0, %v417_v0 }
  0xa7   : > { %1655 = vmatprep.mubr.f32.mxu0 %v446_v6 }
  0xfd   : > { %v20390_v11 = vpop.f32.mrb[0].mxu0 }
  0xfe   : > { %v23838_v13 = vadd.f32 %v20390_v11, %v23830_v9  ;;  %v20454_v14 = vpop.f32.mrb[0].mxu1  ;;  %v745_v15 = vpop.f32.mrb[1].mxu0 }
  0xff   : > { %v982_v18 = vadd.f32 %v20454_v14, %v23835_v10  ;;  %v23842_v19 = vadd.f32 %v23830_v9, %v745_v15  ;;  %v976_v20 = vpop.f32.mrb[1].mxu1 }
 0x100   : > { %30543 = vst [vmem:[#allocation18_spill] sm:$0xff] %v23838_v13  ;;  %v977_v21 = vadd.f32 %v23835_v10, %v976_v20 }
 0x101   : > { %30544 = vst [vmem:[#allocation19_spill] sm:$0xff] %v23842_v19  ;;  %v21701_v22 = vpack.c.bf16 %v23838_v13, %v23842_v19  ;;  %v20393_v25 = vpop.f32.mrb[2].mxu0 }
 0x102   : > { %v23847_v26 = vpack.c.bf16 %v982_v18, %v977_v21  ;;  %v23850_v28 = vadd.f32 %v20393_v25, %v23830_v9  ;;  %v20457_v29 = vpop.f32.mrb[2].mxu1  ;;  %v755_v30 = vpop.f32.mrb[3].mxu0 }
 0x103   : > { %v992_v31 = vadd.f32 %v20457_v29, %v23835_v10  ;;  %v23854_v33 = vadd.f32 %v23830_v9, %v755_v30  ;;  %v986_v34 = vpop.f32.mrb[3].mxu1  ;;  %21702 = vmatpush1.bf16.msra.mxu1 %v21701_v22 }
 0x104   : > { %30545 = vst [vmem:[#allocation20_spill] sm:$0xff] %v23847_v26  ;;  %30546 = vst [vmem:[#allocation21_spill] sm:$0xff] %v23850_v28  ;;  %v987_v35 = vadd.f32 %v23835_v10, %v986_v34  ;;  %21750 = vmatpush1.bf16.msra.mxu0 %v23847_v26  ;;  %21703 = vmatprep.subr.bf16.mxu1 %v30134_v5 }
 0x105   : > { %30547 = vst [vmem:[#allocation22_spill] sm:$0xff] %v23854_v33  ;;  %v21704_v36 = vpack.c.bf16 %v23850_v28, %v23854_v33  ;;  %v20396_v38 = vpop.f32.mrb[4].mxu0  ;;  %21751 = vmatprep.subr.bf16.mxu0 %v30134_v5  ;;  %v24413_v33 = vld [vmem:[%s30104_s7 + $0x130] sm:$0xff] }
 0x106   : > { %v23862_v39 = vpack.c.bf16 %v992_v31, %v987_v35  ;;  %v23865_v40 = vadd.f32 %v20396_v38, %v23830_v9  ;;  %v20460_v41 = vpop.f32.mrb[4].mxu1  ;;  %v765_v42 = vpop.f32.mrb[5].mxu0 }
 0x107   : > { %v1002_v43 = vadd.f32 %v20460_v41, %v23835_v10  ;;  %v23869_v44 = vadd.f32 %v23830_v9, %v765_v42  ;;  %v996_v45 = vpop.f32.mrb[5].mxu1  ;;  %21705 = vmatpush1.bf16.msra.mxu1 %v21704_v36 }
 0x108   : > { %30548 = vst [vmem:[#allocation23_spill] sm:$0xff] %v23862_v39  ;;  %30549 = vst [vmem:[#allocation24_spill] sm:$0xff] %v23865_v40  ;;  %v997_v46 = vadd.f32 %v23835_v10, %v996_v45  ;;  %21753 = vmatpush1.bf16.msra.mxu0 %v23862_v39  ;;  %21706 = vmatprep.subr.bf16.mxu1 %v30134_v5 }
 0x109   : > { %30550 = vst [vmem:[#allocation25_spill] sm:$0xff] %v23869_v44  ;;  %v21707_v47 = vpack.c.bf16 %v23865_v40, %v23869_v44  ;;  %v20399_v48 = vpop.f32.mrb[6].mxu0  ;;  %21754 = vmatprep.subr.bf16.mxu0 %v30134_v5  ;;  %v24403_v44 = vld [vmem:[%s30104_s7 + $0x138] sm:$0xff] }
 0x10a   : > { %v23877_v49 = vpack.c.bf16 %v1002_v43, %v997_v46  ;;  %v23880_v50 = vadd.f32 %v20399_v48, %v23830_v9  ;;  %v20463_v51 = vpop.f32.mrb[6].mxu1  ;;  %v775_v52 = vpop.f32.mrb[7].mxu0 }
 0x10b   : > { %v1012_v53 = vadd.f32 %v20463_v51, %v23835_v10  ;;  %v23884_v54 = vadd.f32 %v23830_v9, %v775_v52  ;;  %v1006_v55 = vpop.f32.mrb[7].mxu1  ;;  %21708 = vmatpush1.bf16.msra.mxu1 %v21707_v47 }
 0x10c   : > { %30551 = vst [vmem:[#allocation26_spill] sm:$0xff] %v23877_v49  ;;  %30552 = vst [vmem:[#allocation27_spill] sm:$0xff] %v23880_v50  ;;  %v1007_v56 = vadd.f32 %v23835_v10, %v1006_v55  ;;  %21756 = vmatpush1.bf16.msra.mxu0 %v23877_v49  ;;  %21709 = vmatprep.subr.bf16.mxu1 %v30134_v5 }
 0x10d   : > { %30553 = vst [vmem:[#allocation28_spill] sm:$0xff] %v23884_v54  ;;  %v21710_v57 = vpack.c.bf16 %v23880_v50, %v23884_v54  ;;  %v20402_v58 = vpop.f32.mrb[8].mxu0  ;;  %21757 = vmatprep.subr.bf16.mxu0 %v30134_v5 }
 0x10e   : > { %v23892_v59 = vpack.c.bf16 %v1012_v53, %v1007_v56  ;;  %v23895_v60 = vadd.f32 %v20402_v58, %v23830_v9  ;;  %v20466_v61 = vpop.f32.mrb[8].mxu1  ;;  %v785_v62 = vpop.f32.mrb[9].mxu0 }
 0x10f   : > { %v1022_v63 = vadd.f32 %v20466_v61, %v23835_v10  ;;  %v23899_v0 = vadd.f32 %v23830_v9, %v785_v62  ;;  %v1016_v1 = vpop.f32.mrb[9].mxu1  ;;  %21711 = vmatpush1.bf16.msra.mxu1 %v21710_v57 }
 0x110   : > { %30554 = vst [vmem:[#allocation29_spill] sm:$0xff] %v23892_v59  ;;  %30555 = vst [vmem:[#allocation30_spill] sm:$0xff] %v23895_v60  ;;  %v1017_v2 = vadd.f32 %v23835_v10, %v1016_v1  ;;  %21759 = vmatpush1.bf16.msra.mxu0 %v23892_v59  ;;  %21712 = vmatprep.subr.bf16.mxu1 %v30134_v5 }
 0x111   : > { %30556 = vst [vmem:[#allocation31_spill] sm:$0xff] %v23899_v0  ;;  %v21713_v6 = vpack.c.bf16 %v23895_v60, %v23899_v0  ;;  %v20405_v11 = vpop.f32.mrb[10].mxu0  ;;  %21760 = vmatprep.subr.bf16.mxu0 %v30134_v5 }
 0x112   : > { %v23907_v14 = vpack.c.bf16 %v1022_v63, %v1017_v2  ;;  %v23910_v15 = vadd.f32 %v20405_v11, %v23830_v9  ;;  %v20469_v18 = vpop.f32.mrb[10].mxu1  ;;  %v795_v20 = vpop.f32.mrb[11].mxu0 }
 0x113   : > { %v1032_v21 = vadd.f32 %v20469_v18, %v23835_v10  ;;  %v23914_v22 = vadd.f32 %v23830_v9, %v795_v20  ;;  %v1026_v25 = vpop.f32.mrb[11].mxu1  ;;  %21714 = vmatpush1.bf16.msra.mxu1 %v21713_v6 }
 0x114   : > { %30557 = vst [vmem:[#allocation32_spill] sm:$0xff] %v23907_v14  ;;  %30558 = vst [vmem:[#allocation33_spill] sm:$0xff] %v23910_v15  ;;  %v1027_v29 = vadd.f32 %v23835_v10, %v1026_v25  ;;  %21762 = vmatpush1.bf16.msra.mxu0 %v23907_v14  ;;  %21715 = vmatprep.subr.bf16.mxu1 %v30134_v5 }
 0x115   : > { %30559 = vst [vmem:[#allocation34_spill] sm:$0xff] %v23914_v22  ;;  %v21716_v30 = vpack.c.bf16 %v23910_v15, %v23914_v22  ;;  %v20408_v31 = vpop.f32.mrb[12].mxu0  ;;  %21763 = vmatprep.subr.bf16.mxu0 %v30134_v5 }
 0x116   : > { %v23922_v34 = vpack.c.bf16 %v1032_v21, %v1027_v29  ;;  %v23925_v35 = vadd.f32 %v20408_v31, %v23830_v9  ;;  %v20472_v36 = vpop.f32.mrb[12].mxu1  ;;  %v805_v38 = vpop.f32.mrb[13].mxu0 }
 0x117   : > { %v1042_v41 = vadd.f32 %v20472_v36, %v23835_v10  ;;  %v23929_v42 = vadd.f32 %v23830_v9, %v805_v38  ;;  %v1036_v43 = vpop.f32.mrb[13].mxu1  ;;  %21717 = vmatpush1.bf16.msra.mxu1 %v21716_v30 }
 0x118   : > { %30560 = vst [vmem:[#allocation35_spill] sm:$0xff] %v23922_v34  ;;  %30561 = vst [vmem:[#allocation36_spill] sm:$0xff] %v23925_v35  ;;  %v1037_v45 = vadd.f32 %v23835_v10, %v1036_v43  ;;  %21765 = vmatpush1.bf16.msra.mxu0 %v23922_v34  ;;  %21718 = vmatprep.subr.bf16.mxu1 %v30134_v5 }
 0x119   : > { %30562 = vst [vmem:[#allocation37_spill] sm:$0xff] %v23929_v42  ;;  %v21719_v46 = vpack.c.bf16 %v23925_v35, %v23929_v42  ;;  %v20411_v47 = vpop.f32.mrb[14].mxu0  ;;  %21766 = vmatprep.subr.bf16.mxu0 %v30134_v5 }
 0x11a   : > { %v23937_v48 = vpack.c.bf16 %v1042_v41, %v1037_v45  ;;  %v23940_v51 = vadd.f32 %v20411_v47, %v23830_v9  ;;  %v20475_v52 = vpop.f32.mrb[14].mxu1  ;;  %v815_v53 = vpop.f32.mrb[15].mxu0 }
 0x11b   : > { %v1052_v55 = vadd.f32 %v20475_v52, %v23835_v10  ;;  %v23944_v56 = vadd.f32 %v23830_v9, %v815_v53  ;;  %v1046_v57 = vpop.f32.mrb[15].mxu1  ;;  %21720 = vmatpush1.bf16.msra.mxu1 %v21719_v46 }
 0x11c   : > { %30563 = vst [vmem:[#allocation38_spill] sm:$0xff] %v23937_v48  ;;  %30564 = vst [vmem:[#allocation39_spill] sm:$0xff] %v23940_v51  ;;  %v1047_v58 = vadd.f32 %v23835_v10, %v1046_v57  ;;  %21768 = vmatpush1.bf16.msra.mxu0 %v23937_v48  ;;  %21721 = vmatprep.subr.bf16.mxu1 %v30134_v5 }
 0x11d   : > { %30565 = vst [vmem:[#allocation40_spill] sm:$0xff] %v23944_v56  ;;  %v21722_v61 = vpack.c.bf16 %v23940_v51, %v23944_v56  ;;  %v20414_v62 = vpop.f32.mrb[16].mxu0  ;;  %21769 = vmatprep.subr.bf16.mxu0 %v30134_v5 }
 0x11e   : > { %v23952_v63 = vpack.c.bf16 %v1052_v55, %v1047_v58  ;;  %v23955_v1 = vadd.f32 %v20414_v62, %v23830_v9  ;;  %v20478_v2 = vpop.f32.mrb[16].mxu1  ;;  %v825_v6 = vpop.f32.mrb[17].mxu0 }
 0x11f   : > { %v1062_v11 = vadd.f32 %v20478_v2, %v23835_v10  ;;  %v23959_v18 = vadd.f32 %v23830_v9, %v825_v6  ;;  %v1056_v20 = vpop.f32.mrb[17].mxu1  ;;  %21723 = vmatpush1.bf16.msra.mxu1 %v21722_v61 }
 0x120   : > { %30566 = vst [vmem:[#allocation41_spill] sm:$0xff] %v23952_v63  ;;  %30567 = vst [vmem:[#allocation42_spill] sm:$0xff] %v23955_v1  ;;  %v1057_v21 = vadd.f32 %v23835_v10, %v1056_v20  ;;  %21771 = vmatpush1.bf16.msra.mxu0 %v23952_v63  ;;  %21724 = vmatprep.subr.bf16.mxu1 %v30134_v5 }
 0x121   : > { %30568 = vst [vmem:[#allocation43_spill] sm:$0xff] %v23959_v18  ;;  %v21725_v25 = vpack.c.bf16 %v23955_v1, %v23959_v18  ;;  %v20417_v29 = vpop.f32.mrb[18].mxu0  ;;  %21772 = vmatprep.subr.bf16.mxu0 %v30134_v5 }
 0x122   : > { %v23967_v30 = vpack.c.bf16 %v1062_v11, %v1057_v21  ;;  %v23970_v31 = vadd.f32 %v20417_v29, %v23830_v9  ;;  %v20481_v36 = vpop.f32.mrb[18].mxu1  ;;  %v835_v38 = vpop.f32.mrb[19].mxu0 }
 0x123   : > { %v1072_v41 = vadd.f32 %v20481_v36, %v23835_v10  ;;  %v23974_v43 = vadd.f32 %v23830_v9, %v835_v38  ;;  %v1066_v45 = vpop.f32.mrb[19].mxu1  ;;  %21726 = vmatpush1.bf16.msra.mxu1 %v21725_v25 }
 0x124   : > { %30569 = vst [vmem:[#allocation44_spill] sm:$0xff] %v23967_v30  ;;  %30570 = vst [vmem:[#allocation45_spill] sm:$0xff] %v23970_v31  ;;  %v1067_v46 = vadd.f32 %v23835_v10, %v1066_v45  ;;  %21774 = vmatpush1.bf16.msra.mxu0 %v23967_v30  ;;  %21727 = vmatprep.subr.bf16.mxu1 %v30134_v5 }
 0x125   : > { %30571 = vst [vmem:[#allocation46_spill] sm:$0xff] %v23974_v43  ;;  %v21728_v47 = vpack.c.bf16 %v23970_v31, %v23974_v43  ;;  %v20420_v52 = vpop.f32.mrb[20].mxu0  ;;  %21775 = vmatprep.subr.bf16.mxu0 %v30134_v5 }
 0x126   : > { %v23982_v53 = vpack.c.bf16 %v1072_v41, %v1067_v46  ;;  %v23985_v55 = vadd.f32 %v20420_v52, %v23830_v9  ;;  %v20484_v57 = vpop.f32.mrb[20].mxu1  ;;  %v845_v58 = vpop.f32.mrb[21].mxu0 }
 0x127   : > { %v1082_v61 = vadd.f32 %v20484_v57, %v23835_v10  ;;  %v23989_v62 = vadd.f32 %v23830_v9, %v845_v58  ;;  %v1076_v2 = vpop.f32.mrb[21].mxu1  ;;  %21729 = vmatpush1.bf16.msra.mxu1 %v21728_v47 }
 0x128   : > { %30572 = vst [vmem:[#allocation47_spill] sm:$0xff] %v23982_v53  ;;  %30573 = vst [vmem:[#allocation48_spill] sm:$0xff] %v23985_v55  ;;  %v1077_v6 = vadd.f32 %v23835_v10, %v1076_v2  ;;  %21777 = vmatpush1.bf16.msra.mxu0 %v23982_v53  ;;  %21730 = vmatprep.subr.bf16.mxu1 %v30134_v5 }
 0x129   : > { %30574 = vst [vmem:[#allocation49_spill] sm:$0xff] %v23989_v62  ;;  %v21731_v11 = vpack.c.bf16 %v23985_v55, %v23989_v62  ;;  %v20423_v20 = vpop.f32.mrb[22].mxu0  ;;  %21778 = vmatprep.subr.bf16.mxu0 %v30134_v5 }
 0x12a   : > { %v23997_v21 = vpack.c.bf16 %v1082_v61, %v1077_v6  ;;  %v24000_v25 = vadd.f32 %v20423_v20, %v23830_v9  ;;  %v20487_v29 = vpop.f32.mrb[22].mxu1  ;;  %v855_v36 = vpop.f32.mrb[23].mxu0 }
 0x12b   : > { %v1092_v38 = vadd.f32 %v20487_v29, %v23835_v10  ;;  %v24004_v41 = vadd.f32 %v23830_v9, %v855_v36  ;;  %v1086_v45 = vpop.f32.mrb[23].mxu1  ;;  %21732 = vmatpush1.bf16.msra.mxu1 %v21731_v11 }
 0x12c   : > { %30575 = vst [vmem:[#allocation50_spill] sm:$0xff] %v23997_v21  ;;  %30576 = vst [vmem:[#allocation51_spill] sm:$0xff] %v24000_v25  ;;  %v1087_v46 = vadd.f32 %v23835_v10, %v1086_v45  ;;  %21780 = vmatpush1.bf16.msra.mxu0 %v23997_v21  ;;  %21733 = vmatprep.subr.bf16.mxu1 %v30134_v5 }
 0x12d   : > { %30577 = vst [vmem:[#allocation52_spill] sm:$0xff] %v24004_v41  ;;  %v21734_v47 = vpack.c.bf16 %v24000_v25, %v24004_v41  ;;  %v20426_v52 = vpop.f32.mrb[24].mxu0  ;;  %21781 = vmatprep.subr.bf16.mxu0 %v30134_v5 }
 0x12e   : > { %v24012_v57 = vpack.c.bf16 %v1092_v38, %v1087_v46  ;;  %v24015_v58 = vadd.f32 %v20426_v52, %v23830_v9  ;;  %v20490_v61 = vpop.f32.mrb[24].mxu1  ;;  %v865_v2 = vpop.f32.mrb[25].mxu0 }
 0x12f   : > { %v1102_v6 = vadd.f32 %v20490_v61, %v23835_v10  ;;  %v24019_v11 = vadd.f32 %v23830_v9, %v865_v2  ;;  %v1096_v20 = vpop.f32.mrb[25].mxu1  ;;  %21735 = vmatpush1.bf16.msra.mxu1 %v21734_v47 }
 0x130   : > { %30578 = vst [vmem:[#allocation53_spill] sm:$0xff] %v24012_v57  ;;  %30579 = vst [vmem:[#allocation54_spill] sm:$0xff] %v24015_v58  ;;  %v1097_v29 = vadd.f32 %v23835_v10, %v1096_v20  ;;  %21783 = vmatpush1.bf16.msra.mxu0 %v24012_v57  ;;  %21736 = vmatprep.subr.bf16.mxu1 %v30134_v5 }
 0x131   : > { %30580 = vst [vmem:[#allocation55_spill] sm:$0xff] %v24019_v11  ;;  %v21737_v36 = vpack.c.bf16 %v24015_v58, %v24019_v11  ;;  %v20429_v38 = vpop.f32.mrb[26].mxu0  ;;  %21784 = vmatprep.subr.bf16.mxu0 %v30134_v5 }
 0x132   : > { %v24027_v45 = vpack.c.bf16 %v1102_v6, %v1097_v29  ;;  %v24030_v46 = vadd.f32 %v20429_v38, %v23830_v9  ;;  %v20493_v52 = vpop.f32.mrb[26].mxu1  ;;  %v875_v61 = vpop.f32.mrb[27].mxu0 }
 0x133   : > { %v1112_v47 = vadd.f32 %v20493_v52, %v23835_v10  ;;  %v24034_v2 = vadd.f32 %v23830_v9, %v875_v61  ;;  %v1106_v20 = vpop.f32.mrb[27].mxu1  ;;  %21738 = vmatpush1.bf16.msra.mxu1 %v21737_v36 }
 0x134   : > { %30581 = vst [vmem:[#allocation56_spill] sm:$0xff] %v24027_v45  ;;  %30582 = vst [vmem:[#allocation57_spill] sm:$0xff] %v24030_v46  ;;  %v1107_v4 = vadd.f32 %v23835_v10, %v1106_v20  ;;  %21786 = vmatpush1.bf16.msra.mxu0 %v24027_v45  ;;  %21739 = vmatprep.subr.bf16.mxu1 %v30134_v5 }
 0x135   : > { %30583 = vst [vmem:[#allocation58_spill] sm:$0xff] %v24034_v2  ;;  %v21740_v6 = vpack.c.bf16 %v24030_v46, %v24034_v2  ;;  %v20432_v29 = vpop.f32.mrb[28].mxu0  ;;  %21787 = vmatprep.subr.bf16.mxu0 %v30134_v5  ;;  %v30604_v46 = vmov 0.0|0.0  }
 0x136   : > { %v24042_v38 = vpack.c.bf16 %v1112_v47, %v1107_v4  ;;  %v24045_v52 = vadd.f32 %v20432_v29, %v23830_v9  ;;  %v20496_v61 = vpop.f32.mrb[28].mxu1  ;;  %v885_v37 = vpop.f32.mrb[29].mxu0 }
 0x137   : > { %v1122_v36 = vadd.f32 %v20496_v61, %v23835_v10  ;;  %v24049_v20 = vadd.f32 %v23830_v9, %v885_v37  ;;  %v1116_v32 = vpop.f32.mrb[29].mxu1  ;;  %21741 = vmatpush1.bf16.msra.mxu1 %v21740_v6 }
 0x138   : > { %30584 = vst [vmem:[#allocation59_spill] sm:$0xff] %v24042_v38  ;;  %30585 = vst [vmem:[#allocation60_spill] sm:$0xff] %v24045_v52  ;;  %v1117_v27 = vadd.f32 %v23835_v10, %v1116_v32  ;;  %21789 = vmatpush1.bf16.msra.mxu0 %v24042_v38  ;;  %21742 = vmatprep.subr.bf16.mxu1 %v30134_v5 }
 0x139   : > { %30586 = vst [vmem:[#allocation61_spill] sm:$0xff] %v24049_v20  ;;  %v21743_v4 = vpack.c.bf16 %v24045_v52, %v24049_v20  ;;  %v20435_v47 = vpop.f32.mrb[30].mxu0  ;;  %21790 = vmatprep.subr.bf16.mxu0 %v30134_v5 }
 0x13a   : > { %v24057_v29 = vpack.c.bf16 %v1122_v36, %v1117_v27  ;;  %v24060_v61 = vadd.f32 %v20435_v47, %v23830_v9  ;;  %v20499_v37 = vpop.f32.mrb[30].mxu1  ;;  %v895_v24 = vpop.f32.mrb[31].mxu0  ;;  %v24124_v47 = vld [vmem:[%s30104_s7 + $0x30] sm:$0xff] }
 0x13b   : > { %v1132_v6 = vadd.f32 %v20499_v37, %v23835_v10  ;;  %v24064_v32 = vadd.f32 %v23830_v9, %v895_v24  ;;  %v1126_v17 = vpop.f32.mrb[31].mxu1  ;;  %21744 = vmatpush1.bf16.msra.mxu1 %v21743_v4  ;;  %v24077_v24 = vld [vmem:[%s30104_s7] sm:$0xff]  ;;  %v24098_v9 = vld [vmem:[%s30104_s7 + $0x28] sm:$0xff]  ;;  %v24114_v4 = vld [vmem:[%s30104_s7 + $0x38] sm:$0xff]  ;;  %30596 = vst [vmem:[#allocation71_spill] sm:$0xff] %v24124_v47 }
 0x13c   : > { %30587 = vst [vmem:[#allocation62_spill] sm:$0xff] %v24057_v29  ;;  %30588 = vst [vmem:[#allocation63_spill] sm:$0xff] %v24060_v61  ;;  %v1127_v12 = vadd.f32 %v23835_v10, %v1126_v17  ;;  %21792 = vmatpush1.bf16.msra.mxu0 %v24057_v29  ;;  %21745 = vmatprep.subr.bf16.mxu1 %v30134_v5  ;;  %v24083_v17 = vld [vmem:[%s30104_s7 + $0x18] sm:$0xff]  ;;  %v24108_v10 = vld [vmem:[%s30104_s7 + $0x20] sm:$0xff] }
 0x13d   : > { %30589 = vst [vmem:[#allocation64_spill] sm:$0xff] %v24064_v32  ;;  %v21746_v27 = vpack.c.bf16 %v24060_v61, %v24064_v32  ;;  %21793 = vmatprep.subr.bf16.mxu0 %v30134_v5  ;;  %30591 = vst [vmem:[#allocation66_spill] sm:$0xff] %v24083_v17  ;;  %v24130_v37 = vld [vmem:[%s30104_s7 + $0x48] sm:$0xff]  ;;  %v20518_v16 = vpop.f32.mrb[32].mxu0  ;;  %v24184_v32 = vld [vmem:[%s30104_s7 + $0x78] sm:$0xff] }
 0x13e   : > { %v24072_v36 = vpack.c.bf16 %v1132_v6, %v1127_v12  ;;  %v24092_v12 = vld [vmem:[%s30104_s7 + $0x10] sm:$0xff]  ;;  %30593 = vst [vmem:[#allocation68_spill] sm:$0xff] %v24098_v9  ;;  %30594 = vst [vmem:[#allocation69_spill] sm:$0xff] %v24108_v10  ;;  %v24140_v6 = vld [vmem:[%s30104_s7 + $0x40] sm:$0xff]  ;;  %v1213_v61 = vadd.f32 %v20518_v16, %v24170_v8 }
 0x13f   : > { %21747 = vmatpush1.bf16.msra.mxu1 %v21746_v27  ;;  %30592 = vst [vmem:[#allocation67_spill] sm:$0xff] %v24092_v12  ;;  %30595 = vst [vmem:[#allocation70_spill] sm:$0xff] %v24114_v4  ;;  %v24146_v27 = vld [vmem:[%s30104_s7 + $0x58] sm:$0xff]  ;;  %v24197_v16 = vld [vmem:[%s30104_s7 + $0x70] sm:$0xff] }
 0x140   : > { %30590 = vst [vmem:[#allocation65_spill] sm:$0xff] %v24072_v36  ;;  %21795 = vmatpush1.bf16.msra.mxu0 %v24072_v36  ;;  %22772 = vmatprep.subr.bf16.mxu1 %v30134_v5  ;;  %30597 = vst [vmem:[#allocation72_spill] sm:$0xff] %v24130_v37 }
 0x141   : > { %30598 = vst [vmem:[#allocation73_spill] sm:$0xff] %v24140_v6  ;;  %30599 = vst [vmem:[#allocation74_spill] sm:$0xff] %v24146_v27 }
 0x142   : > { %1431 = vmatmul.mubr.f32.vlgmr.msra.gmra.mrb[32].mxu1 %v24077_v24  ;;  %30603 = vst [vmem:[#allocation78_spill] sm:$0xff] %v24184_v32  ;;  %30606 = vst [vmem:[#allocation80_spill] sm:$0xff] %v24197_v16 }
 0x143   : > { %1656 = vmatmul.mubr.f32.vlgmr.msra.gmra.mrb[64].mxu0 %v24077_v24  ;;  %1435 = vmatprep.mubr.f32.mxu1 %v24083_v17 }
 0x144   : > { %1660 = vmatprep.mubr.f32.mxu0 %v24083_v17  ;;  %22788 = vmatpush1.bf16.msra.mxu1 %v23847_v26  ;;  %v24435_v26 = vld [vmem:[%s30104_s7 + $0x158] sm:$0xff]  ;;  %v24569_v17 = vld [vmem:[%s30104_s7 + $0x1f0] sm:$0xff] }
 0x145   : > { %22773 = vmatprep.subr.bf16.mxu1 %v30134_v5 }
 0x146   : > { %1436 = vmatmul.mubr.f32.gmra.mrb[34].mxu1 %v24092_v12 }
 0x147   : > { %1661 = vmatmul.mubr.f32.gmra.mrb[66].mxu0 %v24092_v12  ;;  %1440 = vmatprep.mubr.f32.mxu1 %v24098_v9  ;;  %v24562_v12 = vld [vmem:[%s30104_s7 + $0x1f8] sm:$0xff] }
 0x148   : > { %1665 = vmatprep.mubr.f32.mxu0 %v24098_v9  ;;  %22789 = vmatpush1.bf16.msra.mxu1 %v23862_v39  ;;  %v24429_v39 = vld [vmem:[%s30104_s7 + $0x140] sm:$0xff] }
 0x149   : > { %22774 = vmatprep.subr.bf16.mxu1 %v30134_v5  ;;  %v24557_v9 = vld [vmem:[%s30104_s7 + $0x1e0] sm:$0xff] }
 0x14a   : > { %1441 = vmatmul.mubr.f32.gmra.mrb[36].mxu1 %v24108_v10 }
 0x14b   : > { %1666 = vmatmul.mubr.f32.gmra.mrb[68].mxu0 %v24108_v10  ;;  %1445 = vmatprep.mubr.f32.mxu1 %v24114_v4  ;;  %v24550_v10 = vld [vmem:[%s30104_s7 + $0x1e8] sm:$0xff] }
 0x14c   : > { %1670 = vmatprep.mubr.f32.mxu0 %v24114_v4  ;;  %22790 = vmatpush1.bf16.msra.mxu1 %v23877_v49  ;;  %v24419_v49 = vld [vmem:[%s30104_s7 + $0x148] sm:$0xff]  ;;  %v24545_v4 = vld [vmem:[%s30104_s7 + $0x1d0] sm:$0xff] }
 0x14d   : > { %22775 = vmatprep.subr.bf16.mxu1 %v30134_v5 }
 0x14e   : > { %1446 = vmatmul.mubr.f32.gmra.mrb[38].mxu1 %v24124_v47 }
 0x14f   : > { %1671 = vmatmul.mubr.f32.gmra.mrb[70].mxu0 %v24124_v47  ;;  %1450 = vmatprep.mubr.f32.mxu1 %v24130_v37  ;;  %v24538_v47 = vld [vmem:[%s30104_s7 + $0x1d8] sm:$0xff] }
 0x150   : > { %1675 = vmatprep.mubr.f32.mxu0 %v24130_v37  ;;  %22791 = vmatpush1.bf16.msra.mxu1 %v23892_v59  ;;  %v24533_v37 = vld [vmem:[%s30104_s7 + $0x1c0] sm:$0xff] }
 0x151   : > { %22776 = vmatprep.subr.bf16.mxu1 %v30134_v5 }
 0x152   : > { %1451 = vmatmul.mubr.f32.gmra.mrb[40].mxu1 %v24140_v6 }
 0x153   : > { %1676 = vmatmul.mubr.f32.gmra.mrb[72].mxu0 %v24140_v6  ;;  %1455 = vmatprep.mubr.f32.mxu1 %v24146_v27  ;;  %v24526_v6 = vld [vmem:[%s30104_s7 + $0x1c8] sm:$0xff] }
 0x154   : > { %1680 = vmatprep.mubr.f32.mxu0 %v24146_v27  ;;  %22792 = vmatpush1.bf16.msra.mxu1 %v23907_v14  ;;  %v24397_v14 = vld [vmem:[%s30104_s7 + $0x120] sm:$0xff]  ;;  %v24521_v27 = vld [vmem:[%s30104_s7 + $0x1b0] sm:$0xff] }
 0x155   : > { %22777 = vmatprep.subr.bf16.mxu1 %v30134_v5  ;;  %v1207_v5 = vpop.f32.mrb[33].mxu0 }
 0x156   : > { %1456 = vmatmul.mubr.f32.gmra.mrb[42].mxu1 %v24156_v7  ;;  %v1208_v52 = vadd.f32 %v24170_v8, %v1207_v5  ;;  %v20521_v2 = vpop.f32.mrb[34].mxu0  ;;  %v24204_v5 = vld [vmem:[%s30104_s7 + $0x88] sm:$0xff] }
 0x157   : > { %1681 = vmatmul.mubr.f32.gmra.mrb[74].mxu0 %v24156_v7  ;;  %1460 = vmatprep.mubr.f32.mxu1 %v24162_v23  ;;  %v1223_v58 = vadd.f32 %v20521_v2, %v24170_v8  ;;  %v1217_v25 = vpop.f32.mrb[35].mxu0  ;;  %30607 = vst [vmem:[#allocation81_spill] sm:$0xff] %v24204_v5  ;;  %v24217_v2 = vld [vmem:[%s30104_s7 + $0x80] sm:$0xff]  ;;  %v24514_v7 = vld [vmem:[%s30104_s7 + $0x1b8] sm:$0xff] }
 0x158   : > { %1685 = vmatprep.mubr.f32.mxu0 %v24162_v23  ;;  %22793 = vmatpush1.bf16.msra.mxu1 %v23922_v34  ;;  %v24190_v20 = vpack.c.bf16 %v1213_v61, %v1208_v52  ;;  %v1218_v52 = vadd.f32 %v24170_v8, %v1217_v25  ;;  %v20524_v11 = vpop.f32.mrb[36].mxu0  ;;  %30609 = vst [vmem:[#allocation83_spill] sm:$0xff] %v24217_v2  ;;  %v24223_v25 = vld [vmem:[%s30104_s7 + $0x98] sm:$0xff]  ;;  %v24509_v23 = vld [vmem:[%s30104_s7 + $0x1a0] sm:$0xff] }
 0x159   : > { %22778 = vmatprep.subr.bf16.mxu1 %v30604_v46  ;;  %v1233_v41 = vadd.f32 %v20524_v11, %v24170_v8  ;;  %v1227_v55 = vpop.f32.mrb[37].mxu0  ;;  %v24236_v11 = vld [vmem:[%s30104_s7 + $0x90] sm:$0xff] }
 0x15a   : > { %1461 = vmatmul.mubr.f32.gmra.mrb[44].mxu1 %v24177_v3  ;;  %30605 = vst [vmem:[#allocation79_spill] sm:$0xff] %v24190_v20  ;;  %v24210_v61 = vpack.c.bf16 %v1223_v58, %v1218_v52  ;;  %v1228_v58 = vadd.f32 %v24170_v8, %v1227_v55  ;;  %v20527_v31 = vpop.f32.mrb[38].mxu0  ;;  %v24243_v55 = vld [vmem:[%s30104_s7 + $0xa8] sm:$0xff] }
 0x15b   : > { %1686 = vmatmul.mubr.f32.gmra.mrb[76].mxu0 %v24177_v3  ;;  %1465 = vmatprep.mubr.f32.mxu1 %v24184_v32  ;;  %v1243_v62 = vadd.f32 %v20527_v31, %v24170_v8  ;;  %v1237_v43 = vpop.f32.mrb[39].mxu0  ;;  %v24255_v31 = vld [vmem:[%s30104_s7 + $0xa0] sm:$0xff]  ;;  %v24502_v3 = vld [vmem:[%s30104_s7 + $0x1a8] sm:$0xff] }
 0x15c   : > { %1690 = vmatprep.mubr.f32.mxu0 %v24184_v32  ;;  %22794 = vmatpush1.bf16.msra.mxu1 %v23937_v48  ;;  %30608 = vst [vmem:[#allocation82_spill] sm:$0xff] %v24210_v61  ;;  %v24230_v52 = vpack.c.bf16 %v1233_v41, %v1228_v58  ;;  %v1238_v41 = vadd.f32 %v24170_v8, %v1237_v43  ;;  %v20530_v1 = vpop.f32.mrb[40].mxu0  ;;  %v24261_v43 = vld [vmem:[%s30104_s7 + $0xb8] sm:$0xff] }
 0x15d   : > { %22779 = vmatprep.subr.bf16.mxu1 %v30604_v46  ;;  %v1253_v51 = vadd.f32 %v20530_v1, %v24170_v8  ;;  %v1247_v18 = vpop.f32.mrb[41].mxu0  ;;  %v24273_v1 = vld [vmem:[%s30104_s7 + $0xb0] sm:$0xff] }
 0x15e   : > { %1466 = vmatmul.mubr.f32.gmra.mrb[46].mxu1 %v24197_v16  ;;  %30610 = vst [vmem:[#allocation84_spill] sm:$0xff] %v24230_v52  ;;  %v24249_v58 = vpack.c.bf16 %v1243_v62, %v1238_v41  ;;  %v1248_v62 = vadd.f32 %v24170_v8, %v1247_v18  ;;  %v20533_v56 = vpop.f32.mrb[42].mxu0  ;;  %v24279_v18 = vld [vmem:[%s30104_s7 + $0xc8] sm:$0xff] }
 0x15f   : > { %1691 = vmatmul.mubr.f32.gmra.mrb[78].mxu0 %v24197_v16  ;;  %1470 = vmatprep.mubr.f32.mxu1 %v24204_v5  ;;  %v1263_v35 = vadd.f32 %v20533_v56, %v24170_v8  ;;  %v1257_v15 = vpop.f32.mrb[43].mxu0  ;;  %v24291_v56 = vld [vmem:[%s30104_s7 + $0xc0] sm:$0xff]  ;;  %v24464_v16 = vld [vmem:[%s30104_s7 + $0x178] sm:$0xff] }
 0x160   : > { %22795 = vmatpush1.bf16.msra.mxu1 %v23952_v63  ;;  %1695 = vmatprep.mubr.f32.mxu0 %v24204_v5  ;;  %30611 = vst [vmem:[#allocation85_spill] sm:$0xff] %v24249_v58  ;;  %v24267_v41 = vpack.c.bf16 %v1253_v51, %v1248_v62  ;;  %v1258_v51 = vadd.f32 %v24170_v8, %v1257_v15  ;;  %v24297_v15 = vld [vmem:[%s30104_s7 + $0xd8] sm:$0xff] }
 0x161   : > { %22780 = vmatprep.subr.bf16.mxu1 %v30604_v46 }
 0x162   : > { %1471 = vmatmul.mubr.f32.gmra.mrb[48].mxu1 %v24217_v2  ;;  %30612 = vst [vmem:[#allocation86_spill] sm:$0xff] %v24267_v41  ;;  %v24285_v62 = vpack.c.bf16 %v1263_v35, %v1258_v51 }
 0x163   : > { %1475 = vmatprep.mubr.f32.mxu1 %v24223_v25  ;;  %1696 = vmatmul.mubr.f32.gmra.mrb[80].mxu0 %v24217_v2  ;;  %v24445_v2 = vld [vmem:[%s30104_s7 + $0x150] sm:$0xff] }
 0x164   : > { %22796 = vmatpush1.bf16.msra.mxu1 %v23967_v30  ;;  %30613 = vst [vmem:[#allocation87_spill] sm:$0xff] %v24285_v62 }
 0x165   : > { %22781 = vmatprep.subr.bf16.mxu1 %v30604_v46 }
 0x166   : > { %1476 = vmatmul.mubr.f32.gmra.mrb[50].mxu1 %v24236_v11 }
 0x167   : > { %1480 = vmatprep.mubr.f32.mxu1 %v24243_v55 }
 0x168   : > { %22797 = vmatpush1.bf16.msra.mxu1 %v23982_v53  ;;  %v20536_v53 = vpop.f32.mrb[44].mxu0 }
 0x169   : > { %22782 = vmatprep.subr.bf16.mxu1 %v30604_v46  ;;  %v1273_v30 = vadd.f32 %v20536_v53, %v24170_v8  ;;  %v1267_v63 = vpop.f32.mrb[45].mxu0  ;;  %v24309_v53 = vld [vmem:[%s30104_s7 + $0xd0] sm:$0xff] }
 0x16a   : > { %1481 = vmatmul.mubr.f32.gmra.mrb[52].mxu1 %v24255_v31  ;;  %v1268_v35 = vadd.f32 %v24170_v8, %v1267_v63  ;;  %v24315_v63 = vld [vmem:[%s30104_s7 + $0xe8] sm:$0xff] }
 0x16b   : > { %1485 = vmatprep.mubr.f32.mxu1 %v24261_v43 }
 0x16c   : > { %22798 = vmatpush1.bf16.msra.mxu1 %v23997_v21  ;;  %v24303_v51 = vpack.c.bf16 %v1273_v30, %v1268_v35  ;;  %v20539_v21 = vpop.f32.mrb[46].mxu0 }
 0x16d   : > { %22783 = vmatprep.subr.bf16.mxu1 %v30604_v46  ;;  %v1283_v42 = vadd.f32 %v20539_v21, %v24170_v8  ;;  %v1277_v22 = vpop.f32.mrb[47].mxu0  ;;  %v24327_v21 = vld [vmem:[%s30104_s7 + $0xe0] sm:$0xff] }
 0x16e   : > { %1486 = vmatmul.mubr.f32.gmra.mrb[54].mxu1 %v24273_v1  ;;  %30614 = vst [vmem:[#allocation88_spill] sm:$0xff] %v24303_v51  ;;  %v1278_v30 = vadd.f32 %v24170_v8, %v1277_v22  ;;  %v24333_v22 = vld [vmem:[%s30104_s7 + $0xf8] sm:$0xff] }
 0x16f   : > { %1490 = vmatprep.mubr.f32.mxu1 %v24279_v18 }
 0x170   : > { %22799 = vmatpush1.bf16.msra.mxu1 %v24012_v57  ;;  %v24321_v35 = vpack.c.bf16 %v1283_v42, %v1278_v30  ;;  %v20542_v57 = vpop.f32.mrb[48].mxu0 }
 0x171   : > { %22784 = vmatprep.subr.bf16.mxu1 %v30604_v46  ;;  %v1293_v60 = vadd.f32 %v20542_v57, %v24170_v8  ;;  %v1287_v50 = vpop.f32.mrb[49].mxu0  ;;  %v24345_v57 = vld [vmem:[%s30104_s7 + $0xf0] sm:$0xff] }
 0x172   : > { %1491 = vmatmul.mubr.f32.gmra.mrb[56].mxu1 %v24291_v56  ;;  %30615 = vst [vmem:[#allocation89_spill] sm:$0xff] %v24321_v35  ;;  %v1288_v42 = vadd.f32 %v24170_v8, %v1287_v50  ;;  %v24351_v50 = vld [vmem:[%s30104_s7 + $0x108] sm:$0xff] }
 0x173   : > { %1495 = vmatprep.mubr.f32.mxu1 %v24297_v15 }
 0x174   : > { %22800 = vmatpush1.bf16.msra.mxu1 %v24027_v45  ;;  %v24339_v30 = vpack.c.bf16 %v1293_v60, %v1288_v42  ;;  %v20545_v45 = vpop.f32.mrb[50].mxu0 }
 0x175   : > { %22785 = vmatprep.subr.bf16.mxu1 %v30604_v46  ;;  %v1303_v48 = vadd.f32 %v20545_v45, %v24170_v8  ;;  %v1297_v34 = vpop.f32.mrb[51].mxu0  ;;  %v24363_v45 = vld [vmem:[%s30104_s7 + $0x100] sm:$0xff] }
 0x176   : > { %1496 = vmatmul.mubr.f32.gmra.mrb[58].mxu1 %v24309_v53  ;;  %30616 = vst [vmem:[#allocation90_spill] sm:$0xff] %v24339_v30  ;;  %v1298_v60 = vadd.f32 %v24170_v8, %v1297_v34  ;;  %v24369_v34 = vld [vmem:[%s30104_s7 + $0x118] sm:$0xff] }
 0x177   : > { %1500 = vmatprep.mubr.f32.mxu1 %v24315_v63 }
 0x178   : > { %22801 = vmatpush1.bf16.msra.mxu1 %v24042_v38  ;;  %v24357_v42 = vpack.c.bf16 %v1303_v48, %v1298_v60  ;;  %v20548_v38 = vpop.f32.mrb[52].mxu0 }
 0x179   : > { %22786 = vmatprep.subr.bf16.mxu1 %v30604_v46  ;;  %v1313_v0 = vadd.f32 %v20548_v38, %v24170_v8  ;;  %v1307_v54 = vpop.f32.mrb[53].mxu0  ;;  %v24381_v38 = vld [vmem:[%s30104_s7 + $0x110] sm:$0xff] }
 0x17a   : > { %1501 = vmatmul.mubr.f32.gmra.mrb[60].mxu1 %v24327_v21  ;;  %30617 = vst [vmem:[#allocation91_spill] sm:$0xff] %v24357_v42  ;;  %v1308_v48 = vadd.f32 %v24170_v8, %v1307_v54  ;;  %v24387_v54 = vld [vmem:[%s30104_s7 + $0x128] sm:$0xff] }
 0x17b   : > { %1505 = vmatprep.mubr.f32.mxu1 %v24333_v22 }
 0x17c   : > { %22802 = vmatpush1.bf16.msra.mxu1 %v24057_v29  ;;  %v24375_v60 = vpack.c.bf16 %v1313_v0, %v1308_v48  ;;  %v20551_v29 = vpop.f32.mrb[54].mxu0 }
 0x17d   : > { %22787 = vmatprep.subr.bf16.mxu1 %v30604_v46  ;;  %v1323_v40 = vadd.f32 %v20551_v29, %v24170_v8  ;;  %v1317_v28 = vpop.f32.mrb[55].mxu0 }
 0x17e   : > { %1506 = vmatmul.mubr.f32.gmra.mrb[62].mxu1 %v24345_v57  ;;  %30618 = vst [vmem:[#allocation92_spill] sm:$0xff] %v24375_v60  ;;  %v20554_v48 = vpop.f32.mrb[56].mxu0 }
 0x17f   : > { %1510 = vmatprep.mubr.f32.mxu1 %v24351_v50  ;;  %v1333_v29 = vadd.f32 %v20554_v48, %v24170_v8  ;;  %v1327_v59 = vpop.f32.mrb[57].mxu0 }
 0x180   : > { %22803 = vmatpush1.bf16.msra.mxu1 %v24072_v36  ;;  %v1318_v36 = vadd.f32 %v24170_v8, %v1317_v28  ;;  %v1328_v28 = vadd.f32 %v24170_v8, %v1327_v59 }
 0x181   : > { %21796 = vmatprep.subr.bf16.mxu1 %v30604_v46 }
 0x182   : > { %1511 = vmatmul.mubr.f32.gmra.mrb[64].mxu1 %v24363_v45  ;;  %v24391_v0 = vpack.c.bf16 %v1323_v40, %v1318_v36  ;;  %v24407_v40 = vpack.c.bf16 %v1333_v29, %v1328_v28  ;;  %v20557_v36 = vpop.f32.mrb[58].mxu0 }
 0x183   : > { %1515 = vmatprep.mubr.f32.mxu1 %v24369_v34  ;;  %v1343_v48 = vadd.f32 %v20557_v36, %v24170_v8  ;;  %v1337_v13 = vpop.f32.mrb[59].mxu0 }
 0x184   : > { %30619 = vst [vmem:[#allocation93_spill] sm:$0xff] %v24391_v0  ;;  %30620 = vst [vmem:[#allocation94_spill] sm:$0xff] %v24407_v40  ;;  %v1338_v59 = vadd.f32 %v24170_v8, %v1337_v13  ;;  %v20560_v28 = vpop.f32.mrb[60].mxu0 }
 0x185   : > { %v1353_v36 = vadd.f32 %v20560_v28, %v24170_v8  ;;  %v1347_v19 = vpop.f32.mrb[61].mxu0  ;;  %v24450_v28 = vld [vmem:[%s30104_s7 + $0x168] sm:$0xff] }
 0x186   : > { %1516 = vmatmul.mubr.f32.gmra.mrb[66].mxu1 %v24381_v38  ;;  %v24423_v29 = vpack.c.bf16 %v1343_v48, %v1338_v59  ;;  %v1348_v13 = vadd.f32 %v24170_v8, %v1347_v19  ;;  %v20563_v59 = vpop.f32.mrb[62].mxu0 }
 0x187   : > { %1520 = vmatprep.mubr.f32.mxu1 %v24387_v54  ;;  %v1363_v5 = vadd.f32 %v20563_v59, %v24170_v8  ;;  %v1357_v19 = vpop.f32.mrb[63].mxu0  ;;  %v24478_v59 = vld [vmem:[%s30104_s7 + $0x188] sm:$0xff] }
 0x188   : > { %30621 = vst [vmem:[#allocation95_spill] sm:$0xff] %v24423_v29  ;;  %v24439_v48 = vpack.c.bf16 %v1353_v36, %v1348_v13  ;;  %v1358_v36 = vadd.f32 %v24170_v8, %v1357_v19  ;;  %v24459_v13 = vld [vmem:[%s30104_s7 + $0x160] sm:$0xff]  ;;  %v24473_v8 = vld [vmem:[%s30104_s7 + $0x170] sm:$0xff]  ;;  %v24490_v19 = vld [vmem:[%s30104_s7 + $0x198] sm:$0xff] }
 0x18a   : > { %1521 = vmatmul.mubr.f32.gmra.mrb[68].mxu1 %v24397_v14  ;;  %30622 = vst [vmem:[#allocation96_spill] sm:$0xff] %v24439_v48  ;;  %v24466_v32 = vpack.c.bf16 %v1363_v5, %v1358_v36  ;;  %v24485_v5 = vld [vmem:[%s30104_s7 + $0x180] sm:$0xff]  ;;  %v24497_v36 = vld [vmem:[%s30104_s7 + $0x190] sm:$0xff] }
 0x18b   : > { %1525 = vmatprep.mubr.f32.mxu1 %v24403_v44 }
 0x18c   : > { %30623 = vst [vmem:[#allocation97_spill] sm:$0xff] %v24466_v32 }
 0x18e   : > { %1526 = vmatmul.mubr.f32.gmra.mrb[70].mxu1 %v24413_v33 }
 0x18f   : > { %1530 = vmatprep.mubr.f32.mxu1 %v24419_v49 }
 0x192   : > { %1531 = vmatmul.mubr.f32.gmra.mrb[72].mxu1 %v24429_v39 }
 0x193   : > { %1535 = vmatprep.mubr.f32.mxu1 %v24435_v26 }
 0x196   : > { %1536 = vmatmul.mubr.f32.gmra.mrb[74].mxu1 %v24445_v2 }
 0x197   : > { %1540 = vmatprep.mubr.f32.mxu1 %v24450_v28 }
 0x19a   : > { %1541 = vmatmul.mubr.f32.gmra.mrb[76].mxu1 %v24459_v13 }
 0x19b   : > { %1545 = vmatprep.mubr.f32.mxu1 %v24464_v16 }
 0x19e   : > { %1546 = vmatmul.mubr.f32.gmra.mrb[78].mxu1 %v24473_v8 }
 0x19f   : > { %1550 = vmatprep.mubr.f32.mxu1 %v24478_v59 }
 0x1a2   : > { %1551 = vmatmul.mubr.f32.gmra.mrb[80].mxu1 %v24485_v5 }
 0x1a3   : > { %1555 = vmatprep.mubr.f32.mxu1 %v24490_v19 }
 0x1a6   : > { %1556 = vmatmul.mubr.f32.gmra.mrb[82].mxu1 %v24497_v36 }
 0x1a7   : > { %1560 = vmatprep.mubr.f32.mxu1 %v24502_v3 }
 0x1aa   : > { %1561 = vmatmul.mubr.f32.gmra.mrb[84].mxu1 %v24509_v23 }
 0x1ab   : > { %1565 = vmatprep.mubr.f32.mxu1 %v24514_v7 }
 0x1ae   : > { %1566 = vmatmul.mubr.f32.gmra.mrb[86].mxu1 %v24521_v27 }
 0x1af   : > { %1570 = vmatprep.mubr.f32.mxu1 %v24526_v6 }
 0x1b2   : > { %1571 = vmatmul.mubr.f32.gmra.mrb[88].mxu1 %v24533_v37 }
 0x1b3   : > { %1575 = vmatprep.mubr.f32.mxu1 %v24538_v47 }
 0x1b6   : > { %1576 = vmatmul.mubr.f32.gmra.mrb[90].mxu1 %v24545_v4 }
 0x1b7   : > { %1580 = vmatprep.mubr.f32.mxu1 %v24550_v10 }
 0x1ba   : > { %1581 = vmatmul.mubr.f32.gmra.mrb[92].mxu1 %v24557_v9 }
 0x1bb   : > { %1585 = vmatprep.mubr.f32.mxu1 %v24562_v12 }
 0x1be   : > { %1586 = vmatmul.mubr.f32.gmra.mrb[94].mxu1 %v24569_v17 }
 0x1bf   : > { %1700 = vmatprep.mubr.f32.mxu1 %v24223_v25 }
 0x1c2   : > { %1701 = vmatmul.mubr.f32.vlgmr.msra.gmra.mrb[96].mxu1 %v24236_v11 }
 0x1c3   : > { %1705 = vmatprep.mubr.f32.mxu1 %v24243_v55  ;;  %21798 = vmatpush1.bf16.msra.mxu1 %v24190_v20 }
 0x1c4   : > { %21799 = vmatprep.subr.bf16.mxu1 %v30604_v46 }
 0x1c6   : > { %1706 = vmatmul.mubr.f32.gmra.mrb[98].mxu1 %v24255_v31 }
 0x1c7   : > { %1710 = vmatprep.mubr.f32.mxu1 %v24261_v43  ;;  %21801 = vmatpush1.bf16.msra.mxu1 %v24210_v61  ;;  %v30633_v61 = vld [vmem:[#allocation72_spill] sm:$0xff] }
 0x1c8   : > { %21802 = vmatprep.subr.bf16.mxu1 %v30604_v46 }
 0x1ca   : > { %1711 = vmatmul.mubr.f32.gmra.mrb[100].mxu1 %v24273_v1 }
 0x1cb   : > { %1715 = vmatprep.mubr.f32.mxu1 %v24279_v18  ;;  %21804 = vmatpush1.bf16.msra.mxu1 %v24230_v52 }
 0x1cc   : > { %21805 = vmatprep.subr.bf16.mxu1 %v30604_v46 }
 0x1ce   : > { %1716 = vmatmul.mubr.f32.gmra.mrb[102].mxu1 %v24291_v56 }
 0x1cf   : > { %1720 = vmatprep.mubr.f32.mxu1 %v24297_v15  ;;  %21807 = vmatpush1.bf16.msra.mxu1 %v24249_v58  ;;  %v30628_v58 = vld [vmem:[#allocation67_spill] sm:$0xff] }
 0x1d0   : > { %21808 = vmatprep.subr.bf16.mxu1 %v30604_v46 }
 0x1d2   : > { %1721 = vmatmul.mubr.f32.gmra.mrb[104].mxu1 %v24309_v53 }
 0x1d3   : > { %1725 = vmatprep.mubr.f32.mxu1 %v24315_v63  ;;  %21810 = vmatpush1.bf16.msra.mxu1 %v24267_v41 }
 0x1d4   : > { %21811 = vmatprep.subr.bf16.mxu1 %v30604_v46 }
 0x1d6   : > { %1726 = vmatmul.mubr.f32.gmra.mrb[106].mxu1 %v24327_v21 }
 0x1d7   : > { %1730 = vmatprep.mubr.f32.mxu1 %v24333_v22  ;;  %21813 = vmatpush1.bf16.msra.mxu1 %v24285_v62 }
 0x1d8   : > { %21814 = vmatprep.subr.bf16.mxu1 %v30604_v46 }
 0x1da   : > { %1731 = vmatmul.mubr.f32.gmra.mrb[108].mxu1 %v24345_v57 }
 0x1db   : > { %1735 = vmatprep.mubr.f32.mxu1 %v24351_v50  ;;  %21816 = vmatpush1.bf16.msra.mxu1 %v24303_v51  ;;  %v30627_v51 = vld [vmem:[#allocation66_spill] sm:$0xff] }
 0x1dc   : > { %21817 = vmatprep.subr.bf16.mxu1 %v30604_v46 }
 0x1de   : > { %1736 = vmatmul.mubr.f32.gmra.mrb[110].mxu1 %v24363_v45 }
 0x1df   : > { %1740 = vmatprep.mubr.f32.mxu1 %v24369_v34  ;;  %21819 = vmatpush1.bf16.msra.mxu1 %v24321_v35 }
 0x1e0   : > { %21820 = vmatprep.subr.bf16.mxu1 %v30604_v46 }
 0x1e2   : > { %1741 = vmatmul.mubr.f32.gmra.mrb[112].mxu1 %v24381_v38 }
 0x1e3   : > { %1745 = vmatprep.mubr.f32.mxu1 %v24387_v54  ;;  %21822 = vmatpush1.bf16.msra.mxu1 %v24339_v30 }
 0x1e4   : > { %21823 = vmatprep.subr.bf16.mxu1 %v30604_v46 }
 0x1e6   : > { %1746 = vmatmul.mubr.f32.gmra.mrb[114].mxu1 %v24397_v14 }
 0x1e7   : > { %1750 = vmatprep.mubr.f32.mxu1 %v24403_v44  ;;  %21825 = vmatpush1.bf16.msra.mxu1 %v24357_v42 }
 0x1e8   : > { %21826 = vmatprep.subr.bf16.mxu1 %v30604_v46 }
 0x1ea   : > { %1751 = vmatmul.mubr.f32.gmra.mrb[116].mxu1 %v24413_v33 }
 0x1eb   : > { %1755 = vmatprep.mubr.f32.mxu1 %v24419_v49  ;;  %21828 = vmatpush1.bf16.msra.mxu1 %v24375_v60 }
 0x1ec   : > { %21829 = vmatprep.subr.bf16.mxu1 %v30604_v46 }
 0x1ee   : > { %1756 = vmatmul.mubr.f32.gmra.mrb[118].mxu1 %v24429_v39 }
 0x1ef   : > { %1760 = vmatprep.mubr.f32.mxu1 %v24435_v26  ;;  %21831 = vmatpush1.bf16.msra.mxu1 %v24391_v0 }
 0x1f0   : > { %21832 = vmatprep.subr.bf16.mxu1 %v30604_v46 }
 0x1f2   : > { %1761 = vmatmul.mubr.f32.gmra.mrb[120].mxu1 %v24445_v2 }
 0x1f3   : > { %1765 = vmatprep.mubr.f32.mxu1 %v24450_v28  ;;  %21834 = vmatpush1.bf16.msra.mxu1 %v24407_v40 }
 0x1f4   : > { %21835 = vmatprep.subr.bf16.mxu1 %v30604_v46 }
 0x1f6   : > { %1766 = vmatmul.mubr.f32.gmra.mrb[122].mxu1 %v24459_v13 }
 0x1f7   : > { %1770 = vmatprep.mubr.f32.mxu1 %v24464_v16  ;;  %21837 = vmatpush1.bf16.msra.mxu1 %v24423_v29 }
 0x1f8   : > { %21838 = vmatprep.subr.bf16.mxu1 %v30604_v46 }
 0x1fa   : > { %1771 = vmatmul.mubr.f32.gmra.mrb[124].mxu1 %v24473_v8 }
 0x1fb   : > { %1775 = vmatprep.mubr.f32.mxu1 %v24478_v59  ;;  %21840 = vmatpush1.bf16.msra.mxu1 %v24439_v48  ;;  %v30624_v48 = vmov 0 }
 0x1fc   : > { %21841 = vmatprep.subr.bf16.mxu1 %v30604_v46  ;;  %v30625_v48 = vsel %vm24652_vm2, 4294967295, %v30624_v48 }
 0x1fd   : > { %30626 = vst [vmem:[#allocation98_spill] sm:$0xff] %v30625_v48 }
 0x1fe   : > { %1776 = vmatmul.mubr.f32.gmra.mrb[126].mxu1 %v24485_v5 }
 0x1ff   : > { %1780 = vmatprep.mubr.f32.mxu1 %v24490_v19  ;;  %21843 = vmatpush1.bf16.msra.mxu1 %v24466_v32 }
 0x202   : > { %1781 = vmatmul.mubr.f32.gmra.mrb[128].mxu1 %v24497_v36 }
 0x203   : > { %1785 = vmatprep.mubr.f32.mxu1 %v24502_v3 }
 0x206   : > { %1786 = vmatmul.mubr.f32.gmra.mrb[130].mxu1 %v24509_v23 }
 0x207   : > { %1790 = vmatprep.mubr.f32.mxu1 %v24514_v7 }
 0x20a   : > { %1791 = vmatmul.mubr.f32.gmra.mrb[132].mxu1 %v24521_v27 }
 0x20b   : > { %1795 = vmatprep.mubr.f32.mxu1 %v24526_v6 }
 0x20e   : > { %1796 = vmatmul.mubr.f32.gmra.mrb[134].mxu1 %v24533_v37 }
 0x20f   : > { %1800 = vmatprep.mubr.f32.mxu1 %v24538_v47 }
 0x212   : > { %1801 = vmatmul.mubr.f32.gmra.mrb[136].mxu1 %v24545_v4 }
 0x213   : > { %1805 = vmatprep.mubr.f32.mxu1 %v24550_v10 }
 0x215   : > { %v1432_v32 = vpop.f32.mrb[32].mxu1 }
 0x216   : > { %v1434_v29 = vpop.f32.mrb[33].mxu1  ;;  %1806 = vmatmul.mubr.f32.gmra.mrb[138].mxu1 %v24557_v9  ;;  %20568 = vmatprep.mubr.msk.f32.mxu0 %vm2041_vm1, %v1432_v32  ;;  %v1657_v0 = vpop.f32.mrb[64].mxu0  ;;  %v23111_v32 = vld [vmem:[%s30104_s7 + $0x8] sm:$0xff] }
 0x217   : > { %v1659_v42 = vpop.f32.mrb[65].mxu0  ;;  %1810 = vmatprep.mubr.f32.mxu1 %v24562_v12 }
 0x219   : > { %v1437_v35 = vpop.f32.mrb[34].mxu1 }
 0x21a   : > { %v1662_v62 = vpop.f32.mrb[66].mxu0  ;;  %v1439_v46 = vpop.f32.mrb[35].mxu1  ;;  %1811 = vmatmul.mubr.f32.gmra.mrb[140].mxu1 %v24569_v17 }
 0x21b   : > { %v21844_v29 = vpack.c.bf16 %v1662_v62, %v1657_v0  ;;  %1880 = vmatprep.mubr.f32.mxu1 %v23111_v32  ;;  %v1664_v42 = vpop.f32.mrb[67].mxu0 }
 0x21c   : > { %v30629_v42 = vld [vmem:[#allocation68_spill] sm:$0xff] }
 0x21d   : > { %21846 = vmatprep.subr.msk.bf16.mxu0 %vm24652_vm2, %v21844_v29  ;;  %v1442_v40 = vpop.f32.mrb[36].mxu1 }
 0x21e   : > { %21849 = vmatpush3.bf16.xpose.msk.msra.mxu0 %vm24652_vm2, %v21844_v29  ;;  %v1444_v46 = vpop.f32.mrb[37].mxu1  ;;  %1881 = vmatmul.mubr.f32.vlgmr.msra.gmra.mrb[142].mxu1 %v24077_v24  ;;  %v1667_v60 = vpop.f32.mrb[68].mxu0 }
 0x21f   : > { %v1669_v30 = vpop.f32.mrb[69].mxu0  ;;  %1885 = vmatprep.mubr.f32.mxu1 %v30627_v51 }
 0x220   : > { %v30631_v30 = vld [vmem:[#allocation70_spill] sm:$0xff] }
 0x221   : > { %v1447_v62 = vpop.f32.mrb[38].mxu1 }
 0x222   : > { %v1672_v0 = vpop.f32.mrb[70].mxu0  ;;  %v1449_v41 = vpop.f32.mrb[39].mxu1  ;;  %1886 = vmatmul.mubr.f32.gmra.mrb[144].mxu1 %v30628_v58 }
 0x223   : > { %v21850_v32 = vpack.c.bf16 %v1672_v0, %v1667_v60  ;;  %1890 = vmatprep.mubr.f32.mxu1 %v30629_v42  ;;  %v1674_v52 = vpop.f32.mrb[71].mxu0  ;;  %v30630_v41 = vld [vmem:[#allocation69_spill] sm:$0xff]  ;;  %v30632_v0 = vld [vmem:[#allocation71_spill] sm:$0xff] }
 0x225   : > { %20569 = vmatmul.mubr.msk.f32.vlgmr.msra.gmra.mrb[82].mxu0 %vm2041_vm1, %v1437_v35  ;;  %21852 = vmatprep.subr.msk.bf16.mxu0 %vm24652_vm2, %v21850_v32  ;;  %v1452_v29 = vpop.f32.mrb[40].mxu1 }
 0x226   : > { %21855 = vmatpush3.bf16.xpose.msk.msra.mxu0 %vm24652_vm2, %v21850_v32  ;;  %20575 = vmatprep.mubr.msk.f32.mxu0 %vm2041_vm1, %v1442_v40  ;;  %v1454_v24 = vpop.f32.mrb[41].mxu1  ;;  %v1677_v51 = vpop.f32.mrb[72].mxu0 }
 0x227   : > { %1891 = vmatmul.mubr.f32.gmra.mrb[146].mxu1 %v30630_v41  ;;  %v1679_v58 = vpop.f32.mrb[73].mxu0  ;;  %v30634_v41 = vld [vmem:[#allocation73_spill] sm:$0xff] }
 0x228   : > { %1895 = vmatprep.mubr.f32.mxu1 %v30631_v30  ;;  %v30635_v58 = vld [vmem:[#allocation74_spill] sm:$0xff] }
 0x229   : > { %v1457_v60 = vpop.f32.mrb[42].mxu1 }
 0x22a   : > { %v1682_v52 = vpop.f32.mrb[74].mxu0  ;;  %v1459_v46 = vpop.f32.mrb[43].mxu1 }
 0x22b   : > { %v21856_v35 = vpack.c.bf16 %v1682_v52, %v1677_v51  ;;  %1896 = vmatmul.mubr.f32.gmra.mrb[148].mxu1 %v30632_v0  ;;  %v1684_v42 = vpop.f32.mrb[75].mxu0  ;;  %v30636_v46 = vld [vmem:[#allocation75_spill] sm:$0xff] }
 0x22c   : > { %1900 = vmatprep.mubr.f32.mxu1 %v30633_v61  ;;  %v30637_v42 = vld [vmem:[#allocation76_spill] sm:$0xff] }
 0x22d   : > { %20576 = vmatmul.mubr.msk.f32.vlgmr.msra.gmra.mrb[84].mxu0 %vm2041_vm1, %v1447_v62  ;;  %21858 = vmatprep.subr.msk.bf16.mxu0 %vm24652_vm2, %v21856_v35  ;;  %v1462_v40 = vpop.f32.mrb[44].mxu1 }
 0x22e   : > { %21861 = vmatpush3.bf16.xpose.msk.msra.mxu0 %vm24652_vm2, %v21856_v35  ;;  %20582 = vmatprep.mubr.msk.f32.mxu0 %vm2041_vm1, %v1452_v29  ;;  %v1464_v32 = vpop.f32.mrb[45].mxu1  ;;  %v1687_v24 = vpop.f32.mrb[76].mxu0 }
 0x22f   : > { %1901 = vmatmul.mubr.f32.gmra.mrb[150].mxu1 %v30634_v41  ;;  %v1689_v51 = vpop.f32.mrb[77].mxu0 }
 0x230   : > { %1905 = vmatprep.mubr.f32.mxu1 %v30635_v58  ;;  %v30639_v51 = vld [vmem:[#allocation78_spill] sm:$0xff] }
 0x231   : > { %v1467_v30 = vpop.f32.mrb[46].mxu1 }
 0x232   : > { %v1692_v61 = vpop.f32.mrb[78].mxu0  ;;  %v1469_v52 = vpop.f32.mrb[47].mxu1 }
 0x233   : > { %v21862_v62 = vpack.c.bf16 %v1692_v61, %v1687_v24  ;;  %1906 = vmatmul.mubr.f32.gmra.mrb[152].mxu1 %v30636_v46  ;;  %v1694_v0 = vpop.f32.mrb[79].mxu0  ;;  %v30638_v24 = vld [vmem:[#allocation77_spill] sm:$0xff]  ;;  %v30640_v61 = vld [vmem:[#allocation80_spill] sm:$0xff]  ;;  %v30642_v46 = vld [vmem:[#allocation83_spill] sm:$0xff] }
 0x234   : > { %1910 = vmatprep.mubr.f32.mxu1 %v30637_v42  ;;  %v30641_v52 = vld [vmem:[#allocation81_spill] sm:$0xff] }
 0x235   : > { %20583 = vmatmul.mubr.msk.f32.vlgmr.msra.gmra.mrb[86].mxu0 %vm2041_vm1, %v1457_v60  ;;  %21864 = vmatprep.subr.msk.bf16.mxu0 %vm24652_vm2, %v21862_v62  ;;  %v1472_v29 = vpop.f32.mrb[48].mxu1 }
 0x236   : > { %21867 = vmatpush3.bf16.xpose.msk.msra.mxu0 %vm24652_vm2, %v21862_v62  ;;  %20589 = vmatprep.mubr.msk.f32.mxu0 %vm2041_vm1, %v1462_v40  ;;  %v1474_v35 = vpop.f32.mrb[49].mxu1  ;;  %v24693_v32 = vpop.f32.mrb[80].mxu0 }
 0x237   : > { %1911 = vmatmul.mubr.f32.gmra.mrb[154].mxu1 %v30638_v24  ;;  %v1699_v41 = vpop.f32.mrb[81].mxu0 }
 0x238   : > { %1915 = vmatprep.mubr.f32.mxu1 %v30639_v51 }
 0x239   : > { %v24697_v58 = vpop.f32.mrb[50].mxu1 }
 0x23a   : > { %v1479_v60 = vpop.f32.mrb[51].mxu1 }
 0x23b   : > { %1916 = vmatmul.mubr.f32.gmra.mrb[156].mxu1 %v30640_v61 }
 0x23c   : > { %1920 = vmatprep.mubr.f32.mxu1 %v30641_v52 }
 0x23d   : > { %20590 = vmatmul.mubr.msk.f32.vlgmr.msra.gmra.mrb[88].mxu0 %vm2041_vm1, %v1467_v30  ;;  %v24702_v62 = vpop.f32.mrb[52].mxu1 }
 0x23e   : > { %20596 = vmatprep.mubr.msk.f32.mxu0 %vm2041_vm1, %v1472_v29  ;;  %v1484_v40 = vpop.f32.mrb[53].mxu1 }
 0x23f   : > { %1921 = vmatmul.mubr.f32.gmra.mrb[158].mxu1 %v30642_v46 }
 0x240   : > { %1925 = vmatprep.mubr.f32.mxu1 %v24223_v25 }
 0x241   : > { %v24707_v0 = vpop.f32.mrb[54].mxu1 }
 0x242   : > { %v1489_v42 = vpop.f32.mrb[55].mxu1 }
 0x243   : > { %1926 = vmatmul.mubr.f32.gmra.mrb[160].mxu1 %v24236_v11 }
 0x244   : > { %1930 = vmatprep.mubr.f32.mxu1 %v24243_v55 }
 0x245   : > { %v24711_v35 = vpop.f32.mrb[56].mxu1 }
 0x246   : > { %v1494_v24 = vpop.f32.mrb[57].mxu1 }
 0x247   : > { %1931 = vmatmul.mubr.f32.gmra.mrb[162].mxu1 %v24255_v31 }
 0x248   : > { %1935 = vmatprep.mubr.f32.mxu1 %v24261_v43 }
 0x249   : > { %v24715_v30 = vpop.f32.mrb[58].mxu1 }
 0x24a   : > { %v1499_v29 = vpop.f32.mrb[59].mxu1 }
 0x24b   : > { %1936 = vmatmul.mubr.f32.gmra.mrb[164].mxu1 %v24273_v1 }
 0x24c   : > { %1940 = vmatprep.mubr.f32.mxu1 %v24279_v18 }
 0x24d   : > { %v24719_v25 = vpop.f32.mrb[60].mxu1 }
 0x24e   : > { %v1504_v41 = vpop.f32.mrb[61].mxu1 }
 0x24f   : > { %1941 = vmatmul.mubr.f32.gmra.mrb[166].mxu1 %v24291_v56 }
 0x250   : > { %1945 = vmatprep.mubr.f32.mxu1 %v24297_v15 }
 0x251   : > { %v24723_v11 = vpop.f32.mrb[62].mxu1 }
 0x252   : > { %v1509_v55 = vpop.f32.mrb[63].mxu1 }
 0x253   : > { %1946 = vmatmul.mubr.f32.gmra.mrb[168].mxu1 %v24309_v53 }
 0x254   : > { %1950 = vmatprep.mubr.f32.mxu1 %v24315_v63 }
 0x255   : > { %v24727_v31 = vpop.f32.mrb[64].mxu1 }
 0x256   : > { %v1514_v43 = vpop.f32.mrb[65].mxu1 }
 0x257   : > { %1951 = vmatmul.mubr.f32.gmra.mrb[170].mxu1 %v24327_v21 }
 0x258   : > { %1955 = vmatprep.mubr.f32.mxu1 %v24333_v22 }
 0x259   : > { %v24731_v1 = vpop.f32.mrb[66].mxu1 }
 0x25a   : > { %v1519_v18 = vpop.f32.mrb[67].mxu1 }
 0x25b   : > { %1956 = vmatmul.mubr.f32.gmra.mrb[172].mxu1 %v24345_v57 }
 0x25c   : > { %1960 = vmatprep.mubr.f32.mxu1 %v24351_v50 }
 0x25d   : > { %v24735_v56 = vpop.f32.mrb[68].mxu1 }
 0x25e   : > { %v1524_v15 = vpop.f32.mrb[69].mxu1 }
 0x25f   : > { %1961 = vmatmul.mubr.f32.gmra.mrb[174].mxu1 %v24363_v45 }
 0x260   : > { %1965 = vmatprep.mubr.f32.mxu1 %v24369_v34 }
 0x261   : > { %v24739_v53 = vpop.f32.mrb[70].mxu1 }
 0x262   : > { %v1529_v63 = vpop.f32.mrb[71].mxu1 }
 0x263   : > { %1966 = vmatmul.mubr.f32.gmra.mrb[176].mxu1 %v24381_v38 }
 0x264   : > { %1970 = vmatprep.mubr.f32.mxu1 %v24387_v54 }
 0x265   : > { %v24743_v21 = vpop.f32.mrb[72].mxu1 }
 0x266   : > { %v1534_v22 = vpop.f32.mrb[73].mxu1 }
 0x267   : > { %1971 = vmatmul.mubr.f32.gmra.mrb[178].mxu1 %v24397_v14 }
 0x268   : > { %1975 = vmatprep.mubr.f32.mxu1 %v24403_v44 }
 0x269   : > { %v24747_v57 = vpop.f32.mrb[74].mxu1 }
 0x26a   : > { %v1539_v50 = vpop.f32.mrb[75].mxu1 }
 0x26b   : > { %1976 = vmatmul.mubr.f32.gmra.mrb[180].mxu1 %v24413_v33 }
 0x26c   : > { %1980 = vmatprep.mubr.f32.mxu1 %v24419_v49 }
 0x26d   : > { %v24751_v45 = vpop.f32.mrb[76].mxu1 }
 0x26e   : > { %v1544_v34 = vpop.f32.mrb[77].mxu1 }
 0x26f   : > { %1981 = vmatmul.mubr.f32.gmra.mrb[182].mxu1 %v24429_v39 }
 0x270   : > { %1985 = vmatprep.mubr.f32.mxu1 %v24435_v26 }
 0x271   : > { %v24755_v38 = vpop.f32.mrb[78].mxu1 }
 0x272   : > { %v1549_v54 = vpop.f32.mrb[79].mxu1 }
 0x273   : > { %1986 = vmatmul.mubr.f32.gmra.mrb[184].mxu1 %v24445_v2 }
 0x274   : > { %1990 = vmatprep.mubr.f32.mxu1 %v24450_v28 }
 0x275   : > { %v24759_v44 = vpop.f32.mrb[80].mxu1 }
 0x276   : > { %v1554_v14 = vpop.f32.mrb[81].mxu1 }
 0x277   : > { %1991 = vmatmul.mubr.f32.gmra.mrb[186].mxu1 %v24459_v13 }
 0x278   : > { %1995 = vmatprep.mubr.f32.mxu1 %v24464_v16 }
 0x279   : > { %v24763_v33 = vpop.f32.mrb[82].mxu1 }
 0x27a   : > { %v1559_v49 = vpop.f32.mrb[83].mxu1 }
 0x27b   : > { %1996 = vmatmul.mubr.f32.gmra.mrb[188].mxu1 %v24473_v8 }
 0x27c   : > { %2000 = vmatprep.mubr.f32.mxu1 %v24478_v59 }
 0x27d   : > { %v24767_v26 = vpop.f32.mrb[84].mxu1 }
 0x27e   : > { %v1564_v39 = vpop.f32.mrb[85].mxu1 }
 0x27f   : > { %2001 = vmatmul.mubr.f32.gmra.mrb[190].mxu1 %v24485_v5 }
 0x280   : > { %2005 = vmatprep.mubr.f32.mxu1 %v24490_v19 }
 0x281   : > { %v24771_v2 = vpop.f32.mrb[86].mxu1 }
 0x282   : > { %v1569_v28 = vpop.f32.mrb[87].mxu1 }
 0x283   : > { %2006 = vmatmul.mubr.f32.gmra.mrb[192].mxu1 %v24497_v36 }
 0x284   : > { %2010 = vmatprep.mubr.f32.mxu1 %v24502_v3 }
 0x285   : > { %v24775_v16 = vpop.f32.mrb[88].mxu1 }
 0x286   : > { %v1574_v13 = vpop.f32.mrb[89].mxu1 }
 0x287   : > { %2011 = vmatmul.mubr.f32.gmra.mrb[194].mxu1 %v24509_v23 }
 0x288   : > { %2015 = vmatprep.mubr.f32.mxu1 %v24514_v7 }
 0x289   : > { %v24779_v8 = vpop.f32.mrb[90].mxu1 }
 0x28a   : > { %v1579_v59 = vpop.f32.mrb[91].mxu1 }
 0x28b   : > { %2016 = vmatmul.mubr.f32.gmra.mrb[196].mxu1 %v24521_v27  ;;  %v30643_v59 = vld [vmem:[#allocation20_spill] sm:$0xff] }
 0x28c   : > { %2020 = vmatprep.mubr.f32.mxu1 %v24526_v6 }
 0x28d   : > { %v24783_v5 = vpop.f32.mrb[92].mxu1 }
 0x28e   : > { %v1584_v19 = vpop.f32.mrb[93].mxu1 }
 0x28f   : > { %2021 = vmatmul.mubr.f32.gmra.mrb[198].mxu1 %v24533_v37 }
 0x290   : > { %2025 = vmatprep.mubr.f32.mxu1 %v24538_v47 }
 0x291   : > { %v24787_v3 = vpop.f32.mrb[94].mxu1 }
 0x292   : > { %v1589_v36 = vpop.f32.mrb[95].mxu1 }
 0x293   : > { %2026 = vmatmul.mubr.f32.gmra.mrb[200].mxu1 %v24545_v4 }
 0x294   : > { %2030 = vmatprep.mubr.f32.mxu1 %v24550_v10 }
 0x295   : > { %v1702_v7 = vpop.f32.mrb[96].mxu1 }
 0x296   : > { %v21868_v23 = vpack.c.bf16 %v1702_v7, %v24693_v32  ;;  %v1704_v27 = vpop.f32.mrb[97].mxu1 }
 0x297   : > { %2031 = vmatmul.mubr.f32.gmra.mrb[202].mxu1 %v24557_v9 }
 0x298   : > { %21870 = vmatprep.subr.msk.bf16.mxu0 %vm24652_vm2, %v21868_v23  ;;  %2035 = vmatprep.mubr.f32.mxu1 %v24562_v12 }
 0x299   : > { %v1707_v37 = vpop.f32.mrb[98].mxu1  ;;  %21873 = vmatpush3.bf16.xpose.msk.msra.mxu0 %vm24652_vm2, %v21868_v23  ;;  %v30645_v23 = vld [vmem:[#allocation23_spill] sm:$0xff] }
 0x29a   : > { %v1709_v47 = vpop.f32.mrb[99].mxu1 }
 0x29b   : > { %2036 = vmatmul.mubr.f32.gmra.mrb[204].mxu1 %v24569_v17  ;;  %v24904_v47 = vld [vmem:[%s30106_s9 + $0x8] sm:$0xff] }
 0x29c   : > { %20631 = vmatprep.mubr.msk.f32.mxu1 %vm2041_vm1, %v24735_v56 }
 0x29d   : > { %v1712_v10 = vpop.f32.mrb[100].mxu1 }
 0x29e   : > { %v21874_v4 = vpack.c.bf16 %v1712_v10, %v1707_v37  ;;  %v1714_v6 = vpop.f32.mrb[101].mxu1 }
 0x2a0   : > { %20597 = vmatmul.mubr.msk.f32.vlgmr.msra.gmra.mrb[90].mxu0 %vm2041_vm1, %v24697_v58  ;;  %21876 = vmatprep.subr.msk.bf16.mxu0 %vm24652_vm2, %v21874_v4 }
 0x2a1   : > { %v1717_v12 = vpop.f32.mrb[102].mxu1  ;;  %21879 = vmatpush3.bf16.xpose.msk.msra.mxu0 %vm24652_vm2, %v21874_v4  ;;  %20603 = vmatprep.mubr.msk.f32.mxu0 %vm2041_vm1, %v24702_v62 }
 0x2a2   : > { %v1719_v17 = vpop.f32.mrb[103].mxu1 }
 0x2a3   : > { %v24915_v17 = vld [vmem:[%s30106_s9] sm:$0xff] }
 0x2a5   : > { %v1722_v9 = vpop.f32.mrb[104].mxu1 }
 0x2a6   : > { %v21880_v32 = vpack.c.bf16 %v1722_v9, %v1717_v12  ;;  %v1724_v51 = vpop.f32.mrb[105].mxu1  ;;  %v30647_v12 = vld [vmem:[#allocation18_spill] sm:$0xff] }
 0x2a8   : > { %20604 = vmatmul.mubr.msk.f32.vlgmr.msra.gmra.mrb[92].mxu0 %vm2041_vm1, %v24707_v0  ;;  %21882 = vmatprep.subr.msk.bf16.mxu0 %vm24652_vm2, %v21880_v32 }
 0x2a9   : > { %v1727_v58 = vpop.f32.mrb[106].mxu1  ;;  %21885 = vmatpush3.bf16.xpose.msk.msra.mxu0 %vm24652_vm2, %v21880_v32  ;;  %20610 = vmatprep.mubr.msk.f32.mxu0 %vm2041_vm1, %v24711_v35  ;;  %v30648_v32 = vld [vmem:[#allocation22_spill] sm:$0xff] }
 0x2aa   : > { %v1729_v60 = vpop.f32.mrb[107].mxu1 }
 0x2ab   : > { %v30650_v60 = vld [vmem:[#allocation29_spill] sm:$0xff] }
 0x2ad   : > { %v1732_v61 = vpop.f32.mrb[108].mxu1 }
 0x2ae   : > { %v21886_v52 = vpack.c.bf16 %v1732_v61, %v1727_v58  ;;  %v1734_v62 = vpop.f32.mrb[109].mxu1  ;;  %v30651_v61 = vld [vmem:[#allocation32_spill] sm:$0xff] }
 0x2b0   : > { %20611 = vmatmul.mubr.msk.f32.vlgmr.msra.gmra.mrb[94].mxu0 %vm2041_vm1, %v24715_v30  ;;  %21888 = vmatprep.subr.msk.bf16.mxu0 %vm24652_vm2, %v21886_v52 }
 0x2b1   : > { %v1737_v40 = vpop.f32.mrb[110].mxu1  ;;  %21891 = vmatpush3.bf16.xpose.msk.msra.mxu0 %vm24652_vm2, %v21886_v52  ;;  %20617 = vmatprep.mubr.msk.f32.mxu0 %vm2041_vm1, %v24719_v25 }
 0x2b2   : > { %v1739_v46 = vpop.f32.mrb[111].mxu1 }
 0x2b5   : > { %v1742_v0 = vpop.f32.mrb[112].mxu1 }
 0x2b6   : > { %v21892_v42 = vpack.c.bf16 %v1742_v0, %v1737_v40  ;;  %v1744_v35 = vpop.f32.mrb[113].mxu1 }
 0x2b8   : > { %20618 = vmatmul.mubr.msk.f32.vlgmr.msra.gmra.mrb[96].mxu0 %vm2041_vm1, %v24723_v11  ;;  %21894 = vmatprep.subr.msk.bf16.mxu0 %vm24652_vm2, %v21892_v42 }
 0x2b9   : > { %v1747_v24 = vpop.f32.mrb[114].mxu1  ;;  %21897 = vmatpush3.bf16.xpose.msk.msra.mxu0 %vm24652_vm2, %v21892_v42  ;;  %20624 = vmatprep.mubr.msk.f32.mxu0 %vm2041_vm1, %v24727_v31 }
 0x2ba   : > { %v1749_v30 = vpop.f32.mrb[115].mxu1 }
 0x2bb   : > { %v30652_v30 = vld [vmem:[#allocation21_spill] sm:$0xff] }
 0x2bd   : > { %v1752_v29 = vpop.f32.mrb[116].mxu1 }
 0x2be   : > { %v21898_v25 = vpack.c.bf16 %v1752_v29, %v1747_v24  ;;  %v1754_v41 = vpop.f32.mrb[117].mxu1 }
 0x2c0   : > { %20625 = vmatmul.mubr.msk.f32.vlgmr.msra.gmra.mrb[98].mxu0 %vm2041_vm1, %v24731_v1  ;;  %21900 = vmatprep.subr.msk.bf16.mxu1 %vm24652_vm2, %v21898_v25 }
 0x2c1   : > { %v1757_v11 = vpop.f32.mrb[118].mxu1  ;;  %21903 = vmatpush3.bf16.xpose.msk.msra.mxu1 %vm24652_vm2, %v21898_v25  ;;  %20638 = vmatprep.mubr.msk.f32.mxu0 %vm2041_vm1, %v24743_v21  ;;  %v30653_v25 = vld [vmem:[#allocation24_spill] sm:$0xff] }
 0x2c2   : > { %v1759_v55 = vpop.f32.mrb[119].mxu1 }
 0x2c5   : > { %v1762_v43 = vpop.f32.mrb[120].mxu1 }
 0x2c6   : > { %v21904_v31 = vpack.c.bf16 %v1762_v43, %v1757_v11  ;;  %v1764_v18 = vpop.f32.mrb[121].mxu1  ;;  %v30654_v11 = vld [vmem:[#allocation28_spill] sm:$0xff]  ;;  %v30655_v43 = vld [vmem:[#allocation31_spill] sm:$0xff] }
 0x2c8   : > { %20632 = vmatmul.mubr.msk.f32.vlgmr.msra.gmra.mrb[206].mxu1 %vm2041_vm1, %v24739_v53  ;;  %21906 = vmatprep.subr.msk.bf16.mxu0 %vm24652_vm2, %v21904_v31 }
 0x2c9   : > { %v1767_v1 = vpop.f32.mrb[122].mxu1  ;;  %21909 = vmatpush3.bf16.xpose.msk.msra.mxu0 %vm24652_vm2, %v21904_v31  ;;  %20645 = vmatprep.mubr.msk.f32.mxu1 %vm2041_vm1, %v24751_v45  ;;  %v30656_v31 = vld [vmem:[#allocation35_spill] sm:$0xff] }
 0x2ca   : > { %v1769_v56 = vpop.f32.mrb[123].mxu1 }
 0x2cd   : > { %v1772_v15 = vpop.f32.mrb[124].mxu1 }
 0x2ce   : > { %v21910_v63 = vpack.c.bf16 %v1772_v15, %v1767_v1  ;;  %v1774_v21 = vpop.f32.mrb[125].mxu1  ;;  %v30657_v15 = vld [vmem:[#allocation38_spill] sm:$0xff] }
 0x2d0   : > { %20639 = vmatmul.mubr.msk.f32.vlgmr.msra.gmra.mrb[100].mxu0 %vm2041_vm1, %v24747_v57  ;;  %21912 = vmatprep.subr.msk.bf16.mxu1 %vm24652_vm2, %v21910_v63 }
 0x2d1   : > { %v1777_v53 = vpop.f32.mrb[126].mxu1  ;;  %21915 = vmatpush3.bf16.xpose.msk.msra.mxu1 %vm24652_vm2, %v21910_v63  ;;  %20652 = vmatprep.mubr.msk.f32.mxu0 %vm2041_vm1, %v24759_v44 }
 0x2d2   : > { %v1779_v22 = vpop.f32.mrb[127].mxu1 }
 0x2d5   : > { %v1782_v50 = vpop.f32.mrb[128].mxu1 }
 0x2d6   : > { %v21916_v45 = vpack.c.bf16 %v1782_v50, %v1777_v53  ;;  %v1784_v34 = vpop.f32.mrb[129].mxu1 }
 0x2d8   : > { %20646 = vmatmul.mubr.msk.f32.vlgmr.msra.gmra.mrb[208].mxu1 %vm2041_vm1, %v24755_v38  ;;  %21918 = vmatprep.subr.msk.bf16.mxu0 %vm24652_vm2, %v21916_v45 }
 0x2d9   : > { %v1787_v57 = vpop.f32.mrb[130].mxu1  ;;  %21921 = vmatpush3.bf16.xpose.msk.msra.mxu0 %vm24652_vm2, %v21916_v45  ;;  %20659 = vmatprep.mubr.msk.f32.mxu1 %vm2041_vm1, %v24767_v26  ;;  %v30658_v45 = vld [vmem:[#allocation27_spill] sm:$0xff] }
 0x2da   : > { %v1789_v54 = vpop.f32.mrb[131].mxu1 }
 0x2dd   : > { %v1792_v14 = vpop.f32.mrb[132].mxu1 }
 0x2de   : > { %v21922_v44 = vpack.c.bf16 %v1792_v14, %v1787_v57  ;;  %v1794_v49 = vpop.f32.mrb[133].mxu1  ;;  %v30659_v57 = vld [vmem:[#allocation30_spill] sm:$0xff] }
 0x2df   : > { %v30660_v14 = vld [vmem:[#allocation34_spill] sm:$0xff] }
 0x2e0   : > { %20653 = vmatmul.mubr.msk.f32.vlgmr.msra.gmra.mrb[102].mxu0 %vm2041_vm1, %v24763_v33  ;;  %21924 = vmatprep.subr.msk.bf16.mxu1 %vm24652_vm2, %v21922_v44 }
 0x2e1   : > { %v1797_v38 = vpop.f32.mrb[134].mxu1  ;;  %21927 = vmatpush3.bf16.xpose.msk.msra.mxu1 %vm24652_vm2, %v21922_v44  ;;  %20666 = vmatprep.mubr.msk.f32.mxu0 %vm2041_vm1, %v24775_v16 }
 0x2e2   : > { %v1799_v39 = vpop.f32.mrb[135].mxu1 }
 0x2e3   : > { %v30662_v39 = vld [vmem:[#allocation41_spill] sm:$0xff] }
 0x2e5   : > { %v1802_v28 = vpop.f32.mrb[136].mxu1 }
 0x2e6   : > { %v21928_v26 = vpack.c.bf16 %v1802_v28, %v1797_v38  ;;  %v1804_v13 = vpop.f32.mrb[137].mxu1  ;;  %v30661_v38 = vld [vmem:[#allocation37_spill] sm:$0xff] }
 0x2e7   : > { %v30663_v13 = vld [vmem:[#allocation44_spill] sm:$0xff] }
 0x2e8   : > { %20660 = vmatmul.mubr.msk.f32.vlgmr.msra.gmra.mrb[210].mxu1 %vm2041_vm1, %v24771_v2  ;;  %21930 = vmatprep.subr.msk.bf16.mxu0 %vm24652_vm2, %v21928_v26 }
 0x2e9   : > { %21933 = vmatpush3.bf16.xpose.msk.msra.mxu0 %vm24652_vm2, %v21928_v26  ;;  %20673 = vmatprep.mubr.msk.f32.mxu1 %vm2041_vm1, %v24783_v5  ;;  %v1807_v33 = vpop.f32.mrb[138].mxu1  ;;  %v30644_v5 = vld [vmem:[#allocation19_spill] sm:$0xff] }
 0x2ea   : > { %21942 = vmatprep.subr.msk.bf16.mxu0 %vm24652_vm2, %v30643_v59  ;;  %v1809_v16 = vpop.f32.mrb[139].mxu1 }
 0x2ed   : > { %v1812_v19 = vpop.f32.mrb[140].mxu1 }
 0x2ee   : > { %v21934_v36 = vpack.c.bf16 %v1812_v19, %v1807_v33  ;;  %v1814_v7 = vpop.f32.mrb[141].mxu1 }
 0x2ef   : > { %v30664_v7 = vld [vmem:[#allocation33_spill] sm:$0xff] }
 0x2f0   : > { %20667 = vmatmul.mubr.msk.f32.vlgmr.msra.gmra.mrb[104].mxu0 %vm2041_vm1, %v24779_v8  ;;  %21936 = vmatprep.subr.msk.bf16.mxu1 %vm24652_vm2, %v21934_v36  ;;  %v30646_v8 = vld [vmem:[#allocation26_spill] sm:$0xff] }
 0x2f1   : > { %21939 = vmatpush3.bf16.xpose.msk.msra.mxu1 %vm24652_vm2, %v21934_v36  ;;  %21945 = vmatpush3.bf16.xpose.msk.msra.mxu0 %vm24652_vm2, %v30643_v59  ;;  %v1882_v2 = vpop.f32.mrb[142].mxu1 }
 0x2f2   : > { %20680 = vmatprep.mubr.msk.f32.mxu0 %vm2041_vm1, %v30644_v5  ;;  %21948 = vmatprep.subr.msk.bf16.mxu1 %vm24652_vm2, %v30645_v23  ;;  %v1884_v27 = vpop.f32.mrb[143].mxu1  ;;  %v30665_v5 = vld [vmem:[#allocation36_spill] sm:$0xff] }
 0x2f3   : > { %21954 = vmatprep.subr.msk.bf16.mxu0 %vm24652_vm2, %v30646_v8  ;;  %v30666_v27 = vld [vmem:[#allocation40_spill] sm:$0xff] }
 0x2f5   : > { %v1887_v37 = vpop.f32.mrb[144].mxu1 }
 0x2f6   : > { %v24906_v10 = vpack.c.bf16 %v1887_v37, %v1882_v2  ;;  %v1889_v4 = vpop.f32.mrb[145].mxu1 }
 0x2f7   : > { %v30667_v4 = vld [vmem:[#allocation43_spill] sm:$0xff] }
 0x2f8   : > { %v20570_v6 = vpop.f32.mrb[82].mxu0  ;;  %20674 = vmatmul.mubr.msk.f32.vlgmr.msra.gmra.mrb[212].mxu1 %vm2041_vm1, %v24787_v3  ;;  %20681 = vmatmul.mubr.msk.f32.vlgmr.msra.gmra.mrb[106].mxu0 %vm2041_vm1, %v30647_v12  ;;  %v30649_v3 = vld [vmem:[#allocation25_spill] sm:$0xff] }
 0x2f9   : > { %v2120_v9 = vpop.f32.mrb[83].mxu0  ;;  %21951 = vmatpush3.bf16.xpose.msk.msra.mxu1 %vm24652_vm2, %v30645_v23  ;;  %20687 = vmatprep.mubr.msk.f32.mxu1 %vm2041_vm1, %v30648_v32  ;;  %v24923_v51 = vadd.f32 %v20570_v6, %v24904_v47  ;;  %v30668_v6 = vld [vmem:[#allocation47_spill] sm:$0xff]  ;;  %v30669_v32 = vld [vmem:[#allocation50_spill] sm:$0xff] }
 0x2fa   : > { %21957 = vmatpush3.bf16.xpose.msk.msra.mxu0 %vm24652_vm2, %v30646_v8  ;;  %20694 = vmatprep.mubr.msk.f32.mxu0 %vm2041_vm1, %v30649_v3  ;;  %v1892_v58 = vpop.f32.mrb[146].mxu1  ;;  %v24939_v62 = vadd.f32 %v2120_v9, %v24915_v17 }
 0x2fb   : > { %21960 = vmatprep.subr.msk.bf16.mxu1 %vm24652_vm2, %v30650_v60  ;;  %21966 = vmatprep.subr.msk.bf16.mxu0 %vm24652_vm2, %v30651_v61  ;;  %v4830_v52 = vsel %vm4826_vm3, %v24923_v51, -inf  ;;  %v1894_v40 = vpop.f32.mrb[147].mxu1 }
 0x2fc   : > { %4831 = vmax.xlane.f32.xlu0 %v4830_v52  ;;  %v4827_v0 = vsel %vm4826_vm3, %v24939_v62, -inf  ;;  %v30670_v52 = vld [vmem:[#allocation39_spill] sm:$0xff]  ;;  %v30671_v40 = vld [vmem:[#allocation42_spill] sm:$0xff] }
 0x2fe   : > { %v1897_v46 = vpop.f32.mrb[148].mxu1 }
 0x2ff   : > { %v24943_v42 = vpack.c.bf16 %v1897_v46, %v1892_v58  ;;  %v1899_v35 = vpop.f32.mrb[149].mxu1  ;;  %v30672_v46 = vld [vmem:[#allocation46_spill] sm:$0xff] }
 0x300   : > { %4828 = vmax.xlane.f32.xlu0 %v4827_v0  ;;  %v20577_v24 = vpop.f32.mrb[84].mxu0  ;;  %20688 = vmatmul.mubr.msk.f32.vlgmr.msra.gmra.mrb[214].mxu1 %vm2041_vm1, %v30652_v30  ;;  %v30673_v35 = vld [vmem:[#allocation49_spill] sm:$0xff] }
 0x301   : > { %v2207_v29 = vpop.f32.mrb[85].mxu0  ;;  %20695 = vmatmul.mubr.msk.f32.vlgmr.msra.gmra.mrb[108].mxu0 %vm2041_vm1, %v30653_v25  ;;  %21963 = vmatpush3.bf16.xpose.msk.msra.mxu1 %vm24652_vm2, %v30650_v60  ;;  %v24953_v41 = vadd.f32 %v20577_v24, %v24904_v47  ;;  %v30674_v24 = vld [vmem:[#allocation53_spill] sm:$0xff] }
 0x302   : > { %20701 = vmatprep.mubr.msk.f32.mxu1 %vm2041_vm1, %v30654_v11  ;;  %21969 = vmatpush3.bf16.xpose.msk.msra.mxu0 %vm24652_vm2, %v30651_v61  ;;  %v1902_v55 = vpop.f32.mrb[150].mxu1  ;;  %v24968_v1 = vadd.f32 %v2207_v29, %v24915_v17  ;;  %v30675_v29 = vld [vmem:[#allocation56_spill] sm:$0xff] }
 0x303   : > { %20708 = vmatprep.mubr.msk.f32.mxu0 %vm2041_vm1, %v30655_v43  ;;  %21972 = vmatprep.subr.msk.bf16.mxu1 %vm24652_vm2, %v30656_v31  ;;  %v4836_v18 = vsel %vm4826_vm3, %v24953_v41, -inf  ;;  %v1904_v56 = vpop.f32.mrb[151].mxu1  ;;  %v30676_v43 = vld [vmem:[#allocation45_spill] sm:$0xff] }
 0x304   : > { %21978 = vmatprep.subr.msk.bf16.mxu0 %vm24652_vm2, %v30657_v15  ;;  %4837 = vmax.xlane.f32.xlu1 %v4836_v18  ;;  %v4833_v21 = vsel %vm4826_vm3, %v24968_v1, -inf  ;;  %v30678_v18 = vld [vmem:[#allocation52_spill] sm:$0xff] }
 0x306   : > { %v1907_v63 = vpop.f32.mrb[152].mxu1 }
 0x307   : > { %v24975_v53 = vpack.c.bf16 %v1907_v63, %v1902_v55  ;;  %v1909_v22 = vpop.f32.mrb[153].mxu1  ;;  %v30680_v63 = vld [vmem:[#allocation59_spill] sm:$0xff] }
 0x308   : > { %4834 = vmax.xlane.f32.xlu1 %v4833_v21  ;;  %v20584_v50 = vpop.f32.mrb[86].mxu0  ;;  %20702 = vmatmul.mubr.msk.f32.vlgmr.msra.gmra.mrb[216].mxu1 %vm2041_vm1, %v30658_v45  ;;  %v30681_v22 = vld [vmem:[#allocation62_spill] sm:$0xff] }
 0x309   : > { %v2294_v34 = vpop.f32.mrb[87].mxu0  ;;  %20709 = vmatmul.mubr.msk.f32.vlgmr.msra.gmra.mrb[110].mxu0 %vm2041_vm1, %v30659_v57  ;;  %21975 = vmatpush3.bf16.xpose.msk.msra.mxu1 %vm24652_vm2, %v30656_v31  ;;  %v24985_v54 = vadd.f32 %v20584_v50, %v24904_v47  ;;  %v30677_v31 = vld [vmem:[#allocation48_spill] sm:$0xff]  ;;  %v30682_v57 = vld [vmem:[#allocation51_spill] sm:$0xff] }
 0x30a   : > { %20715 = vmatprep.mubr.msk.f32.mxu1 %vm2041_vm1, %v30660_v14  ;;  %21981 = vmatpush3.bf16.xpose.msk.msra.mxu0 %vm24652_vm2, %v30657_v15  ;;  %v24993_v44 = vadd.f32 %v2294_v34, %v24915_v17  ;;  %v1912_v49 = vpop.f32.mrb[154].mxu1  ;;  %v30679_v15 = vld [vmem:[#allocation55_spill] sm:$0xff]  ;;  %v30683_v14 = vld [vmem:[#allocation54_spill] sm:$0xff] }
 0x30b   : > { %20722 = vmatprep.mubr.msk.f32.mxu0 %vm2041_vm1, %v30661_v38  ;;  %21984 = vmatprep.subr.msk.bf16.mxu1 %vm24652_vm2, %v30662_v39  ;;  %v4842_v28 = vsel %vm4826_vm3, %v24985_v54, -inf  ;;  %v1914_v26 = vpop.f32.mrb[155].mxu1 }
 0x30c   : > { %21990 = vmatprep.subr.msk.bf16.mxu0 %vm24652_vm2, %v30663_v13  ;;  %4843 = vmax.xlane.f32.xlu1 %v4842_v28  ;;  %v4839_v33 = vsel %vm4826_vm3, %v24993_v44, -inf  ;;  %v30686_v28 = vld [vmem:[#allocation65_spill] sm:$0xff] }
 0x30d   : > { %4840 = vmax.xlane.f32.xlu0 %v4839_v33 }
 0x30e   : > { %v1917_v59 = vpop.f32.mrb[156].mxu1 }
 0x30f   : > { %v25007_v16 = vpack.c.bf16 %v1917_v59, %v1912_v49  ;;  %v1919_v19 = vpop.f32.mrb[157].mxu1  ;;  %v30684_v49 = vld [vmem:[#allocation58_spill] sm:$0xff] }
 0x310   : > { %v20591_v36 = vpop.f32.mrb[88].mxu0  ;;  %20716 = vmatmul.mubr.msk.f32.vlgmr.msra.gmra.mrb[218].mxu1 %vm2041_vm1, %v30664_v7  ;;  %v30688_v19 = vld [vmem:[#allocation57_spill] sm:$0xff]  ;;  %v30690_v7 = vld [vmem:[#allocation64_spill] sm:$0xff] }
 0x311   : > { %v2381_v2 = vpop.f32.mrb[89].mxu0  ;;  %20723 = vmatmul.mubr.msk.f32.vlgmr.msra.gmra.mrb[112].mxu0 %vm2041_vm1, %v30665_v5  ;;  %21987 = vmatpush3.bf16.xpose.msk.msra.mxu1 %vm24652_vm2, %v30662_v39  ;;  %v25017_v23 = vadd.f32 %v20591_v36, %v24904_v47  ;;  %v30685_v39 = vld [vmem:[#allocation61_spill] sm:$0xff]  ;;  %v30689_v36 = vld [vmem:[#allocation60_spill] sm:$0xff] }
 0x312   : > { %20729 = vmatprep.mubr.msk.f32.mxu1 %vm2041_vm1, %v30666_v27  ;;  %21993 = vmatpush3.bf16.xpose.msk.msra.mxu0 %vm24652_vm2, %v30663_v13  ;;  %v25025_v8 = vadd.f32 %v2381_v2, %v24915_v17  ;;  %v1922_v37 = vpop.f32.mrb[158].mxu1 }
 0x313   : > { %20736 = vmatprep.mubr.msk.f32.mxu0 %vm2041_vm1, %v30667_v4  ;;  %21996 = vmatprep.subr.msk.bf16.mxu1 %vm24652_vm2, %v30668_v6  ;;  %v4848_v12 = vsel %vm4826_vm3, %v25017_v23, -inf  ;;  %v1924_v9 = vpop.f32.mrb[159].mxu1 }
 0x314   : > { %22002 = vmatprep.subr.msk.bf16.mxu0 %vm24652_vm2, %v30669_v32  ;;  %4849 = vmax.xlane.f32.xlu1 %v4848_v12  ;;  %v4845_v3 = vsel %vm4826_vm3, %v25025_v8, -inf }
 0x315   : > { %4846 = vmax.xlane.f32.xlu0 %v4845_v3 }
 0x316   : > { %v1927_v58 = vpop.f32.mrb[160].mxu1 }
 0x317   : > { %v25039_v60 = vpack.c.bf16 %v1927_v58, %v1922_v37  ;;  %v1929_v61 = vpop.f32.mrb[161].mxu1 }
 0x318   : > { %20730 = vmatmul.mubr.msk.f32.vlgmr.msra.gmra.mrb[220].mxu1 %vm2041_vm1, %v30670_v52 }
 0x319   : > { %20737 = vmatmul.mubr.msk.f32.vlgmr.msra.gmra.mrb[114].mxu0 %vm2041_vm1, %v30671_v40  ;;  %21999 = vmatpush3.bf16.xpose.msk.msra.mxu1 %vm24652_vm2, %v30668_v6  ;;  %v30692_v6 = vld [vmem:[#allocation63_spill] sm:$0xff] }
 0x31a   : > { %20743 = vmatprep.mubr.msk.f32.mxu1 %vm2041_vm1, %v30672_v46  ;;  %22005 = vmatpush3.bf16.xpose.msk.msra.mxu0 %vm24652_vm2, %v30669_v32  ;;  %v1932_v0 = vpop.f32.mrb[162].mxu1 }
 0x31b   : > { %20750 = vmatprep.mubr.msk.f32.mxu0 %vm2041_vm1, %v30673_v35  ;;  %22008 = vmatprep.subr.msk.bf16.mxu1 %vm24652_vm2, %v30674_v24  ;;  %v1934_v30 = vpop.f32.mrb[163].mxu1 }
 0x31c   : > { %22014 = vmatprep.subr.msk.bf16.mxu0 %vm24652_vm2, %v30675_v29 }
 0x31e   : > { %v1937_v25 = vpop.f32.mrb[164].mxu1 }
 0x31f   : > { %v25061_v11 = vpack.c.bf16 %v1937_v25, %v1932_v0  ;;  %v1939_v55 = vpop.f32.mrb[165].mxu1 }
 0x320   : > { %20744 = vmatmul.mubr.msk.f32.vlgmr.msra.gmra.mrb[222].mxu1 %vm2041_vm1, %v30676_v43 }
 0x321   : > { %20751 = vmatmul.mubr.msk.f32.vlgmr.msra.gmra.mrb[116].mxu0 %vm2041_vm1, %v30677_v31  ;;  %22011 = vmatpush3.bf16.xpose.msk.msra.mxu1 %vm24652_vm2, %v30674_v24 }
 0x322   : > { %20757 = vmatprep.mubr.msk.f32.mxu1 %vm2041_vm1, %v30678_v18  ;;  %22017 = vmatpush3.bf16.xpose.msk.msra.mxu0 %vm24652_vm2, %v30675_v29  ;;  %v1942_v56 = vpop.f32.mrb[166].mxu1 }
 0x323   : > { %20764 = vmatprep.mubr.msk.f32.mxu0 %vm2041_vm1, %v30679_v15  ;;  %22020 = vmatprep.subr.msk.bf16.mxu1 %vm24652_vm2, %v30680_v63  ;;  %v1944_v21 = vpop.f32.mrb[167].mxu1 }
 0x324   : > { %22026 = vmatprep.subr.msk.bf16.mxu0 %vm24652_vm2, %v30681_v22 }
 0x326   : > { %v1947_v50 = vpop.f32.mrb[168].mxu1 }
 0x327   : > { %v25083_v45 = vpack.c.bf16 %v1947_v50, %v1942_v56  ;;  %v1949_v34 = vpop.f32.mrb[169].mxu1 }
 0x328   : > { %20758 = vmatmul.mubr.msk.f32.vlgmr.msra.gmra.mrb[224].mxu1 %vm2041_vm1, %v30682_v57 }
 0x329   : > { %20765 = vmatmul.mubr.msk.f32.vlgmr.msra.gmra.mrb[118].mxu0 %vm2041_vm1, %v30683_v14  ;;  %22023 = vmatpush3.bf16.xpose.msk.msra.mxu1 %vm24652_vm2, %v30680_v63 }
 0x32a   : > { %20771 = vmatprep.mubr.msk.f32.mxu1 %vm2041_vm1, %v30684_v49  ;;  %22029 = vmatpush3.bf16.xpose.msk.msra.mxu0 %vm24652_vm2, %v30681_v22  ;;  %v1952_v38 = vpop.f32.mrb[170].mxu1 }
 0x32b   : > { %20778 = vmatprep.mubr.msk.f32.mxu0 %vm2041_vm1, %v30685_v39  ;;  %22032 = vmatprep.subr.msk.bf16.mxu1 %vm24652_vm2, %v30686_v28  ;;  %v1954_v26 = vpop.f32.mrb[171].mxu1 }
 0x32c   : > { %22037 = vmatprep.subr.bf16.mxu0 %v24906_v10 }
 0x32e   : > { %v1957_v13 = vpop.f32.mrb[172].mxu1 }
 0x32f   : > { %v25103_v33 = vpack.c.bf16 %v1957_v13, %v1952_v38  ;;  %v1959_v59 = vpop.f32.mrb[173].mxu1 }
 0x330   : > { %20772 = vmatmul.mubr.msk.f32.vlgmr.msra.gmra.mrb[226].mxu1 %vm2041_vm1, %v30688_v19 }
 0x331   : > { %30687 = vst [vmem:[#allocation66_spill] sm:$0xff] %v25103_v33  ;;  %20779 = vmatmul.mubr.msk.f32.vlgmr.msra.gmra.mrb[120].mxu0 %vm2041_vm1, %v30689_v36  ;;  %22035 = vmatpush3.bf16.xpose.msk.msra.mxu1 %vm24652_vm2, %v30686_v28 }
 0x332   : > { %20785 = vmatprep.mubr.msk.f32.mxu1 %vm2041_vm1, %v30690_v7  ;;  %22039 = vmatpush3.bf16.msra.mxu0 %v24906_v10  ;;  %v1962_v2 = vpop.f32.mrb[174].mxu1 }
 0x333   : > { %22041 = vmatprep.subr.bf16.mxu1 %v24943_v42  ;;  %22045 = vmatprep.subr.bf16.mxu0 %v24975_v53  ;;  %v1964_v5 = vpop.f32.mrb[175].mxu1 }
 0x336   : > { %v1967_v27 = vpop.f32.mrb[176].mxu1 }
 0x337   : > { %v25117_v37 = vpack.c.bf16 %v1967_v27, %v1962_v2  ;;  %v1969_v4 = vpop.f32.mrb[177].mxu1 }
 0x338   : > { %20786 = vmatmul.mubr.msk.f32.vlgmr.msra.gmra.mrb[228].mxu1 %vm2041_vm1, %v30692_v6 }
 0x339   : > { %30691 = vst [vmem:[#allocation67_spill] sm:$0xff] %v25117_v37  ;;  %22043 = vmatpush3.bf16.msra.mxu1 %v24943_v42 }
 0x33a   : > { %22049 = vmatprep.subr.bf16.mxu1 %v25007_v16  ;;  %v1972_v12 = vpop.f32.mrb[178].mxu1 }
 0x33b   : > { %v1974_v9 = vpop.f32.mrb[179].mxu1 }
 0x33e   : > { %v1977_v10 = vpop.f32.mrb[180].mxu1 }
 0x33f   : > { %v25123_v32 = vpack.c.bf16 %v1977_v10, %v1972_v12  ;;  %v1979_v3 = vpop.f32.mrb[181].mxu1 }
 0x341   : > { %30693 = vst [vmem:[#allocation68_spill] sm:$0xff] %v25123_v32 }
 0x342   : > { %v1982_v58 = vpop.f32.mrb[182].mxu1 }
 0x343   : > { %v1984_v61 = vpop.f32.mrb[183].mxu1 }
 0x346   : > { %v1987_v52 = vpop.f32.mrb[184].mxu1 }
 0x347   : > { %v25125_v40 = vpack.c.bf16 %v1987_v52, %v1982_v58  ;;  %v1989_v46 = vpop.f32.mrb[185].mxu1 }
 0x349   : > { %30694 = vst [vmem:[#allocation69_spill] sm:$0xff] %v25125_v40 }
 0x34a   : > { %v1992_v0 = vpop.f32.mrb[186].mxu1 }
 0x34b   : > { %v1994_v35 = vpop.f32.mrb[187].mxu1 }
 0x34e   : > { %v1997_v24 = vpop.f32.mrb[188].mxu1 }
 0x34f   : > { %v25127_v30 = vpack.c.bf16 %v1997_v24, %v1992_v0  ;;  %v1999_v42 = vpop.f32.mrb[189].mxu1 }
 0x351   : > { %30695 = vst [vmem:[#allocation70_spill] sm:$0xff] %v25127_v30 }
 0x352   : > { %v2002_v29 = vpop.f32.mrb[190].mxu1 }
 0x353   : > { %v2004_v25 = vpop.f32.mrb[191].mxu1 }
 0x356   : > { %v2007_v55 = vpop.f32.mrb[192].mxu1 }
 0x357   : > { %v25129_v43 = vpack.c.bf16 %v2007_v55, %v2002_v29  ;;  %v2009_v31 = vpop.f32.mrb[193].mxu1 }
 0x359   : > { %30696 = vst [vmem:[#allocation71_spill] sm:$0xff] %v25129_v43 }
 0x35a   : > { %v2012_v18 = vpop.f32.mrb[194].mxu1 }
 0x35b   : > { %v2014_v56 = vpop.f32.mrb[195].mxu1 }
 0x35e   : > { %v2017_v15 = vpop.f32.mrb[196].mxu1 }
 0x35f   : > { %v25131_v63 = vpack.c.bf16 %v2017_v15, %v2012_v18  ;;  %v2019_v21 = vpop.f32.mrb[197].mxu1 }
 0x361   : > { %30697 = vst [vmem:[#allocation72_spill] sm:$0xff] %v25131_v63 }
 0x362   : > { %v2022_v22 = vpop.f32.mrb[198].mxu1 }
 0x363   : > { %v2024_v50 = vpop.f32.mrb[199].mxu1 }
 0x366   : > { %v2027_v34 = vpop.f32.mrb[200].mxu1 }
 0x367   : > { %v25133_v57 = vpack.c.bf16 %v2027_v34, %v2022_v22  ;;  %v2029_v14 = vpop.f32.mrb[201].mxu1 }
 0x369   : > { %30698 = vst [vmem:[#allocation73_spill] sm:$0xff] %v25133_v57 }
 0x36a   : > { %v2032_v49 = vpop.f32.mrb[202].mxu1 }
 0x36b   : > { %v2034_v38 = vpop.f32.mrb[203].mxu1 }
 0x36e   : > { %v2037_v39 = vpop.f32.mrb[204].mxu1 }
 0x36f   : > { %v25135_v28 = vpack.c.bf16 %v2037_v39, %v2032_v49  ;;  %v2039_v26 = vpop.f32.mrb[205].mxu1 }
 0x371   : > { %30699 = vst [vmem:[#allocation74_spill] sm:$0xff] %v25135_v28 }
 0x373   : > { %v20598_v13 = vpop.f32.mrb[90].mxu0 }
 0x374   : > { %v2468_v59 = vpop.f32.mrb[91].mxu0  ;;  %v25138_v19 = vadd.f32 %v20598_v13, %v24904_v47 }
 0x375   : > { %v25141_v36 = vadd.f32 %v2468_v59, %v24915_v17 }
 0x376   : > { %v4854_v7 = vsel %vm4826_vm3, %v25138_v19, -inf }
 0x377   : > { %4855 = vmax.xlane.f32.xlu1 %v4854_v7  ;;  %v4851_v2 = vsel %vm4826_vm3, %v25141_v36, -inf }
 0x378   : > { %4852 = vmax.xlane.f32.xlu0 %v4851_v2 }
 0x37b   : > { %v20605_v5 = vpop.f32.mrb[92].mxu0 }
 0x37c   : > { %v2555_v27 = vpop.f32.mrb[93].mxu0  ;;  %v25148_v4 = vadd.f32 %v20605_v5, %v24904_v47 }
 0x37d   : > { %v25151_v6 = vadd.f32 %v2555_v27, %v24915_v17 }
 0x37e   : > { %v4860_v12 = vsel %vm4826_vm3, %v25148_v4, -inf }
 0x37f   : > { %4861 = vmax.xlane.f32.xlu1 %v4860_v12  ;;  %v4857_v9 = vsel %vm4826_vm3, %v25151_v6, -inf }
 0x380   : > { %4858 = vmax.xlane.f32.xlu0 %v4857_v9 }
 0x383   : > { %v20612_v10 = vpop.f32.mrb[94].mxu0 }
 0x384   : > { %v2642_v3 = vpop.f32.mrb[95].mxu0  ;;  %v25158_v58 = vadd.f32 %v20612_v10, %v24904_v47 }
 0x385   : > { %v25161_v61 = vadd.f32 %v2642_v3, %v24915_v17 }
 0x386   : > { %v4866_v52 = vsel %vm4826_vm3, %v25158_v58, -inf }
 0x387   : > { %4867 = vmax.xlane.f32.xlu1 %v4866_v52  ;;  %v4863_v46 = vsel %vm4826_vm3, %v25161_v61, -inf }
 0x388   : > { %4864 = vmax.xlane.f32.xlu0 %v4863_v46 }
 0x38b   : > { %v20619_v0 = vpop.f32.mrb[96].mxu0 }
 0x38c   : > { %v2729_v35 = vpop.f32.mrb[97].mxu0  ;;  %v25168_v24 = vadd.f32 %v20619_v0, %v24904_v47 }
 0x38d   : > { %v25171_v42 = vadd.f32 %v2729_v35, %v24915_v17 }
 0x38e   : > { %30700 = vst [vmem:[#allocation75_spill] sm:$0xff] %v25168_v24  ;;  %v4872_v29 = vsel %vm4826_vm3, %v25168_v24, -inf }
 0x38f   : > { %4873 = vmax.xlane.f32.xlu1 %v4872_v29  ;;  %v4869_v25 = vsel %vm4826_vm3, %v25171_v42, -inf }
 0x390   : > { %4870 = vmax.xlane.f32.xlu0 %v4869_v25 }
 0x393   : > { %v20626_v55 = vpop.f32.mrb[98].mxu0 }
 0x394   : > { %v2816_v31 = vpop.f32.mrb[99].mxu0  ;;  %v25178_v18 = vadd.f32 %v20626_v55, %v24904_v47 }
 0x395   : > { %v25181_v56 = vadd.f32 %v2816_v31, %v24915_v17 }
 0x396   : > { %30701 = vst [vmem:[#allocation76_spill] sm:$0xff] %v25178_v18  ;;  %v4878_v15 = vsel %vm4826_vm3, %v25178_v18, -inf }
 0x397   : > { %4879 = vmax.xlane.f32.xlu1 %v4878_v15  ;;  %v4875_v21 = vsel %vm4826_vm3, %v25181_v56, -inf }
 0x398   : > { %4876 = vmax.xlane.f32.xlu0 %v4875_v21 }
 0x39b   : > { %v20633_v22 = vpop.f32.mrb[206].mxu1 }
 0x39c   : > { %v2903_v50 = vpop.f32.mrb[207].mxu1  ;;  %v25188_v34 = vadd.f32 %v20633_v22, %v24904_v47 }
 0x39d   : > { %v25191_v14 = vadd.f32 %v2903_v50, %v24915_v17 }
 0x39e   : > { %30702 = vst [vmem:[#allocation77_spill] sm:$0xff] %v25188_v34  ;;  %v4884_v49 = vsel %vm4826_vm3, %v25188_v34, -inf }
 0x39f   : > { %4885 = vmax.xlane.f32.xlu1 %v4884_v49  ;;  %v4881_v38 = vsel %vm4826_vm3, %v25191_v14, -inf }
 0x3a0   : > { %4882 = vmax.xlane.f32.xlu0 %v4881_v38 }
 0x3a3   : > { %v20640_v39 = vpop.f32.mrb[100].mxu0 }
 0x3a4   : > { %v2990_v26 = vpop.f32.mrb[101].mxu0  ;;  %v25198_v13 = vadd.f32 %v20640_v39, %v24904_v47 }
 0x3a5   : > { %v25201_v59 = vadd.f32 %v2990_v26, %v24915_v17 }
 0x3a6   : > { %30703 = vst [vmem:[#allocation78_spill] sm:$0xff] %v25198_v13  ;;  %v4890_v7 = vsel %vm4826_vm3, %v25198_v13, -inf }
 0x3a7   : > { %30704 = vst [vmem:[#allocation80_spill] sm:$0xff] %v25201_v59  ;;  %4891 = vmax.xlane.f32.xlu1 %v4890_v7  ;;  %v4887_v2 = vsel %vm4826_vm3, %v25201_v59, -inf }
 0x3a8   : > { %4888 = vmax.xlane.f32.xlu0 %v4887_v2 }
 0x3ab   : > { %v20647_v5 = vpop.f32.mrb[208].mxu1 }
 0x3ac   : > { %v3077_v27 = vpop.f32.mrb[209].mxu1  ;;  %v25208_v12 = vadd.f32 %v20647_v5, %v24904_v47 }
 0x3ad   : > { %v25211_v9 = vadd.f32 %v3077_v27, %v24915_v17 }
 0x3ae   : > { %30705 = vst [vmem:[#allocation81_spill] sm:$0xff] %v25208_v12  ;;  %v4896_v10 = vsel %vm4826_vm3, %v25208_v12, -inf }
 0x3af   : > { %30706 = vst [vmem:[#allocation83_spill] sm:$0xff] %v25211_v9  ;;  %4897 = vmax.xlane.f32.xlu1 %v4896_v10  ;;  %v4893_v3 = vsel %vm4826_vm3, %v25211_v9, -inf }
 0x3b0   : > { %4894 = vmax.xlane.f32.xlu0 %v4893_v3 }
 0x3b3   : > { %v20654_v52 = vpop.f32.mrb[102].mxu0 }
 0x3b4   : > { %v3164_v46 = vpop.f32.mrb[103].mxu0  ;;  %v25218_v0 = vadd.f32 %v20654_v52, %v24904_v47 }
 0x3b5   : > { %v25221_v35 = vadd.f32 %v3164_v46, %v24915_v17 }
 0x3b6   : > { %30707 = vst [vmem:[#allocation20_spill] sm:$0xff] %v25218_v0  ;;  %v4902_v29 = vsel %vm4826_vm3, %v25218_v0, -inf }
 0x3b7   : > { %30708 = vst [vmem:[#allocation19_spill] sm:$0xff] %v25221_v35  ;;  %4903 = vmax.xlane.f32.xlu1 %v4902_v29  ;;  %v4899_v25 = vsel %vm4826_vm3, %v25221_v35, -inf }
 0x3b8   : > { %4900 = vmax.xlane.f32.xlu0 %v4899_v25 }
 0x3bb   : > { %v20661_v55 = vpop.f32.mrb[210].mxu1 }
 0x3bc   : > { %v3251_v31 = vpop.f32.mrb[211].mxu1  ;;  %v25228_v15 = vadd.f32 %v20661_v55, %v24904_v47 }
 0x3bd   : > { %v25231_v21 = vadd.f32 %v3251_v31, %v24915_v17 }
 0x3be   : > { %30709 = vst [vmem:[#allocation23_spill] sm:$0xff] %v25228_v15  ;;  %v4908_v22 = vsel %vm4826_vm3, %v25228_v15, -inf }
 0x3bf   : > { %30710 = vst [vmem:[#allocation26_spill] sm:$0xff] %v25231_v21  ;;  %4909 = vmax.xlane.f32.xlu1 %v4908_v22  ;;  %v4905_v50 = vsel %vm4826_vm3, %v25231_v21, -inf }
 0x3c0   : > { %4906 = vmax.xlane.f32.xlu0 %v4905_v50 }
 0x3c3   : > { %v20668_v49 = vpop.f32.mrb[104].mxu0 }
 0x3c4   : > { %v3338_v38 = vpop.f32.mrb[105].mxu0  ;;  %v25238_v39 = vadd.f32 %v20668_v49, %v24904_v47 }
 0x3c5   : > { %v25241_v26 = vadd.f32 %v3338_v38, %v24915_v17 }
 0x3c6   : > { %30711 = vst [vmem:[#allocation18_spill] sm:$0xff] %v25238_v39  ;;  %v4914_v7 = vsel %vm4826_vm3, %v25238_v39, -inf }
 0x3c7   : > { %30712 = vst [vmem:[#allocation22_spill] sm:$0xff] %v25241_v26  ;;  %4915 = vmax.xlane.f32.xlu1 %v4914_v7  ;;  %v4911_v2 = vsel %vm4826_vm3, %v25241_v26, -inf }
 0x3c8   : > { %4912 = vmax.xlane.f32.xlu0 %v4911_v2 }
 0x3cb   : > { %v20675_v5 = vpop.f32.mrb[212].mxu1  ;;  %v25247_v27 = vpop.f32.mrb[106].mxu0 }
 0x3cc   : > { %30713 = vst [vmem:[#allocation25_spill] sm:$0xff] %v25247_v27  ;;  %v3425_v10 = vpop.f32.mrb[213].mxu1  ;;  %v25249_v3 = vpop.f32.mrb[107].mxu0  ;;  %v5161_v52 = vsel %vm4826_vm3, %v25247_v27, -inf  ;;  %v25254_v46 = vadd.f32 %v20675_v5, %v24904_v47 }
 0x3cd   : > { %30714 = vst [vmem:[#allocation29_spill] sm:$0xff] %v25249_v3  ;;  %5162 = vmax.xlane.f32.xlu1 %v5161_v52  ;;  %v5158_v29 = vsel %vm4826_vm3, %v25249_v3, -inf  ;;  %v25259_v25 = vadd.f32 %v3425_v10, %v24915_v17 }
 0x3ce   : > { %30715 = vst [vmem:[#allocation32_spill] sm:$0xff] %v25254_v46  ;;  %5159 = vmax.xlane.f32.xlu0 %v5158_v29  ;;  %v4920_v55 = vsel %vm4826_vm3, %v25254_v46, -inf }
 0x3cf   : > { %30716 = vst [vmem:[#allocation21_spill] sm:$0xff] %v25259_v25  ;;  %v4917_v31 = vsel %vm4826_vm3, %v25259_v25, -inf }
 0x3d1   : > { %4921 = vmax.xlane.f32.xlu1 %v4920_v55 }
 0x3d2   : > { %4918 = vmax.xlane.f32.xlu0 %v4917_v31 }
 0x3d3   : > { %v25265_v22 = vpop.f32.mrb[214].mxu1 }
 0x3d4   : > { %30717 = vst [vmem:[#allocation24_spill] sm:$0xff] %v25265_v22  ;;  %v25267_v47 = vpop.f32.mrb[108].mxu0  ;;  %v25269_v50 = vpop.f32.mrb[215].mxu1  ;;  %v5167_v49 = vsel %vm4826_vm3, %v25265_v22, -inf }
 0x3d5   : > { %30718 = vst [vmem:[#allocation28_spill] sm:$0xff] %v25267_v47  ;;  %30719 = vst [vmem:[#allocation31_spill] sm:$0xff] %v25269_v50  ;;  %v25273_v17 = vpop.f32.mrb[109].mxu0  ;;  %5168 = vmax.xlane.f32.xlu1 %v5167_v49  ;;  %v5164_v38 = vsel %vm4826_vm3, %v25269_v50, -inf  ;;  %v5173_v7 = vsel %vm4826_vm3, %v25267_v47, -inf }
 0x3d6   : > { %30720 = vst [vmem:[#allocation35_spill] sm:$0xff] %v25273_v17  ;;  %5165 = vmax.xlane.f32.xlu0 %v5164_v38  ;;  %v5170_v2 = vsel %vm4826_vm3, %v25273_v17, -inf }
 0x3d9   : > { %5174 = vmax.xlane.f32.xlu1 %v5173_v7 }
 0x3da   : > { %5171 = vmax.xlane.f32.xlu0 %v5170_v2 }
 0x3db   : > { %v25281_v5 = vpop.f32.mrb[216].mxu1 }
 0x3dc   : > { %30721 = vst [vmem:[#allocation38_spill] sm:$0xff] %v25281_v5  ;;  %v25283_v10 = vpop.f32.mrb[110].mxu0  ;;  %v25285_v52 = vpop.f32.mrb[217].mxu1  ;;  %v5179_v29 = vsel %vm4826_vm3, %v25281_v5, -inf }
 0x3dd   : > { %30722 = vst [vmem:[#allocation27_spill] sm:$0xff] %v25283_v10  ;;  %30723 = vst [vmem:[#allocation30_spill] sm:$0xff] %v25285_v52  ;;  %v25289_v55 = vpop.f32.mrb[111].mxu0  ;;  %5180 = vmax.xlane.f32.xlu1 %v5179_v29  ;;  %v5176_v31 = vsel %vm4826_vm3, %v25285_v52, -inf  ;;  %v5185_v49 = vsel %vm4826_vm3, %v25283_v10, -inf }
 0x3de   : > { %30724 = vst [vmem:[#allocation34_spill] sm:$0xff] %v25289_v55  ;;  %5177 = vmax.xlane.f32.xlu0 %v5176_v31  ;;  %v5182_v38 = vsel %vm4826_vm3, %v25289_v55, -inf }
 0x3e1   : > { %5186 = vmax.xlane.f32.xlu1 %v5185_v49 }
 0x3e2   : > { %5183 = vmax.xlane.f32.xlu0 %v5182_v38 }
 0x3e3   : > { %v25297_v7 = vpop.f32.mrb[218].mxu1 }
 0x3e4   : > { %30725 = vst [vmem:[#allocation37_spill] sm:$0xff] %v25297_v7  ;;  %v25299_v2 = vpop.f32.mrb[112].mxu0  ;;  %v25301_v48 = vpop.f32.mrb[219].mxu1  ;;  %v5191_v29 = vsel %vm4826_vm3, %v25297_v7, -inf }
 0x3e5   : > { %30726 = vst [vmem:[#allocation41_spill] sm:$0xff] %v25299_v2  ;;  %30727 = vst [vmem:[#allocation44_spill] sm:$0xff] %v25301_v48  ;;  %v25305_v5 = vpop.f32.mrb[113].mxu0  ;;  %5192 = vmax.xlane.f32.xlu1 %v5191_v29  ;;  %v5188_v31 = vsel %vm4826_vm3, %v25301_v48, -inf  ;;  %v5197_v49 = vsel %vm4826_vm3, %v25299_v2, -inf }
 0x3e6   : > { %30728 = vst [vmem:[#allocation33_spill] sm:$0xff] %v25305_v5  ;;  %5189 = vmax.xlane.f32.xlu0 %v5188_v31  ;;  %v5194_v38 = vsel %vm4826_vm3, %v25305_v5, -inf }
 0x3e9   : > { %5198 = vmax.xlane.f32.xlu1 %v5197_v49 }
 0x3ea   : > { %5195 = vmax.xlane.f32.xlu0 %v5194_v38 }
 0x3eb   : > { %v25313_v22 = vpop.f32.mrb[220].mxu1 }
 0x3ec   : > { %30729 = vst [vmem:[#allocation36_spill] sm:$0xff] %v25313_v22  ;;  %v25315_v52 = vpop.f32.mrb[114].mxu0  ;;  %v25317_v7 = vpop.f32.mrb[221].mxu1  ;;  %v5203_v49 = vsel %vm4826_vm3, %v25313_v22, -inf }
 0x3ed   : > { %30730 = vst [vmem:[#allocation40_spill] sm:$0xff] %v25315_v52  ;;  %30731 = vst [vmem:[#allocation43_spill] sm:$0xff] %v25317_v7  ;;  %v25319_v50 = vpop.f32.mrb[115].mxu0  ;;  %v5209_v29 = vsel %vm4826_vm3, %v25315_v52, -inf  ;;  %v5200_v38 = vsel %vm4826_vm3, %v25317_v7, -inf }
 0x3ee   : > { %30732 = vst [vmem:[#allocation47_spill] sm:$0xff] %v25319_v50  ;;  %5210 = vmax.xlane.f32.xlu1 %v5209_v29  ;;  %v5206_v31 = vsel %vm4826_vm3, %v25319_v50, -inf }
 0x3ef   : > { %5207 = vmax.xlane.f32.xlu0 %v5206_v31 }
 0x3f2   : > { %5204 = vmax.xlane.f32.xlu1 %v5203_v49 }
 0x3f3   : > { %5201 = vmax.xlane.f32.xlu0 %v5200_v38  ;;  %v25329_v48 = vpop.f32.mrb[222].mxu1 }
 0x3f4   : > { %30733 = vst [vmem:[#allocation50_spill] sm:$0xff] %v25329_v48  ;;  %v25331_v2 = vpop.f32.mrb[116].mxu0  ;;  %v25333_v10 = vpop.f32.mrb[223].mxu1  ;;  %v5215_v29 = vsel %vm4826_vm3, %v25329_v48, -inf }
 0x3f5   : > { %30734 = vst [vmem:[#allocation39_spill] sm:$0xff] %v25331_v2  ;;  %30735 = vst [vmem:[#allocation42_spill] sm:$0xff] %v25333_v10  ;;  %v25337_v52 = vpop.f32.mrb[117].mxu0  ;;  %v5212_v31 = vsel %vm4826_vm3, %v25333_v10, -inf  ;;  %v5221_v49 = vsel %vm4826_vm3, %v25331_v2, -inf }
 0x3f6   : > { %30736 = vst [vmem:[#allocation46_spill] sm:$0xff] %v25337_v52  ;;  %5216 = vmax.xlane.f32.xlu1 %v5215_v29  ;;  %v5218_v38 = vsel %vm4826_vm3, %v25337_v52, -inf }
 0x3f7   : > { %5213 = vmax.xlane.f32.xlu0 %v5212_v31 }
 0x3fa   : > { %5222 = vmax.xlane.f32.xlu1 %v5221_v49 }
 0x3fb   : > { %5219 = vmax.xlane.f32.xlu0 %v5218_v38  ;;  %v25345_v22 = vpop.f32.mrb[224].mxu1 }
 0x3fc   : > { %30737 = vst [vmem:[#allocation49_spill] sm:$0xff] %v25345_v22  ;;  %v25347_v7 = vpop.f32.mrb[118].mxu0  ;;  %v25349_v48 = vpop.f32.mrb[225].mxu1  ;;  %v5227_v50 = vsel %vm4826_vm3, %v25345_v22, -inf }
 0x3fd   : > { %30738 = vst [vmem:[#allocation53_spill] sm:$0xff] %v25347_v7  ;;  %30739 = vst [vmem:[#allocation56_spill] sm:$0xff] %v25349_v48  ;;  %v25353_v10 = vpop.f32.mrb[119].mxu0  ;;  %v5224_v29 = vsel %vm4826_vm3, %v25349_v48, -inf  ;;  %v5233_v31 = vsel %vm4826_vm3, %v25347_v7, -inf }
 0x3fe   : > { %30740 = vst [vmem:[#allocation45_spill] sm:$0xff] %v25353_v10  ;;  %5228 = vmax.xlane.f32.xlu1 %v5227_v50  ;;  %v5230_v49 = vsel %vm4826_vm3, %v25353_v10, -inf }
 0x3ff   : > { %5225 = vmax.xlane.f32.xlu0 %v5224_v29 }
 0x402   : > { %5234 = vmax.xlane.f32.xlu1 %v5233_v31 }
 0x403   : > { %5231 = vmax.xlane.f32.xlu0 %v5230_v49  ;;  %v25361_v38 = vpop.f32.mrb[226].mxu1 }
 0x404   : > { %30741 = vst [vmem:[#allocation48_spill] sm:$0xff] %v25361_v38  ;;  %v25363_v2 = vpop.f32.mrb[120].mxu0  ;;  %v5239_v22 = vsel %vm4826_vm3, %v25361_v38, -inf  ;;  %v25367_v52 = vpop.f32.mrb[227].mxu1 }
 0x405   : > { %30742 = vst [vmem:[#allocation52_spill] sm:$0xff] %v25363_v2  ;;  %30743 = vst [vmem:[#allocation55_spill] sm:$0xff] %v25367_v52  ;;  %v25369_v48 = vpop.f32.mrb[121].mxu0  ;;  %v5236_v50 = vsel %vm4826_vm3, %v25367_v52, -inf  ;;  %v5245_v29 = vsel %vm4826_vm3, %v25363_v2, -inf  ;;  %v4832_v52 = vpop.xlane.xlu0 %4831 }
 0x406   : > { %30744 = vst [vmem:[#allocation59_spill] sm:$0xff] %v25369_v48  ;;  %5240 = vmax.xlane.f32.xlu1 %v5239_v22  ;;  %v5242_v31 = vsel %vm4826_vm3, %v25369_v48, -inf  ;;  %v4955_v48 = vlaneseq }
 0x407   : > { %5237 = vmax.xlane.f32.xlu0 %v5236_v50  ;;  %v4838_v50 = vpop.xlane.xlu1 %4837 }
 0x408   : > { %v4956_v20 = vand.u32 127, %v4955_v48  ;;  %v25385_v28 = vshrl.u32 %v4955_v48, 7 }
 0x40a   : > { %5246 = vmax.xlane.f32.xlu1 %v5245_v29  ;;  %v4829_v29 = vpop.xlane.xlu0 %4828 }
 0x40b   : > { %5243 = vmax.xlane.f32.xlu0 %v5242_v31  ;;  %v25377_v49 = vpop.f32.mrb[228].mxu1  ;;  %v4835_v2 = vpop.xlane.xlu1 %4834 }
 0x40c   : > { %30745 = vst [vmem:[#allocation62_spill] sm:$0xff] %v25377_v49  ;;  %v25379_v38 = vpop.f32.mrb[229].mxu1  ;;  %v5251_v7 = vsel %vm4826_vm3, %v25377_v49, -inf  ;;  %v4961_v49 = vadd.s32 4294967288, %v4956_v20 }
 0x40d   : > { %30746 = vst [vmem:[#allocation51_spill] sm:$0xff] %v25379_v38  ;;  %v5248_v22 = vsel %vm4826_vm3, %v25379_v38, -inf }
 0x40e   : > { %5252 = vmax.xlane.f32.xlu1 %v5251_v7  ;;  %v4841_v5 = vpop.xlane.xlu0 %4840  ;;  %v25388_v7 = vsub.s32 %v4956_v20, %v25385_v28 }
 0x40f   : > { %5249 = vmax.xlane.f32.xlu0 %v5248_v22  ;;  %v4844_v10 = vpop.xlane.xlu1 %4843  ;;  %v25391_v22 = vsub.s32 %v4961_v49, %v25385_v28 }
 0x410   : > { %30747 = vst [vmem:[#allocation54_spill] sm:$0xff] %v25388_v7  ;;  %v4971_v39 = vrot.slane %v4835_v2, %v25388_v7  ;;  %v4980_v63 = vrot.slane %v4841_v5, %v25388_v7  ;;  %v4960_v48 = vrot.slane %v4829_v29, %v25388_v7 }
 0x411   : > { %30748 = vst [vmem:[#allocation58_spill] sm:$0xff] %v25391_v22  ;;  %v4984_v3 = vrot.slane %v4844_v10, %v25391_v22  ;;  %v4975_v15 = vrot.slane %v4838_v50, %v25391_v22  ;;  %v4965_v10 = vrot.slane %v4832_v52, %v25391_v22 }
 0x412   : > { %v4847_v47 = vpop.xlane.xlu0 %4846 }
 0x413   : > { %v4850_v31 = vpop.xlane.xlu1 %4849  ;;  %v4989_v20 = vrot.slane %v4847_v47, %v25388_v7  ;;  %v4976_v5 = vsel %vm4966_vm4, %v4975_v15, %v4971_v39 }
 0x414   : > { %v4993_v25 = vrot.slane %v4850_v31, %v25391_v22  ;;  %v4985_v31 = vsel %vm4966_vm4, %v4984_v3, %v4980_v63 }
 0x416   : > { %v4853_v27 = vpop.xlane.xlu0 %4852 }
 0x417   : > { %v4856_v55 = vpop.xlane.xlu1 %4855  ;;  %v4998_v43 = vrot.slane %v4853_v27, %v25388_v7  ;;  %v4994_v27 = vsel %vm4966_vm4, %v4993_v25, %v4989_v20 }
 0x418   : > { %v5002_v49 = vrot.slane %v4856_v55, %v25391_v22  ;;  %v4967_v55 = vsel %vm4966_vm4, %v4965_v10, %v4960_v48 }
 0x419   : > { %v5104_v15 = vsel %vm5103_vm5, %v4976_v5, %v4967_v55 }
 0x41a   : > { %v4859_v46 = vpop.xlane.xlu0 %4858  ;;  %v5003_v39 = vsel %vm4966_vm4, %v5002_v49, %v4998_v43  ;;  %v5106_v63 = vsel %vm5105_vm6, %v4985_v31, %v5104_v15 }
 0x41b   : > { %v4862_v17 = vpop.xlane.xlu1 %4861  ;;  %v5007_v50 = vrot.slane %v4859_v46, %v25388_v7 }
 0x41c   : > { %v5011_v29 = vrot.slane %v4862_v17, %v25391_v22 }
 0x41e   : > { %v4865_v57 = vpop.xlane.xlu0 %4864  ;;  %v5012_v3 = vsel %vm4966_vm4, %v5011_v29, %v5007_v50 }
 0x41f   : > { %v4868_v38 = vpop.xlane.xlu1 %4867  ;;  %v5016_v26 = vrot.slane %v4865_v57, %v25388_v7  ;;  %v5108_v57 = vsel %vm5107_vm7, %v4994_v27, %v5106_v63 }
 0x420   : > { %v5020_v47 = vrot.slane %v4868_v38, %v25391_v22  ;;  %v5110_v17 = vsel %vm5109_vm8, %v5003_v39, %v5108_v57 }
 0x422   : > { %v4871_v0 = vpop.xlane.xlu0 %4870  ;;  %v5021_v46 = vsel %vm4966_vm4, %v5020_v47, %v5016_v26 }
 0x423   : > { %v4874_v2 = vpop.xlane.xlu1 %4873  ;;  %v5025_v52 = vrot.slane %v4871_v0, %v25388_v7  ;;  %v5112_v0 = vsel %vm5111_vm9, %v5012_v3, %v5110_v17 }
 0x424   : > { %v5029_v30 = vrot.slane %v4874_v2, %v25391_v22  ;;  %v5114_v43 = vsel %vm5113_vm10, %v5021_v46, %v5112_v0 }
 0x426   : > { %v5030_v25 = vsel %vm4966_vm4, %v5029_v30, %v5025_v52  ;;  %v4877_v20 = vpop.xlane.xlu0 %4876 }
 0x427   : > { %v5116_v38 = vsel %vm5115_vm11, %v5030_v25, %v5114_v43  ;;  %v4880_v48 = vpop.xlane.xlu1 %4879  ;;  %v5034_v57 = vrot.slane %v4877_v20, %v25388_v7 }
 0x428   : > { %v5038_v3 = vrot.slane %v4880_v48, %v25391_v22 }
 0x42c   : > { %v4886_v49 = vpop.xlane.xlu1 %4885 }
 0x42d   : > { %v4883_v2 = vpop.xlane.xlu0 %4882  ;;  %v5047_v55 = vrot.slane %v4886_v49, %v25391_v22 }
 0x42e   : > { %v5043_v27 = vrot.slane %v4883_v2, %v25388_v7 }
 0x430   : > { %v5048_v43 = vsel %vm4966_vm4, %v5047_v55, %v5043_v27 }
 0x434   : > { %v4892_v10 = vpop.xlane.xlu1 %4891 }
 0x435   : > { %v4889_v5 = vpop.xlane.xlu0 %4888  ;;  %v5056_v15 = vrot.slane %v4892_v10, %v25391_v22 }
 0x436   : > { %v5052_v39 = vrot.slane %v4889_v5, %v25388_v7 }
 0x438   : > { %v5057_v48 = vsel %vm4966_vm4, %v5056_v15, %v5052_v39 }
 0x43c   : > { %5126 = vxpose.xlu0.b32.start [1/2] (short) (narrow) %v5116_v38, 16  ;;  %v4898_v26 = vpop.xlane.xlu1 %4897 }
 0x43d   : > { %v4895_v29 = vpop.xlane.xlu0 %4894  ;;  %v5065_v46 = vrot.slane %v4898_v26, %v25391_v22  ;;  %v5039_v26 = vsel %vm4966_vm4, %v5038_v3, %v5034_v57 }
 0x43e   : > { %v5061_v25 = vrot.slane %v4895_v29, %v25388_v7 }
 0x440   : > { %v5066_v29 = vsel %vm4966_vm4, %v5065_v46, %v5061_v25 }
 0x444   : > { %v4904_v50 = vpop.xlane.xlu1 %4903 }
 0x445   : > { %v4901_v30 = vpop.xlane.xlu0 %4900  ;;  %v5074_v17 = vrot.slane %v4904_v50, %v25391_v22  ;;  %v5117_v50 = vsel %vm5103_vm5, %v5048_v43, %v5039_v26 }
 0x446   : > { %v5070_v0 = vrot.slane %v4901_v30, %v25388_v7 }
 0x448   : > { %v5075_v30 = vsel %vm4966_vm4, %v5074_v17, %v5070_v0 }
 0x44c   : > { %v4910_v31 = vpop.xlane.xlu1 %4909 }
 0x44d   : > { %v4907_v47 = vpop.xlane.xlu0 %4906  ;;  %v5083_v38 = vrot.slane %v4910_v31, %v25391_v22  ;;  %v5118_v31 = vsel %vm5105_vm6, %v5057_v48, %v5117_v50 }
 0x44e   : > { %v5079_v49 = vrot.slane %v4907_v47, %v25388_v7  ;;  %v5119_v27 = vsel %vm5107_vm7, %v5066_v29, %v5118_v31 }
 0x44f   : > { %v5120_v3 = vsel %vm5109_vm8, %v5075_v30, %v5119_v27 }
 0x450   : > { %v5084_v47 = vsel %vm4966_vm4, %v5083_v38, %v5079_v49 }
 0x451   : > { %v5121_v57 = vsel %vm5111_vm9, %v5084_v47, %v5120_v3 }
 0x454   : > { %v4916_v52 = vpop.xlane.xlu1 %4915 }
 0x455   : > { %v4913_v63 = vpop.xlane.xlu0 %4912  ;;  %v5092_v20 = vrot.slane %v4916_v52, %v25391_v22 }
 0x456   : > { %v5088_v10 = vrot.slane %v4913_v63, %v25388_v7 }
 0x458   : > { %v5093_v39 = vsel %vm4966_vm4, %v5092_v20, %v5088_v10 }
 0x459   : > { %v5122_v25 = vsel %vm5113_vm10, %v5093_v39, %v5121_v57 }
 0x45a   : > { %v25437_v2 = vpop.xlane.xlu1 %5162 }
 0x45b   : > { %v5160_v5 = vpop.xlane.xlu0 %5159  ;;  %v5293_v34 = vrot.slane %v25437_v2, %v25391_v22 }
 0x45c   : > { %v5289_v9 = vrot.slane %v5160_v5, %v25388_v7 }
 0x45e   : > { %v4922_v55 = vpop.xlane.xlu1 %4921 }
 0x45f   : > { %v5101_v52 = vrot.slane %v4922_v55, %v25391_v22  ;;  %v4919_v15 = vpop.xlane.xlu0 %4918 }
 0x460   : > { %v5097_v63 = vrot.slane %v4919_v15, %v25388_v7 }
 0x462   : > { %v5102_v46 = vsel %vm4966_vm4, %v5101_v52, %v5097_v63  ;;  %v5169_v0 = vpop.xlane.xlu1 %5168 }
 0x463   : > { %v5123_v17 = vsel %vm5115_vm11, %v5102_v46, %v5122_v25  ;;  %v5166_v43 = vpop.xlane.xlu0 %5165  ;;  %v5302_v12 = vrot.slane %v5169_v0, %v25391_v22 }
 0x464   : > { %5127 = vxpose.xlu0.b32.end [2/2] (short) (narrow) %v5123_v17, 16  ;;  %v5298_v21 = vrot.slane %v5166_v43, %v25388_v7 }
 0x466   : > { %v5175_v38 = vpop.xlane.xlu1 %5174  ;;  %v5303_v59 = vsel %vm4966_vm4, %v5302_v12, %v5298_v21 }
 0x467   : > { %v5172_v49 = vpop.xlane.xlu0 %5171  ;;  %v5311_v40 = vrot.slane %v5175_v38, %v25391_v22 }
 0x468   : > { %v5307_v13 = vrot.slane %v5172_v49, %v25388_v7  ;;  %v5294_v49 = vsel %vm4966_vm4, %v5293_v34, %v5289_v9 }
 0x469   : > { %v5430_v2 = vsel %vm5103_vm5, %v5303_v59, %v5294_v49 }
 0x46a   : > { %v5181_v48 = vpop.xlane.xlu1 %5180  ;;  %v5312_v0 = vsel %vm4966_vm4, %v5311_v40, %v5307_v13 }
 0x46b   : > { %v5178_v26 = vpop.xlane.xlu0 %5177  ;;  %v5320_v37 = vrot.slane %v5181_v48, %v25391_v22  ;;  %v5431_v48 = vsel %vm5105_vm6, %v5312_v0, %v5430_v2 }
 0x46c   : > { %v5316_v18 = vrot.slane %v5178_v26, %v25388_v7 }
 0x46e   : > { %v5187_v20 = vpop.xlane.xlu1 %5186  ;;  %v5321_v33 = vsel %vm4966_vm4, %v5320_v37, %v5316_v18 }
 0x46f   : > { %v5184_v10 = vpop.xlane.xlu0 %5183  ;;  %v5329_v43 = vrot.slane %v5187_v20, %v25391_v22  ;;  %v5432_v26 = vsel %vm5107_vm7, %v5321_v33, %v5431_v48 }
 0x470   : > { %v5325_v38 = vrot.slane %v5184_v10, %v25388_v7 }
 0x472   : > { %v5193_v29 = vpop.xlane.xlu1 %5192  ;;  %v5330_v12 = vsel %vm4966_vm4, %v5329_v43, %v5325_v38 }
 0x473   : > { %v5190_v50 = vpop.xlane.xlu0 %5189  ;;  %v5338_v40 = vrot.slane %v5193_v29, %v25391_v22 }
 0x474   : > { %v5334_v13 = vrot.slane %v5190_v50, %v25388_v7 }
 0x476   : > { %v5199_v30 = vpop.xlane.xlu1 %5198 }
 0x477   : > { %v5196_v31 = vpop.xlane.xlu0 %5195  ;;  %v5347_v21 = vrot.slane %v5199_v30, %v25391_v22 }
 0x478   : > { %v5343_v34 = vrot.slane %v5196_v31, %v25388_v7  ;;  %v5433_v31 = vsel %vm5109_vm8, %v5330_v12, %v5432_v26 }
 0x47b   : > { %v5211_v47 = vpop.xlane.xlu1 %5210 }
 0x47c   : > { %v5208_v55 = vpop.xlane.xlu0 %5207  ;;  %v5365_v59 = vrot.slane %v5211_v47, %v25391_v22  ;;  %v5339_v47 = vsel %vm4966_vm4, %v5338_v40, %v5334_v13 }
 0x47d   : > { %v5361_v9 = vrot.slane %v5208_v55, %v25388_v7  ;;  %v5434_v48 = vsel %vm5111_vm9, %v5339_v47, %v5433_v31  ;;  %v25537_v31 = vsub.s32 1, %v25385_v28  ;;  %v25540_v47 = vsub.s32 2, %v25385_v28 }
 0x47f   : > { %v25457_v27 = vpop.xlane.xlu1 %5204  ;;  %30750 = vst [vmem:[#allocation65_spill] sm:$0xff] %v25537_v31  ;;  %30751 = vst [vmem:[#allocation57_spill] sm:$0xff] %v25540_v47 }
 0x480   : > { %v25459_v52 = vpop.xlane.xlu0 %5201  ;;  %v5356_v10 = vrot.slane %v25457_v27, %v25391_v22 }
 0x481   : > { %v5352_v29 = vrot.slane %v25459_v52, %v25388_v7 }
 0x483   : > { %v5217_v15 = vpop.xlane.xlu1 %5216  ;;  %v5357_v2 = vsel %vm4966_vm4, %v5356_v10, %v5352_v29  ;;  %v25533_v29 = vsub.s32 0, %v25385_v28 }
 0x484   : > { %v5214_v39 = vpop.xlane.xlu0 %5213  ;;  %v5374_v37 = vrot.slane %v5217_v15, %v25391_v22 }
 0x485   : > { %v5370_v18 = vrot.slane %v5214_v39, %v25388_v7  ;;  %30749 = vst [vmem:[#allocation61_spill] sm:$0xff] %v25533_v29 }
 0x487   : > { %v5223_v63 = vpop.xlane.xlu1 %5222  ;;  %v5375_v27 = vsel %vm4966_vm4, %v5374_v37, %v5370_v18 }
 0x488   : > { %v5220_v3 = vpop.xlane.xlu0 %5219  ;;  %v5383_v33 = vrot.slane %v5223_v63, %v25391_v22 }
 0x489   : > { %v5379_v20 = vrot.slane %v5220_v3, %v25388_v7  ;;  %v5348_v3 = vsel %vm4966_vm4, %v5347_v21, %v5343_v34 }
 0x48b   : > { %v5229_v57 = vpop.xlane.xlu1 %5228  ;;  %v5384_v0 = vsel %vm4966_vm4, %v5383_v33, %v5379_v20 }
 0x48c   : > { %v5226_v46 = vpop.xlane.xlu0 %5225  ;;  %v5392_v50 = vrot.slane %v5229_v57, %v25391_v22 }
 0x48d   : > { %v5388_v30 = vrot.slane %v5226_v46, %v25388_v7  ;;  %v5366_v46 = vsel %vm4966_vm4, %v5365_v59, %v5361_v9 }
 0x48f   : > { %v5235_v25 = vpop.xlane.xlu1 %5234 }
 0x490   : > { %v5232_v17 = vpop.xlane.xlu0 %5231  ;;  %v5401_v55 = vrot.slane %v5235_v25, %v25391_v22 }
 0x491   : > { %v5397_v15 = vrot.slane %v5232_v17, %v25388_v7  ;;  %v5393_v17 = vsel %vm4966_vm4, %v5392_v50, %v5388_v30 }
 0x493   : > { %v5241_v35 = vpop.xlane.xlu1 %5240 }
 0x494   : > { %v5238_v32 = vpop.xlane.xlu0 %5237  ;;  %v5410_v52 = vrot.slane %v5241_v35, %v25391_v22  ;;  %v5437_v35 = vsel %vm5103_vm5, %v5375_v27, %v5366_v46  ;;  %v25557_v46 = vsub.s32 6, %v25385_v28 }
 0x495   : > { %v5406_v57 = vrot.slane %v5238_v32, %v25388_v7  ;;  %v5402_v32 = vsel %vm4966_vm4, %v5401_v55, %v5397_v15  ;;  %v5438_v26 = vsel %vm5105_vm6, %v5384_v0, %v5437_v35 }
 0x496   : > { %v5439_v12 = vsel %vm5107_vm7, %v5393_v17, %v5438_v26  ;;  %30755 = vst [vmem:[#allocation99_spill] sm:$0xff] %v25557_v46 }
 0x497   : > { %v5247_v24 = vpop.xlane.xlu1 %5246  ;;  %v5440_v34 = vsel %vm5109_vm8, %v5402_v32, %v5439_v12 }
 0x498   : > { %v5244_v5 = vpop.xlane.xlu0 %5243  ;;  %v5419_v43 = vrot.slane %v5247_v24, %v25391_v22  ;;  %v5411_v24 = vsel %vm4966_vm4, %v5410_v52, %v5406_v57  ;;  %v25553_v52 = vsub.s32 5, %v25385_v28 }
 0x499   : > { %v5415_v25 = vrot.slane %v5244_v5, %v25388_v7  ;;  %v5435_v5 = vsel %vm5113_vm10, %v5348_v3, %v5434_v48  ;;  %v5441_v59 = vsel %vm5111_vm9, %v5411_v24, %v5440_v34  ;;  %v25549_v3 = vsub.s32 4, %v25385_v28 }
 0x49a   : > { %v5436_v13 = vsel %vm5115_vm11, %v5357_v2, %v5435_v5  ;;  %30754 = vst [vmem:[#allocation63_spill] sm:$0xff] %v25553_v52 }
 0x49b   : > { %v5253_v39 = vpop.xlane.xlu1 %5252  ;;  %v5420_v40 = vsel %vm4966_vm4, %v5419_v43, %v5415_v25  ;;  %30753 = vst [vmem:[#allocation64_spill] sm:$0xff] %v25549_v3  ;;  %v25561_v43 = vsub.s32 7, %v25385_v28 }
 0x49c   : > { %v5250_v63 = vpop.xlane.xlu0 %5249  ;;  %v5428_v38 = vrot.slane %v5253_v39, %v25391_v22  ;;  %v5442_v9 = vsel %vm5113_vm10, %v5420_v40, %v5441_v59  ;;  %v25545_v39 = vsub.s32 3, %v25385_v28 }
 0x49d   : > { %v5424_v49 = vrot.slane %v5250_v63, %v25388_v7  ;;  %30756 = vst [vmem:[#allocation100_spill] sm:$0xff] %v25561_v43 }
 0x49e   : > { %30752 = vst [vmem:[#allocation60_spill] sm:$0xff] %v25545_v39 }
 0x49f   : > { %v5429_v18 = vsel %vm4966_vm4, %v5428_v38, %v5424_v49 }
 0x4a0   : > { %v5443_v33 = vsel %vm5115_vm11, %v5429_v18, %v5442_v9 }
 0x4e0   : > { %v5142_v21 = vpop.trf.xlu0 }
 0x4e1   : > { %v25522_v37 = vmax.f32 %v5142_v21, %v5436_v13 }
 0x4e3   : > { %5448 = vxpose.xlu1.b32.start [1/2] (short) (narrow) %v25522_v37, 16  ;;  %v5755_v24 = vrot.slane %v25522_v37, %v25533_v29  ;;  %v5777_v5 = vrot.slane %v25522_v37, %v25540_v47  ;;  %v5799_v12 = vrot.slane %v25522_v37, %v25549_v3  ;;  %v5821_v40 = vrot.slane %v25522_v37, %v25557_v46 }
 0x4e4   : > { %v5143_v20 = vpop.trf.xlu0  ;;  %v5766_v59 = vrot.slane %v25522_v37, %v25537_v31  ;;  %v5788_v9 = vrot.slane %v25522_v37, %v25545_v39 }
 0x4e5   : > { %v25529_v10 = vmax.f32 %v5143_v20, %v5443_v33  ;;  %v5810_v33 = vrot.slane %v25522_v37, %v25553_v52  ;;  %v5832_v20 = vrot.slane %v25522_v37, %v25561_v43 }
 0x4e7   : > { %5449 = vxpose.xlu1.b32.end [2/2] (short) (narrow) %v25529_v10, 16  ;;  %v5843_v13 = vrot.slane %v25529_v10, %v25533_v29  ;;  %v5865_v21 = vrot.slane %v25529_v10, %v25540_v47  ;;  %v5887_v34 = vrot.slane %v25529_v10, %v25549_v3  ;;  %v5909_v18 = vrot.slane %v25529_v10, %v25557_v46 }
 0x563   : > { %v5464_v50 = vpop.trf.xlu1 }
 0x564   : > { %v5483_v30 = vrot.slane %v5464_v50, %v25533_v29  ;;  %v5494_v55 = vrot.slane %v5464_v50, %v25537_v31  ;;  %v5505_v15 = vrot.slane %v5464_v50, %v25540_v47  ;;  %v5516_v63 = vrot.slane %v5464_v50, %v25545_v39 }
 0x565   : > { %v5527_v27 = vrot.slane %v5464_v50, %v25549_v3  ;;  %v5538_v57 = vrot.slane %v5464_v50, %v25553_v52  ;;  %v5549_v0 = vrot.slane %v5464_v50, %v25557_v46  ;;  %v5560_v17 = vrot.slane %v5464_v50, %v25561_v43 }
 0x566   : > { %5489 = vbcast.lane.b32.xlu1 %v5483_v30, 264  ;;  %5485 = vbcast.lane.b32.xlu0 %v5483_v30, 256  ;;  %v5854_v50 = vrot.slane %v25529_v10, %v25537_v31  ;;  %v5876_v30 = vrot.slane %v25529_v10, %v25545_v39 }
 0x567   : > { %v5465_v25 = vpop.trf.xlu1 }
 0x568   : > { %v5571_v38 = vrot.slane %v5465_v25, %v25533_v29  ;;  %v5582_v49 = vrot.slane %v5465_v25, %v25537_v31  ;;  %v5593_v2 = vrot.slane %v5465_v25, %v25540_v47  ;;  %v5604_v28 = vrot.slane %v5465_v25, %v25545_v39 }
 0x569   : > { %v5615_v35 = vrot.slane %v5465_v25, %v25549_v3  ;;  %v5626_v32 = vrot.slane %v5465_v25, %v25553_v52  ;;  %v5637_v48 = vrot.slane %v5465_v25, %v25557_v46  ;;  %v5648_v26 = vrot.slane %v5465_v25, %v25561_v43 }
 0x56a   : > { %5496 = vbcast.lane.b32.xlu1 %v5494_v55, 256  ;;  %5507 = vbcast.lane.b32.xlu0 %v5505_v15, 256 }
 0x56e   : > { %5500 = vbcast.lane.b32.xlu1 %v5494_v55, 264  ;;  %5518 = vbcast.lane.b32.xlu0 %v5516_v63, 256 }
 0x572   : > { %5511 = vbcast.lane.b32.xlu1 %v5505_v15, 264  ;;  %5529 = vbcast.lane.b32.xlu0 %v5527_v27, 256 }
 0x576   : > { %5522 = vbcast.lane.b32.xlu1 %v5516_v63, 264  ;;  %5540 = vbcast.lane.b32.xlu0 %v5538_v57, 256  ;;  %v5898_v63 = vrot.slane %v25529_v10, %v25553_v52 }
 0x57a   : > { %5533 = vbcast.lane.b32.xlu1 %v5527_v27, 264  ;;  %5551 = vbcast.lane.b32.xlu0 %v5549_v0, 256 }
 0x57e   : > { %5544 = vbcast.lane.b32.xlu1 %v5538_v57, 264  ;;  %5562 = vbcast.lane.b32.xlu0 %v5560_v17, 256 }
 0x582   : > { %5555 = vbcast.lane.b32.xlu1 %v5549_v0, 264  ;;  %5573 = vbcast.lane.b32.xlu0 %v5571_v38, 256 }
 0x586   : > { %5566 = vbcast.lane.b32.xlu1 %v5560_v17, 264  ;;  %5584 = vbcast.lane.b32.xlu0 %v5582_v49, 256 }
 0x58a   : > { %5577 = vbcast.lane.b32.xlu1 %v5571_v38, 264  ;;  %5595 = vbcast.lane.b32.xlu0 %v5593_v2, 256  ;;  %v5920_v38 = vrot.slane %v25529_v10, %v25561_v43 }
 0x58e   : > { %5588 = vbcast.lane.b32.xlu1 %v5582_v49, 264  ;;  %5606 = vbcast.lane.b32.xlu0 %v5604_v28, 256 }
 0x592   : > { %5599 = vbcast.lane.b32.xlu1 %v5593_v2, 264  ;;  %5617 = vbcast.lane.b32.xlu0 %v5615_v35, 256 }
 0x596   : > { %5610 = vbcast.lane.b32.xlu1 %v5604_v28, 264  ;;  %5628 = vbcast.lane.b32.xlu0 %v5626_v32, 256 }
 0x59a   : > { %5621 = vbcast.lane.b32.xlu1 %v5615_v35, 264  ;;  %5639 = vbcast.lane.b32.xlu0 %v5637_v48, 256 }
 0x59e   : > { %5632 = vbcast.lane.b32.xlu1 %v5626_v32, 264  ;;  %5650 = vbcast.lane.b32.xlu0 %v5648_v26, 256 }
 0x5a2   : > { %5643 = vbcast.lane.b32.xlu1 %v5637_v48, 264  ;;  %5757 = vbcast.lane.b32.xlu0 %v5755_v24, 256 }
 0x5a6   : > { %5654 = vbcast.lane.b32.xlu1 %v5648_v26, 264  ;;  %5779 = vbcast.lane.b32.xlu0 %v5777_v5, 256 }
 0x5aa   : > { %5761 = vbcast.lane.b32.xlu1 %v5755_v24, 264  ;;  %5801 = vbcast.lane.b32.xlu0 %v5799_v12, 256 }
 0x5ae   : > { %5783 = vbcast.lane.b32.xlu1 %v5777_v5, 264  ;;  %5823 = vbcast.lane.b32.xlu0 %v5821_v40, 256 }
 0x5b2   : > { %5805 = vbcast.lane.b32.xlu1 %v5799_v12, 264  ;;  %5845 = vbcast.lane.b32.xlu0 %v5843_v13, 256 }
 0x5b6   : > { %5827 = vbcast.lane.b32.xlu1 %v5821_v40, 264  ;;  %5867 = vbcast.lane.b32.xlu0 %v5865_v21, 256 }
 0x5ba   : > { %5849 = vbcast.lane.b32.xlu1 %v5843_v13, 264  ;;  %5889 = vbcast.lane.b32.xlu0 %v5887_v34, 256 }
 0x5be   : > { %5871 = vbcast.lane.b32.xlu1 %v5865_v21, 264  ;;  %5911 = vbcast.lane.b32.xlu0 %v5909_v18, 256 }
 0x5c2   : > { %5893 = vbcast.lane.b32.xlu1 %v5887_v34, 264  ;;  %5768 = vbcast.lane.b32.xlu0 %v5766_v59, 256 }
 0x5c6   : > { %5915 = vbcast.lane.b32.xlu1 %v5909_v18, 264  ;;  %5790 = vbcast.lane.b32.xlu0 %v5788_v9, 256 }
 0x5ca   : > { %5772 = vbcast.lane.b32.xlu1 %v5766_v59, 264  ;;  %5812 = vbcast.lane.b32.xlu0 %v5810_v33, 256 }
 0x5ce   : > { %5794 = vbcast.lane.b32.xlu1 %v5788_v9, 264  ;;  %5834 = vbcast.lane.b32.xlu0 %v5832_v20, 256 }
 0x5d2   : > { %5816 = vbcast.lane.b32.xlu1 %v5810_v33, 264  ;;  %5856 = vbcast.lane.b32.xlu0 %v5854_v50, 256 }
 0x5d6   : > { %5838 = vbcast.lane.b32.xlu1 %v5832_v20, 264  ;;  %5878 = vbcast.lane.b32.xlu0 %v5876_v30, 256 }
 0x5d8   : > { %v5486_v55 = vpop.permute.xlu0 %5485  ;;  %v5490_v15 = vpop.permute.xlu1 %5489 }
 0x5d9   : > { %v5656_v27 = vsub.f32 %v24939_v62, %v5486_v55  ;;  %v5657_v37 = vsub.f32 %v24923_v51, %v5490_v15 }
 0x5da   : > { %5860 = vbcast.lane.b32.xlu1 %v5854_v50, 264  ;;  %5900 = vbcast.lane.b32.xlu0 %v5898_v63, 256 }
 0x5db   : > { %v5688_v57 = vmul.f32 1.442695, %v5656_v27  ;;  %v5690_v0 = vmul.f32 1.442695, %v5657_v37 }
 0x5dc   : > { %v5508_v25 = vpop.permute.xlu0 %5507  ;;  %v5497_v17 = vpop.permute.xlu1 %5496 }
 0x5dd   : > { %22847 = vpow2.f32 %v5688_v57  ;;  %v5660_v49 = vsub.f32 %v24993_v44, %v5508_v25  ;;  %v5658_v2 = vsub.f32 %v24968_v1, %v5497_v17 }
 0x5de   : > { %22849 = vpow2.f32 %v5690_v0  ;;  %5882 = vbcast.lane.b32.xlu1 %v5876_v30, 264  ;;  %5922 = vbcast.lane.b32.xlu0 %v5920_v38, 256 }
 0x5df   : > { %v5696_v62 = vmul.f32 1.442695, %v5660_v49  ;;  %v5692_v28 = vmul.f32 1.442695, %v5658_v2 }
 0x5e0   : > { %v5519_v51 = vpop.permute.xlu0 %5518  ;;  %v5501_v35 = vpop.permute.xlu1 %5500 }
 0x5e1   : > { %22851 = vpow2.f32 %v5696_v62  ;;  %v5662_v32 = vsub.f32 %v25025_v8, %v5519_v51  ;;  %v5659_v48 = vsub.f32 %v24953_v41, %v5501_v35 }
 0x5e2   : > { %22853 = vpow2.f32 %v5692_v28  ;;  %5904 = vbcast.lane.b32.xlu1 %v5898_v63, 264 }
 0x5e3   : > { %v5700_v10 = vmul.f32 1.442695, %v5662_v32  ;;  %v5694_v26 = vmul.f32 1.442695, %v5659_v48  ;;  %v30758_v48 = vld [vmem:[#allocation66_spill] sm:$0xff] }
 0x5e4   : > { %v5530_v24 = vpop.permute.xlu0 %5529  ;;  %v5512_v44 = vpop.permute.xlu1 %5511 }
 0x5e5   : > { %22855 = vpow2.f32 %v5700_v10  ;;  %v5664_v1 = vsub.f32 %v25141_v36, %v5530_v24  ;;  %v5661_v5 = vsub.f32 %v24985_v54, %v5512_v44  ;;  %v30759_v24 = vld [vmem:[#allocation80_spill] sm:$0xff] }
 0x5e6   : > { %22857 = vpow2.f32 %v5694_v26  ;;  %5926 = vbcast.lane.b32.xlu1 %v5920_v38, 264 }
 0x5e7   : > { %v25612_v12 = vpop.eup %22847  ;;  %v5704_v40 = vmul.f32 1.442695, %v5664_v1  ;;  %v5698_v13 = vmul.f32 1.442695, %v5661_v5 }
 0x5e8   : > { %v25614_v8 = vpop.eup %22849  ;;  %20792 = vmatprep.mubr.msk.f32.mxu0 %vm4826_vm3, %v25612_v12  ;;  %v5541_v41 = vpop.permute.xlu0 %5540 }
 0x5e9   : > { %v5523_v21 = vpop.permute.xlu1 %5522  ;;  %22859 = vpow2.f32 %v5704_v40  ;;  %v5666_v34 = vsub.f32 %v25151_v6, %v5541_v41  ;;  %20793 = vmatmul.mubr.msk.f32.vlgmr.msra.gmra.mrb[122].mxu0 %vm4826_vm3, %v25614_v8  ;;  %v30761_v41 = vld [vmem:[#allocation67_spill] sm:$0xff] }
 0x5ea   : > { %v5663_v36 = vsub.f32 %v25017_v23, %v5523_v21  ;;  %22861 = vpow2.f32 %v5698_v13  ;;  %22047 = vmatpush3.bf16.msra.mxu0 %v24975_v53 }
 0x5eb   : > { %v25623_v54 = vpop.eup %22851  ;;  %v5708_v18 = vmul.f32 1.442695, %v5666_v34  ;;  %22053 = vmatprep.subr.bf16.mxu0 %v25039_v60 }
 0x5ec   : > { %v5702_v59 = vmul.f32 1.442695, %v5663_v36  ;;  %v25626_v9 = vpop.eup %22853  ;;  %v5552_v33 = vpop.permute.xlu0 %5551  ;;  %20806 = vmatprep.mubr.msk.f32.mxu0 %vm4826_vm3, %v25623_v54 }
 0x5ed   : > { %v5534_v6 = vpop.permute.xlu1 %5533  ;;  %22863 = vpow2.f32 %v5708_v18  ;;  %v5668_v23 = vsub.f32 %v25161_v61, %v5552_v33  ;;  %20799 = vmatprep.mubr.msk.f32.mxu1 %vm4826_vm3, %v25626_v9  ;;  %v30762_v18 = vld [vmem:[#allocation83_spill] sm:$0xff] }
 0x5ee   : > { %v5665_v53 = vsub.f32 %v25138_v19, %v5534_v6  ;;  %22865 = vpow2.f32 %v5702_v59 }
 0x5ef   : > { %v25634_v20 = vpop.eup %22855  ;;  %v5712_v50 = vmul.f32 1.442695, %v5668_v23 }
 0x5f0   : > { %v5706_v30 = vmul.f32 1.442695, %v5665_v53  ;;  %v25636_v55 = vpop.eup %22857  ;;  %v5563_v15 = vpop.permute.xlu0 %5562 }
 0x5f1   : > { %v5545_v63 = vpop.permute.xlu1 %5544  ;;  %22867 = vpow2.f32 %v5712_v50  ;;  %v5670_v27 = vsub.f32 %v25171_v42, %v5563_v15  ;;  %20800 = vmatmul.mubr.msk.f32.vlgmr.msra.gmra.mrb[230].mxu1 %vm4826_vm3, %v25636_v55  ;;  %v30764_v50 = vld [vmem:[#allocation68_spill] sm:$0xff] }
 0x5f2   : > { %v5667_v61 = vsub.f32 %v25148_v4, %v5545_v63  ;;  %22869 = vpow2.f32 %v5706_v30  ;;  %22051 = vmatpush3.bf16.msra.mxu1 %v25007_v16  ;;  %20813 = vmatprep.mubr.msk.f32.mxu1 %vm4826_vm3, %v25634_v20 }
 0x5f3   : > { %v25645_v19 = vpop.eup %22859  ;;  %v5716_v37 = vmul.f32 1.442695, %v5670_v27  ;;  %22057 = vmatprep.subr.bf16.mxu1 %v25061_v11  ;;  %v30765_v27 = vld [vmem:[#allocation19_spill] sm:$0xff] }
 0x5f4   : > { %v5710_v57 = vmul.f32 1.442695, %v5667_v61  ;;  %v25648_v0 = vpop.eup %22861  ;;  %v5574_v42 = vpop.permute.xlu0 %5573 }
 0x5f5   : > { %v5556_v25 = vpop.permute.xlu1 %5555  ;;  %22871 = vpow2.f32 %v5716_v37  ;;  %v5672_v17 = vsub.f32 %v25181_v56, %v5574_v42  ;;  %20807 = vmatmul.mubr.msk.f32.vlgmr.msra.gmra.mrb[124].mxu0 %vm4826_vm3, %v25648_v0  ;;  %v30766_v37 = vld [vmem:[#allocation78_spill] sm:$0xff] }
 0x5f6   : > { %v5669_v16 = vsub.f32 %v25158_v58, %v5556_v25  ;;  %22873 = vpow2.f32 %v5710_v57  ;;  %22055 = vmatpush3.bf16.msra.mxu0 %v25039_v60  ;;  %20820 = vmatprep.mubr.msk.f32.mxu0 %vm4826_vm3, %v25645_v19  ;;  %v30757_v60 = vld [vmem:[#allocation75_spill] sm:$0xff] }
 0x5f7   : > { %v25657_v4 = vpop.eup %22863  ;;  %v5720_v38 = vmul.f32 1.442695, %v5672_v17  ;;  %22061 = vmatprep.subr.bf16.mxu0 %v25083_v45 }
 0x5f8   : > { %v5714_v49 = vmul.f32 1.442695, %v5669_v16  ;;  %v25660_v2 = vpop.eup %22865  ;;  %v5585_v56 = vpop.permute.xlu0 %5584  ;;  %v30767_v16 = vld [vmem:[#allocation69_spill] sm:$0xff] }
 0x5f9   : > { %v5567_v62 = vpop.permute.xlu1 %5566  ;;  %22875 = vpow2.f32 %v5720_v38  ;;  %v5674_v28 = vsub.f32 %v25191_v14, %v5585_v56  ;;  %20814 = vmatmul.mubr.msk.f32.vlgmr.msra.gmra.mrb[232].mxu1 %vm4826_vm3, %v25660_v2 }
 0x5fa   : > { %v5671_v58 = vsub.f32 %v30757_v60, %v5567_v62  ;;  %22877 = vpow2.f32 %v5714_v49  ;;  %22059 = vmatpush3.bf16.msra.mxu1 %v25061_v11  ;;  %20827 = vmatprep.mubr.msk.f32.mxu1 %vm4826_vm3, %v25657_v4  ;;  %v30760_v11 = vld [vmem:[#allocation76_spill] sm:$0xff]  ;;  %v30768_v62 = vld [vmem:[#allocation26_spill] sm:$0xff]  ;;  %v30769_v60 = vld [vmem:[#allocation81_spill] sm:$0xff] }
 0x5fb   : > { %v25669_v51 = vpop.eup %22867  ;;  %v5724_v35 = vmul.f32 1.442695, %v5674_v28  ;;  %22065 = vmatprep.subr.bf16.mxu1 %v30758_v48 }
 0x5fc   : > { %v5718_v32 = vmul.f32 1.442695, %v5671_v58  ;;  %v25672_v10 = vpop.eup %22869  ;;  %v5596_v14 = vpop.permute.xlu0 %5595 }
 0x5fd   : > { %v5578_v26 = vpop.permute.xlu1 %5577  ;;  %22879 = vpow2.f32 %v5724_v35  ;;  %v5676_v44 = vsub.f32 %v30759_v24, %v5596_v14  ;;  %20821 = vmatmul.mubr.msk.f32.vlgmr.msra.gmra.mrb[126].mxu0 %vm4826_vm3, %v25672_v10  ;;  %v30770_v14 = vld [vmem:[#allocation70_spill] sm:$0xff] }
 0x5fe   : > { %v5673_v1 = vsub.f32 %v30760_v11, %v5578_v26  ;;  %22881 = vpow2.f32 %v5718_v32  ;;  %22063 = vmatpush3.bf16.msra.mxu0 %v25083_v45  ;;  %20834 = vmatprep.mubr.msk.f32.mxu0 %vm4826_vm3, %v25669_v51  ;;  %v30763_v45 = vld [vmem:[#allocation77_spill] sm:$0xff]  ;;  %v30771_v11 = vld [vmem:[#allocation22_spill] sm:$0xff] }
 0x5ff   : > { %v25681_v5 = vpop.eup %22871  ;;  %v5728_v40 = vmul.f32 1.442695, %v5676_v44  ;;  %22069 = vmatprep.subr.bf16.mxu0 %v30761_v41 }
 0x600   : > { %v5722_v13 = vmul.f32 1.442695, %v5673_v1  ;;  %v25684_v21 = vpop.eup %22873  ;;  %v5607_v34 = vpop.permute.xlu0 %5606 }
 0x601   : > { %v5589_v36 = vpop.permute.xlu1 %5588  ;;  %22883 = vpow2.f32 %v5728_v40  ;;  %v5678_v59 = vsub.f32 %v30762_v18, %v5607_v34  ;;  %20828 = vmatmul.mubr.msk.f32.vlgmr.msra.gmra.mrb[234].mxu1 %vm4826_vm3, %v25684_v21  ;;  %v30772_v40 = vld [vmem:[#allocation20_spill] sm:$0xff]  ;;  %v30773_v18 = vld [vmem:[#allocation71_spill] sm:$0xff] }
 0x602   : > { %v5675_v33 = vsub.f32 %v30763_v45, %v5589_v36  ;;  %22885 = vpow2.f32 %v5722_v13  ;;  %22067 = vmatpush3.bf16.msra.mxu1 %v30758_v48  ;;  %20841 = vmatprep.mubr.msk.f32.mxu1 %vm4826_vm3, %v25681_v5 }
 0x603   : > { %v25693_v6 = vpop.eup %22875  ;;  %v5732_v23 = vmul.f32 1.442695, %v5678_v59  ;;  %22073 = vmatprep.subr.bf16.mxu1 %v30764_v50 }
 0x604   : > { %v5726_v53 = vmul.f32 1.442695, %v5675_v33  ;;  %v25696_v30 = vpop.eup %22877  ;;  %v5618_v15 = vpop.permute.xlu0 %5617 }
 0x605   : > { %v5600_v63 = vpop.permute.xlu1 %5599  ;;  %22887 = vpow2.f32 %v5732_v23  ;;  %v5680_v61 = vsub.f32 %v30765_v27, %v5618_v15  ;;  %20835 = vmatmul.mubr.msk.f32.vlgmr.msra.gmra.mrb[128].mxu0 %vm4826_vm3, %v25696_v30  ;;  %v30774_v23 = vld [vmem:[#allocation21_spill] sm:$0xff]  ;;  %v6063_v43 = vsel %vm4826_vm3, %v25696_v30, 0.0  ;;  %v6024_v30 = vsel %vm4826_vm3, %v25612_v12, 0.0  ;;  %v30818_v12 = vld [vmem:[#allocation50_spill] sm:$0xff] }
 0x606   : > { %v5677_v57 = vsub.f32 %v30766_v37, %v5600_v63  ;;  %22889 = vpow2.f32 %v5726_v53  ;;  %22071 = vmatpush3.bf16.msra.mxu0 %v30761_v41  ;;  %20848 = vmatprep.mubr.msk.f32.mxu0 %vm4826_vm3, %v25693_v6  ;;  %v30776_v37 = vld [vmem:[#allocation72_spill] sm:$0xff] }
 0x607   : > { %v25705_v42 = vpop.eup %22879  ;;  %v5736_v25 = vmul.f32 1.442695, %v5680_v61  ;;  %22077 = vmatprep.subr.bf16.mxu0 %v30767_v16 }
 0x608   : > { %v5730_v17 = vmul.f32 1.442695, %v5677_v57  ;;  %v25708_v38 = vpop.eup %22881  ;;  %v5629_v49 = vpop.permute.xlu0 %5628 }
 0x609   : > { %v5611_v56 = vpop.permute.xlu1 %5610  ;;  %22891 = vpow2.f32 %v5736_v25  ;;  %v5682_v28 = vsub.f32 %v30768_v62, %v5629_v49  ;;  %20842 = vmatmul.mubr.msk.f32.vlgmr.msra.gmra.mrb[236].mxu1 %vm4826_vm3, %v25708_v38 }
 0x60a   : > { %v5679_v58 = vsub.f32 %v30769_v60, %v5611_v56  ;;  %22893 = vpow2.f32 %v5730_v17  ;;  %22075 = vmatpush3.bf16.msra.mxu1 %v30764_v50  ;;  %20855 = vmatprep.mubr.msk.f32.mxu1 %vm4826_vm3, %v25705_v42  ;;  %v30775_v50 = vld [vmem:[#allocation23_spill] sm:$0xff]  ;;  %v30778_v56 = vld [vmem:[#allocation18_spill] sm:$0xff] }
 0x60b   : > { %v25717_v35 = vpop.eup %22883  ;;  %v5740_v32 = vmul.f32 1.442695, %v5682_v28  ;;  %22081 = vmatprep.subr.bf16.mxu1 %v30770_v14 }
 0x60c   : > { %v5734_v48 = vmul.f32 1.442695, %v5679_v58  ;;  %v25720_v26 = vpop.eup %22885  ;;  %v5640_v24 = vpop.permute.xlu0 %5639 }
 0x60d   : > { %v5622_v44 = vpop.permute.xlu1 %5621  ;;  %22895 = vpow2.f32 %v5740_v32  ;;  %v5684_v1 = vsub.f32 %v30771_v11, %v5640_v24  ;;  %20849 = vmatmul.mubr.msk.f32.vlgmr.msra.gmra.mrb[130].mxu0 %vm4826_vm3, %v25720_v26  ;;  %v30779_v32 = vld [vmem:[#allocation73_spill] sm:$0xff] }
 0x60e   : > { %v5681_v13 = vsub.f32 %v30772_v40, %v5622_v44  ;;  %22897 = vpow2.f32 %v5734_v48  ;;  %22079 = vmatpush3.bf16.msra.mxu0 %v30767_v16  ;;  %20862 = vmatprep.mubr.msk.f32.mxu0 %vm4826_vm3, %v25717_v35  ;;  %v30777_v16 = vld [vmem:[#allocation29_spill] sm:$0xff]  ;;  %v30780_v44 = vld [vmem:[#allocation32_spill] sm:$0xff]  ;;  %v30781_v40 = vld [vmem:[#allocation35_spill] sm:$0xff] }
 0x60f   : > { %v25729_v41 = vpop.eup %22887  ;;  %v5744_v34 = vmul.f32 1.442695, %v5684_v1  ;;  %22085 = vmatprep.subr.bf16.mxu0 %v30773_v18 }
 0x610   : > { %v5738_v36 = vmul.f32 1.442695, %v5681_v13  ;;  %v25732_v59 = vpop.eup %22889  ;;  %v5651_v45 = vpop.permute.xlu0 %5650 }
 0x611   : > { %v5633_v33 = vpop.permute.xlu1 %5632  ;;  %22899 = vpow2.f32 %v5744_v34  ;;  %v5686_v53 = vsub.f32 %v30774_v23, %v5651_v45  ;;  %20856 = vmatmul.mubr.msk.f32.vlgmr.msra.gmra.mrb[238].mxu1 %vm4826_vm3, %v25732_v59  ;;  %v30783_v23 = vld [vmem:[#allocation25_spill] sm:$0xff] }
 0x612   : > { %v5683_v15 = vsub.f32 %v30775_v50, %v5633_v33  ;;  %22901 = vpow2.f32 %v5738_v36  ;;  %22083 = vmatpush3.bf16.msra.mxu1 %v30770_v14  ;;  %20869 = vmatprep.mubr.msk.f32.mxu1 %vm4826_vm3, %v25729_v41  ;;  %v30782_v36 = vld [vmem:[#allocation74_spill] sm:$0xff] }
 0x613   : > { %v25741_v63 = vpop.eup %22891  ;;  %v5748_v27 = vmul.f32 1.442695, %v5686_v53  ;;  %22089 = vmatprep.subr.bf16.mxu1 %v30776_v37 }
 0x614   : > { %v5742_v61 = vmul.f32 1.442695, %v5683_v15  ;;  %v25744_v57 = vpop.eup %22893  ;;  %v5758_v25 = vpop.permute.xlu0 %5757 }
 0x615   : > { %v5644_v17 = vpop.permute.xlu1 %5643  ;;  %22903 = vpow2.f32 %v5748_v27  ;;  %v5928_v49 = vsub.f32 %v30777_v16, %v5758_v25  ;;  %20863 = vmatmul.mubr.msk.f32.vlgmr.msra.gmra.mrb[132].mxu0 %vm4826_vm3, %v25744_v57  ;;  %v30784_v27 = vld [vmem:[#allocation34_spill] sm:$0xff]  ;;  %v30785_v25 = vld [vmem:[#allocation79_spill] sm:$0xff] }
 0x616   : > { %v5685_v62 = vsub.f32 %v30778_v56, %v5644_v17  ;;  %22905 = vpow2.f32 %v5742_v61  ;;  %22087 = vmatpush3.bf16.msra.mxu0 %v30773_v18  ;;  %20876 = vmatprep.mubr.msk.f32.mxu0 %vm4826_vm3, %v25741_v63  ;;  %v30786_v56 = vld [vmem:[#allocation28_spill] sm:$0xff] }
 0x617   : > { %v25753_v28 = vpop.eup %22895  ;;  %v5960_v60 = vmul.f32 1.442695, %v5928_v49  ;;  %22093 = vmatprep.subr.bf16.mxu0 %v30779_v32 }
 0x618   : > { %v5746_v58 = vmul.f32 1.442695, %v5685_v62  ;;  %v25756_v48 = vpop.eup %22897  ;;  %v5780_v14 = vpop.permute.xlu0 %5779 }
 0x619   : > { %v5655_v24 = vpop.permute.xlu1 %5654  ;;  %22907 = vpow2.f32 %v5960_v60  ;;  %20870 = vmatmul.mubr.msk.f32.vlgmr.msra.gmra.mrb[240].mxu1 %vm4826_vm3, %v25756_v48  ;;  %v5932_v13 = vsub.f32 %v30781_v40, %v5780_v14 }
 0x61a   : > { %v5687_v11 = vsub.f32 %v30780_v44, %v5655_v24  ;;  %22909 = vpow2.f32 %v5746_v58  ;;  %22091 = vmatpush3.bf16.msra.mxu1 %v30776_v37  ;;  %20883 = vmatprep.mubr.msk.f32.mxu1 %vm4826_vm3, %v25753_v28  ;;  %v30788_v44 = vld [vmem:[#allocation82_spill] sm:$0xff] }
 0x61b   : > { %v25764_v1 = vpop.eup %22899  ;;  %22097 = vmatprep.subr.bf16.mxu1 %v30782_v36  ;;  %v5968_v15 = vmul.f32 1.442695, %v5932_v13 }
 0x61c   : > { %v5750_v34 = vmul.f32 1.442695, %v5687_v11  ;;  %v25768_v18 = vpop.eup %22901  ;;  %v5802_v45 = vpop.permute.xlu0 %5801 }
 0x61d   : > { %v5762_v33 = vpop.permute.xlu1 %5761  ;;  %20877 = vmatmul.mubr.msk.f32.vlgmr.msra.gmra.mrb[134].mxu0 %vm4826_vm3, %v25768_v18  ;;  %v5936_v61 = vsub.f32 %v30784_v27, %v5802_v45  ;;  %v30791_v27 = vld [vmem:[#allocation84_spill] sm:$0xff] }
 0x61e   : > { %v5929_v53 = vsub.f32 %v30783_v23, %v5762_v33  ;;  %22911 = vpow2.f32 %v5750_v34  ;;  %22095 = vmatpush3.bf16.msra.mxu0 %v30779_v32  ;;  %20890 = vmatprep.mubr.msk.f32.mxu0 %vm4826_vm3, %v25764_v1  ;;  %v30787_v32 = vld [vmem:[#allocation33_spill] sm:$0xff] }
 0x61f   : > { %v25776_v50 = vpop.eup %22903  ;;  %22101 = vmatprep.subr.bf16.mxu0 %v30785_v25  ;;  %v5976_v58 = vmul.f32 1.442695, %v5936_v61 }
 0x620   : > { %v5962_v37 = vmul.f32 1.442695, %v5929_v53  ;;  %v25780_v17 = vpop.eup %22905  ;;  %v5824_v16 = vpop.permute.xlu0 %5823  ;;  %v30790_v53 = vld [vmem:[#allocation47_spill] sm:$0xff] }
 0x621   : > { %v5784_v49 = vpop.permute.xlu1 %5783  ;;  %20884 = vmatmul.mubr.msk.f32.vlgmr.msra.gmra.mrb[242].mxu1 %vm4826_vm3, %v25780_v17  ;;  %v5940_v14 = vsub.f32 %v30787_v32, %v5824_v16  ;;  %v30794_v32 = vld [vmem:[#allocation85_spill] sm:$0xff] }
 0x622   : > { %v5933_v62 = vsub.f32 %v30786_v56, %v5784_v49  ;;  %22913 = vpow2.f32 %v5962_v37  ;;  %22099 = vmatpush3.bf16.msra.mxu1 %v30782_v36  ;;  %20897 = vmatprep.mubr.msk.f32.mxu1 %vm4826_vm3, %v25776_v50  ;;  %v30789_v36 = vld [vmem:[#allocation27_spill] sm:$0xff]  ;;  %v30792_v49 = vld [vmem:[#allocation41_spill] sm:$0xff] }
 0x623   : > { %v22908_v60 = vpop.eup %22907  ;;  %22915 = vpow2.f32 %v5968_v15  ;;  %22105 = vmatprep.subr.bf16.mxu1 %v30788_v44  ;;  %v5984_v33 = vmul.f32 1.442695, %v5940_v14 }
 0x624   : > { %v5970_v24 = vmul.f32 1.442695, %v5933_v62  ;;  %v25790_v11 = vpop.eup %22909  ;;  %v5846_v13 = vpop.permute.xlu0 %5845  ;;  %v6344_v34 = vsel %vm4826_vm3, %v22908_v60, 0.0 }
 0x625   : > { %v5806_v40 = vpop.permute.xlu1 %5805  ;;  %20891 = vmatmul.mubr.msk.f32.vlgmr.msra.gmra.mrb[136].mxu0 %vm4826_vm3, %v25790_v11  ;;  %6345 = vadd.xlane.f32.xlu0 %v6344_v34  ;;  %v5944_v15 = vsub.f32 %v30790_v53, %v5846_v13  ;;  %v30795_v34 = vld [vmem:[#allocation40_spill] sm:$0xff] }
 0x626   : > { %v5937_v45 = vsub.f32 %v30789_v36, %v5806_v40  ;;  %22917 = vpow2.f32 %v5970_v24  ;;  %22103 = vmatpush3.bf16.msra.mxu0 %v30785_v25  ;;  %20904 = vmatprep.mubr.msk.f32.mxu0 %vm4826_vm3, %v22908_v60  ;;  %v30793_v60 = vld [vmem:[#allocation46_spill] sm:$0xff] }
 0x627   : > { %22919 = vpow2.f32 %v5976_v58  ;;  %22109 = vmatprep.subr.bf16.mxu0 %v30791_v27  ;;  %v5992_v25 = vmul.f32 1.442695, %v5944_v15  ;;  %v30797_v15 = vld [vmem:[#allocation86_spill] sm:$0xff] }
 0x628   : > { %v5978_v23 = vmul.f32 1.442695, %v5937_v45  ;;  %v25800_v61 = vpop.eup %22911  ;;  %v5868_v16 = vpop.permute.xlu0 %5867 }
 0x629   : > { %v5828_v37 = vpop.permute.xlu1 %5827  ;;  %20898 = vmatmul.mubr.msk.f32.vlgmr.msra.gmra.mrb[244].mxu1 %vm4826_vm3, %v25800_v61  ;;  %v5948_v58 = vsub.f32 %v30793_v60, %v5868_v16 }
 0x62a   : > { %22921 = vpow2.f32 %v5978_v23  ;;  %v5941_v56 = vsub.f32 %v30792_v49, %v5828_v37  ;;  %22107 = vmatpush3.bf16.msra.mxu1 %v30788_v44  ;;  %v30796_v23 = vld [vmem:[#allocation45_spill] sm:$0xff] }
 0x62b   : > { %22923 = vpow2.f32 %v5984_v33  ;;  %22113 = vmatprep.subr.bf16.mxu1 %v30794_v32  ;;  %v6000_v44 = vmul.f32 1.442695, %v5948_v58 }
 0x62c   : > { %v5986_v62 = vmul.f32 1.442695, %v5941_v56  ;;  %v22914_v14 = vpop.eup %22913  ;;  %v5890_v40 = vpop.permute.xlu0 %5889 }
 0x62d   : > { %v5850_v24 = vpop.permute.xlu1 %5849  ;;  %v25808_v13 = vpop.eup %22915  ;;  %20905 = vmatmul.mubr.msk.f32.vlgmr.msra.gmra.mrb[138].mxu0 %vm4826_vm3, %v22914_v14  ;;  %v6347_v45 = vsel %vm4826_vm3, %v22914_v14, 0.0  ;;  %v5952_v53 = vsub.f32 %v30796_v23, %v5890_v40  ;;  %v30801_v23 = vld [vmem:[#allocation53_spill] sm:$0xff] }
 0x62e   : > { %22925 = vpow2.f32 %v5986_v62  ;;  %v5945_v36 = vsub.f32 %v30795_v34, %v5850_v24  ;;  %22111 = vmatpush3.bf16.msra.mxu0 %v30791_v27  ;;  %20918 = vmatprep.mubr.msk.f32.mxu0 %vm4826_vm3, %v25808_v13  ;;  %v30798_v27 = vld [vmem:[#allocation39_spill] sm:$0xff]  ;;  %v30800_v34 = vld [vmem:[#allocation88_spill] sm:$0xff] }
 0x62f   : > { %22927 = vpow2.f32 %v5992_v25  ;;  %22117 = vmatprep.subr.bf16.mxu0 %v30797_v15  ;;  %6348 = vadd.xlane.f32.xlu1 %v6347_v45  ;;  %v6027_v25 = vsel %vm4826_vm3, %v25614_v8, 0.0  ;;  %v6008_v58 = vmul.f32 1.442695, %v5952_v53  ;;  %v30799_v24 = vld [vmem:[#allocation59_spill] sm:$0xff] }
 0x630   : > { %v5994_v33 = vmul.f32 1.442695, %v5945_v36  ;;  %v25818_v37 = vpop.eup %22917  ;;  %v5912_v49 = vpop.permute.xlu0 %5911 }
 0x631   : > { %v5872_v16 = vpop.permute.xlu1 %5871  ;;  %v25820_v56 = vpop.eup %22919  ;;  %20919 = vmatmul.mubr.msk.f32.vlgmr.msra.gmra.mrb[140].mxu0 %vm4826_vm3, %v25818_v37  ;;  %v5956_v40 = vsub.f32 %v30799_v24, %v5912_v49 }
 0x632   : > { %22929 = vpow2.f32 %v5994_v33  ;;  %v5949_v62 = vsub.f32 %v30798_v27, %v5872_v16  ;;  %22119 = vmatpush3.bf16.msra.mxu0 %v30797_v15  ;;  %20932 = vmatprep.mubr.msk.f32.mxu0 %vm4826_vm3, %v25820_v56  ;;  %v30802_v15 = vld [vmem:[#allocation31_spill] sm:$0xff] }
 0x633   : > { %22931 = vpow2.f32 %v6000_v44  ;;  %22125 = vmatprep.subr.bf16.mxu0 %v30800_v34  ;;  %6028 = vadd.xlane.f32.xlu1 %v6027_v25  ;;  %v6039_v44 = vsel %vm4826_vm3, %v25648_v0, 0.0  ;;  %v6016_v49 = vmul.f32 1.442695, %v5956_v40  ;;  %v30803_v25 = vld [vmem:[#allocation90_spill] sm:$0xff]  ;;  %v6045_v40 = vsel %vm4826_vm3, %v25660_v2, 0.0 }
 0x634   : > { %v25830_v60 = vpop.eup %22921  ;;  %v6002_v14 = vmul.f32 1.442695, %v5949_v62  ;;  %v5769_v45 = vpop.permute.xlu0 %5768  ;;  %v30805_v0 = vld [vmem:[#allocation30_spill] sm:$0xff] }
 0x635   : > { %v5894_v36 = vpop.permute.xlu1 %5893  ;;  %v25834_v33 = vpop.eup %22923  ;;  %20933 = vmatmul.mubr.msk.f32.vlgmr.msra.gmra.mrb[142].mxu0 %vm4826_vm3, %v25830_v60  ;;  %v5930_v16 = vsub.f32 %v30802_v15, %v5769_v45  ;;  %v30806_v15 = vld [vmem:[#allocation92_spill] sm:$0xff] }
 0x636   : > { %22933 = vpow2.f32 %v6002_v14  ;;  %v5953_v8 = vsub.f32 %v30801_v23, %v5894_v36  ;;  %22127 = vmatpush3.bf16.msra.mxu0 %v30800_v34  ;;  %20946 = vmatprep.mubr.msk.f32.mxu0 %vm4826_vm3, %v25834_v33  ;;  %v30804_v34 = vld [vmem:[#allocation52_spill] sm:$0xff] }
 0x637   : > { %22935 = vpow2.f32 %v6008_v58  ;;  %v5964_v62 = vmul.f32 1.442695, %v5930_v16  ;;  %22133 = vmatprep.subr.bf16.mxu0 %v30803_v25  ;;  %6040 = vadd.xlane.f32.xlu1 %v6039_v44 }
 0x638   : > { %v25845_v53 = vpop.eup %22925  ;;  %v6010_v27 = vmul.f32 1.442695, %v5953_v8  ;;  %v5791_v24 = vpop.permute.xlu0 %5790 }
 0x639   : > { %v5916_v14 = vpop.permute.xlu1 %5915  ;;  %v25848_v36 = vpop.eup %22927  ;;  %20947 = vmatmul.mubr.msk.f32.vlgmr.msra.gmra.mrb[144].mxu0 %vm4826_vm3, %v25845_v53  ;;  %v5934_v58 = vsub.f32 %v30805_v0, %v5791_v24  ;;  %v30809_v0 = vld [vmem:[#allocation94_spill] sm:$0xff] }
 0x63a   : > { %22937 = vpow2.f32 %v6010_v27  ;;  %v5957_v45 = vsub.f32 %v30804_v34, %v5916_v14  ;;  %22135 = vmatpush3.bf16.msra.mxu0 %v30803_v25  ;;  %20960 = vmatprep.mubr.msk.f32.mxu0 %vm4826_vm3, %v25848_v36  ;;  %v30808_v14 = vld [vmem:[#allocation44_spill] sm:$0xff] }
 0x63b   : > { %22939 = vpow2.f32 %v5964_v62  ;;  %22141 = vmatprep.subr.bf16.mxu0 %v30806_v15  ;;  %6046 = vadd.xlane.f32.xlu1 %v6045_v40  ;;  %v30807_v62 = vld [vmem:[#allocation24_spill] sm:$0xff]  ;;  %v5972_v2 = vmul.f32 1.442695, %v5934_v58  ;;  %v30810_v58 = vld [vmem:[#allocation38_spill] sm:$0xff] }
 0x63c   : > { %v25859_v23 = vpop.eup %22929  ;;  %22941 = vpow2.f32 %v6016_v49  ;;  %v6018_v8 = vmul.f32 1.442695, %v5957_v45  ;;  %v5813_v44 = vpop.permute.xlu0 %5812  ;;  %v6051_v49 = vsel %vm4826_vm3, %v25672_v10, 0.0 }
 0x63d   : > { %v5773_v16 = vpop.permute.xlu1 %5772  ;;  %v25862_v27 = vpop.eup %22931  ;;  %20961 = vmatmul.mubr.msk.f32.vlgmr.msra.gmra.mrb[146].mxu0 %vm4826_vm3, %v25859_v23  ;;  %v5938_v24 = vsub.f32 %v30808_v14, %v5813_v44  ;;  %v30811_v44 = vld [vmem:[#allocation43_spill] sm:$0xff] }
 0x63e   : > { %22943 = vpow2.f32 %v6018_v8  ;;  %v5931_v25 = vsub.f32 %v30807_v62, %v5773_v16  ;;  %22143 = vmatpush3.bf16.msra.mxu0 %v30806_v15  ;;  %20974 = vmatprep.mubr.msk.f32.mxu0 %vm4826_vm3, %v25862_v27 }
 0x63f   : > { %6052 = vadd.xlane.f32.xlu1 %v6051_v49  ;;  %22149 = vmatprep.subr.bf16.mxu0 %v30809_v0  ;;  %v5980_v10 = vmul.f32 1.442695, %v5938_v24 }
 0x640   : > { %v25873_v34 = vpop.eup %22933  ;;  %v5966_v45 = vmul.f32 1.442695, %v5931_v25  ;;  %v5835_v8 = vpop.permute.xlu0 %5834  ;;  %v6057_v25 = vsel %vm4826_vm3, %v25684_v21, 0.0 }
 0x641   : > { %v5795_v40 = vpop.permute.xlu1 %5794  ;;  %v25876_v16 = vpop.eup %22935  ;;  %20975 = vmatmul.mubr.msk.f32.vlgmr.msra.gmra.mrb[148].mxu0 %vm4826_vm3, %v25873_v34  ;;  %v5942_v62 = vsub.f32 %v30811_v44, %v5835_v8  ;;  %v30814_v44 = vld [vmem:[#allocation42_spill] sm:$0xff] }
 0x642   : > { %22945 = vpow2.f32 %v5966_v45  ;;  %v5935_v15 = vsub.f32 %v30810_v58, %v5795_v40  ;;  %22151 = vmatpush3.bf16.msra.mxu0 %v30809_v0  ;;  %20988 = vmatprep.mubr.msk.f32.mxu0 %vm4826_vm3, %v25876_v16  ;;  %v30812_v45 = vld [vmem:[#allocation96_spill] sm:$0xff]  ;;  %v30813_v0 = vld [vmem:[#allocation37_spill] sm:$0xff] }
 0x643   : > { %22947 = vpow2.f32 %v5972_v2  ;;  %6058 = vadd.xlane.f32.xlu1 %v6057_v25  ;;  %22157 = vmatprep.subr.bf16.mxu0 %v30812_v45 }
 0x644   : > { %v25887_v14 = vpop.eup %22937  ;;  %v5974_v49 = vmul.f32 1.442695, %v5935_v15  ;;  %v5857_v2 = vpop.permute.xlu0 %5856  ;;  %v5988_v15 = vmul.f32 1.442695, %v5942_v62 }
 0x645   : > { %v22940_v40 = vpop.eup %22939  ;;  %v5817_v58 = vpop.permute.xlu1 %5816  ;;  %20989 = vmatmul.mubr.msk.f32.vlgmr.msra.gmra.mrb[150].mxu0 %vm4826_vm3, %v25887_v14  ;;  %v5946_v25 = vsub.f32 %v30814_v44, %v5857_v2  ;;  %v30817_v2 = vld [vmem:[#allocation56_spill] sm:$0xff] }
 0x646   : > { %v25890_v24 = vpop.eup %22941  ;;  %22949 = vpow2.f32 %v5974_v49  ;;  %v5939_v8 = vsub.f32 %v30813_v0, %v5817_v58  ;;  %20911 = vmatprep.mubr.msk.f32.mxu1 %vm4826_vm3, %v22940_v40  ;;  %v6350_v21 = vsel %vm4826_vm3, %v22940_v40, 0.0  ;;  %22159 = vmatpush3.bf16.msra.mxu0 %v30812_v45  ;;  %v30815_v40 = vmov 0.0|0.0  }
 0x647   : > { %22951 = vpow2.f32 %v5980_v10  ;;  %21002 = vmatprep.mubr.msk.f32.mxu0 %vm4826_vm3, %v25890_v24  ;;  %6064 = vadd.xlane.f32.xlu1 %v6063_v43  ;;  %v30816_v10 = vld [vmem:[#allocation36_spill] sm:$0xff]  ;;  %v5996_v45 = vmul.f32 1.442695, %v5946_v25  ;;  %v6069_v43 = vsel %vm4826_vm3, %v25708_v38, 0.0  ;;  %v30819_v25 = vld [vmem:[#allocation55_spill] sm:$0xff] }
 0x648   : > { %v25903_v49 = vpop.eup %22943  ;;  %v5982_v58 = vmul.f32 1.442695, %v5939_v8  ;;  %6351 = vadd.xlane.f32.xlu0 %v6350_v21  ;;  %v5879_v46 = vpop.permute.xlu0 %5878  ;;  %22164 = vmatprep.subr.bf16.mxu0 %v30815_v40 }
 0x649   : > { %v5839_v0 = vpop.permute.xlu1 %5838  ;;  %21003 = vmatmul.mubr.msk.f32.vlgmr.msra.gmra.mrb[152].mxu0 %vm4826_vm3, %v25903_v49  ;;  %v5950_v44 = vsub.f32 %v30817_v2, %v5879_v46  ;;  %v6030_v46 = vsel %vm4826_vm3, %v25626_v9, 0.0  ;;  %v30820_v2 = vld [vmem:[#allocation87_spill] sm:$0xff] }
 0x64a   : > { %22953 = vpow2.f32 %v5982_v58  ;;  %v5943_v62 = vsub.f32 %v30816_v10, %v5839_v0 }
 0x64b   : > { %22955 = vpow2.f32 %v5988_v15  ;;  %6070 = vadd.xlane.f32.xlu1 %v6069_v43  ;;  %v6004_v38 = vmul.f32 1.442695, %v5950_v44  ;;  %v30821_v44 = vld [vmem:[#allocation49_spill] sm:$0xff] }
 0x64c   : > { %v25914_v8 = vpop.eup %22945  ;;  %v5990_v21 = vmul.f32 1.442695, %v5943_v62  ;;  %6025 = vadd.xlane.f32.xlu0 %v6024_v30  ;;  %v5901_v10 = vpop.permute.xlu0 %5900  ;;  %v6075_v30 = vsel %vm4826_vm3, %v25720_v26, 0.0  ;;  %v6033_v26 = vsel %vm4826_vm3, %v25636_v55, 0.0 }
 0x64d   : > { %v25916_v58 = vpop.eup %22947  ;;  %v5861_v0 = vpop.permute.xlu1 %5860  ;;  %20912 = vmatmul.mubr.msk.f32.vlgmr.msra.gmra.mrb[246].mxu1 %vm4826_vm3, %v25914_v8  ;;  %v5954_v62 = vsub.f32 %v30819_v25, %v5901_v10  ;;  %v30823_v25 = vld [vmem:[#allocation89_spill] sm:$0xff] }
 0x64e   : > { %22957 = vpow2.f32 %v5990_v21  ;;  %v5947_v15 = vsub.f32 %v30818_v12, %v5861_v0  ;;  %22115 = vmatpush3.bf16.msra.mxu1 %v30794_v32  ;;  %20925 = vmatprep.mubr.msk.f32.mxu1 %vm4826_vm3, %v25916_v58  ;;  %v30822_v12 = vld [vmem:[#allocation51_spill] sm:$0xff] }
 0x64f   : > { %22959 = vpow2.f32 %v5996_v45  ;;  %22121 = vmatprep.subr.bf16.mxu1 %v30820_v2  ;;  %6076 = vadd.xlane.f32.xlu1 %v6075_v30  ;;  %v6012_v10 = vmul.f32 1.442695, %v5954_v62 }
 0x650   : > { %v25930_v43 = vpop.eup %22949  ;;  %v5998_v21 = vmul.f32 1.442695, %v5947_v15  ;;  %6031 = vadd.xlane.f32.xlu0 %v6030_v46  ;;  %v5923_v45 = vpop.permute.xlu0 %5922  ;;  %v6081_v46 = vsel %vm4826_vm3, %v25732_v59, 0.0 }
 0x651   : > { %v25932_v32 = vpop.eup %22951  ;;  %v5883_v9 = vpop.permute.xlu1 %5882  ;;  %20926 = vmatmul.mubr.msk.f32.vlgmr.msra.gmra.mrb[248].mxu1 %vm4826_vm3, %v25930_v43  ;;  %v5958_v15 = vsub.f32 %v30822_v12, %v5923_v45  ;;  %v6036_v45 = vsel %vm4826_vm3, %v25623_v54, 0.0  ;;  %v6093_v54 = vsel %vm4826_vm3, %v25756_v48, 0.0  ;;  %v6048_v48 = vsel %vm4826_vm3, %v25645_v19, 0.0 }
 0x652   : > { %22961 = vpow2.f32 %v5998_v21  ;;  %v5951_v0 = vsub.f32 %v30821_v44, %v5883_v9  ;;  %22123 = vmatpush3.bf16.msra.mxu1 %v30820_v2  ;;  %20939 = vmatprep.mubr.msk.f32.mxu1 %vm4826_vm3, %v25932_v32  ;;  %v6087_v9 = vsel %vm4826_vm3, %v25744_v57, 0.0  ;;  %v30825_v44 = vld [vmem:[#allocation91_spill] sm:$0xff]  ;;  %v6042_v57 = vsel %vm4826_vm3, %v25634_v20, 0.0 }
 0x653   : > { %22963 = vpow2.f32 %v6004_v38  ;;  %22129 = vmatprep.subr.bf16.mxu1 %v30823_v25  ;;  %6082 = vadd.xlane.f32.xlu1 %v6081_v46  ;;  %v30824_v38 = vld [vmem:[#allocation48_spill] sm:$0xff]  ;;  %v6020_v59 = vmul.f32 1.442695, %v5958_v15  ;;  %v6099_v20 = vsel %vm4826_vm3, %v25768_v18, 0.0  ;;  %v6105_v18 = vsel %vm4826_vm3, %v25780_v17, 0.0 }
 0x654   : > { %v25946_v30 = vpop.eup %22953  ;;  %v6006_v21 = vmul.f32 1.442695, %v5951_v0  ;;  %6034 = vadd.xlane.f32.xlu0 %v6033_v26  ;;  %v6054_v19 = vsel %vm4826_vm3, %v25657_v4, 0.0  ;;  %v6111_v17 = vsel %vm4826_vm3, %v25790_v11, 0.0  ;;  %v6060_v4 = vsel %vm4826_vm3, %v25669_v51, 0.0 }
 0x655   : > { %v25948_v2 = vpop.eup %22955  ;;  %v5905_v55 = vpop.permute.xlu1 %5904  ;;  %20940 = vmatmul.mubr.msk.f32.vlgmr.msra.gmra.mrb[250].mxu1 %vm4826_vm3, %v25946_v30  ;;  %v6066_v11 = vsel %vm4826_vm3, %v25681_v5, 0.0  ;;  %v6353_v51 = vsel %vm4826_vm3, %v25914_v8, 0.0  ;;  %v6359_v5 = vsel %vm4826_vm3, %v25818_v37, 0.0  ;;  %v6084_v8 = vsel %vm4826_vm3, %v25717_v35, 0.0 }
 0x656   : > { %22965 = vpow2.f32 %v6006_v21  ;;  %v5955_v62 = vsub.f32 %v30824_v38, %v5905_v55  ;;  %22131 = vmatpush3.bf16.msra.mxu1 %v30823_v25  ;;  %20953 = vmatprep.mubr.msk.f32.mxu1 %vm4826_vm3, %v25948_v2  ;;  %v30827_v25 = vld [vmem:[#allocation93_spill] sm:$0xff]  ;;  %v6371_v37 = vsel %vm4826_vm3, %v25830_v60, 0.0  ;;  %v6383_v35 = vsel %vm4826_vm3, %v25845_v53, 0.0 }
 0x657   : > { %22967 = vpow2.f32 %v6012_v10  ;;  %22137 = vmatprep.subr.bf16.mxu1 %v30825_v44  ;;  %6088 = vadd.xlane.f32.xlu1 %v6087_v9  ;;  %v30826_v10 = vld [vmem:[#allocation62_spill] sm:$0xff]  ;;  %v6395_v53 = vsel %vm4826_vm3, %v25859_v23, 0.0  ;;  %v6368_v23 = vsel %vm4826_vm3, %v25820_v56, 0.0  ;;  %v6431_v56 = vsel %vm4826_vm3, %v25903_v49, 0.0 }
 0x658   : > { %v25961_v0 = vpop.eup %22957  ;;  %v6014_v26 = vmul.f32 1.442695, %v5955_v62  ;;  %6037 = vadd.xlane.f32.xlu0 %v6036_v45  ;;  %v30828_v62 = vld [vmem:[#allocation95_spill] sm:$0xff]  ;;  %v30829_v45 = vld [vmem:[#allocation97_spill] sm:$0xff]  ;;  %v6404_v49 = vsel %vm4826_vm3, %v25862_v27, 0.0  ;;  %v6428_v27 = vsel %vm4826_vm3, %v25890_v24, 0.0 }
 0x659   : > { %v25963_v12 = vpop.eup %22959  ;;  %v5927_v46 = vpop.permute.xlu1 %5926  ;;  %20954 = vmatmul.mubr.msk.f32.vlgmr.msra.gmra.mrb[252].mxu1 %vm4826_vm3, %v25961_v0  ;;  %v6389_v60 = vsel %vm4826_vm3, %v25961_v0, 0.0  ;;  %v6362_v0 = vsel %vm4826_vm3, %v25916_v58, 0.0  ;;  %v6380_v58 = vsel %vm4826_vm3, %v25834_v33, 0.0 }
 0x65a   : > { %22969 = vpow2.f32 %v6014_v26  ;;  %v5959_v15 = vsub.f32 %v30826_v10, %v5927_v46  ;;  %22139 = vmatpush3.bf16.msra.mxu1 %v30825_v44  ;;  %20967 = vmatprep.mubr.msk.f32.mxu1 %vm4826_vm3, %v25963_v12  ;;  %v30830_v46 = vld [vmem:[#allocation6_spill] sm:$0xff]  ;;  %v6398_v33 = vsel %vm4826_vm3, %v25963_v12, 0.0 }
 0x65b   : > { %22971 = vpow2.f32 %v6020_v59  ;;  %22145 = vmatprep.subr.bf16.mxu1 %v30827_v25  ;;  %6094 = vadd.xlane.f32.xlu1 %v6093_v54  ;;  %v30831_v54 = vld [vmem:[#allocation8_spill] sm:$0xff] }
 0x65c   : > { %v25976_v21 = vpop.eup %22961  ;;  %v6022_v55 = vmul.f32 1.442695, %v5959_v15  ;;  %6043 = vadd.xlane.f32.xlu0 %v6042_v57  ;;  %v6117_v15 = vsel %vm4826_vm3, %v25800_v61, 0.0  ;;  %v6072_v57 = vsel %vm4826_vm3, %v25693_v6, 0.0  ;;  %v6078_v61 = vsel %vm4826_vm3, %v25705_v42, 0.0 }
 0x65d   : > { %v25978_v38 = vpop.eup %22963  ;;  %20968 = vmatmul.mubr.msk.f32.vlgmr.msra.gmra.mrb[254].mxu1 %vm4826_vm3, %v25976_v21  ;;  %v6365_v6 = vsel %vm4826_vm3, %v25930_v43, 0.0  ;;  %v6090_v42 = vsel %vm4826_vm3, %v25729_v41, 0.0  ;;  %v6096_v43 = vsel %vm4826_vm3, %v25741_v63, 0.0  ;;  %v510_v41 = vld [vmem:[%s30105_s8 + $0x8] sm:$0xff]  ;;  %v6108_v63 = vsel %vm4826_vm3, %v25764_v1, 0.0 }
 0x65e   : > { %22973 = vpow2.f32 %v6022_v55  ;;  %22147 = vmatpush3.bf16.msra.mxu1 %v30827_v25  ;;  %20981 = vmatprep.mubr.msk.f32.mxu1 %vm4826_vm3, %v25978_v38  ;;  %v30832_v25 = vld [vmem:[#allocation10_spill] sm:$0xff]  ;;  %v30833_v55 = vld [vmem:[#allocation12_spill] sm:$0xff]  ;;  %v6407_v1 = vsel %vm4826_vm3, %v25873_v34, 0.0 }
 0x65f   : > { %22153 = vmatprep.subr.bf16.mxu1 %v30828_v62  ;;  %6100 = vadd.xlane.f32.xlu1 %v6099_v20  ;;  %v30834_v20 = vld [vmem:[#allocation7_spill] sm:$0xff] }
 0x660   : > { %v25990_v59 = vpop.eup %22965  ;;  %6049 = vadd.xlane.f32.xlu0 %v6048_v48  ;;  %v6377_v48 = vsel %vm4826_vm3, %v25946_v30, 0.0  ;;  %9298 = vmatprep.mubr.f32.mxu0 %v510_v41  ;;  %v6401_v30 = vsel %vm4826_vm3, %v25976_v21, 0.0  ;;  %v6374_v21 = vsel %vm4826_vm3, %v25932_v32, 0.0  ;;  %v6392_v32 = vsel %vm4826_vm3, %v25848_v36, 0.0 }
 0x661   : > { %v25992_v9 = vpop.eup %22967  ;;  %20982 = vmatmul.mubr.msk.f32.vlgmr.msra.gmra.mrb[0].mxu1 %vm4826_vm3, %v25990_v59 }
 0x662   : > { %22155 = vmatpush3.bf16.msra.mxu1 %v30828_v62  ;;  %20995 = vmatprep.mubr.msk.f32.mxu1 %vm4826_vm3, %v25992_v9  ;;  %v6102_v62 = vsel %vm4826_vm3, %v25753_v28, 0.0  ;;  %v6114_v28 = vsel %vm4826_vm3, %v25776_v50, 0.0  ;;  %v6413_v50 = vsel %vm4826_vm3, %v25990_v59, 0.0  ;;  %v6386_v59 = vsel %vm4826_vm3, %v25948_v2, 0.0 }
 0x663   : > { %22161 = vmatprep.subr.bf16.mxu1 %v30829_v45  ;;  %6106 = vadd.xlane.f32.xlu1 %v6105_v18  ;;  %v6356_v18 = vsel %vm4826_vm3, %v25808_v13, 0.0  ;;  %v6419_v13 = vsel %vm4826_vm3, %v25887_v14, 0.0  ;;  %v6410_v2 = vsel %vm4826_vm3, %v25978_v38, 0.0  ;;  %v6422_v36 = vsel %vm4826_vm3, %v25992_v9, 0.0 }
 0x664   : > { %v26004_v44 = vpop.eup %22969  ;;  %6055 = vadd.xlane.f32.xlu0 %v6054_v19  ;;  %v6416_v19 = vsel %vm4826_vm3, %v25876_v16, 0.0 }
 0x665   : > { %v26006_v26 = vpop.eup %22971  ;;  %20996 = vmatmul.mubr.msk.f32.vlgmr.msra.gmra.mrb[2].mxu1 %vm4826_vm3, %v26004_v44  ;;  %v6425_v34 = vsel %vm4826_vm3, %v26004_v44, 0.0 }
 0x666   : > { %22163 = vmatpush3.bf16.msra.mxu1 %v30829_v45  ;;  %21009 = vmatprep.mubr.msk.f32.mxu1 %vm4826_vm3, %v26006_v26  ;;  %v6434_v16 = vsel %vm4826_vm3, %v26006_v26, 0.0 }
 0x667   : > { %22213 = vmatprep.subr.bf16.mxu1 %v30830_v46  ;;  %6112 = vadd.xlane.f32.xlu1 %v6111_v17 }
 0x668   : > { %v26018_v10 = vpop.eup %22973  ;;  %6061 = vadd.xlane.f32.xlu0 %v6060_v4 }
 0x669   : > { %21010 = vmatmul.mubr.msk.f32.vlgmr.msra.gmra.mrb[4].mxu1 %vm4826_vm3, %v26018_v10  ;;  %v6437_v14 = vsel %vm4826_vm3, %v26018_v10, 0.0 }
 0x66a   : > { %22215 = vmatpush3.bf16.msra.mxu1 %v30830_v46 }
 0x66b   : > { %22217 = vmatprep.subr.bf16.mxu1 %v30831_v54  ;;  %6118 = vadd.xlane.f32.xlu1 %v6117_v15 }
 0x66c   : > { %6067 = vadd.xlane.f32.xlu0 %v6066_v11 }
 0x66e   : > { %22219 = vmatpush3.bf16.msra.mxu1 %v30831_v54 }
 0x66f   : > { %22221 = vmatprep.subr.bf16.mxu1 %v30832_v25  ;;  %6354 = vadd.xlane.f32.xlu1 %v6353_v51 }
 0x670   : > { %6073 = vadd.xlane.f32.xlu0 %v6072_v57 }
 0x672   : > { %22223 = vmatpush3.bf16.msra.mxu1 %v30832_v25 }
 0x673   : > { %22225 = vmatprep.subr.bf16.mxu1 %v30833_v55  ;;  %6360 = vadd.xlane.f32.xlu1 %v6359_v5 }
 0x674   : > { %6079 = vadd.xlane.f32.xlu0 %v6078_v61 }
 0x676   : > { %22227 = vmatpush3.bf16.msra.mxu1 %v30833_v55 }
 0x677   : > { %22229 = vmatprep.subr.bf16.mxu1 %v30834_v20  ;;  %6366 = vadd.xlane.f32.xlu1 %v6365_v6 }
 0x678   : > { %6085 = vadd.xlane.f32.xlu0 %v6084_v8 }
 0x67b   : > { %6372 = vadd.xlane.f32.xlu1 %v6371_v37 }
 0x67c   : > { %6091 = vadd.xlane.f32.xlu0 %v6090_v42 }
 0x67f   : > { %6378 = vadd.xlane.f32.xlu1 %v6377_v48 }
 0x680   : > { %6097 = vadd.xlane.f32.xlu0 %v6096_v43 }
 0x683   : > { %6384 = vadd.xlane.f32.xlu1 %v6383_v35 }
 0x684   : > { %6103 = vadd.xlane.f32.xlu0 %v6102_v62 }
 0x687   : > { %6390 = vadd.xlane.f32.xlu1 %v6389_v60 }
 0x688   : > { %6109 = vadd.xlane.f32.xlu0 %v6108_v63 }
 0x68b   : > { %6396 = vadd.xlane.f32.xlu1 %v6395_v53 }
 0x68c   : > { %6115 = vadd.xlane.f32.xlu0 %v6114_v28 }
 0x68f   : > { %6402 = vadd.xlane.f32.xlu1 %v6401_v30 }
 0x690   : > { %6357 = vadd.xlane.f32.xlu0 %v6356_v18 }
 0x693   : > { %6408 = vadd.xlane.f32.xlu1 %v6407_v1 }
 0x694   : > { %6363 = vadd.xlane.f32.xlu0 %v6362_v0 }
 0x697   : > { %6414 = vadd.xlane.f32.xlu1 %v6413_v50 }
 0x698   : > { %6369 = vadd.xlane.f32.xlu0 %v6368_v23 }
 0x69b   : > { %6420 = vadd.xlane.f32.xlu1 %v6419_v13 }
 0x69c   : > { %6375 = vadd.xlane.f32.xlu0 %v6374_v21 }
 0x69f   : > { %6426 = vadd.xlane.f32.xlu1 %v6425_v34 }
 0x6a0   : > { %6381 = vadd.xlane.f32.xlu0 %v6380_v58 }
 0x6a3   : > { %6432 = vadd.xlane.f32.xlu1 %v6431_v56 }
 0x6a4   : > { %6387 = vadd.xlane.f32.xlu0 %v6386_v59 }
 0x6a7   : > { %6438 = vadd.xlane.f32.xlu1 %v6437_v14 }
 0x6a8   : > { %6393 = vadd.xlane.f32.xlu0 %v6392_v32 }
 0x6ac   : > { %6399 = vadd.xlane.f32.xlu0 %v6398_v33 }
 0x6b0   : > { %6405 = vadd.xlane.f32.xlu0 %v6404_v49 }
 0x6b2   : > { %v26122_v25 = vpop.xlane.xlu0 %6345 }
 0x6b3   : > { %v6475_v20 = vrot.slane %v26122_v25, %v25388_v7 }
 0x6b4   : > { %6411 = vadd.xlane.f32.xlu0 %v6410_v2 }
 0x6b8   : > { %6417 = vadd.xlane.f32.xlu0 %v6416_v19 }
 0x6bc   : > { %6423 = vadd.xlane.f32.xlu0 %v6422_v36  ;;  %v26107_v45 = vpop.xlane.xlu1 %6348  ;;  %v20794_v12 = vpop.f32.mrb[122].mxu0 }
 0x6bd   : > { %v6714_v44 = vpop.f32.mrb[123].mxu0 }
 0x6be   : > { %v22165_v17 = vpack.c.bf16 %v20794_v12, %v6714_v44 }
 0x6c0   : > { %6429 = vadd.xlane.f32.xlu0 %v6428_v27  ;;  %22166 = vmatpush1.bf16.msra.mxu0 %v22165_v17  ;;  %v26112_v38 = vpop.xlane.xlu1 %6028 }
 0x6c1   : > { %22167 = vmatprep.subr.bf16.mxu0 %v30815_v40 }
 0x6c4   : > { %6435 = vadd.xlane.f32.xlu0 %v6434_v16  ;;  %v20801_v9 = vpop.f32.mrb[230].mxu1  ;;  %v26116_v10 = vpop.xlane.xlu1 %6040 }
 0x6c5   : > { %v6795_v4 = vpop.f32.mrb[231].mxu1 }
 0x6c6   : > { %v22168_v46 = vpack.c.bf16 %v20801_v9, %v6795_v4 }
 0x6c8   : > { %v20808_v15 = vpop.f32.mrb[124].mxu0  ;;  %22169 = vmatpush1.bf16.msra.mxu0 %v22168_v46  ;;  %v26120_v57 = vpop.xlane.xlu1 %6046 }
 0x6c9   : > { %v6876_v11 = vpop.f32.mrb[125].mxu0  ;;  %22170 = vmatprep.subr.bf16.mxu0 %v30815_v40 }
 0x6ca   : > { %v22171_v24 = vpack.c.bf16 %v20808_v15, %v6876_v11  ;;  %v6159_v15 = vrot.slane %v26112_v38, %v25391_v22  ;;  %v6177_v11 = vrot.slane %v26116_v10, %v25391_v22 }
 0x6cc   : > { %v20815_v54 = vpop.f32.mrb[232].mxu1  ;;  %22172 = vmatpush1.bf16.msra.mxu0 %v22171_v24  ;;  %v26125_v6 = vpop.xlane.xlu1 %6052 }
 0x6cd   : > { %v6957_v51 = vpop.f32.mrb[233].mxu1  ;;  %22173 = vmatprep.subr.bf16.mxu0 %v30815_v40  ;;  %v6195_v38 = vrot.slane %v26125_v6, %v25391_v22 }
 0x6ce   : > { %v22174_v26 = vpack.c.bf16 %v20815_v54, %v6957_v51 }
 0x6d0   : > { %v20822_v5 = vpop.f32.mrb[126].mxu0  ;;  %22175 = vmatpush1.bf16.msra.mxu0 %v22174_v26  ;;  %v26132_v62 = vpop.xlane.xlu1 %6058  ;;  %v6186_v26 = vrot.slane %v26120_v57, %v25391_v22 }
 0x6d1   : > { %v7038_v61 = vpop.f32.mrb[127].mxu0  ;;  %22176 = vmatprep.subr.bf16.mxu0 %v30815_v40 }
 0x6d2   : > { %v22177_v55 = vpack.c.bf16 %v20822_v5, %v7038_v61 }
 0x6d4   : > { %22178 = vmatpush1.bf16.msra.mxu0 %v22177_v55  ;;  %v20829_v37 = vpop.f32.mrb[234].mxu1  ;;  %v26136_v18 = vpop.xlane.xlu1 %6064 }
 0x6d5   : > { %v26127_v8 = vpop.xlane.xlu0 %6351  ;;  %22179 = vmatprep.subr.bf16.mxu0 %v30815_v40  ;;  %v7119_v42 = vpop.f32.mrb[235].mxu1 }
 0x6d6   : > { %v22180_v48 = vpack.c.bf16 %v20829_v37, %v7119_v42  ;;  %v6204_v42 = vrot.slane %v26132_v62, %v25391_v22 }
 0x6d8   : > { %v20836_v35 = vpop.f32.mrb[128].mxu0  ;;  %22181 = vmatpush1.bf16.msra.mxu0 %v22180_v48  ;;  %v26139_v34 = vpop.xlane.xlu1 %6070 }
 0x6d9   : > { %v26130_v43 = vpop.xlane.xlu0 %6025  ;;  %v7200_v41 = vpop.f32.mrb[129].mxu0  ;;  %22182 = vmatprep.subr.bf16.mxu0 %v30815_v40 }
 0x6da   : > { %v22183_v60 = vpack.c.bf16 %v20836_v35, %v7200_v41  ;;  %v6155_v16 = vrot.slane %v26130_v43, %v25388_v7  ;;  %v6213_v41 = vrot.slane %v26136_v18, %v25391_v22  ;;  %v6222_v18 = vrot.slane %v26139_v34, %v25391_v22 }
 0x6dc   : > { %v20843_v53 = vpop.f32.mrb[236].mxu1  ;;  %22184 = vmatpush1.bf16.msra.mxu0 %v22183_v60  ;;  %v26143_v49 = vpop.xlane.xlu1 %6076  ;;  %v6160_v48 = vsel %vm4966_vm4, %v6159_v15, %v6155_v16 }
 0x6dd   : > { %v6032_v63 = vpop.xlane.xlu0 %6031  ;;  %v7281_v28 = vpop.f32.mrb[237].mxu1  ;;  %22185 = vmatprep.subr.bf16.mxu0 %v30815_v40 }
 0x6de   : > { %v22186_v30 = vpack.c.bf16 %v20843_v53, %v7281_v28  ;;  %v6164_v9 = vrot.slane %v6032_v63, %v25388_v7 }
 0x6e0   : > { %v20850_v0 = vpop.f32.mrb[130].mxu0  ;;  %22187 = vmatpush1.bf16.msra.mxu0 %v22186_v30  ;;  %v26156_v24 = vpop.xlane.xlu1 %6082 }
 0x6e1   : > { %v6035_v1 = vpop.xlane.xlu0 %6034  ;;  %v7362_v50 = vpop.f32.mrb[131].mxu0  ;;  %22188 = vmatprep.subr.bf16.mxu0 %v30815_v40 }
 0x6e2   : > { %v22189_v23 = vpack.c.bf16 %v20850_v0, %v7362_v50  ;;  %v6168_v12 = vrot.slane %v6035_v1, %v25391_v22 }
 0x6e4   : > { %v20857_v21 = vpop.f32.mrb[238].mxu1  ;;  %22190 = vmatpush1.bf16.msra.mxu0 %v22189_v23  ;;  %v6169_v5 = vsel %vm4966_vm4, %v6168_v12, %v6164_v9  ;;  %v26179_v30 = vpop.xlane.xlu1 %6088  ;;  %v512_v9 = vld [vmem:[%s30105_s8 + $0x18] sm:$0xff] }
 0x6e5   : > { %v6038_v13 = vpop.xlane.xlu0 %6037  ;;  %v7443_v58 = vpop.f32.mrb[239].mxu1  ;;  %22191 = vmatprep.subr.bf16.mxu0 %v30815_v40  ;;  %v6296_v60 = vsel %vm5103_vm5, %v6169_v5, %v6160_v48  ;;  %v515_v48 = vld [vmem:[%s30105_s8 + $0x30] sm:$0xff] }
 0x6e6   : > { %v22192_v56 = vpack.c.bf16 %v20857_v21, %v7443_v58  ;;  %v6173_v17 = vrot.slane %v6038_v13, %v25388_v7 }
 0x6e8   : > { %v20864_v14 = vpop.f32.mrb[132].mxu0  ;;  %22193 = vmatpush1.bf16.msra.mxu0 %v22192_v56  ;;  %v6178_v10 = vsel %vm4966_vm4, %v6177_v11, %v6173_v17  ;;  %v511_v11 = vld [vmem:[%s30105_s8 + $0x10] sm:$0xff] }
 0x6e9   : > { %v6044_v59 = vpop.xlane.xlu0 %6043  ;;  %v7524_v32 = vpop.f32.mrb[133].mxu0  ;;  %22194 = vmatprep.subr.bf16.mxu0 %v30815_v40  ;;  %v6297_v62 = vsel %vm5105_vm6, %v6178_v10, %v6296_v60  ;;  %v516_v10 = vld [vmem:[%s30105_s8 + $0x38] sm:$0xff] }
 0x6ea   : > { %v22195_v33 = vpack.c.bf16 %v20864_v14, %v7524_v32  ;;  %v6182_v4 = vrot.slane %v6044_v59, %v25388_v7 }
 0x6ec   : > { %v20871_v19 = vpop.f32.mrb[240].mxu1  ;;  %22196 = vmatpush1.bf16.msra.mxu0 %v22195_v33  ;;  %v6187_v43 = vsel %vm4966_vm4, %v6186_v26, %v6182_v4 }
 0x6ed   : > { %v6050_v2 = vpop.xlane.xlu0 %6049  ;;  %v7605_v36 = vpop.f32.mrb[241].mxu1  ;;  %22197 = vmatprep.subr.bf16.mxu0 %v30815_v40  ;;  %v6298_v1 = vsel %vm5107_vm7, %v6187_v43, %v6297_v62 }
 0x6ee   : > { %v22198_v44 = vpack.c.bf16 %v20871_v19, %v7605_v36  ;;  %v6191_v54 = vrot.slane %v6050_v2, %v25388_v7  ;;  %v6095_v19 = vpop.xlane.xlu1 %6094 }
 0x6f0   : > { %v20878_v46 = vpop.f32.mrb[134].mxu0  ;;  %22199 = vmatpush1.bf16.msra.mxu0 %v22198_v44  ;;  %v6196_v6 = vsel %vm4966_vm4, %v6195_v38, %v6191_v54 }
 0x6f1   : > { %v6056_v27 = vpop.xlane.xlu0 %6055  ;;  %v7686_v51 = vpop.f32.mrb[135].mxu0  ;;  %22200 = vmatprep.subr.bf16.mxu0 %v30815_v40  ;;  %v6299_v23 = vsel %vm5109_vm8, %v6196_v6, %v6298_v1  ;;  %v517_v1 = vld [vmem:[%s30105_s8 + $0x40] sm:$0xff] }
 0x6f2   : > { %v6200_v61 = vrot.slane %v6056_v27, %v25388_v7  ;;  %v22201_v55 = vpack.c.bf16 %v20878_v46, %v7686_v51  ;;  %v509_v27 = vld [vmem:[%s30105_s8] sm:$0xff]  ;;  %v6101_v4 = vpop.xlane.xlu1 %6100  ;;  %v514_v51 = vld [vmem:[%s30105_s8 + $0x28] sm:$0xff] }
 0x6f4   : > { %v20885_v35 = vpop.f32.mrb[242].mxu1  ;;  %22202 = vmatpush1.bf16.msra.mxu0 %v22201_v55  ;;  %v6205_v53 = vsel %vm4966_vm4, %v6204_v42, %v6200_v61  ;;  %v513_v61 = vld [vmem:[%s30105_s8 + $0x20] sm:$0xff] }
 0x6f5   : > { %v6062_v37 = vpop.xlane.xlu0 %6061  ;;  %v7767_v63 = vpop.f32.mrb[243].mxu1  ;;  %22203 = vmatprep.subr.bf16.mxu0 %v30815_v40  ;;  %v6300_v56 = vsel %vm5111_vm9, %v6205_v53, %v6299_v23  ;;  %v6231_v23 = vrot.slane %v26143_v49, %v25391_v22 }
 0x6f6   : > { %v6209_v57 = vrot.slane %v6062_v37, %v25388_v7  ;;  %v22204_v28 = vpack.c.bf16 %v20885_v35, %v7767_v63  ;;  %v6107_v55 = vpop.xlane.xlu1 %6106  ;;  %v6240_v63 = vrot.slane %v26156_v24, %v25391_v22  ;;  %v520_v24 = vld [vmem:[%s30105_s8 + $0x58] sm:$0xff] }
 0x6f8   : > { %v6214_v0 = vsel %vm4966_vm4, %v6213_v41, %v6209_v57  ;;  %v20892_v21 = vpop.f32.mrb[136].mxu0  ;;  %22205 = vmatpush1.bf16.msra.mxu0 %v22204_v28  ;;  %v518_v57 = vld [vmem:[%s30105_s8 + $0x48] sm:$0xff] }
 0x6f9   : > { %v6068_v50 = vpop.xlane.xlu0 %6067  ;;  %v7848_v58 = vpop.f32.mrb[137].mxu0  ;;  %22206 = vmatprep.subr.bf16.mxu0 %v30815_v40  ;;  %v6301_v32 = vsel %vm5113_vm10, %v6214_v0, %v6300_v56  ;;  %v6249_v0 = vrot.slane %v26179_v30, %v25391_v22  ;;  %v6267_v56 = vrot.slane %v6101_v4, %v25391_v22 }
 0x6fa   : > { %v6218_v13 = vrot.slane %v6068_v50, %v25388_v7  ;;  %v22207_v59 = vpack.c.bf16 %v20892_v21, %v7848_v58  ;;  %v6113_v41 = vpop.xlane.xlu1 %6112 }
 0x6fc   : > { %v6223_v14 = vsel %vm4966_vm4, %v6222_v18, %v6218_v13  ;;  %v20899_v2 = vpop.f32.mrb[244].mxu1  ;;  %22208 = vmatpush1.bf16.msra.mxu0 %v22207_v59  ;;  %v6258_v13 = vrot.slane %v6095_v19, %v25391_v22  ;;  %v6285_v19 = vrot.slane %v6113_v41, %v25391_v22  ;;  %v524_v41 = vld [vmem:[%s30105_s8 + $0x78] sm:$0xff] }
 0x6fd   : > { %v26191_v33 = vpop.xlane.xlu0 %6073  ;;  %v6302_v34 = vsel %vm5115_vm11, %v6223_v14, %v6301_v32  ;;  %v7929_v36 = vpop.f32.mrb[245].mxu1  ;;  %22209 = vmatprep.subr.bf16.mxu0 %v30815_v40  ;;  %v6276_v14 = vrot.slane %v6107_v55, %v25391_v22 }
 0x6fe   : > { %6312 = vxpose.xlu0.b32.start [1/2] (short) (narrow) %v6302_v34, 16  ;;  %v22210_v12 = vpack.c.bf16 %v20899_v2, %v7929_v36  ;;  %v6227_v62 = vrot.slane %v26191_v33, %v25388_v7  ;;  %v519_v2 = vld [vmem:[%s30105_s8 + $0x50] sm:$0xff]  ;;  %v6119_v36 = vpop.xlane.xlu1 %6118 }
 0x700   : > { %v26195_v17 = vpop.f32.mrb[138].mxu0  ;;  %22211 = vmatpush1.bf16.msra.mxu0 %v22210_v12  ;;  %v6232_v32 = vsel %vm4966_vm4, %v6231_v23, %v6227_v62  ;;  %v525_v23 = vld [vmem:[%s30105_s8 + $0x80] sm:$0xff] }
 0x701   : > { %v6080_v44 = vpop.xlane.xlu0 %6079  ;;  %v26200_v16 = vpop.f32.mrb[139].mxu0  ;;  %22260 = vmatprep.subr.bf16.mxu0 %v30815_v40  ;;  %v563_v40 = vld [vmem:[%s30105_s8 + $0x1b0] sm:$0xff] }
 0x702   : > { %v6236_v35 = vrot.slane %v6080_v44, %v25388_v7 }
 0x703   : > { %9299 = vmatmul.mubr.f32.vlgmr.msra.gmra.mrb[154].mxu0 %v509_v27 }
 0x704   : > { %v26206_v15 = vpop.f32.mrb[140].mxu0  ;;  %9303 = vmatprep.mubr.f32.mxu0 %v512_v9  ;;  %v6241_v21 = vsel %vm4966_vm4, %v6240_v63, %v6236_v35  ;;  %v522_v9 = vld [vmem:[%s30105_s8 + $0x68] sm:$0xff] }
 0x705   : > { %v6086_v46 = vpop.xlane.xlu0 %6085  ;;  %v26211_v54 = vpop.f32.mrb[141].mxu0  ;;  %v6303_v12 = vsel %vm5103_vm5, %v6241_v21, %v6232_v32  ;;  %v529_v32 = vld [vmem:[%s30105_s8 + $0xa0] sm:$0xff] }
 0x706   : > { %v6245_v60 = vrot.slane %v6086_v46, %v25388_v7 }
 0x707   : > { %9304 = vmatmul.mubr.f32.gmra.mrb[156].mxu0 %v511_v11 }
 0x708   : > { %v26216_v5 = vpop.f32.mrb[142].mxu0  ;;  %9308 = vmatprep.mubr.f32.mxu0 %v514_v51  ;;  %v6250_v30 = vsel %vm4966_vm4, %v6249_v0, %v6245_v60  ;;  %v526_v0 = vld [vmem:[%s30105_s8 + $0x88] sm:$0xff] }
 0x709   : > { %v6092_v26 = vpop.xlane.xlu0 %6091  ;;  %v26221_v38 = vpop.f32.mrb[143].mxu0  ;;  %v6304_v4 = vsel %vm5105_vm6, %v6250_v30, %v6303_v12  ;;  %v530_v30 = vld [vmem:[%s30105_s8 + $0xa8] sm:$0xff] }
 0x70a   : > { %v6254_v53 = vrot.slane %v6092_v26, %v25388_v7 }
 0x70b   : > { %9309 = vmatmul.mubr.f32.gmra.mrb[158].mxu0 %v513_v61  ;;  %v6294_v61 = vrot.slane %v6119_v36, %v25391_v22  ;;  %v534_v36 = vld [vmem:[%s30105_s8 + $0xc8] sm:$0xff] }
 0x70c   : > { %v26226_v42 = vpop.f32.mrb[144].mxu0  ;;  %9313 = vmatprep.mubr.f32.mxu0 %v516_v10  ;;  %v6259_v33 = vsel %vm4966_vm4, %v6258_v13, %v6254_v53  ;;  %v523_v53 = vld [vmem:[%s30105_s8 + $0x70] sm:$0xff]  ;;  %v528_v13 = vld [vmem:[%s30105_s8 + $0x98] sm:$0xff] }
 0x70d   : > { %v6098_v37 = vpop.xlane.xlu0 %6097  ;;  %v26231_v43 = vpop.f32.mrb[145].mxu0  ;;  %v6305_v11 = vsel %vm5107_vm7, %v6259_v33, %v6304_v4  ;;  %v532_v33 = vld [vmem:[%s30105_s8 + $0xb8] sm:$0xff] }
 0x70e   : > { %v6263_v50 = vrot.slane %v6098_v37, %v25388_v7  ;;  %v536_v4 = vld [vmem:[%s30105_s8 + $0xd8] sm:$0xff] }
 0x70f   : > { %9314 = vmatmul.mubr.f32.gmra.mrb[160].mxu0 %v515_v48  ;;  %v521_v48 = vld [vmem:[%s30105_s8 + $0x60] sm:$0xff] }
 0x710   : > { %v26243_v28 = vpop.f32.mrb[146].mxu0  ;;  %9318 = vmatprep.mubr.f32.mxu0 %v518_v57  ;;  %v6268_v44 = vsel %vm4966_vm4, %v6267_v56, %v6263_v50  ;;  %v527_v56 = vld [vmem:[%s30105_s8 + $0x90] sm:$0xff] }
 0x711   : > { %v6104_v6 = vpop.xlane.xlu0 %6103  ;;  %v26251_v18 = vpop.f32.mrb[147].mxu0  ;;  %v6306_v55 = vsel %vm5109_vm8, %v6268_v44, %v6305_v11 }
 0x712   : > { %v6272_v58 = vrot.slane %v6104_v6, %v25388_v7 }
 0x713   : > { %9319 = vmatmul.mubr.f32.gmra.mrb[162].mxu0 %v517_v1 }
 0x714   : > { %v26267_v34 = vpop.f32.mrb[148].mxu0  ;;  %9323 = vmatprep.mubr.f32.mxu0 %v520_v24  ;;  %v6277_v46 = vsel %vm4966_vm4, %v6276_v14, %v6272_v58 }
 0x715   : > { %v6110_v59 = vpop.xlane.xlu0 %6109  ;;  %30835 = vst [vmem:[#allocation75_spill] sm:$0xff] %v26267_v34  ;;  %v26275_v27 = vpop.f32.mrb[149].mxu0  ;;  %v6307_v35 = vsel %vm5111_vm9, %v6277_v46, %v6306_v55 }
 0x716   : > { %v6281_v49 = vrot.slane %v6110_v59, %v25388_v7  ;;  %30836 = vst [vmem:[#allocation66_spill] sm:$0xff] %v26275_v27 }
 0x717   : > { %9324 = vmatmul.mubr.f32.gmra.mrb[164].mxu0 %v519_v2 }
 0x718   : > { %v6286_v51 = vsel %vm4966_vm4, %v6285_v19, %v6281_v49  ;;  %v26287_v37 = vpop.f32.mrb[150].mxu0  ;;  %9328 = vmatprep.mubr.f32.mxu0 %v522_v9  ;;  %v531_v19 = vld [vmem:[%s30105_s8 + $0xb0] sm:$0xff]  ;;  %v533_v9 = vld [vmem:[%s30105_s8 + $0xc0] sm:$0xff] }
 0x719   : > { %v6116_v26 = vpop.xlane.xlu0 %6115  ;;  %30837 = vst [vmem:[#allocation80_spill] sm:$0xff] %v26287_v37  ;;  %v26292_v57 = vpop.f32.mrb[151].mxu0  ;;  %v6308_v6 = vsel %vm5113_vm10, %v6286_v51, %v6307_v35  ;;  %v535_v51 = vld [vmem:[%s30105_s8 + $0xd0] sm:$0xff] }
 0x71a   : > { %v6290_v10 = vrot.slane %v6116_v26, %v25388_v7  ;;  %30838 = vst [vmem:[#allocation76_spill] sm:$0xff] %v26292_v57  ;;  %v538_v26 = vld [vmem:[%s30105_s8 + $0xe8] sm:$0xff] }
 0x71b   : > { %9329 = vmatmul.mubr.f32.gmra.mrb[166].mxu0 %v521_v48  ;;  %v540_v48 = vld [vmem:[%s30105_s8 + $0xf8] sm:$0xff] }
 0x71c   : > { %v6295_v60 = vsel %vm4966_vm4, %v6294_v61, %v6290_v10  ;;  %v26301_v62 = vpop.f32.mrb[152].mxu0  ;;  %9333 = vmatprep.mubr.f32.mxu0 %v524_v41  ;;  %v537_v10 = vld [vmem:[%s30105_s8 + $0xe0] sm:$0xff] }
 0x71d   : > { %v6309_v63 = vsel %vm5115_vm11, %v6295_v60, %v6308_v6  ;;  %30839 = vst [vmem:[#allocation67_spill] sm:$0xff] %v26301_v62  ;;  %v26306_v1 = vpop.f32.mrb[153].mxu0  ;;  %v539_v60 = vld [vmem:[%s30105_s8 + $0xf0] sm:$0xff]  ;;  %v542_v6 = vld [vmem:[%s30105_s8 + $0x108] sm:$0xff] }
 0x71e   : > { %6313 = vxpose.xlu0.b32.end [2/2] (short) (narrow) %v6309_v63, 16  ;;  %30840 = vst [vmem:[#allocation83_spill] sm:$0xff] %v26306_v1  ;;  %v26391_v63 = vpop.xlane.xlu1 %6354  ;;  %v567_v62 = vld [vmem:[%s30105_s8 + $0x1d0] sm:$0xff]  ;;  %v569_v1 = vld [vmem:[%s30105_s8 + $0x1e0] sm:$0xff] }
 0x71f   : > { %9334 = vmatmul.mubr.f32.gmra.mrb[168].mxu0 %v523_v53  ;;  %v541_v53 = vld [vmem:[%s30105_s8 + $0x100] sm:$0xff]  ;;  %v6488_v57 = vrot.slane %v26391_v63, %v25391_v22 }
 0x720   : > { %v26311_v50 = vpop.f32.mrb[246].mxu1  ;;  %9338 = vmatprep.mubr.f32.mxu0 %v526_v0  ;;  %v544_v0 = vld [vmem:[%s30105_s8 + $0x118] sm:$0xff] }
 0x721   : > { %v26313_v24 = vpop.f32.mrb[247].mxu1 }
 0x723   : > { %9339 = vmatmul.mubr.f32.gmra.mrb[170].mxu0 %v525_v23  ;;  %v26399_v23 = vpop.xlane.xlu0 %6357 }
 0x724   : > { %v26321_v21 = vpop.f32.mrb[248].mxu1  ;;  %9343 = vmatprep.mubr.f32.mxu0 %v528_v13  ;;  %v543_v13 = vld [vmem:[%s30105_s8 + $0x110] sm:$0xff] }
 0x725   : > { %v26323_v58 = vpop.f32.mrb[249].mxu1 }
 0x727   : > { %9344 = vmatmul.mubr.f32.gmra.mrb[172].mxu0 %v527_v56  ;;  %v546_v56 = vld [vmem:[%s30105_s8 + $0x128] sm:$0xff] }
 0x728   : > { %v26331_v59 = vpop.f32.mrb[250].mxu1  ;;  %9348 = vmatprep.mubr.f32.mxu0 %v530_v30  ;;  %v26407_v30 = vpop.xlane.xlu1 %6360 }
 0x729   : > { %v26333_v14 = vpop.f32.mrb[251].mxu1  ;;  %v6497_v63 = vrot.slane %v26407_v30, %v25391_v22 }
 0x72b   : > { %9349 = vmatmul.mubr.f32.gmra.mrb[174].mxu0 %v529_v32  ;;  %v545_v32 = vld [vmem:[%s30105_s8 + $0x120] sm:$0xff] }
 0x72c   : > { %v26341_v49 = vpop.f32.mrb[252].mxu1  ;;  %9353 = vmatprep.mubr.f32.mxu0 %v532_v33  ;;  %v548_v33 = vld [vmem:[%s30105_s8 + $0x138] sm:$0xff] }
 0x72d   : > { %v26343_v2 = vpop.f32.mrb[253].mxu1 }
 0x72f   : > { %9354 = vmatmul.mubr.f32.gmra.mrb[176].mxu0 %v531_v19  ;;  %v26415_v19 = vpop.xlane.xlu0 %6363 }
 0x730   : > { %v26351_v12 = vpop.f32.mrb[254].mxu1  ;;  %9358 = vmatprep.mubr.f32.mxu0 %v534_v36  ;;  %v26417_v36 = vpop.xlane.xlu1 %6366  ;;  %v6502_v34 = vrot.slane %v26415_v19, %v25388_v7 }
 0x731   : > { %30841 = vst [vmem:[#allocation77_spill] sm:$0xff] %v26351_v12  ;;  %v26353_v44 = vpop.f32.mrb[255].mxu1  ;;  %v6506_v27 = vrot.slane %v26417_v36, %v25391_v22 }
 0x733   : > { %9359 = vmatmul.mubr.f32.gmra.mrb[178].mxu0 %v533_v9  ;;  %v547_v9 = vld [vmem:[%s30105_s8 + $0x130] sm:$0xff]  ;;  %v6507_v19 = vsel %vm4966_vm4, %v6506_v27, %v6502_v34 }
 0x734   : > { %v26361_v46 = vpop.f32.mrb[0].mxu1  ;;  %9363 = vmatprep.mubr.f32.mxu0 %v536_v4  ;;  %v550_v4 = vld [vmem:[%s30105_s8 + $0x148] sm:$0xff] }
 0x735   : > { %30842 = vst [vmem:[#allocation68_spill] sm:$0xff] %v26361_v46  ;;  %v26363_v11 = vpop.f32.mrb[1].mxu1  ;;  %v6484_v46 = vrot.slane %v26127_v8, %v25388_v7 }
 0x736   : > { %30843 = vst [vmem:[#allocation19_spill] sm:$0xff] %v26363_v11  ;;  %v6493_v11 = vrot.slane %v26399_v23, %v25388_v7 }
 0x737   : > { %9364 = vmatmul.mubr.f32.gmra.mrb[180].mxu0 %v535_v51  ;;  %v26425_v51 = vpop.xlane.xlu0 %6369 }
 0x738   : > { %v26371_v61 = vpop.f32.mrb[2].mxu1  ;;  %9368 = vmatprep.mubr.f32.mxu0 %v538_v26  ;;  %v549_v26 = vld [vmem:[%s30105_s8 + $0x140] sm:$0xff] }
 0x739   : > { %30844 = vst [vmem:[#allocation78_spill] sm:$0xff] %v26371_v61  ;;  %v26373_v55 = vpop.f32.mrb[3].mxu1 }
 0x73a   : > { %30845 = vst [vmem:[#allocation69_spill] sm:$0xff] %v26373_v55  ;;  %v571_v55 = vld [vmem:[%s30105_s8 + $0x1f0] sm:$0xff] }
 0x73b   : > { %9369 = vmatmul.mubr.f32.gmra.mrb[182].mxu0 %v537_v10  ;;  %v552_v10 = vld [vmem:[%s30105_s8 + $0x158] sm:$0xff] }
 0x73c   : > { %v26381_v35 = vpop.f32.mrb[4].mxu1  ;;  %9373 = vmatprep.mubr.f32.mxu0 %v540_v48  ;;  %v26433_v48 = vpop.xlane.xlu1 %6372 }
 0x73d   : > { %30846 = vst [vmem:[#allocation26_spill] sm:$0xff] %v26381_v35  ;;  %v26383_v41 = vpop.f32.mrb[5].mxu1  ;;  %v6515_v25 = vrot.slane %v26433_v48, %v25391_v22 }
 0x73e   : > { %30847 = vst [vmem:[#allocation81_spill] sm:$0xff] %v26383_v41  ;;  %v565_v41 = vld [vmem:[%s30105_s8 + $0x1c0] sm:$0xff] }
 0x73f   : > { %9374 = vmatmul.mubr.f32.gmra.mrb[184].mxu0 %v539_v60  ;;  %v551_v60 = vld [vmem:[%s30105_s8 + $0x150] sm:$0xff] }
 0x740   : > { %9378 = vmatprep.mubr.f32.mxu0 %v542_v6  ;;  %v554_v6 = vld [vmem:[%s30105_s8 + $0x168] sm:$0xff] }
 0x743   : > { %9379 = vmatmul.mubr.f32.gmra.mrb[186].mxu0 %v541_v53  ;;  %v26441_v53 = vpop.xlane.xlu0 %6375 }
 0x744   : > { %9383 = vmatprep.mubr.f32.mxu0 %v544_v0  ;;  %v26443_v0 = vpop.xlane.xlu1 %6378 }
 0x747   : > { %9384 = vmatmul.mubr.f32.gmra.mrb[188].mxu0 %v543_v13  ;;  %v553_v13 = vld [vmem:[%s30105_s8 + $0x160] sm:$0xff] }
 0x748   : > { %9388 = vmatprep.mubr.f32.mxu0 %v546_v56  ;;  %v556_v56 = vld [vmem:[%s30105_s8 + $0x178] sm:$0xff] }
 0x74b   : > { %9389 = vmatmul.mubr.f32.gmra.mrb[190].mxu0 %v545_v32  ;;  %v26451_v32 = vpop.xlane.xlu0 %6381 }
 0x74c   : > { %9393 = vmatprep.mubr.f32.mxu0 %v548_v33  ;;  %v555_v33 = vld [vmem:[%s30105_s8 + $0x170] sm:$0xff]  ;;  %v6529_v34 = vrot.slane %v26451_v32, %v25388_v7 }
 0x74f   : > { %9394 = vmatmul.mubr.f32.gmra.mrb[192].mxu0 %v547_v9  ;;  %v558_v9 = vld [vmem:[%s30105_s8 + $0x188] sm:$0xff] }
 0x750   : > { %9398 = vmatprep.mubr.f32.mxu0 %v550_v4  ;;  %v26459_v4 = vpop.xlane.xlu1 %6384 }
 0x751   : > { %v6533_v30 = vrot.slane %v26459_v4, %v25391_v22 }
 0x753   : > { %9399 = vmatmul.mubr.f32.gmra.mrb[194].mxu0 %v549_v26  ;;  %v557_v26 = vld [vmem:[%s30105_s8 + $0x180] sm:$0xff] }
 0x754   : > { %9403 = vmatprep.mubr.f32.mxu0 %v552_v10  ;;  %v560_v10 = vld [vmem:[%s30105_s8 + $0x198] sm:$0xff] }
 0x757   : > { %9404 = vmatmul.mubr.f32.gmra.mrb[196].mxu0 %v551_v60  ;;  %v26467_v60 = vpop.xlane.xlu0 %6387 }
 0x758   : > { %9408 = vmatprep.mubr.f32.mxu0 %v554_v6  ;;  %v26469_v6 = vpop.xlane.xlu1 %6390 }
 0x75b   : > { %9409 = vmatmul.mubr.f32.gmra.mrb[198].mxu0 %v553_v13  ;;  %v559_v13 = vld [vmem:[%s30105_s8 + $0x190] sm:$0xff] }
 0x75c   : > { %9413 = vmatprep.mubr.f32.mxu0 %v556_v56  ;;  %v562_v56 = vld [vmem:[%s30105_s8 + $0x1a8] sm:$0xff] }
 0x75f   : > { %9414 = vmatmul.mubr.f32.gmra.mrb[200].mxu0 %v555_v33  ;;  %v26477_v33 = vpop.xlane.xlu0 %6393 }
 0x760   : > { %9418 = vmatprep.mubr.f32.mxu0 %v558_v9  ;;  %v561_v9 = vld [vmem:[%s30105_s8 + $0x1a0] sm:$0xff] }
 0x763   : > { %9419 = vmatmul.mubr.f32.gmra.mrb[202].mxu0 %v557_v26  ;;  %v564_v26 = vld [vmem:[%s30105_s8 + $0x1b8] sm:$0xff] }
 0x764   : > { %9423 = vmatprep.mubr.f32.mxu0 %v560_v10  ;;  %v26485_v10 = vpop.xlane.xlu1 %6396 }
 0x767   : > { %9424 = vmatmul.mubr.f32.gmra.mrb[204].mxu0 %v559_v13  ;;  %v566_v13 = vld [vmem:[%s30105_s8 + $0x1c8] sm:$0xff] }
 0x768   : > { %9428 = vmatprep.mubr.f32.mxu0 %v562_v56  ;;  %v26493_v56 = vpop.xlane.xlu0 %6399  ;;  %v26495_v35 = vpop.xlane.xlu1 %6402 }
 0x769   : > { %v6556_v48 = vrot.slane %v26493_v56, %v25388_v7 }
 0x76b   : > { %9429 = vmatmul.mubr.f32.gmra.mrb[206].mxu0 %v561_v9  ;;  %v568_v9 = vld [vmem:[%s30105_s8 + $0x1d8] sm:$0xff] }
 0x76c   : > { %9433 = vmatprep.mubr.f32.mxu0 %v564_v26  ;;  %v26503_v26 = vpop.xlane.xlu0 %6405 }
 0x76d   : > { %v6565_v27 = vrot.slane %v26503_v26, %v25388_v7 }
 0x76f   : > { %9434 = vmatmul.mubr.f32.gmra.mrb[208].mxu0 %v563_v40  ;;  %v570_v40 = vld [vmem:[%s30105_s8 + $0x1e8] sm:$0xff] }
 0x770   : > { %9438 = vmatprep.mubr.f32.mxu0 %v566_v13  ;;  %v26511_v13 = vpop.xlane.xlu1 %6408 }
 0x773   : > { %9439 = vmatmul.mubr.f32.gmra.mrb[210].mxu0 %v565_v41  ;;  %v572_v41 = vld [vmem:[%s30105_s8 + $0x1f8] sm:$0xff] }
 0x774   : > { %9443 = vmatprep.mubr.f32.mxu0 %v568_v9  ;;  %v6412_v9 = vpop.xlane.xlu0 %6411  ;;  %v6415_v61 = vpop.xlane.xlu1 %6414 }
 0x775   : > { %v6574_v56 = vrot.slane %v6412_v9, %v25388_v7 }
 0x777   : > { %9444 = vmatmul.mubr.f32.gmra.mrb[212].mxu0 %v567_v62  ;;  %v26525_v62 = vld [vmem:[%s30104_s7 + $0x8] sm:$0xff] }
 0x778   : > { %9448 = vmatprep.mubr.f32.mxu0 %v570_v40  ;;  %v6418_v37 = vpop.xlane.xlu0 %6417  ;;  %30848 = vst [vmem:[#allocation70_spill] sm:$0xff] %v26525_v62  ;;  %v6421_v40 = vpop.xlane.xlu1 %6420 }
 0x77b   : > { %9449 = vmatmul.mubr.f32.gmra.mrb[214].mxu0 %v569_v1 }
 0x77c   : > { %9453 = vmatprep.mubr.f32.mxu0 %v572_v41  ;;  %v6424_v1 = vpop.xlane.xlu0 %6423  ;;  %v6479_v41 = vrot.slane %v26107_v45, %v25391_v22  ;;  %v6511_v45 = vrot.slane %v26425_v51, %v25388_v7  ;;  %v6551_v51 = vrot.slane %v26485_v10, %v25391_v22  ;;  %v6538_v10 = vrot.slane %v26467_v60, %v25388_v7 }
 0x77e   : > { %v6480_v8 = vsel %vm4966_vm4, %v6479_v41, %v6475_v20  ;;  %v6542_v20 = vrot.slane %v26469_v6, %v25391_v22  ;;  %v6583_v41 = vrot.slane %v6418_v37, %v25388_v7 }
 0x77f   : > { %9454 = vmatmul.mubr.f32.gmra.mrb[216].mxu0 %v571_v55  ;;  %v6427_v55 = vpop.xlane.xlu1 %6426 }
 0x780   : > { %10599 = vmatprep.mubr.f32.mxu0 %v26525_v62  ;;  %v6489_v62 = vsel %vm4966_vm4, %v6488_v57, %v6484_v46  ;;  %v6430_v23 = vpop.xlane.xlu0 %6429  ;;  %v6498_v57 = vsel %vm4966_vm4, %v6497_v63, %v6493_v11  ;;  %v6524_v46 = vrot.slane %v26443_v0, %v25391_v22  ;;  %v6520_v11 = vrot.slane %v26441_v53, %v25388_v7 }
 0x781   : > { %v6616_v12 = vsel %vm5103_vm5, %v6489_v62, %v6480_v8  ;;  %v6516_v62 = vsel %vm4966_vm4, %v6515_v25, %v6511_v45  ;;  %v6560_v0 = vrot.slane %v26495_v35, %v25391_v22  ;;  %v6547_v53 = vrot.slane %v26477_v33, %v25388_v7 }
 0x782   : > { %v6617_v4 = vsel %vm5105_vm6, %v6498_v57, %v6616_v12  ;;  %v6569_v35 = vrot.slane %v26511_v13, %v25391_v22  ;;  %v6578_v12 = vrot.slane %v6415_v61, %v25391_v22  ;;  %v6587_v63 = vrot.slane %v6421_v40, %v25391_v22 }
 0x783   : > { %v6433_v36 = vpop.xlane.xlu1 %6432  ;;  %v6618_v6 = vsel %vm5107_vm7, %v6507_v19, %v6617_v4  ;;  %v6525_v45 = vsel %vm4966_vm4, %v6524_v46, %v6520_v11  ;;  %v6561_v60 = vsel %vm4966_vm4, %v6560_v0, %v6556_v48  ;;  %v6592_v33 = vrot.slane %v6424_v1, %v25388_v7 }
 0x784   : > { %v6619_v32 = vsel %vm5109_vm8, %v6516_v62, %v6618_v6  ;;  %v6436_v26 = vpop.xlane.xlu0 %6435  ;;  %v6596_v9 = vrot.slane %v6427_v55, %v25391_v22  ;;  %v6534_v8 = vsel %vm4966_vm4, %v6533_v30, %v6529_v34  ;;  %v6570_v61 = vsel %vm4966_vm4, %v6569_v35, %v6565_v27 }
 0x785   : > { %v6601_v25 = vrot.slane %v6430_v23, %v25388_v7  ;;  %v6552_v37 = vsel %vm4966_vm4, %v6551_v51, %v6547_v53  ;;  %v6579_v57 = vsel %vm4966_vm4, %v6578_v12, %v6574_v56  ;;  %v6610_v40 = vrot.slane %v6436_v26, %v25388_v7 }
 0x786   : > { %v6543_v46 = vsel %vm4966_vm4, %v6542_v20, %v6538_v10  ;;  %v6605_v19 = vrot.slane %v6433_v36, %v25391_v22  ;;  %v6623_v1 = vsel %vm5103_vm5, %v6561_v60, %v6552_v37  ;;  %v6588_v55 = vsel %vm4966_vm4, %v6587_v63, %v6583_v41 }
 0x787   : > { %v6439_v13 = vpop.xlane.xlu1 %6438  ;;  %v6620_v30 = vsel %vm5111_vm9, %v6525_v45, %v6619_v32  ;;  %v6624_v23 = vsel %vm5105_vm6, %v6570_v61, %v6623_v1  ;;  %v6597_v51 = vsel %vm4966_vm4, %v6596_v9, %v6592_v33 }
 0x788   : > { %v6614_v62 = vrot.slane %v6439_v13, %v25391_v22  ;;  %v6621_v11 = vsel %vm5113_vm10, %v6534_v8, %v6620_v30  ;;  %v6625_v48 = vsel %vm5107_vm7, %v6579_v57, %v6624_v23  ;;  %v6606_v20 = vsel %vm4966_vm4, %v6605_v19, %v6601_v25 }
 0x789   : > { %v6622_v36 = vsel %vm5115_vm11, %v6543_v46, %v6621_v11  ;;  %v6626_v4 = vsel %vm5109_vm8, %v6588_v55, %v6625_v48  ;;  %v30849_v46 = vld [vmem:[#allocation99_spill] sm:$0xff]  ;;  %v30850_v55 = vld [vmem:[#allocation100_spill] sm:$0xff] }
 0x78a   : > { %v6615_v27 = vsel %vm4966_vm4, %v6614_v62, %v6610_v40  ;;  %v6627_v6 = vsel %vm5111_vm9, %v6597_v51, %v6626_v4 }
 0x78b   : > { %v6628_v10 = vsel %vm5113_vm10, %v6606_v20, %v6627_v6 }
 0x78c   : > { %v6629_v53 = vsel %vm5115_vm11, %v6615_v27, %v6628_v10 }
 0x79a   : > { %v6328_v0 = vpop.trf.xlu0 }
 0x79b   : > { %v6632_v34 = vadd.f32 %v6622_v36, %v6328_v0 }
 0x79d   : > { %22975 = vrcp.f32 %v6632_v34 }
 0x79e   : > { %v6329_v56 = vpop.trf.xlu0 }
 0x79f   : > { %v6633_v35 = vadd.f32 %v6629_v53, %v6329_v56 }
 0x7a1   : > { %22977 = vrcp.f32 %v6633_v35 }
 0x7a7   : > { %v22976_v12 = vpop.eup %22975 }
 0x7a8   : > { %v6636_v32 = vmul.f32 %v22976_v12, %v6632_v34 }
 0x7aa   : > { %v6638_v41 = vsub.f32 2.0, %v6636_v32 }
 0x7ab   : > { %v22978_v26 = vpop.eup %22977 }
 0x7ac   : > { %v6640_v63 = vmul.f32 %v22976_v12, %v6638_v41  ;;  %v6637_v45 = vmul.f32 %v22978_v26, %v6633_v35 }
 0x7ae   : > { %v6639_v60 = vsub.f32 2.0, %v6637_v45  ;;  %v9538_v33 = vrot.slane %v6640_v63, %v25549_v3  ;;  %v9494_v9 = vrot.slane %v6640_v63, %v25533_v29  ;;  %v9505_v61 = vrot.slane %v6640_v63, %v25537_v31 }
 0x7af   : > { %v9516_v57 = vrot.slane %v6640_v63, %v25540_v47  ;;  %v9527_v1 = vrot.slane %v6640_v63, %v25545_v39  ;;  %v9549_v62 = vrot.slane %v6640_v63, %v25553_v52  ;;  %v9560_v48 = vrot.slane %v6640_v63, %v30849_v46 }
 0x7b0   : > { %v6641_v8 = vmul.f32 %v22978_v26, %v6639_v60  ;;  %9544 = vbcast.lane.b32.xlu0 %v9538_v33, 264  ;;  %9496 = vbcast.lane.b32.xlu1 %v9494_v9, 256  ;;  %v9571_v6 = vrot.slane %v6640_v63, %v30850_v55 }
 0x7b2   : > { %v26615_v13 = vrot.slane %v6641_v8, %v25540_v47  ;;  %v26620_v25 = vrot.slane %v6641_v8, %v25545_v39  ;;  %v26624_v37 = vrot.slane %v6641_v8, %v25549_v3  ;;  %v26629_v40 = vrot.slane %v6641_v8, %v25553_v52 }
 0x7b3   : > { %v26633_v19 = vrot.slane %v6641_v8, %v30849_v46  ;;  %v26638_v30 = vrot.slane %v6641_v8, %v30850_v55  ;;  %v9582_v12 = vrot.slane %v6641_v8, %v25533_v29  ;;  %v9593_v45 = vrot.slane %v6641_v8, %v25537_v31 }
 0x7b4   : > { %9500 = vbcast.lane.b32.xlu1 %v9494_v9, 264  ;;  %9610 = vbcast.lane.b32.xlu0 %v26615_v13, 264 }
 0x7b8   : > { %9507 = vbcast.lane.b32.xlu1 %v9505_v61, 256  ;;  %9621 = vbcast.lane.b32.xlu0 %v26620_v25, 264 }
 0x7bc   : > { %9511 = vbcast.lane.b32.xlu1 %v9505_v61, 264  ;;  %9632 = vbcast.lane.b32.xlu0 %v26624_v37, 264 }
 0x7c0   : > { %9518 = vbcast.lane.b32.xlu1 %v9516_v57, 256  ;;  %9643 = vbcast.lane.b32.xlu0 %v26629_v40, 264 }
 0x7c4   : > { %9522 = vbcast.lane.b32.xlu1 %v9516_v57, 264  ;;  %9654 = vbcast.lane.b32.xlu0 %v26633_v19, 264 }
 0x7c8   : > { %9529 = vbcast.lane.b32.xlu1 %v9527_v1, 256  ;;  %9665 = vbcast.lane.b32.xlu0 %v26638_v30, 264 }
 0x7cc   : > { %9533 = vbcast.lane.b32.xlu1 %v9527_v1, 264 }
 0x7d0   : > { %9540 = vbcast.lane.b32.xlu1 %v9538_v33, 256 }
 0x7d4   : > { %9551 = vbcast.lane.b32.xlu1 %v9549_v62, 256 }
 0x7d6   : > { %v9300_v23 = vpop.f32.mrb[154].mxu0 }
 0x7d7   : > { %v26643_v51 = vadd.f32 %v9300_v23, %v26200_v16  ;;  %v9302_v11 = vpop.f32.mrb[155].mxu0 }
 0x7d8   : > { %9555 = vbcast.lane.b32.xlu1 %v9549_v62, 264 }
 0x7da   : > { %v9305_v20 = vpop.f32.mrb[156].mxu0 }
 0x7db   : > { %v26647_v36 = vadd.f32 %v26195_v17, %v9305_v20  ;;  %v9307_v0 = vpop.f32.mrb[157].mxu0 }
 0x7dc   : > { %9562 = vbcast.lane.b32.xlu1 %v9560_v48, 256 }
 0x7de   : > { %v9310_v4 = vpop.f32.mrb[158].mxu0 }
 0x7df   : > { %v26650_v34 = vadd.f32 %v9310_v4, %v26313_v24  ;;  %v9312_v27 = vpop.f32.mrb[159].mxu0 }
 0x7e0   : > { %9566 = vbcast.lane.b32.xlu1 %v9560_v48, 264 }
 0x7e2   : > { %v9315_v10 = vpop.f32.mrb[160].mxu0 }
 0x7e3   : > { %v26654_v16 = vadd.f32 %v26311_v50, %v9315_v10  ;;  %v9317_v53 = vpop.f32.mrb[161].mxu0 }
 0x7e4   : > { %9573 = vbcast.lane.b32.xlu1 %v9571_v6, 256 }
 0x7e6   : > { %v9320_v56 = vpop.f32.mrb[162].mxu0 }
 0x7e7   : > { %v26657_v17 = vadd.f32 %v9320_v56, %v26211_v54  ;;  %v9322_v35 = vpop.f32.mrb[163].mxu0 }
 0x7e8   : > { %9577 = vbcast.lane.b32.xlu1 %v9571_v6, 264 }
 0x7ea   : > { %v9325_v32 = vpop.f32.mrb[164].mxu0 }
 0x7eb   : > { %v26661_v24 = vadd.f32 %v26206_v15, %v9325_v32  ;;  %v9327_v41 = vpop.f32.mrb[165].mxu0 }
 0x7ec   : > { %9584 = vbcast.lane.b32.xlu1 %v9582_v12, 256  ;;  %v30852_v41 = vld [vmem:[#allocation77_spill] sm:$0xff] }
 0x7ee   : > { %v9330_v26 = vpop.f32.mrb[166].mxu0 }
 0x7ef   : > { %v26664_v50 = vadd.f32 %v9330_v26, %v26323_v58  ;;  %v9332_v63 = vpop.f32.mrb[167].mxu0 }
 0x7f0   : > { %9588 = vbcast.lane.b32.xlu1 %v9582_v12, 264 }
 0x7f2   : > { %v9335_v60 = vpop.f32.mrb[168].mxu0 }
 0x7f3   : > { %v9337_v54 = vpop.f32.mrb[169].mxu0  ;;  %v26668_v33 = vadd.f32 %v26321_v21, %v9335_v60 }
 0x7f4   : > { %9595 = vbcast.lane.b32.xlu1 %v9593_v45, 256 }
 0x7f6   : > { %v9340_v9 = vpop.f32.mrb[170].mxu0 }
 0x7f7   : > { %v26671_v15 = vadd.f32 %v9340_v9, %v26221_v38  ;;  %v9342_v61 = vpop.f32.mrb[171].mxu0 }
 0x7f8   : > { %9599 = vbcast.lane.b32.xlu1 %v9593_v45, 264  ;;  %v23113_v45 = vld [vmem:[%s23513_s17] sm:$0xff] }
 0x7f9   : > { %v30854_v61 = vld [vmem:[#allocation66_spill] sm:$0xff] }
 0x7fa   : > { %v9345_v57 = vpop.f32.mrb[172].mxu0 }
 0x7fb   : > { %v26675_v58 = vadd.f32 %v26216_v5, %v9345_v57  ;;  %v9347_v1 = vpop.f32.mrb[173].mxu0 }
 0x7fc   : > { %9606 = vbcast.lane.b32.xlu1 %v26615_v13, 256 }
 0x7fe   : > { %v9350_v8 = vpop.f32.mrb[174].mxu0 }
 0x7ff   : > { %v26679_v62 = vadd.f32 %v9350_v8, %v26333_v14  ;;  %v9352_v21 = vpop.f32.mrb[175].mxu0  ;;  %v23114_v8 = vld [vmem:[%s23513_s17 + $0x8] sm:$0xff] }
 0x800   : > { %9617 = vbcast.lane.b32.xlu1 %v26620_v25, 256 }
 0x802   : > { %v9355_v23 = vpop.f32.mrb[176].mxu0 }
 0x803   : > { %v26683_v38 = vadd.f32 %v26331_v59, %v9355_v23  ;;  %v9357_v11 = vpop.f32.mrb[177].mxu0 }
 0x804   : > { %9628 = vbcast.lane.b32.xlu1 %v26624_v37, 256 }
 0x806   : > { %v9360_v48 = vpop.f32.mrb[178].mxu0 }
 0x807   : > { %v26687_v5 = vadd.f32 %v9360_v48, %v26231_v43  ;;  %v9362_v13 = vpop.f32.mrb[179].mxu0  ;;  %v30856_v48 = vld [vmem:[#allocation75_spill] sm:$0xff] }
 0x808   : > { %9639 = vbcast.lane.b32.xlu1 %v26629_v40, 256 }
 0x80a   : > { %v9365_v20 = vpop.f32.mrb[180].mxu0 }
 0x80b   : > { %v26691_v14 = vadd.f32 %v26226_v42, %v9365_v20  ;;  %v9367_v25 = vpop.f32.mrb[181].mxu0 }
 0x80c   : > { %9650 = vbcast.lane.b32.xlu1 %v26633_v19, 256 }
 0x80e   : > { %v9370_v0 = vpop.f32.mrb[182].mxu0 }
 0x80f   : > { %v26695_v59 = vadd.f32 %v9370_v0, %v26343_v2  ;;  %v9372_v37 = vpop.f32.mrb[183].mxu0  ;;  %v30857_v0 = vld [vmem:[#allocation7_spill] sm:$0xff] }
 0x810   : > { %9661 = vbcast.lane.b32.xlu1 %v26638_v30, 256  ;;  %v23115_v37 = vld [vmem:[%s23513_s17 + $0x10] sm:$0xff] }
 0x812   : > { %v9375_v4 = vpop.f32.mrb[184].mxu0 }
 0x813   : > { %v26698_v40 = vadd.f32 %v26341_v49, %v9375_v4  ;;  %v9377_v43 = vpop.f32.mrb[185].mxu0  ;;  %v26709_v49 = vstv %s575_s30  ;;  %s23278_s30 = scalar_lea.vmem %s30049_s23, 4096 }
 0x814   : > { %30851 = vst [vmem:[#allocation22_spill] sm:$0xff] %v26709_v49  ;;  %p23279_p11 = scmp.ne.s32.totalorder %s30049_s23, %s23278_s30 }
 0x816   : > { %v9380_v27 = vpop.f32.mrb[186].mxu0  ;;  %p23280_p12 = pnand %p23279_p11, %p23447_p5 }
 0x817   : > { %v26701_v6 = vadd.f32 %v9380_v27, %v26251_v18  ;;  %v9382_v19 = vpop.f32.mrb[187].mxu0 }
 0x818   : > { %p23281_p13 = pneg %p23280_p12 }
 0x81a   : > { %v9385_v42 = vpop.f32.mrb[188].mxu0 }
 0x81b   : > { %v26704_v10 = vadd.f32 %v26243_v28, %v9385_v42  ;;  %v9387_v30 = vpop.f32.mrb[189].mxu0  ;;  %v30860_v42 = vld [vmem:[#allocation19_spill] sm:$0xff] }
 0x81e   : > { %v9390_v2 = vpop.f32.mrb[190].mxu0 }
 0x81f   : > { %v26707_v53 = vadd.f32 %v9390_v2, %v26353_v44  ;;  %v9392_v56 = vpop.f32.mrb[191].mxu0 }
 0x822   : > { %v9497_v35 = vpop.permute.xlu1 %9496  ;;  %v9395_v12 = vpop.f32.mrb[192].mxu0 }
 0x823   : > { %v9667_v18 = vmul.f32 %v9497_v35, %v26643_v51  ;;  %v26714_v26 = vadd.f32 %v30852_v41, %v9395_v12  ;;  %v9397_v28 = vpop.f32.mrb[193].mxu0  ;;  %v23116_v35 = vld [vmem:[%s23513_s17 + $0x18] sm:$0xff]  ;;  %v30862_v12 = vld [vmem:[#allocation11_spill] sm:$0xff] }
 0x824   : > { %v30863_v28 = vld [vmem:[#allocation68_spill] sm:$0xff] }
 0x825   : > { %v9700_v32 = vmul.f32 %v26709_v49, %v9667_v18 }
 0x826   : > { %v9501_v63 = vpop.permute.xlu1 %9500  ;;  %v9400_v54 = vpop.f32.mrb[194].mxu0 }
 0x827   : > { %v26717_v60 = vadd.f32 %v23113_v45, %v9700_v32  ;;  %v9668_v44 = vmul.f32 %v9501_v63, %v26647_v36  ;;  %v26722_v57 = vadd.f32 %v9400_v54, %v30854_v61  ;;  %v9402_v51 = vpop.f32.mrb[195].mxu0  ;;  %v23117_v54 = vld [vmem:[%s23513_s17 + $0x20] sm:$0xff]  ;;  %v30865_v61 = vld [vmem:[#allocation13_spill] sm:$0xff] }
 0x829   : > { %30853 = vst [vmem:[#allocation20_spill] sm:$0xff] %v26717_v60  ;;  %v9701_v9 = vmul.f32 %v26709_v49, %v9668_v44  ;;  %21028 = vmatprep.mubr.msk.f32.mxu1 %vm582_vm0, %v26717_v60 }
 0x82a   : > { %v9508_v1 = vpop.permute.xlu1 %9507  ;;  %v9405_v11 = vpop.f32.mrb[196].mxu0 }
 0x82b   : > { %v26727_v21 = vadd.f32 %v23114_v8, %v9701_v9  ;;  %v9669_v23 = vmul.f32 %v9508_v1, %v26650_v34  ;;  %v26732_v13 = vadd.f32 %v30856_v48, %v9405_v11  ;;  %v9407_v20 = vpop.f32.mrb[197].mxu0  ;;  %v30859_v34 = vld [vmem:[#allocation9_spill] sm:$0xff]  ;;  %v30866_v8 = vld [vmem:[#allocation76_spill] sm:$0xff]  ;;  %v23118_v48 = vld [vmem:[%s23513_s17 + $0x28] sm:$0xff] }
 0x82d   : > { %30855 = vst [vmem:[#allocation71_spill] sm:$0xff] %v26727_v21  ;;  %v9702_v36 = vmul.f32 %v26709_v49, %v9669_v23  ;;  %21029 = vmatmul.mubr.msk.f32.vlgmr.msra.gmra.mrb[6].mxu1 %vm582_vm0, %v26727_v21 }
 0x82e   : > { %v9512_v25 = vpop.permute.xlu1 %9511  ;;  %22231 = vmatpush3.bf16.msra.mxu1 %v30857_v0  ;;  %v9410_v27 = vpop.f32.mrb[198].mxu0 }
 0x82f   : > { %v26738_v4 = vadd.f32 %v23115_v37, %v9702_v36  ;;  %v9670_v43 = vmul.f32 %v9512_v25, %v26654_v16  ;;  %22233 = vmatprep.subr.bf16.mxu1 %v30859_v34  ;;  %v26744_v30 = vadd.f32 %v9410_v27, %v30860_v42  ;;  %v9412_v2 = vpop.f32.mrb[199].mxu0  ;;  %v30868_v25 = vld [vmem:[#allocation14_spill] sm:$0xff]  ;;  %v9545_v37 = vpop.permute.xlu0 %9544 }
 0x830   : > { %v23119_v2 = vld [vmem:[%s23513_s17 + $0x30] sm:$0xff] }
 0x831   : > { %30858 = vst [vmem:[#allocation21_spill] sm:$0xff] %v26738_v4  ;;  %v9703_v19 = vmul.f32 %v26709_v49, %v9670_v43  ;;  %21031 = vmatprep.mubr.msk.f32.mxu1 %vm582_vm0, %v26738_v4 }
 0x832   : > { %v9519_v56 = vpop.permute.xlu1 %9518  ;;  %22235 = vmatpush3.bf16.msra.mxu1 %v30859_v34  ;;  %v9415_v32 = vpop.f32.mrb[200].mxu0  ;;  %v30869_v34 = vld [vmem:[#allocation80_spill] sm:$0xff] }
 0x833   : > { %v26750_v18 = vadd.f32 %v23116_v35, %v9703_v19  ;;  %v9671_v16 = vmul.f32 %v9519_v56, %v26657_v17  ;;  %22237 = vmatprep.subr.bf16.mxu1 %v30862_v12  ;;  %v26756_v63 = vadd.f32 %v30863_v28, %v9415_v32  ;;  %v9417_v45 = vpop.f32.mrb[201].mxu0  ;;  %v9676_v35 = vmul.f32 %v9545_v37, %v26675_v58  ;;  %v30871_v32 = vld [vmem:[#allocation69_spill] sm:$0xff] }
 0x835   : > { %30861 = vst [vmem:[#allocation23_spill] sm:$0xff] %v26750_v18  ;;  %v9704_v41 = vmul.f32 %v26709_v49, %v9671_v16  ;;  %21032 = vmatmul.mubr.msk.f32.gmra.mrb[8].mxu1 %vm582_vm0, %v26750_v18  ;;  %v9709_v58 = vmul.f32 %v26709_v49, %v9676_v35 }
 0x836   : > { %v9523_v44 = vpop.permute.xlu1 %9522  ;;  %22239 = vmatpush3.bf16.msra.mxu1 %v30862_v12  ;;  %v9420_v51 = vpop.f32.mrb[202].mxu0 }
 0x837   : > { %v26762_v9 = vadd.f32 %v23117_v54, %v9704_v41  ;;  %v9672_v17 = vmul.f32 %v9523_v44, %v26661_v24  ;;  %22241 = vmatprep.subr.bf16.mxu1 %v30865_v61  ;;  %v26768_v23 = vadd.f32 %v9420_v51, %v30866_v8  ;;  %v9422_v11 = vpop.f32.mrb[203].mxu0  ;;  %v23120_v44 = vld [vmem:[%s23513_s17 + $0x38] sm:$0xff]  ;;  %v30873_v51 = vld [vmem:[#allocation78_spill] sm:$0xff] }
 0x839   : > { %30864 = vst [vmem:[#allocation72_spill] sm:$0xff] %v26762_v9  ;;  %v9705_v1 = vmul.f32 %v26709_v49, %v9672_v17  ;;  %21034 = vmatprep.mubr.msk.f32.mxu1 %vm582_vm0, %v26762_v9 }
 0x83a   : > { %v9530_v36 = vpop.permute.xlu1 %9529  ;;  %22243 = vmatpush3.bf16.msra.mxu1 %v30865_v61  ;;  %v9425_v0 = vpop.f32.mrb[204].mxu0 }
 0x83b   : > { %v26774_v20 = vadd.f32 %v23118_v48, %v9705_v1  ;;  %v9673_v24 = vmul.f32 %v9530_v36, %v26664_v50  ;;  %22245 = vmatprep.subr.bf16.mxu1 %v30868_v25  ;;  %v26780_v27 = vadd.f32 %v30869_v34, %v9425_v0  ;;  %v9427_v19 = vpop.f32.mrb[205].mxu0  ;;  %v23121_v36 = vld [vmem:[%s23513_s17 + $0x40] sm:$0xff]  ;;  %v30876_v34 = vld [vmem:[#allocation83_spill] sm:$0xff] }
 0x83d   : > { %30867 = vst [vmem:[#allocation29_spill] sm:$0xff] %v26774_v20  ;;  %v9706_v43 = vmul.f32 %v26709_v49, %v9673_v24  ;;  %21035 = vmatmul.mubr.msk.f32.gmra.mrb[10].mxu1 %vm582_vm0, %v26774_v20 }
 0x83e   : > { %v9534_v42 = vpop.permute.xlu1 %9533  ;;  %v9430_v16 = vpop.f32.mrb[206].mxu0 }
 0x83f   : > { %v26785_v56 = vadd.f32 %v23119_v2, %v9706_v43  ;;  %v9674_v50 = vmul.f32 %v9534_v42, %v26668_v33  ;;  %v26791_v41 = vadd.f32 %v9430_v16, %v30871_v32  ;;  %v9432_v28 = vpop.f32.mrb[207].mxu0  ;;  %v30878_v32 = vld [vmem:[#allocation67_spill] sm:$0xff] }
 0x841   : > { %30870 = vst [vmem:[#allocation18_spill] sm:$0xff] %v26785_v56  ;;  %v9707_v12 = vmul.f32 %v26709_v49, %v9674_v50  ;;  %21037 = vmatprep.mubr.msk.f32.mxu1 %vm582_vm0, %v26785_v56  ;;  %v23123_v50 = vld [vmem:[%s23513_s17 + $0x50] sm:$0xff] }
 0x842   : > { %v9541_v45 = vpop.permute.xlu1 %9540  ;;  %v9435_v17 = vpop.f32.mrb[208].mxu0 }
 0x843   : > { %v26796_v54 = vadd.f32 %v23120_v44, %v9707_v12  ;;  %v9675_v33 = vmul.f32 %v9541_v45, %v26671_v15  ;;  %v26802_v1 = vadd.f32 %v30873_v51, %v9435_v17  ;;  %v9437_v8 = vpop.f32.mrb[209].mxu0  ;;  %v23122_v15 = vld [vmem:[%s23513_s17 + $0x48] sm:$0xff]  ;;  %v30880_v51 = vld [vmem:[#allocation81_spill] sm:$0xff] }
 0x844   : > { %v26811_v0 = vadd.f32 %v23122_v15, %v9709_v58 }
 0x845   : > { %30872 = vst [vmem:[#allocation73_spill] sm:$0xff] %v26796_v54  ;;  %v9708_v61 = vmul.f32 %v26709_v49, %v9675_v33  ;;  %21038 = vmatmul.mubr.msk.f32.gmra.mrb[12].mxu1 %vm582_vm0, %v26796_v54  ;;  %v23124_v33 = vld [vmem:[%s23513_s17 + $0x58] sm:$0xff] }
 0x846   : > { %v9552_v11 = vpop.permute.xlu1 %9551  ;;  %30875 = vst [vmem:[#allocation35_spill] sm:$0xff] %v26811_v0  ;;  %v9440_v37 = vpop.f32.mrb[210].mxu0 }
 0x847   : > { %v26807_v48 = vadd.f32 %v23121_v36, %v9708_v61  ;;  %v9677_v24 = vmul.f32 %v9552_v11, %v26679_v62  ;;  %v26815_v19 = vadd.f32 %v9440_v37, %v30876_v34  ;;  %v9442_v42 = vpop.f32.mrb[211].mxu0  ;;  %v30882_v34 = vld [vmem:[#allocation26_spill] sm:$0xff] }
 0x849   : > { %30874 = vst [vmem:[#allocation32_spill] sm:$0xff] %v26807_v48  ;;  %v9710_v43 = vmul.f32 %v26709_v49, %v9677_v24  ;;  %21040 = vmatprep.mubr.msk.f32.mxu1 %vm582_vm0, %v26807_v48  ;;  %v23125_v24 = vld [vmem:[%s23513_s17 + $0x60] sm:$0xff] }
 0x84a   : > { %v9556_v2 = vpop.permute.xlu1 %9555  ;;  %21041 = vmatmul.mubr.msk.f32.gmra.mrb[14].mxu1 %vm582_vm0, %v26811_v0  ;;  %v9445_v16 = vpop.f32.mrb[212].mxu0 }
 0x84b   : > { %v26822_v62 = vadd.f32 %v23123_v50, %v9710_v43  ;;  %v9678_v35 = vmul.f32 %v9556_v2, %v26683_v38  ;;  %v26827_v28 = vadd.f32 %v30878_v32, %v9445_v16  ;;  %v9447_v45 = vpop.f32.mrb[213].mxu0 }
 0x84c   : > { %v23127_v45 = vld [vmem:[%s23513_s17 + $0x70] sm:$0xff] }
 0x84d   : > { %30877 = vst [vmem:[#allocation74_spill] sm:$0xff] %v26822_v62  ;;  %v9711_v12 = vmul.f32 %v26709_v49, %v9678_v35  ;;  %21043 = vmatprep.mubr.msk.f32.mxu1 %vm582_vm0, %v26822_v62  ;;  %v23126_v35 = vld [vmem:[%s23513_s17 + $0x68] sm:$0xff] }
 0x84e   : > { %v9563_v44 = vpop.permute.xlu1 %9562  ;;  %v9450_v61 = vpop.f32.mrb[214].mxu0 }
 0x84f   : > { %v26832_v58 = vadd.f32 %v23124_v33, %v9711_v12  ;;  %v9679_v17 = vmul.f32 %v9563_v44, %v26687_v5  ;;  %v26837_v8 = vadd.f32 %v9450_v61, %v30880_v51  ;;  %v9452_v11 = vpop.f32.mrb[215].mxu0 }
 0x850   : > { %v9611_v11 = vpop.permute.xlu0 %9610 }
 0x851   : > { %30879 = vst [vmem:[#allocation25_spill] sm:$0xff] %v26832_v58  ;;  %v9712_v38 = vmul.f32 %v26709_v49, %v9679_v17  ;;  %21044 = vmatmul.mubr.msk.f32.gmra.mrb[16].mxu1 %vm582_vm0, %v26832_v58 }
 0x852   : > { %v9567_v36 = vpop.permute.xlu1 %9566  ;;  %v9455_v43 = vpop.f32.mrb[216].mxu0 }
 0x853   : > { %v26842_v15 = vadd.f32 %v23125_v24, %v9712_v38  ;;  %v9680_v37 = vmul.f32 %v9567_v36, %v26691_v14  ;;  %v26847_v42 = vadd.f32 %v30882_v34, %v9455_v43  ;;  %v9457_v2 = vpop.f32.mrb[217].mxu0  ;;  %v23129_v24 = vld [vmem:[%s23513_s17 + $0x80] sm:$0xff] }
 0x854   : > { %v23130_v2 = vld [vmem:[%s23513_s17 + $0x88] sm:$0xff] }
 0x855   : > { %30881 = vst [vmem:[#allocation34_spill] sm:$0xff] %v26842_v15  ;;  %v9713_v5 = vmul.f32 %v26709_v49, %v9680_v37  ;;  %21046 = vmatprep.mubr.msk.f32.mxu1 %vm582_vm0, %v26842_v15 }
 0x856   : > { %v9574_v50 = vpop.permute.xlu1 %9573 }
 0x857   : > { %v26852_v16 = vadd.f32 %v23126_v35, %v9713_v5  ;;  %v9681_v12 = vmul.f32 %v9574_v50, %v26695_v59  ;;  %v23128_v59 = vld [vmem:[%s23513_s17 + $0x78] sm:$0xff] }
 0x859   : > { %30883 = vst [vmem:[#allocation79_spill] sm:$0xff] %v26852_v16  ;;  %v9714_v32 = vmul.f32 %v26709_v49, %v9681_v12  ;;  %21047 = vmatmul.mubr.msk.f32.gmra.mrb[18].mxu1 %vm582_vm0, %v26852_v16 }
 0x85a   : > { %v9578_v14 = vpop.permute.xlu1 %9577 }
 0x85b   : > { %v26859_v44 = vadd.f32 %v23127_v45, %v9714_v32  ;;  %v9682_v33 = vmul.f32 %v9578_v14, %v26698_v40 }
 0x85d   : > { %30884 = vst [vmem:[#allocation28_spill] sm:$0xff] %v26859_v44  ;;  %v9715_v17 = vmul.f32 %v26709_v49, %v9682_v33  ;;  %21049 = vmatprep.mubr.msk.f32.mxu1 %vm582_vm0, %v26859_v44  ;;  %v9688_v33 = vmul.f32 %v9611_v11, %v26732_v13 }
 0x85e   : > { %v9585_v61 = vpop.permute.xlu1 %9584 }
 0x85f   : > { %v26866_v38 = vadd.f32 %v23128_v59, %v9715_v17  ;;  %v9683_v51 = vmul.f32 %v9585_v61, %v26701_v6  ;;  %v9622_v6 = vpop.permute.xlu0 %9621  ;;  %v23132_v59 = vld [vmem:[%s23513_s17 + $0x98] sm:$0xff] }
 0x861   : > { %30885 = vst [vmem:[#allocation33_spill] sm:$0xff] %v26866_v38  ;;  %v9716_v36 = vmul.f32 %v26709_v49, %v9683_v51  ;;  %21050 = vmatmul.mubr.msk.f32.gmra.mrb[20].mxu1 %vm582_vm0, %v26866_v38 }
 0x862   : > { %v9589_v40 = vpop.permute.xlu1 %9588 }
 0x863   : > { %v26873_v37 = vadd.f32 %v23129_v24, %v9716_v36  ;;  %v9684_v43 = vmul.f32 %v9589_v40, %v26704_v10  ;;  %v23131_v10 = vld [vmem:[%s23513_s17 + $0x90] sm:$0xff]  ;;  %v9633_v17 = vpop.permute.xlu0 %9632  ;;  %v9721_v40 = vmul.f32 %v26709_v49, %v9688_v33  ;;  %v9690_v24 = vmul.f32 %v9622_v6, %v26756_v63 }
 0x864   : > { %v9692_v63 = vmul.f32 %v9633_v17, %v26780_v27 }
 0x865   : > { %30886 = vst [vmem:[#allocation82_spill] sm:$0xff] %v26873_v37  ;;  %v9717_v5 = vmul.f32 %v26709_v49, %v9684_v43  ;;  %21052 = vmatprep.mubr.msk.f32.mxu1 %vm582_vm0, %v26873_v37  ;;  %v23133_v43 = vld [vmem:[%s23513_s17 + $0xa0] sm:$0xff] }
 0x866   : > { %v9596_v34 = vpop.permute.xlu1 %9595  ;;  %v9725_v27 = vmul.f32 %v26709_v49, %v9692_v63  ;;  %v23140_v63 = vld [vmem:[%s23513_s17 + $0xd8] sm:$0xff] }
 0x867   : > { %v26880_v50 = vadd.f32 %v23130_v2, %v9717_v5  ;;  %v9685_v35 = vmul.f32 %v9596_v34, %v26707_v53  ;;  %v9644_v11 = vpop.permute.xlu0 %9643  ;;  %v23134_v2 = vld [vmem:[%s23513_s17 + $0xa8] sm:$0xff] }
 0x868   : > { %v9694_v17 = vmul.f32 %v9644_v11, %v26802_v1 }
 0x869   : > { %30887 = vst [vmem:[#allocation27_spill] sm:$0xff] %v26880_v50  ;;  %v9718_v12 = vmul.f32 %v26709_v49, %v9685_v35  ;;  %21053 = vmatmul.mubr.msk.f32.gmra.mrb[22].mxu1 %vm582_vm0, %v26880_v50  ;;  %v9723_v35 = vmul.f32 %v26709_v49, %v9690_v24  ;;  %v23138_v24 = vld [vmem:[%s23513_s17 + $0xc8] sm:$0xff] }
 0x86a   : > { %v9600_v32 = vpop.permute.xlu1 %9599  ;;  %v9727_v1 = vmul.f32 %v26709_v49, %v9694_v17  ;;  %v23142_v17 = vld [vmem:[%s23513_s17 + $0xe8] sm:$0xff] }
 0x86b   : > { %v26887_v14 = vadd.f32 %v23131_v10, %v9718_v12  ;;  %v9686_v45 = vmul.f32 %v9600_v32, %v26714_v26  ;;  %v23135_v32 = vld [vmem:[%s23513_s17 + $0xb0] sm:$0xff] }
 0x86d   : > { %30888 = vst [vmem:[#allocation47_spill] sm:$0xff] %v26887_v14  ;;  %v9719_v61 = vmul.f32 %v26709_v49, %v9686_v45  ;;  %21055 = vmatprep.mubr.msk.f32.mxu1 %vm582_vm0, %v26887_v14  ;;  %v23136_v45 = vld [vmem:[%s23513_s17 + $0xb8] sm:$0xff] }
 0x86e   : > { %v9607_v53 = vpop.permute.xlu1 %9606  ;;  %v26922_v33 = vadd.f32 %v23136_v45, %v9723_v35  ;;  %v23141_v45 = vld [vmem:[%s23513_s17 + $0xe0] sm:$0xff] }
 0x86f   : > { %v26895_v51 = vadd.f32 %v23132_v59, %v9719_v61  ;;  %v9687_v36 = vmul.f32 %v9607_v53, %v26722_v57  ;;  %v26908_v57 = vadd.f32 %v23134_v2, %v9721_v40  ;;  %v9655_v61 = vpop.permute.xlu0 %9654 }
 0x870   : > { %30893 = vst [vmem:[#allocation40_spill] sm:$0xff] %v26922_v33 }
 0x871   : > { %30889 = vst [vmem:[#allocation84_spill] sm:$0xff] %v26895_v51  ;;  %v9720_v26 = vmul.f32 %v26709_v49, %v9687_v36  ;;  %21056 = vmatmul.mubr.msk.f32.gmra.mrb[24].mxu1 %vm582_vm0, %v26895_v51  ;;  %30891 = vst [vmem:[#allocation46_spill] sm:$0xff] %v26908_v57 }
 0x872   : > { %v9618_v13 = vpop.permute.xlu1 %9617 }
 0x873   : > { %v26904_v5 = vadd.f32 %v23133_v43, %v9720_v26  ;;  %v9689_v34 = vmul.f32 %v9618_v13, %v26744_v30  ;;  %v26936_v26 = vadd.f32 %v23138_v24, %v9725_v27  ;;  %v9696_v13 = vmul.f32 %v9655_v61, %v26827_v28 }
 0x875   : > { %30890 = vst [vmem:[#allocation41_spill] sm:$0xff] %v26904_v5  ;;  %v9722_v6 = vmul.f32 %v26709_v49, %v9689_v34  ;;  %21058 = vmatprep.mubr.msk.f32.mxu1 %vm582_vm0, %v26904_v5  ;;  %30895 = vst [vmem:[#allocation86_spill] sm:$0xff] %v26936_v26  ;;  %v9666_v34 = vpop.permute.xlu0 %9665  ;;  %v9729_v28 = vmul.f32 %v26709_v49, %v9696_v13  ;;  %v30905_v13 = vmov 0.0|0.0  }
 0x876   : > { %v9629_v12 = vpop.permute.xlu1 %9628  ;;  %21059 = vmatmul.mubr.msk.f32.gmra.mrb[26].mxu1 %vm582_vm0, %v26908_v57 }
 0x877   : > { %v26918_v30 = vadd.f32 %v23135_v32, %v9722_v6  ;;  %v9691_v10 = vmul.f32 %v9629_v12, %v26768_v23  ;;  %v23137_v23 = vld [vmem:[%s23513_s17 + $0xc0] sm:$0xff]  ;;  %v26950_v6 = vadd.f32 %v23140_v63, %v9727_v1  ;;  %v9698_v12 = vmul.f32 %v9666_v34, %v26847_v42  ;;  %v30903_v1 = vld [vmem:[#allocation16_spill] sm:$0xff] }
 0x878   : > { %v26964_v61 = vadd.f32 %v23142_v17, %v9729_v28 }
 0x879   : > { %30892 = vst [vmem:[#allocation85_spill] sm:$0xff] %v26918_v30  ;;  %v9724_v53 = vmul.f32 %v26709_v49, %v9691_v10  ;;  %21061 = vmatprep.mubr.msk.f32.mxu1 %vm582_vm0, %v26918_v30  ;;  %30897 = vst [vmem:[#allocation59_spill] sm:$0xff] %v26950_v6  ;;  %v9731_v42 = vmul.f32 %v26709_v49, %v9698_v12 }
 0x87a   : > { %v9640_v59 = vpop.permute.xlu1 %9639  ;;  %21062 = vmatmul.mubr.msk.f32.gmra.mrb[28].mxu1 %vm582_vm0, %v26922_v33  ;;  %30899 = vst [vmem:[#allocation53_spill] sm:$0xff] %v26964_v61 }
 0x87b   : > { %v26932_v36 = vadd.f32 %v23137_v23, %v9724_v53  ;;  %v9693_v40 = vmul.f32 %v9640_v59, %v26791_v41  ;;  %v23139_v41 = vld [vmem:[%s23513_s17 + $0xd0] sm:$0xff] }
 0x87c   : > { %v23143_v59 = vld [vmem:[%s23513_s17 + $0xf0] sm:$0xff] }
 0x87d   : > { %30894 = vst [vmem:[#allocation45_spill] sm:$0xff] %v26932_v36  ;;  %v9726_v11 = vmul.f32 %v26709_v49, %v9693_v40  ;;  %21064 = vmatprep.mubr.msk.f32.mxu1 %vm582_vm0, %v26932_v36  ;;  %v23144_v40 = vld [vmem:[%s23513_s17 + $0xf8] sm:$0xff]  ;;  %s23343_s17 = smov [#allocation3]  }
 0x87e   : > { %v9651_v43 = vpop.permute.xlu1 %9650  ;;  %21065 = vmatmul.mubr.msk.f32.gmra.mrb[30].mxu1 %vm582_vm0, %v26936_v26  ;;  %v26976_v24 = vadd.f32 %v23144_v40, %v9731_v42  ;;  %s23282_s12 = sshll.u32 %s23343_s17, 4  ;;  %s23283_s12 = int_to_ptr.vmem [resolvable:$false] %s23282_s12 }
 0x87f   : > { %v26946_v2 = vadd.f32 %v23139_v41, %v9726_v11  ;;  %v9695_v35 = vmul.f32 %v9651_v43, %v26815_v19  ;;  %v27111_v43 = vld [vmem:[%s30101_s4] ss:$0 sm:$0xff]  ;;  %s23284_s14 = scalar_lea.vmem %s23283_s12, 8192  ;;  %p23285_p0 = scmp.lt.s32.totalorder %s30049_s23, %s23283_s12 }
 0x880   : > { %30901 = vst [vmem:[#allocation90_spill] sm:$0xff] %v26976_v24  ;;  %p23286_p1 = scmp.lt.s32.totalorder %s23284_s14, %s23278_s30 }
 0x881   : > { %30896 = vst [vmem:[#allocation39_spill] sm:$0xff] %v26946_v2  ;;  %v9728_v32 = vmul.f32 %v26709_v49, %v9695_v35  ;;  %21067 = vmatprep.mubr.msk.f32.mxu1 %vm582_vm0, %v26946_v2 }
 0x882   : > { %v9662_v10 = vpop.permute.xlu1 %9661  ;;  %21068 = vmatmul.mubr.msk.f32.gmra.mrb[32].mxu1 %vm582_vm0, %v26950_v6  ;;  %p23287_p2 = por %p23286_p1, %p23285_p0 }
 0x883   : > { %v26960_v19 = vadd.f32 %v23141_v45, %v9728_v32  ;;  %v9697_v27 = vmul.f32 %v9662_v10, %v26837_v8  ;;  %v30902_v8 = vld [vmem:[#allocation15_spill] sm:$0xff]  ;;  %v30910_v45 = vld [vmem:[#allocation70_spill] sm:$0xff] }
 0x884   : > { %p23288_p3 = pnand %p23287_p2, %p23281_p13 }
 0x885   : > { %30898 = vst [vmem:[#allocation88_spill] sm:$0xff] %v26960_v19  ;;  %v9730_v53 = vmul.f32 %v26709_v49, %v9697_v27  ;;  %21070 = vmatprep.mubr.msk.f32.mxu1 %vm582_vm0, %v26960_v19 }
 0x886   : > { %21071 = vmatmul.mubr.msk.f32.gmra.mrb[34].mxu1 %vm582_vm0, %v26964_v61 }
 0x887   : > { %v26973_v23 = vadd.f32 %v23143_v59, %v9730_v53 }
 0x889   : > { %30900 = vst [vmem:[#allocation31_spill] sm:$0xff] %v26973_v23  ;;  %21073 = vmatprep.mubr.msk.f32.mxu1 %vm582_vm0, %v26973_v23 }
 0x88a   : > { %21074 = vmatmul.mubr.msk.f32.gmra.mrb[36].mxu1 %vm582_vm0, %v26976_v24 }
 0x88b   : > { %21092 = vmatprep.mubr.msk.f32.mxu1 %vm582_vm0, %v26717_v60 }
 0x88e   : > { %21093 = vmatmul.mubr.msk.f32.vlgmr.msra.gmra.mrb[38].mxu1 %vm582_vm0, %v26727_v21 }
 0x88f   : > { %21095 = vmatprep.mubr.msk.f32.mxu1 %vm582_vm0, %v26738_v4  ;;  %22247 = vmatpush3.bf16.msra.mxu1 %v30868_v25  ;;  %v30904_v25 = vld [vmem:[#allocation17_spill] sm:$0xff] }
 0x890   : > { %22249 = vmatprep.subr.bf16.mxu1 %v30902_v8 }
 0x892   : > { %21096 = vmatmul.mubr.msk.f32.gmra.mrb[40].mxu1 %vm582_vm0, %v26750_v18 }
 0x893   : > { %21098 = vmatprep.mubr.msk.f32.mxu1 %vm582_vm0, %v26762_v9  ;;  %22251 = vmatpush3.bf16.msra.mxu1 %v30902_v8 }
 0x894   : > { %22253 = vmatprep.subr.bf16.mxu1 %v30903_v1 }
 0x896   : > { %21099 = vmatmul.mubr.msk.f32.gmra.mrb[42].mxu1 %vm582_vm0, %v26774_v20 }
 0x897   : > { %21101 = vmatprep.mubr.msk.f32.mxu1 %vm582_vm0, %v26785_v56  ;;  %22255 = vmatpush3.bf16.msra.mxu1 %v30903_v1 }
 0x898   : > { %22257 = vmatprep.subr.bf16.mxu1 %v30904_v25 }
 0x89a   : > { %21102 = vmatmul.mubr.msk.f32.gmra.mrb[44].mxu1 %vm582_vm0, %v26796_v54 }
 0x89b   : > { %21104 = vmatprep.mubr.msk.f32.mxu1 %vm582_vm0, %v26807_v48  ;;  %22259 = vmatpush3.bf16.msra.mxu1 %v30904_v25 }
 0x89c   : > { %22308 = vmatprep.subr.bf16.mxu1 %v30905_v13 }
 0x89e   : > { %21105 = vmatmul.mubr.msk.f32.gmra.mrb[46].mxu1 %vm582_vm0, %v26811_v0 }
 0x89f   : > { %21107 = vmatprep.mubr.msk.f32.mxu1 %vm582_vm0, %v26822_v62 }
 0x8a2   : > { %21108 = vmatmul.mubr.msk.f32.gmra.mrb[48].mxu1 %vm582_vm0, %v26832_v58 }
 0x8a3   : > { %21110 = vmatprep.mubr.msk.f32.mxu1 %vm582_vm0, %v26842_v15 }
 0x8a6   : > { %21111 = vmatmul.mubr.msk.f32.gmra.mrb[50].mxu1 %vm582_vm0, %v26852_v16 }
 0x8a7   : > { %21113 = vmatprep.mubr.msk.f32.mxu1 %vm582_vm0, %v26859_v44 }
 0x8aa   : > { %21114 = vmatmul.mubr.msk.f32.gmra.mrb[52].mxu1 %vm582_vm0, %v26866_v38 }
 0x8ab   : > { %21116 = vmatprep.mubr.msk.f32.mxu1 %vm582_vm0, %v26873_v37 }
 0x8ae   : > { %21117 = vmatmul.mubr.msk.f32.gmra.mrb[54].mxu1 %vm582_vm0, %v26880_v50 }
 0x8af   : > { %21119 = vmatprep.mubr.msk.f32.mxu1 %vm582_vm0, %v26887_v14 }
 0x8b2   : > { %21120 = vmatmul.mubr.msk.f32.gmra.mrb[56].mxu1 %vm582_vm0, %v26895_v51 }
 0x8b3   : > { %21122 = vmatprep.mubr.msk.f32.mxu1 %vm582_vm0, %v26904_v5 }
 0x8b6   : > { %21123 = vmatmul.mubr.msk.f32.gmra.mrb[58].mxu1 %vm582_vm0, %v26908_v57 }
 0x8b7   : > { %21125 = vmatprep.mubr.msk.f32.mxu1 %vm582_vm0, %v26918_v30 }
 0x8ba   : > { %21126 = vmatmul.mubr.msk.f32.gmra.mrb[60].mxu1 %vm582_vm0, %v26922_v33 }
 0x8bb   : > { %21128 = vmatprep.mubr.msk.f32.mxu1 %vm582_vm0, %v26932_v36 }
 0x8be   : > { %21129 = vmatmul.mubr.msk.f32.gmra.mrb[62].mxu1 %vm582_vm0, %v26936_v26 }
 0x8bf   : > { %21131 = vmatprep.mubr.msk.f32.mxu1 %vm582_vm0, %v26946_v2 }
 0x8c2   : > { %21132 = vmatmul.mubr.msk.f32.gmra.mrb[64].mxu1 %vm582_vm0, %v26950_v6 }
 0x8c3   : > { %21134 = vmatprep.mubr.msk.f32.mxu1 %vm582_vm0, %v26960_v19 }
 0x8c6   : > { %21135 = vmatmul.mubr.msk.f32.gmra.mrb[66].mxu1 %vm582_vm0, %v26964_v61 }
 0x8c7   : > { %21137 = vmatprep.mubr.msk.f32.mxu1 %vm582_vm0, %v26973_v23 }
 0x8ca   : > { %21138 = vmatmul.mubr.msk.f32.gmra.mrb[68].mxu1 %vm582_vm0, %v26976_v24 }
 0x8cb   : > { %21156 = vmatprep.mubr.msk.f32.mxu1 %vm582_vm0, %v26717_v60 }
 0x8ce   : > { %21157 = vmatmul.mubr.msk.f32.vlgmr.msra.gmra.mrb[70].mxu1 %vm582_vm0, %v26727_v21 }
 0x8cf   : > { %21159 = vmatprep.mubr.msk.f32.mxu1 %vm582_vm0, %v26738_v4 }
 0x8d2   : > { %21160 = vmatmul.mubr.msk.f32.gmra.mrb[72].mxu1 %vm582_vm0, %v26750_v18 }
 0x8d3   : > { %21162 = vmatprep.mubr.msk.f32.mxu1 %vm582_vm0, %v26762_v9 }
 0x8d6   : > { %21163 = vmatmul.mubr.msk.f32.gmra.mrb[74].mxu1 %vm582_vm0, %v26774_v20 }
 0x8d7   : > { %21165 = vmatprep.mubr.msk.f32.mxu1 %vm582_vm0, %v26785_v56 }
 0x8da   : > { %21166 = vmatmul.mubr.msk.f32.gmra.mrb[76].mxu1 %vm582_vm0, %v26796_v54  ;;  %v27281_v54 = vld [vmem:[%s30104_s7] sm:$0xff] }
 0x8db   : > { %21168 = vmatprep.mubr.msk.f32.mxu1 %vm582_vm0, %v26807_v48 }
 0x8de   : > { %21169 = vmatmul.mubr.msk.f32.gmra.mrb[78].mxu1 %vm582_vm0, %v26811_v0 }
 0x8df   : > { %21171 = vmatprep.mubr.msk.f32.mxu1 %vm582_vm0, %v26822_v62 }
 0x8e2   : > { %21172 = vmatmul.mubr.msk.f32.gmra.mrb[80].mxu1 %vm582_vm0, %v26832_v58 }
 0x8e3   : > { %21174 = vmatprep.mubr.msk.f32.mxu1 %vm582_vm0, %v26842_v15 }
 0x8e6   : > { %21175 = vmatmul.mubr.msk.f32.gmra.mrb[82].mxu1 %vm582_vm0, %v26852_v16 }
 0x8e7   : > { %21177 = vmatprep.mubr.msk.f32.mxu1 %vm582_vm0, %v26859_v44 }
 0x8ea   : > { %21178 = vmatmul.mubr.msk.f32.gmra.mrb[84].mxu1 %vm582_vm0, %v26866_v38 }
 0x8eb   : > { %21180 = vmatprep.mubr.msk.f32.mxu1 %vm582_vm0, %v26873_v37 }
 0x8ee   : > { %21181 = vmatmul.mubr.msk.f32.gmra.mrb[86].mxu1 %vm582_vm0, %v26880_v50 }
 0x8ef   : > { %21183 = vmatprep.mubr.msk.f32.mxu1 %vm582_vm0, %v26887_v14 }
 0x8f2   : > { %21184 = vmatmul.mubr.msk.f32.gmra.mrb[88].mxu1 %vm582_vm0, %v26895_v51 }
 0x8f3   : > { %21186 = vmatprep.mubr.msk.f32.mxu1 %vm582_vm0, %v26904_v5 }
 0x8f6   : > { %21187 = vmatmul.mubr.msk.f32.gmra.mrb[90].mxu1 %vm582_vm0, %v26908_v57 }
 0x8f7   : > { %21189 = vmatprep.mubr.msk.f32.mxu1 %vm582_vm0, %v26918_v30 }
 0x8fa   : > { %21190 = vmatmul.mubr.msk.f32.gmra.mrb[92].mxu1 %vm582_vm0, %v26922_v33 }
 0x8fb   : > { %21192 = vmatprep.mubr.msk.f32.mxu1 %vm582_vm0, %v26932_v36 }
 0x8fe   : > { %21193 = vmatmul.mubr.msk.f32.gmra.mrb[94].mxu1 %vm582_vm0, %v26936_v26 }
 0x8ff   : > { %21195 = vmatprep.mubr.msk.f32.mxu1 %vm582_vm0, %v26946_v2 }
 0x900   : > { %v21030_v11 = vpop.f32.mrb[6].mxu1 }
 0x901   : > { %v27114_v34 = vadd.f32 %v27111_v43, %v21030_v11  ;;  %v9926_v41 = vpop.f32.mrb[7].mxu1 }
 0x902   : > { %v27117_v35 = vadd.f32 %v27111_v43, %v9926_v41  ;;  %21196 = vmatmul.mubr.msk.f32.gmra.mrb[96].mxu1 %vm582_vm0, %v26950_v6 }
 0x903   : > { %30906 = vst [vmem:[#allocation52_spill] sm:$0xff] %v27114_v34  ;;  %21198 = vmatprep.mubr.msk.f32.mxu1 %vm582_vm0, %v26960_v19 }
 0x904   : > { %30907 = vst [vmem:[#allocation30_spill] sm:$0xff] %v27117_v35  ;;  %v22261_v63 = vpack.c.bf16 %v27114_v34, %v27117_v35 }
 0x906   : > { %21199 = vmatmul.mubr.msk.f32.gmra.mrb[98].mxu1 %vm582_vm0, %v26964_v61  ;;  %22262 = vmatpush1.bf16.msra.mxu0 %v22261_v63 }
 0x907   : > { %21201 = vmatprep.mubr.msk.f32.mxu1 %vm582_vm0, %v26973_v23  ;;  %22263 = vmatprep.subr.bf16.mxu0 %v30905_v13 }
 0x908   : > { %v21033_v28 = vpop.f32.mrb[8].mxu1 }
 0x909   : > { %v27131_v12 = vadd.f32 %v27111_v43, %v21033_v28  ;;  %v9936_v32 = vpop.f32.mrb[9].mxu1 }
 0x90a   : > { %v27134_v10 = vadd.f32 %v27111_v43, %v9936_v32  ;;  %21202 = vmatmul.mubr.msk.f32.gmra.mrb[100].mxu1 %vm582_vm0, %v26976_v24 }
 0x90b   : > { %30908 = vst [vmem:[#allocation92_spill] sm:$0xff] %v27131_v12  ;;  %10824 = vmatprep.mubr.f32.mxu1 %v30910_v45 }
 0x90c   : > { %30909 = vst [vmem:[#allocation24_spill] sm:$0xff] %v27134_v10  ;;  %v22264_v27 = vpack.c.bf16 %v27131_v12, %v27134_v10 }
 0x90e   : > { %22265 = vmatpush1.bf16.msra.mxu0 %v22264_v27 }
 0x90f   : > { %22266 = vmatprep.subr.bf16.mxu0 %v30905_v13 }
 0x910   : > { %v21036_v17 = vpop.f32.mrb[10].mxu1 }
 0x911   : > { %v27143_v42 = vadd.f32 %v27111_v43, %v21036_v17  ;;  %v9946_v53 = vpop.f32.mrb[11].mxu1 }
 0x912   : > { %v27146_v59 = vadd.f32 %v27111_v43, %v9946_v53 }
 0x913   : > { %30911 = vst [vmem:[#allocation44_spill] sm:$0xff] %v27143_v42 }
 0x914   : > { %30912 = vst [vmem:[#allocation94_spill] sm:$0xff] %v27146_v59  ;;  %v22267_v40 = vpack.c.bf16 %v27143_v42, %v27146_v59 }
 0x916   : > { %22268 = vmatpush1.bf16.msra.mxu0 %v22267_v40 }
 0x917   : > { %22269 = vmatprep.subr.bf16.mxu0 %v30905_v13 }
 0x918   : > { %v21039_v8 = vpop.f32.mrb[12].mxu1 }
 0x919   : > { %v27152_v1 = vadd.f32 %v27111_v43, %v21039_v8  ;;  %v9956_v25 = vpop.f32.mrb[13].mxu1 }
 0x91a   : > { %v27155_v11 = vadd.f32 %v27111_v43, %v9956_v25 }
 0x91b   : > { %30913 = vst [vmem:[#allocation38_spill] sm:$0xff] %v27152_v1 }
 0x91c   : > { %30914 = vst [vmem:[#allocation43_spill] sm:$0xff] %v27155_v11  ;;  %v22270_v41 = vpack.c.bf16 %v27152_v1, %v27155_v11 }
 0x91d   : > { %v21042_v63 = vpop.f32.mrb[14].mxu1 }
 0x91e   : > { %v27160_v28 = vadd.f32 %v27111_v43, %v21042_v63  ;;  %v9966_v32 = vpop.f32.mrb[15].mxu1  ;;  %22271 = vmatpush1.bf16.msra.mxu0 %v22270_v41 }
 0x91f   : > { %v27163_v45 = vadd.f32 %v27111_v43, %v9966_v32  ;;  %22272 = vmatprep.subr.bf16.mxu0 %v30905_v13 }
 0x920   : > { %30915 = vst [vmem:[#allocation96_spill] sm:$0xff] %v27160_v28 }
 0x921   : > { %30916 = vst [vmem:[#allocation37_spill] sm:$0xff] %v27163_v45  ;;  %v22273_v27 = vpack.c.bf16 %v27160_v28, %v27163_v45 }
 0x923   : > { %22274 = vmatpush1.bf16.msra.mxu0 %v22273_v27 }
 0x924   : > { %v21045_v17 = vpop.f32.mrb[16].mxu1  ;;  %22275 = vmatprep.subr.bf16.mxu0 %v30905_v13 }
 0x925   : > { %v27170_v53 = vadd.f32 %v27111_v43, %v21045_v17  ;;  %v9976_v40 = vpop.f32.mrb[17].mxu1 }
 0x926   : > { %v27173_v8 = vadd.f32 %v27111_v43, %v9976_v40 }
 0x927   : > { %30917 = vst [vmem:[#allocation42_spill] sm:$0xff] %v27170_v53 }
 0x928   : > { %30918 = vst [vmem:[#allocation36_spill] sm:$0xff] %v27173_v8  ;;  %v22276_v25 = vpack.c.bf16 %v27170_v53, %v27173_v8 }
 0x92a   : > { %22277 = vmatpush1.bf16.msra.mxu0 %v22276_v25 }
 0x92b   : > { %22278 = vmatprep.subr.bf16.mxu0 %v30905_v13 }
 0x92c   : > { %v21048_v41 = vpop.f32.mrb[18].mxu1 }
 0x92d   : > { %v27179_v63 = vadd.f32 %v27111_v43, %v21048_v41  ;;  %v9986_v32 = vpop.f32.mrb[19].mxu1 }
 0x92e   : > { %v27182_v27 = vadd.f32 %v27111_v43, %v9986_v32 }
 0x92f   : > { %30919 = vst [vmem:[#allocation56_spill] sm:$0xff] %v27179_v63 }
 0x930   : > { %30920 = vst [vmem:[#allocation50_spill] sm:$0xff] %v27182_v27  ;;  %v22279_v17 = vpack.c.bf16 %v27179_v63, %v27182_v27 }
 0x932   : > { %22280 = vmatpush1.bf16.msra.mxu0 %v22279_v17 }
 0x933   : > { %22281 = vmatprep.subr.bf16.mxu0 %v30905_v13 }
 0x934   : > { %v21051_v40 = vpop.f32.mrb[20].mxu1 }
 0x935   : > { %v27188_v24 = vadd.f32 %v27111_v43, %v21051_v40  ;;  %v9996_v25 = vpop.f32.mrb[21].mxu1 }
 0x936   : > { %v27191_v61 = vadd.f32 %v27111_v43, %v9996_v25 }
 0x937   : > { %30921 = vst [vmem:[#allocation55_spill] sm:$0xff] %v27188_v24 }
 0x938   : > { %30922 = vst [vmem:[#allocation87_spill] sm:$0xff] %v27191_v61  ;;  %v22282_v41 = vpack.c.bf16 %v27188_v24, %v27191_v61 }
 0x93a   : > { %22283 = vmatpush1.bf16.msra.mxu0 %v22282_v41 }
 0x93b   : > { %22284 = vmatprep.subr.bf16.mxu0 %v30905_v13 }
 0x93c   : > { %v21054_v32 = vpop.f32.mrb[22].mxu1 }
 0x93d   : > { %v27197_v6 = vadd.f32 %v27111_v43, %v21054_v32  ;;  %v10006_v17 = vpop.f32.mrb[23].mxu1 }
 0x93e   : > { %v27200_v23 = vadd.f32 %v27111_v43, %v10006_v17 }
 0x93f   : > { %30923 = vst [vmem:[#allocation49_spill] sm:$0xff] %v27197_v6 }
 0x940   : > { %30924 = vst [vmem:[#allocation51_spill] sm:$0xff] %v27200_v23  ;;  %v22285_v40 = vpack.c.bf16 %v27197_v6, %v27200_v23 }
 0x942   : > { %22286 = vmatpush1.bf16.msra.mxu0 %v22285_v40 }
 0x943   : > { %22287 = vmatprep.subr.bf16.mxu0 %v30905_v13 }
 0x944   : > { %v21057_v25 = vpop.f32.mrb[24].mxu1 }
 0x945   : > { %v27206_v26 = vadd.f32 %v27111_v43, %v21057_v25  ;;  %v10016_v41 = vpop.f32.mrb[25].mxu1 }
 0x946   : > { %v27209_v19 = vadd.f32 %v27111_v43, %v10016_v41 }
 0x947   : > { %30925 = vst [vmem:[#allocation89_spill] sm:$0xff] %v27206_v26 }
 0x948   : > { %30926 = vst [vmem:[#allocation48_spill] sm:$0xff] %v27209_v19  ;;  %v22288_v32 = vpack.c.bf16 %v27206_v26, %v27209_v19 }
 0x949   : > { %v21060_v33 = vpop.f32.mrb[26].mxu1 }
 0x94a   : > { %v27214_v17 = vadd.f32 %v27111_v43, %v21060_v33  ;;  %v10026_v2 = vpop.f32.mrb[27].mxu1  ;;  %22289 = vmatpush1.bf16.msra.mxu0 %v22288_v32 }
 0x94b   : > { %v27217_v40 = vadd.f32 %v27111_v43, %v10026_v2  ;;  %22290 = vmatprep.subr.bf16.mxu0 %v30905_v13 }
 0x94c   : > { %30927 = vst [vmem:[#allocation91_spill] sm:$0xff] %v27214_v17 }
 0x94d   : > { %30928 = vst [vmem:[#allocation62_spill] sm:$0xff] %v27217_v40  ;;  %v22291_v25 = vpack.c.bf16 %v27214_v17, %v27217_v40  ;;  %v21063_v57 = vpop.f32.mrb[28].mxu1 }
 0x94e   : > { %v27223_v41 = vadd.f32 %v27111_v43, %v21063_v57  ;;  %v10036_v36 = vpop.f32.mrb[29].mxu1 }
 0x94f   : > { %v27226_v51 = vadd.f32 %v27111_v43, %v10036_v36  ;;  %22292 = vmatpush1.bf16.msra.mxu0 %v22291_v25 }
 0x950   : > { %30929 = vst [vmem:[#allocation93_spill] sm:$0xff] %v27223_v41  ;;  %22293 = vmatprep.subr.bf16.mxu0 %v30905_v13 }
 0x951   : > { %30930 = vst [vmem:[#allocation95_spill] sm:$0xff] %v27226_v51  ;;  %v22294_v33 = vpack.c.bf16 %v27223_v41, %v27226_v51  ;;  %v21066_v2 = vpop.f32.mrb[30].mxu1 }
 0x952   : > { %v27232_v32 = vadd.f32 %v27111_v43, %v21066_v2  ;;  %v10046_v30 = vpop.f32.mrb[31].mxu1 }
 0x953   : > { %v27235_v50 = vadd.f32 %v27111_v43, %v10046_v30  ;;  %22295 = vmatpush1.bf16.msra.mxu0 %v22294_v33 }
 0x954   : > { %30931 = vst [vmem:[#allocation97_spill] sm:$0xff] %v27232_v32  ;;  %22296 = vmatprep.subr.bf16.mxu0 %v30905_v13 }
 0x955   : > { %30932 = vst [vmem:[#allocation6_spill] sm:$0xff] %v27235_v50  ;;  %v22297_v57 = vpack.c.bf16 %v27232_v32, %v27235_v50  ;;  %v21069_v36 = vpop.f32.mrb[32].mxu1 }
 0x956   : > { %v27241_v25 = vadd.f32 %v27111_v43, %v21069_v36  ;;  %v10056_v5 = vpop.f32.mrb[33].mxu1 }
 0x957   : > { %v27244_v38 = vadd.f32 %v27111_v43, %v10056_v5  ;;  %22298 = vmatpush1.bf16.msra.mxu0 %v22297_v57 }
 0x958   : > { %30933 = vst [vmem:[#allocation8_spill] sm:$0xff] %v27241_v25  ;;  %22299 = vmatprep.subr.bf16.mxu0 %v30905_v13 }
 0x959   : > { %30934 = vst [vmem:[#allocation10_spill] sm:$0xff] %v27244_v38  ;;  %v22300_v30 = vpack.c.bf16 %v27241_v25, %v27244_v38  ;;  %v21072_v33 = vpop.f32.mrb[34].mxu1 }
 0x95a   : > { %v27250_v2 = vadd.f32 %v27111_v43, %v21072_v33  ;;  %v10066_v14 = vpop.f32.mrb[35].mxu1  ;;  %v27270_v33 = vld [vmem:[%s30102_s5] ss:$0 sm:$0xff] }
 0x95b   : > { %v27253_v16 = vadd.f32 %v27111_v43, %v10066_v14  ;;  %22301 = vmatpush1.bf16.msra.mxu0 %v22300_v30 }
 0x95c   : > { %30935 = vst [vmem:[#allocation12_spill] sm:$0xff] %v27250_v2  ;;  %22302 = vmatprep.subr.bf16.mxu0 %v30905_v13 }
 0x95d   : > { %30936 = vst [vmem:[#allocation77_spill] sm:$0xff] %v27253_v16  ;;  %v22303_v5 = vpack.c.bf16 %v27250_v2, %v27253_v16  ;;  %v21075_v57 = vpop.f32.mrb[36].mxu1 }
 0x95e   : > { %v27259_v36 = vadd.f32 %v27111_v43, %v21075_v57  ;;  %v10076_v37 = vpop.f32.mrb[37].mxu1 }
 0x95f   : > { %v27262_v58 = vadd.f32 %v27111_v43, %v10076_v37  ;;  %22304 = vmatpush1.bf16.msra.mxu0 %v22303_v5 }
 0x960   : > { %30937 = vst [vmem:[#allocation66_spill] sm:$0xff] %v27259_v36  ;;  %22305 = vmatprep.subr.bf16.mxu0 %v30905_v13 }
 0x961   : > { %30938 = vst [vmem:[#allocation75_spill] sm:$0xff] %v27262_v58  ;;  %v22306_v14 = vpack.c.bf16 %v27259_v36, %v27262_v58  ;;  %v21094_v30 = vpop.f32.mrb[38].mxu1 }
 0x962   : > { %v10157_v44 = vadd.f32 %v27270_v33, %v21094_v30  ;;  %v10151_v57 = vpop.f32.mrb[39].mxu1 }
 0x963   : > { %v10152_v0 = vadd.f32 %v27270_v33, %v10151_v57  ;;  %22307 = vmatpush1.bf16.msra.mxu0 %v22306_v14 }
 0x964   : > { %22356 = vmatprep.subr.bf16.mxu0 %v30905_v13 }
 0x965   : > { %v27275_v37 = vpack.c.bf16 %v10157_v44, %v10152_v0  ;;  %v21097_v43 = vpop.f32.mrb[40].mxu1  ;;  %v27289_v0 = vld [vmem:[%s30104_s7 + $0x18] sm:$0xff] }
 0x966   : > { %v10167_v5 = vadd.f32 %v27270_v33, %v21097_v43  ;;  %v10161_v15 = vpop.f32.mrb[41].mxu1  ;;  %10600 = vmatmul.mubr.f32.vlgmr.msra.gmra.mrb[218].mxu0 %v27281_v54 }
 0x967   : > { %30939 = vst [vmem:[#allocation7_spill] sm:$0xff] %v27275_v37  ;;  %v10162_v30 = vadd.f32 %v27270_v33, %v10161_v15  ;;  %22310 = vmatpush1.bf16.msra.mxu1 %v27275_v37  ;;  %10604 = vmatprep.mubr.f32.mxu0 %v27289_v0  ;;  %v27299_v15 = vld [vmem:[%s30104_s7 + $0x10] sm:$0xff] }
 0x968   : > { %22311 = vmatprep.subr.bf16.mxu1 %v30905_v13 }
 0x969   : > { %v27293_v44 = vpack.c.bf16 %v10167_v5, %v10162_v30  ;;  %v21100_v14 = vpop.f32.mrb[42].mxu1  ;;  %v27307_v5 = vld [vmem:[%s30104_s7 + $0x28] sm:$0xff] }
 0x96a   : > { %v10177_v57 = vadd.f32 %v27270_v33, %v21100_v14  ;;  %v10171_v43 = vpop.f32.mrb[43].mxu1  ;;  %10605 = vmatmul.mubr.f32.gmra.mrb[220].mxu0 %v27299_v15 }
 0x96b   : > { %30940 = vst [vmem:[#allocation9_spill] sm:$0xff] %v27293_v44  ;;  %v10172_v62 = vadd.f32 %v27270_v33, %v10171_v43  ;;  %22313 = vmatpush1.bf16.msra.mxu1 %v27293_v44  ;;  %10609 = vmatprep.mubr.f32.mxu0 %v27307_v5  ;;  %v27317_v43 = vld [vmem:[%s30104_s7 + $0x20] sm:$0xff] }
 0x96c   : > { %22314 = vmatprep.subr.bf16.mxu1 %v30905_v13 }
 0x96d   : > { %v27311_v30 = vpack.c.bf16 %v10177_v57, %v10172_v62  ;;  %v21103_v14 = vpop.f32.mrb[44].mxu1  ;;  %v27325_v62 = vld [vmem:[%s30104_s7 + $0x38] sm:$0xff] }
 0x96e   : > { %v10187_v20 = vadd.f32 %v27270_v33, %v21103_v14  ;;  %v10181_v48 = vpop.f32.mrb[45].mxu1  ;;  %10610 = vmatmul.mubr.f32.gmra.mrb[222].mxu0 %v27317_v43 }
 0x96f   : > { %30941 = vst [vmem:[#allocation19_spill] sm:$0xff] %v27311_v30  ;;  %v10182_v18 = vadd.f32 %v27270_v33, %v10181_v48  ;;  %22316 = vmatpush1.bf16.msra.mxu1 %v27311_v30  ;;  %10614 = vmatprep.mubr.f32.mxu0 %v27325_v62  ;;  %v27335_v48 = vld [vmem:[%s30104_s7 + $0x30] sm:$0xff] }
 0x970   : > { %22317 = vmatprep.subr.bf16.mxu1 %v30905_v13 }
 0x971   : > { %v27329_v57 = vpack.c.bf16 %v10187_v20, %v10182_v18  ;;  %v21106_v14 = vpop.f32.mrb[46].mxu1  ;;  %v27343_v18 = vld [vmem:[%s30104_s7 + $0x48] sm:$0xff] }
 0x972   : > { %v10197_v56 = vadd.f32 %v27270_v33, %v21106_v14  ;;  %v10191_v4 = vpop.f32.mrb[47].mxu1  ;;  %10615 = vmatmul.mubr.f32.gmra.mrb[224].mxu0 %v27335_v48 }
 0x973   : > { %30942 = vst [vmem:[#allocation11_spill] sm:$0xff] %v27329_v57  ;;  %v10192_v9 = vadd.f32 %v27270_v33, %v10191_v4  ;;  %22319 = vmatpush1.bf16.msra.mxu1 %v27329_v57  ;;  %10619 = vmatprep.mubr.f32.mxu0 %v27343_v18  ;;  %v27353_v4 = vld [vmem:[%s30104_s7 + $0x40] sm:$0xff] }
 0x974   : > { %22320 = vmatprep.subr.bf16.mxu1 %v30905_v13 }
 0x975   : > { %v27347_v20 = vpack.c.bf16 %v10197_v56, %v10192_v9  ;;  %v21109_v14 = vpop.f32.mrb[48].mxu1  ;;  %v27361_v9 = vld [vmem:[%s30104_s7 + $0x58] sm:$0xff] }
 0x976   : > { %v10207_v60 = vadd.f32 %v27270_v33, %v21109_v14  ;;  %v10201_v21 = vpop.f32.mrb[49].mxu1  ;;  %10620 = vmatmul.mubr.f32.gmra.mrb[226].mxu0 %v27353_v4 }
 0x977   : > { %30943 = vst [vmem:[#allocation68_spill] sm:$0xff] %v27347_v20  ;;  %v10202_v49 = vadd.f32 %v27270_v33, %v10201_v21  ;;  %22322 = vmatpush1.bf16.msra.mxu1 %v27347_v20  ;;  %10624 = vmatprep.mubr.f32.mxu0 %v27361_v9  ;;  %v27371_v21 = vld [vmem:[%s30104_s7 + $0x50] sm:$0xff] }
 0x978   : > { %22323 = vmatprep.subr.bf16.mxu1 %v30905_v13 }
 0x979   : > { %v27365_v56 = vpack.c.bf16 %v10207_v60, %v10202_v49  ;;  %v21112_v14 = vpop.f32.mrb[50].mxu1  ;;  %v27379_v49 = vld [vmem:[%s30104_s7 + $0x68] sm:$0xff] }
 0x97a   : > { %v10217_v55 = vadd.f32 %v27270_v33, %v21112_v14  ;;  %v10211_v46 = vpop.f32.mrb[51].mxu1  ;;  %10625 = vmatmul.mubr.f32.gmra.mrb[228].mxu0 %v27371_v21 }
 0x97b   : > { %30944 = vst [vmem:[#allocation13_spill] sm:$0xff] %v27365_v56  ;;  %v10212_v52 = vadd.f32 %v27270_v33, %v10211_v46  ;;  %22325 = vmatpush1.bf16.msra.mxu1 %v27365_v56  ;;  %10629 = vmatprep.mubr.f32.mxu0 %v27379_v49  ;;  %v27389_v46 = vld [vmem:[%s30104_s7 + $0x60] sm:$0xff] }
 0x97c   : > { %22326 = vmatprep.subr.bf16.mxu1 %v30905_v13 }
 0x97d   : > { %v27383_v60 = vpack.c.bf16 %v10217_v55, %v10212_v52  ;;  %v21115_v14 = vpop.f32.mrb[52].mxu1  ;;  %v27397_v52 = vld [vmem:[%s30104_s7 + $0x78] sm:$0xff] }
 0x97e   : > { %v10227_v3 = vadd.f32 %v27270_v33, %v21115_v14  ;;  %v10221_v39 = vpop.f32.mrb[53].mxu1  ;;  %10630 = vmatmul.mubr.f32.gmra.mrb[230].mxu0 %v27389_v46 }
 0x97f   : > { %30945 = vst [vmem:[#allocation76_spill] sm:$0xff] %v27383_v60  ;;  %v10222_v47 = vadd.f32 %v27270_v33, %v10221_v39  ;;  %22328 = vmatpush1.bf16.msra.mxu1 %v27383_v60  ;;  %10634 = vmatprep.mubr.f32.mxu0 %v27397_v52  ;;  %v27407_v39 = vld [vmem:[%s30104_s7 + $0x70] sm:$0xff] }
 0x980   : > { %22329 = vmatprep.subr.bf16.mxu1 %v30905_v13 }
 0x981   : > { %v27401_v55 = vpack.c.bf16 %v10227_v3, %v10222_v47  ;;  %v21118_v14 = vpop.f32.mrb[54].mxu1  ;;  %v27415_v47 = vld [vmem:[%s30104_s7 + $0x88] sm:$0xff] }
 0x982   : > { %v10237_v31 = vadd.f32 %v27270_v33, %v21118_v14  ;;  %v10231_v29 = vpop.f32.mrb[55].mxu1  ;;  %10635 = vmatmul.mubr.f32.gmra.mrb[232].mxu0 %v27407_v39 }
 0x983   : > { %30946 = vst [vmem:[#allocation14_spill] sm:$0xff] %v27401_v55  ;;  %v10232_v22 = vadd.f32 %v27270_v33, %v10231_v29  ;;  %22331 = vmatpush1.bf16.msra.mxu1 %v27401_v55  ;;  %10639 = vmatprep.mubr.f32.mxu0 %v27415_v47  ;;  %v27425_v29 = vld [vmem:[%s30104_s7 + $0x80] sm:$0xff] }
 0x984   : > { %22332 = vmatprep.subr.bf16.mxu1 %v30905_v13 }
 0x985   : > { %v27419_v3 = vpack.c.bf16 %v10237_v31, %v10232_v22  ;;  %v21121_v14 = vpop.f32.mrb[56].mxu1  ;;  %v27433_v22 = vld [vmem:[%s30104_s7 + $0x98] sm:$0xff] }
 0x986   : > { %v10247_v7 = vadd.f32 %v27270_v33, %v21121_v14  ;;  %v10241_v36 = vpop.f32.mrb[57].mxu1  ;;  %10640 = vmatmul.mubr.f32.gmra.mrb[234].mxu0 %v27425_v29 }
 0x987   : > { %30947 = vst [vmem:[#allocation80_spill] sm:$0xff] %v27419_v3  ;;  %v10242_v58 = vadd.f32 %v27270_v33, %v10241_v36  ;;  %22334 = vmatpush1.bf16.msra.mxu1 %v27419_v3  ;;  %10644 = vmatprep.mubr.f32.mxu0 %v27433_v22  ;;  %v27443_v36 = vld [vmem:[%s30104_s7 + $0x90] sm:$0xff] }
 0x988   : > { %22335 = vmatprep.subr.bf16.mxu1 %v30905_v13 }
 0x989   : > { %v27437_v31 = vpack.c.bf16 %v10247_v7, %v10242_v58  ;;  %v21124_v14 = vpop.f32.mrb[58].mxu1  ;;  %v27451_v7 = vld [vmem:[%s30104_s7 + $0xa8] sm:$0xff] }
 0x98a   : > { %v10257_v2 = vadd.f32 %v27270_v33, %v21124_v14  ;;  %v10251_v25 = vpop.f32.mrb[59].mxu1  ;;  %10645 = vmatmul.mubr.f32.gmra.mrb[236].mxu0 %v27443_v36 }
 0x98b   : > { %30948 = vst [vmem:[#allocation69_spill] sm:$0xff] %v27437_v31  ;;  %v10252_v16 = vadd.f32 %v27270_v33, %v10251_v25  ;;  %22337 = vmatpush1.bf16.msra.mxu1 %v27437_v31  ;;  %10649 = vmatprep.mubr.f32.mxu0 %v27451_v7  ;;  %v27461_v25 = vld [vmem:[%s30104_s7 + $0xa0] sm:$0xff] }
 0x98c   : > { %22338 = vmatprep.subr.bf16.mxu1 %v30905_v13  ;;  %v27550_v31 = vld [vmem:[%s30103_s6] ss:$0 sm:$0xff] }
 0x98d   : > { %v27455_v58 = vpack.c.bf16 %v10257_v2, %v10252_v16  ;;  %v21127_v14 = vpop.f32.mrb[60].mxu1  ;;  %v27469_v16 = vld [vmem:[%s30104_s7 + $0xb8] sm:$0xff] }
 0x98e   : > { %v10267_v38 = vadd.f32 %v27270_v33, %v21127_v14  ;;  %v10261_v32 = vpop.f32.mrb[61].mxu1  ;;  %10650 = vmatmul.mubr.f32.gmra.mrb[238].mxu0 %v27461_v25 }
 0x98f   : > { %30949 = vst [vmem:[#allocation78_spill] sm:$0xff] %v27455_v58  ;;  %v10262_v41 = vadd.f32 %v27270_v33, %v10261_v32  ;;  %22340 = vmatpush1.bf16.msra.mxu1 %v27455_v58  ;;  %10654 = vmatprep.mubr.f32.mxu0 %v27469_v16  ;;  %v27479_v32 = vld [vmem:[%s30104_s7 + $0xb0] sm:$0xff] }
 0x990   : > { %22341 = vmatprep.subr.bf16.mxu1 %v30905_v13  ;;  %30951 = vst [vmem:[#allocation67_spill] sm:$0xff] %v27479_v32 }
 0x991   : > { %v27473_v2 = vpack.c.bf16 %v10267_v38, %v10262_v41  ;;  %v21130_v14 = vpop.f32.mrb[62].mxu1  ;;  %v27487_v38 = vld [vmem:[%s30104_s7 + $0xc8] sm:$0xff] }
 0x992   : > { %v10277_v50 = vadd.f32 %v27270_v33, %v21130_v14  ;;  %v10271_v51 = vpop.f32.mrb[63].mxu1  ;;  %10655 = vmatmul.mubr.f32.gmra.mrb[240].mxu0 %v27479_v32 }
 0x993   : > { %30950 = vst [vmem:[#allocation83_spill] sm:$0xff] %v27473_v2  ;;  %v10272_v17 = vadd.f32 %v27270_v33, %v10271_v51  ;;  %22343 = vmatpush1.bf16.msra.mxu1 %v27473_v2  ;;  %10659 = vmatprep.mubr.f32.mxu0 %v27487_v38  ;;  %v27497_v51 = vld [vmem:[%s30104_s7 + $0xc0] sm:$0xff] }
 0x994   : > { %22344 = vmatprep.subr.bf16.mxu1 %v30905_v13  ;;  %30953 = vst [vmem:[#allocation26_spill] sm:$0xff] %v27497_v51 }
 0x995   : > { %v27491_v41 = vpack.c.bf16 %v10277_v50, %v10272_v17  ;;  %v21133_v14 = vpop.f32.mrb[64].mxu1  ;;  %v27505_v50 = vld [vmem:[%s30104_s7 + $0xd8] sm:$0xff] }
 0x996   : > { %v10287_v26 = vadd.f32 %v27270_v33, %v21133_v14  ;;  %v10281_v40 = vpop.f32.mrb[65].mxu1  ;;  %10660 = vmatmul.mubr.f32.gmra.mrb[242].mxu0 %v27497_v51 }
 0x997   : > { %30952 = vst [vmem:[#allocation81_spill] sm:$0xff] %v27491_v41  ;;  %v10282_v2 = vadd.f32 %v27270_v33, %v10281_v40  ;;  %22346 = vmatpush1.bf16.msra.mxu1 %v27491_v41  ;;  %10664 = vmatprep.mubr.f32.mxu0 %v27505_v50  ;;  %v27515_v40 = vld [vmem:[%s30104_s7 + $0xd0] sm:$0xff] }
 0x998   : > { %22347 = vmatprep.subr.bf16.mxu1 %v30905_v13  ;;  %30955 = vst [vmem:[#allocation16_spill] sm:$0xff] %v27515_v40 }
 0x999   : > { %v27509_v17 = vpack.c.bf16 %v10287_v26, %v10282_v2  ;;  %v21136_v14 = vpop.f32.mrb[66].mxu1  ;;  %v27523_v26 = vld [vmem:[%s30104_s7 + $0xe8] sm:$0xff] }
 0x99a   : > { %v10297_v19 = vadd.f32 %v27270_v33, %v21136_v14  ;;  %v10291_v6 = vpop.f32.mrb[67].mxu1  ;;  %10665 = vmatmul.mubr.f32.gmra.mrb[244].mxu0 %v27515_v40 }
 0x99b   : > { %30954 = vst [vmem:[#allocation15_spill] sm:$0xff] %v27509_v17  ;;  %v10292_v41 = vadd.f32 %v27270_v33, %v10291_v6  ;;  %22349 = vmatpush1.bf16.msra.mxu1 %v27509_v17  ;;  %10669 = vmatprep.mubr.f32.mxu0 %v27523_v26  ;;  %v27533_v6 = vld [vmem:[%s30104_s7 + $0xe0] sm:$0xff] }
 0x99c   : > { %22350 = vmatprep.subr.bf16.mxu1 %v30905_v13 }
 0x99d   : > { %v27527_v2 = vpack.c.bf16 %v10297_v19, %v10292_v41  ;;  %v21139_v14 = vpop.f32.mrb[68].mxu1  ;;  %v27541_v19 = vld [vmem:[%s30104_s7 + $0xf8] sm:$0xff] }
 0x99e   : > { %v10307_v24 = vadd.f32 %v27270_v33, %v21139_v14  ;;  %v10301_v58 = vpop.f32.mrb[69].mxu1  ;;  %10670 = vmatmul.mubr.f32.gmra.mrb[246].mxu0 %v27533_v6 }
 0x99f   : > { %30956 = vst [vmem:[#allocation17_spill] sm:$0xff] %v27527_v2  ;;  %v10302_v17 = vadd.f32 %v27270_v33, %v10301_v58  ;;  %22352 = vmatpush1.bf16.msra.mxu1 %v27527_v2  ;;  %10674 = vmatprep.mubr.f32.mxu0 %v27541_v19  ;;  %v27556_v2 = vld [vmem:[%s30104_s7 + $0xf0] sm:$0xff] }
 0x9a0   : > { %22353 = vmatprep.subr.bf16.mxu1 %v30905_v13 }
 0x9a1   : > { %v27545_v41 = vpack.c.bf16 %v10307_v24, %v10302_v17  ;;  %v21158_v14 = vpop.f32.mrb[70].mxu1  ;;  %v27564_v24 = vld [vmem:[%s30104_s7 + $0x108] sm:$0xff] }
 0x9a2   : > { %v10382_v33 = vadd.f32 %v27550_v31, %v21158_v14  ;;  %v10376_v58 = vpop.f32.mrb[71].mxu1  ;;  %10675 = vmatmul.mubr.f32.gmra.mrb[248].mxu0 %v27556_v2 }
 0x9a3   : > { %30957 = vst [vmem:[#allocation70_spill] sm:$0xff] %v27545_v41  ;;  %v10377_v23 = vadd.f32 %v27550_v31, %v10376_v58  ;;  %22355 = vmatpush1.bf16.msra.mxu1 %v27545_v41  ;;  %10679 = vmatprep.mubr.f32.mxu0 %v27564_v24  ;;  %v27574_v58 = vld [vmem:[%s30104_s7 + $0x100] sm:$0xff] }
 0x9a5   : > { %v27567_v17 = vpack.c.bf16 %v10382_v33, %v10377_v23  ;;  %v21161_v14 = vpop.f32.mrb[72].mxu1  ;;  %v27584_v23 = vld [vmem:[%s30104_s7 + $0x118] sm:$0xff] }
 0x9a6   : > { %v10392_v61 = vadd.f32 %v27550_v31, %v21161_v14  ;;  %v10386_v63 = vpop.f32.mrb[73].mxu1  ;;  %10825 = vmatmul.mubr.f32.vlgmr.msra.gmra.mrb[102].mxu1 %v27281_v54  ;;  %10680 = vmatmul.mubr.f32.gmra.mrb[250].mxu0 %v27574_v58 }
 0x9a7   : > { %30958 = vst [vmem:[#allocation101_spill] sm:$0xff] %v27567_v17  ;;  %v10387_v41 = vadd.f32 %v27550_v31, %v10386_v63  ;;  %22358 = vmatpush1.bf16.msra.mxu0 %v27567_v17  ;;  %10829 = vmatprep.mubr.f32.mxu1 %v27289_v0  ;;  %v27594_v63 = vld [vmem:[%s30104_s7 + $0x110] sm:$0xff] }
 0x9a8   : > { %22359 = vmatprep.subr.bf16.mxu0 %v30905_v13  ;;  %10684 = vmatprep.mubr.f32.mxu0 %v27584_v23 }
 0x9a9   : > { %v27587_v33 = vpack.c.bf16 %v10392_v61, %v10387_v41  ;;  %v21164_v14 = vpop.f32.mrb[74].mxu1  ;;  %v27604_v61 = vld [vmem:[%s30104_s7 + $0x128] sm:$0xff] }
 0x9aa   : > { %v10402_v53 = vadd.f32 %v27550_v31, %v21164_v14  ;;  %v10396_v3 = vpop.f32.mrb[75].mxu1  ;;  %10830 = vmatmul.mubr.f32.gmra.mrb[104].mxu1 %v27299_v15  ;;  %10685 = vmatmul.mubr.f32.gmra.mrb[252].mxu0 %v27594_v63 }
 0x9ab   : > { %30959 = vst [vmem:[#allocation102_spill] sm:$0xff] %v27587_v33  ;;  %v10397_v17 = vadd.f32 %v27550_v31, %v10396_v3  ;;  %22361 = vmatpush1.bf16.msra.mxu0 %v27587_v33  ;;  %10834 = vmatprep.mubr.f32.mxu1 %v27307_v5  ;;  %v27614_v3 = vld [vmem:[%s30104_s7 + $0x120] sm:$0xff] }
 0x9ac   : > { %22362 = vmatprep.subr.bf16.mxu0 %v30905_v13  ;;  %10689 = vmatprep.mubr.f32.mxu0 %v27604_v61 }
 0x9ad   : > { %v27607_v41 = vpack.c.bf16 %v10402_v53, %v10397_v17  ;;  %v21167_v14 = vpop.f32.mrb[76].mxu1  ;;  %v27624_v53 = vld [vmem:[%s30104_s7 + $0x138] sm:$0xff] }
 0x9ae   : > { %v10412_v55 = vadd.f32 %v27550_v31, %v21167_v14  ;;  %v10406_v27 = vpop.f32.mrb[77].mxu1  ;;  %10835 = vmatmul.mubr.f32.gmra.mrb[106].mxu1 %v27317_v43  ;;  %10690 = vmatmul.mubr.f32.gmra.mrb[254].mxu0 %v27614_v3 }
 0x9af   : > { %30960 = vst [vmem:[#allocation103_spill] sm:$0xff] %v27607_v41  ;;  %v10407_v33 = vadd.f32 %v27550_v31, %v10406_v27  ;;  %22364 = vmatpush1.bf16.msra.mxu0 %v27607_v41  ;;  %10839 = vmatprep.mubr.f32.mxu1 %v27325_v62  ;;  %v27634_v27 = vld [vmem:[%s30104_s7 + $0x130] sm:$0xff] }
 0x9b0   : > { %22365 = vmatprep.subr.bf16.mxu0 %v30905_v13  ;;  %10694 = vmatprep.mubr.f32.mxu0 %v27624_v53 }
 0x9b1   : > { %v27627_v17 = vpack.c.bf16 %v10412_v55, %v10407_v33  ;;  %v21170_v14 = vpop.f32.mrb[78].mxu1  ;;  %v27644_v55 = vld [vmem:[%s30104_s7 + $0x148] sm:$0xff] }
 0x9b2   : > { %v10422_v8 = vadd.f32 %v27550_v31, %v21170_v14  ;;  %v10416_v28 = vpop.f32.mrb[79].mxu1  ;;  %10840 = vmatmul.mubr.f32.gmra.mrb[108].mxu1 %v27335_v48  ;;  %10695 = vmatmul.mubr.f32.gmra.mrb[0].mxu0 %v27634_v27 }
 0x9b3   : > { %30961 = vst [vmem:[#allocation104_spill] sm:$0xff] %v27627_v17  ;;  %v10417_v41 = vadd.f32 %v27550_v31, %v10416_v28  ;;  %22367 = vmatpush1.bf16.msra.mxu0 %v27627_v17  ;;  %10844 = vmatprep.mubr.f32.mxu1 %v27343_v18  ;;  %v27654_v28 = vld [vmem:[%s30104_s7 + $0x140] sm:$0xff] }
 0x9b4   : > { %22368 = vmatprep.subr.bf16.mxu0 %v30905_v13  ;;  %10699 = vmatprep.mubr.f32.mxu0 %v27644_v55 }
 0x9b5   : > { %v27647_v33 = vpack.c.bf16 %v10422_v8, %v10417_v41  ;;  %v21173_v14 = vpop.f32.mrb[80].mxu1  ;;  %v27664_v8 = vld [vmem:[%s30104_s7 + $0x158] sm:$0xff] }
 0x9b6   : > { %v10432_v1 = vadd.f32 %v27550_v31, %v21173_v14  ;;  %v10426_v60 = vpop.f32.mrb[81].mxu1  ;;  %10845 = vmatmul.mubr.f32.gmra.mrb[110].mxu1 %v27353_v4  ;;  %10700 = vmatmul.mubr.f32.gmra.mrb[2].mxu0 %v27654_v28 }
 0x9b7   : > { %30962 = vst [vmem:[#allocation105_spill] sm:$0xff] %v27647_v33  ;;  %v10427_v17 = vadd.f32 %v27550_v31, %v10426_v60  ;;  %22370 = vmatpush1.bf16.msra.mxu0 %v27647_v33  ;;  %10849 = vmatprep.mubr.f32.mxu1 %v27361_v9  ;;  %v27674_v60 = vld [vmem:[%s30104_s7 + $0x150] sm:$0xff] }
 0x9b8   : > { %22371 = vmatprep.subr.bf16.mxu0 %v30905_v13  ;;  %10704 = vmatprep.mubr.f32.mxu0 %v27664_v8 }
 0x9b9   : > { %v27667_v41 = vpack.c.bf16 %v10432_v1, %v10427_v17  ;;  %v21176_v14 = vpop.f32.mrb[82].mxu1  ;;  %v27684_v1 = vld [vmem:[%s30104_s7 + $0x168] sm:$0xff] }
 0x9ba   : > { %v10442_v56 = vadd.f32 %v27550_v31, %v21176_v14  ;;  %v10436_v45 = vpop.f32.mrb[83].mxu1  ;;  %10850 = vmatmul.mubr.f32.gmra.mrb[112].mxu1 %v27371_v21  ;;  %10705 = vmatmul.mubr.f32.gmra.mrb[4].mxu0 %v27674_v60 }
 0x9bb   : > { %30963 = vst [vmem:[#allocation106_spill] sm:$0xff] %v27667_v41  ;;  %v10437_v33 = vadd.f32 %v27550_v31, %v10436_v45  ;;  %22373 = vmatpush1.bf16.msra.mxu0 %v27667_v41  ;;  %10854 = vmatprep.mubr.f32.mxu1 %v27379_v49  ;;  %v27694_v45 = vld [vmem:[%s30104_s7 + $0x160] sm:$0xff] }
 0x9bc   : > { %22374 = vmatprep.subr.bf16.mxu0 %v30905_v13  ;;  %10709 = vmatprep.mubr.f32.mxu0 %v27684_v1 }
 0x9bd   : > { %v27687_v17 = vpack.c.bf16 %v10442_v56, %v10437_v33  ;;  %v21179_v14 = vpop.f32.mrb[84].mxu1  ;;  %v27704_v56 = vld [vmem:[%s30104_s7 + $0x178] sm:$0xff] }
 0x9be   : > { %v10452_v11 = vadd.f32 %v27550_v31, %v21179_v14  ;;  %v10446_v42 = vpop.f32.mrb[85].mxu1  ;;  %10855 = vmatmul.mubr.f32.gmra.mrb[114].mxu1 %v27389_v46  ;;  %10710 = vmatmul.mubr.f32.gmra.mrb[6].mxu0 %v27694_v45 }
 0x9bf   : > { %30964 = vst [vmem:[#allocation107_spill] sm:$0xff] %v27687_v17  ;;  %v10447_v41 = vadd.f32 %v27550_v31, %v10446_v42  ;;  %22376 = vmatpush1.bf16.msra.mxu0 %v27687_v17  ;;  %10859 = vmatprep.mubr.f32.mxu1 %v27397_v52  ;;  %v27714_v42 = vld [vmem:[%s30104_s7 + $0x170] sm:$0xff] }
 0x9c0   : > { %22377 = vmatprep.subr.bf16.mxu0 %v30905_v13  ;;  %10714 = vmatprep.mubr.f32.mxu0 %v27704_v56 }
 0x9c1   : > { %v27707_v33 = vpack.c.bf16 %v10452_v11, %v10447_v41  ;;  %v21182_v14 = vpop.f32.mrb[86].mxu1  ;;  %v27724_v11 = vld [vmem:[%s30104_s7 + $0x188] sm:$0xff] }
 0x9c2   : > { %v10462_v12 = vadd.f32 %v27550_v31, %v21182_v14  ;;  %v10456_v20 = vpop.f32.mrb[87].mxu1  ;;  %10860 = vmatmul.mubr.f32.gmra.mrb[116].mxu1 %v27407_v39  ;;  %10715 = vmatmul.mubr.f32.gmra.mrb[8].mxu0 %v27714_v42 }
 0x9c3   : > { %30965 = vst [vmem:[#allocation108_spill] sm:$0xff] %v27707_v33  ;;  %v10457_v17 = vadd.f32 %v27550_v31, %v10456_v20  ;;  %22379 = vmatpush1.bf16.msra.mxu0 %v27707_v33  ;;  %10864 = vmatprep.mubr.f32.mxu1 %v27415_v47  ;;  %v27734_v20 = vld [vmem:[%s30104_s7 + $0x180] sm:$0xff] }
 0x9c4   : > { %22380 = vmatprep.subr.bf16.mxu0 %v30905_v13  ;;  %10719 = vmatprep.mubr.f32.mxu0 %v27724_v11 }
 0x9c5   : > { %v27727_v41 = vpack.c.bf16 %v10462_v12, %v10457_v17  ;;  %v21185_v14 = vpop.f32.mrb[88].mxu1  ;;  %v27744_v12 = vld [vmem:[%s30104_s7 + $0x198] sm:$0xff] }
 0x9c6   : > { %v10472_v57 = vadd.f32 %v27550_v31, %v21185_v14  ;;  %v10466_v59 = vpop.f32.mrb[89].mxu1  ;;  %10865 = vmatmul.mubr.f32.gmra.mrb[118].mxu1 %v27425_v29  ;;  %10720 = vmatmul.mubr.f32.gmra.mrb[10].mxu0 %v27734_v20 }
 0x9c7   : > { %30966 = vst [vmem:[#allocation109_spill] sm:$0xff] %v27727_v41  ;;  %v10467_v33 = vadd.f32 %v27550_v31, %v10466_v59  ;;  %22382 = vmatpush1.bf16.msra.mxu0 %v27727_v41  ;;  %10869 = vmatprep.mubr.f32.mxu1 %v27433_v22  ;;  %v27754_v59 = vld [vmem:[%s30104_s7 + $0x190] sm:$0xff] }
 0x9c8   : > { %22383 = vmatprep.subr.bf16.mxu0 %v30905_v13  ;;  %10724 = vmatprep.mubr.f32.mxu0 %v27744_v12 }
 0x9c9   : > { %v27747_v17 = vpack.c.bf16 %v10472_v57, %v10467_v33  ;;  %v21188_v14 = vpop.f32.mrb[90].mxu1  ;;  %v27764_v57 = vld [vmem:[%s30104_s7 + $0x1a8] sm:$0xff] }
 0x9ca   : > { %v10482_v10 = vadd.f32 %v27550_v31, %v21188_v14  ;;  %v10476_v34 = vpop.f32.mrb[91].mxu1  ;;  %10870 = vmatmul.mubr.f32.gmra.mrb[120].mxu1 %v27443_v36  ;;  %10725 = vmatmul.mubr.f32.gmra.mrb[12].mxu0 %v27754_v59 }
 0x9cb   : > { %30967 = vst [vmem:[#allocation110_spill] sm:$0xff] %v27747_v17  ;;  %v10477_v41 = vadd.f32 %v27550_v31, %v10476_v34  ;;  %22385 = vmatpush1.bf16.msra.mxu0 %v27747_v17  ;;  %10874 = vmatprep.mubr.f32.mxu1 %v27451_v7  ;;  %v27774_v34 = vld [vmem:[%s30104_s7 + $0x1a0] sm:$0xff] }
 0x9cc   : > { %22386 = vmatprep.subr.bf16.mxu0 %v30905_v13  ;;  %10729 = vmatprep.mubr.f32.mxu0 %v27764_v57 }
 0x9cd   : > { %v27767_v33 = vpack.c.bf16 %v10482_v10, %v10477_v41  ;;  %v21191_v14 = vpop.f32.mrb[92].mxu1  ;;  %v27784_v10 = vld [vmem:[%s30104_s7 + $0x1b8] sm:$0xff] }
 0x9ce   : > { %v10492_v30 = vadd.f32 %v27550_v31, %v21191_v14  ;;  %v10486_v44 = vpop.f32.mrb[93].mxu1  ;;  %10875 = vmatmul.mubr.f32.gmra.mrb[122].mxu1 %v27461_v25  ;;  %10730 = vmatmul.mubr.f32.gmra.mrb[14].mxu0 %v27774_v34 }
 0x9cf   : > { %30968 = vst [vmem:[#allocation111_spill] sm:$0xff] %v27767_v33  ;;  %v10487_v17 = vadd.f32 %v27550_v31, %v10486_v44  ;;  %22388 = vmatpush1.bf16.msra.mxu0 %v27767_v33  ;;  %10879 = vmatprep.mubr.f32.mxu1 %v27469_v16  ;;  %v27794_v44 = vld [vmem:[%s30104_s7 + $0x1b0] sm:$0xff] }
 0x9d0   : > { %22389 = vmatprep.subr.bf16.mxu0 %v30905_v13  ;;  %10734 = vmatprep.mubr.f32.mxu0 %v27784_v10  ;;  %30970 = vst [vmem:[#allocation113_spill] sm:$0xff] %v27794_v44 }
 0x9d1   : > { %v27787_v41 = vpack.c.bf16 %v10492_v30, %v10487_v17  ;;  %v21194_v14 = vpop.f32.mrb[94].mxu1  ;;  %v27804_v30 = vld [vmem:[%s30104_s7 + $0x1c8] sm:$0xff] }
 0x9d2   : > { %v10502_v35 = vadd.f32 %v27550_v31, %v21194_v14  ;;  %v10496_v37 = vpop.f32.mrb[95].mxu1  ;;  %10880 = vmatmul.mubr.f32.gmra.mrb[124].mxu1 %v27479_v32  ;;  %10735 = vmatmul.mubr.f32.gmra.mrb[16].mxu0 %v27794_v44 }
 0x9d3   : > { %30969 = vst [vmem:[#allocation112_spill] sm:$0xff] %v27787_v41  ;;  %v10497_v33 = vadd.f32 %v27550_v31, %v10496_v37  ;;  %22391 = vmatpush1.bf16.msra.mxu0 %v27787_v41  ;;  %10884 = vmatprep.mubr.f32.mxu1 %v27487_v38  ;;  %v27814_v37 = vld [vmem:[%s30104_s7 + $0x1c0] sm:$0xff] }
 0x9d4   : > { %22392 = vmatprep.subr.bf16.mxu0 %v30905_v13  ;;  %10739 = vmatprep.mubr.f32.mxu0 %v27804_v30  ;;  %30972 = vst [vmem:[#allocation115_spill] sm:$0xff] %v27814_v37 }
 0x9d5   : > { %v27807_v17 = vpack.c.bf16 %v10502_v35, %v10497_v33  ;;  %v21197_v14 = vpop.f32.mrb[96].mxu1  ;;  %v27824_v35 = vld [vmem:[%s30104_s7 + $0x1d8] sm:$0xff] }
 0x9d6   : > { %v10512_v32 = vadd.f32 %v27550_v31, %v21197_v14  ;;  %v10506_v44 = vpop.f32.mrb[97].mxu1  ;;  %10885 = vmatmul.mubr.f32.gmra.mrb[126].mxu1 %v27497_v51  ;;  %10740 = vmatmul.mubr.f32.gmra.mrb[18].mxu0 %v27814_v37 }
 0x9d7   : > { %30971 = vst [vmem:[#allocation114_spill] sm:$0xff] %v27807_v17  ;;  %v10507_v41 = vadd.f32 %v27550_v31, %v10506_v44  ;;  %22394 = vmatpush1.bf16.msra.mxu0 %v27807_v17  ;;  %10889 = vmatprep.mubr.f32.mxu1 %v27505_v50  ;;  %v27834_v44 = vld [vmem:[%s30104_s7 + $0x1d0] sm:$0xff] }
 0x9d8   : > { %22395 = vmatprep.subr.bf16.mxu0 %v30905_v13  ;;  %10744 = vmatprep.mubr.f32.mxu0 %v27824_v35  ;;  %30974 = vst [vmem:[#allocation117_spill] sm:$0xff] %v27834_v44 }
 0x9d9   : > { %v27827_v33 = vpack.c.bf16 %v10512_v32, %v10507_v41  ;;  %v21200_v14 = vpop.f32.mrb[98].mxu1  ;;  %v27844_v32 = vld [vmem:[%s30104_s7 + $0x1e8] sm:$0xff] }
 0x9da   : > { %v10522_v51 = vadd.f32 %v27550_v31, %v21200_v14  ;;  %v10516_v37 = vpop.f32.mrb[99].mxu1  ;;  %10890 = vmatmul.mubr.f32.gmra.mrb[128].mxu1 %v27515_v40  ;;  %10745 = vmatmul.mubr.f32.gmra.mrb[20].mxu0 %v27834_v44 }
 0x9db   : > { %30973 = vst [vmem:[#allocation116_spill] sm:$0xff] %v27827_v33  ;;  %v10517_v17 = vadd.f32 %v27550_v31, %v10516_v37  ;;  %22397 = vmatpush1.bf16.msra.mxu0 %v27827_v33  ;;  %10894 = vmatprep.mubr.f32.mxu1 %v27523_v26  ;;  %v27854_v37 = vld [vmem:[%s30104_s7 + $0x1e0] sm:$0xff] }
 0x9dc   : > { %22398 = vmatprep.subr.bf16.mxu0 %v30905_v13  ;;  %10749 = vmatprep.mubr.f32.mxu0 %v27844_v32 }
 0x9dd   : > { %v27847_v41 = vpack.c.bf16 %v10522_v51, %v10517_v17  ;;  %v21203_v14 = vpop.f32.mrb[100].mxu1  ;;  %v27864_v51 = vld [vmem:[%s30104_s7 + $0x1f8] sm:$0xff] }
 0x9de   : > { %v10532_v40 = vadd.f32 %v27550_v31, %v21203_v14  ;;  %v10526_v44 = vpop.f32.mrb[101].mxu1  ;;  %10895 = vmatmul.mubr.f32.gmra.mrb[130].mxu1 %v27533_v6  ;;  %10750 = vmatmul.mubr.f32.gmra.mrb[22].mxu0 %v27854_v37 }
 0x9df   : > { %30975 = vst [vmem:[#allocation118_spill] sm:$0xff] %v27847_v41  ;;  %v10527_v33 = vadd.f32 %v27550_v31, %v10526_v44  ;;  %22400 = vmatpush1.bf16.msra.mxu0 %v27847_v41  ;;  %10899 = vmatprep.mubr.f32.mxu1 %v27541_v19  ;;  %v27873_v31 = vld [vmem:[%s30104_s7 + $0x1f0] sm:$0xff]  ;;  %v23211_v44 = vld [vmem:[%s30104_s7 + $0x8] sm:$0xff] }
 0x9e0   : > { %22401 = vmatprep.subr.bf16.mxu0 %v30905_v13  ;;  %10754 = vmatprep.mubr.f32.mxu0 %v27864_v51 }
 0x9e1   : > { %v27867_v17 = vpack.c.bf16 %v10532_v40, %v10527_v33 }
 0x9e2   : > { %10900 = vmatmul.mubr.f32.gmra.mrb[132].mxu1 %v27556_v2  ;;  %10755 = vmatmul.mubr.f32.gmra.mrb[24].mxu0 %v27873_v31 }
 0x9e3   : > { %30976 = vst [vmem:[#allocation119_spill] sm:$0xff] %v27867_v17  ;;  %22403 = vmatpush1.bf16.msra.mxu0 %v27867_v17  ;;  %10904 = vmatprep.mubr.f32.mxu1 %v27564_v24 }
 0x9e4   : > { %11049 = vmatprep.mubr.f32.mxu0 %v23211_v44 }
 0x9e6   : > { %10905 = vmatmul.mubr.f32.gmra.mrb[134].mxu1 %v27574_v58  ;;  %11050 = vmatmul.mubr.f32.vlgmr.msra.gmra.mrb[26].mxu0 %v27281_v54  ;;  %v30977_v54 = vld [vmem:[#allocation113_spill] sm:$0xff] }
 0x9e7   : > { %10909 = vmatprep.mubr.f32.mxu1 %v27584_v23  ;;  %11054 = vmatprep.mubr.f32.mxu0 %v27289_v0  ;;  %v30978_v0 = vld [vmem:[#allocation67_spill] sm:$0xff] }
 0x9ea   : > { %10910 = vmatmul.mubr.f32.gmra.mrb[136].mxu1 %v27594_v63  ;;  %11055 = vmatmul.mubr.f32.gmra.mrb[28].mxu0 %v27299_v15  ;;  %v30979_v15 = vld [vmem:[#allocation115_spill] sm:$0xff] }
 0x9eb   : > { %10914 = vmatprep.mubr.f32.mxu1 %v27604_v61  ;;  %11059 = vmatprep.mubr.f32.mxu0 %v27307_v5  ;;  %v30980_v5 = vld [vmem:[#allocation26_spill] sm:$0xff] }
 0x9ee   : > { %10915 = vmatmul.mubr.f32.gmra.mrb[138].mxu1 %v27614_v3  ;;  %11060 = vmatmul.mubr.f32.gmra.mrb[30].mxu0 %v27317_v43  ;;  %v30981_v43 = vld [vmem:[#allocation117_spill] sm:$0xff] }
 0x9ef   : > { %10919 = vmatprep.mubr.f32.mxu1 %v27624_v53  ;;  %11064 = vmatprep.mubr.f32.mxu0 %v27325_v62  ;;  %v30982_v62 = vld [vmem:[#allocation16_spill] sm:$0xff] }
 0x9f2   : > { %10920 = vmatmul.mubr.f32.gmra.mrb[140].mxu1 %v27634_v27  ;;  %11065 = vmatmul.mubr.f32.gmra.mrb[32].mxu0 %v27335_v48 }
 0x9f3   : > { %10924 = vmatprep.mubr.f32.mxu1 %v27644_v55  ;;  %11069 = vmatprep.mubr.f32.mxu0 %v27343_v18 }
 0x9f6   : > { %10925 = vmatmul.mubr.f32.gmra.mrb[142].mxu1 %v27654_v28  ;;  %11070 = vmatmul.mubr.f32.gmra.mrb[34].mxu0 %v27353_v4 }
 0x9f7   : > { %10929 = vmatprep.mubr.f32.mxu1 %v27664_v8  ;;  %11074 = vmatprep.mubr.f32.mxu0 %v27361_v9 }
 0x9fa   : > { %10930 = vmatmul.mubr.f32.gmra.mrb[144].mxu1 %v27674_v60  ;;  %11075 = vmatmul.mubr.f32.gmra.mrb[36].mxu0 %v27371_v21 }
 0x9fb   : > { %10934 = vmatprep.mubr.f32.mxu1 %v27684_v1  ;;  %11079 = vmatprep.mubr.f32.mxu0 %v27379_v49 }
 0x9fe   : > { %10935 = vmatmul.mubr.f32.gmra.mrb[146].mxu1 %v27694_v45  ;;  %11080 = vmatmul.mubr.f32.gmra.mrb[38].mxu0 %v27389_v46 }
 0x9ff   : > { %10939 = vmatprep.mubr.f32.mxu1 %v27704_v56  ;;  %11084 = vmatprep.mubr.f32.mxu0 %v27397_v52 }
 0xa02   : > { %10940 = vmatmul.mubr.f32.gmra.mrb[148].mxu1 %v27714_v42  ;;  %11085 = vmatmul.mubr.f32.gmra.mrb[40].mxu0 %v27407_v39 }
 0xa03   : > { %10944 = vmatprep.mubr.f32.mxu1 %v27724_v11  ;;  %11089 = vmatprep.mubr.f32.mxu0 %v27415_v47 }
 0xa06   : > { %10945 = vmatmul.mubr.f32.gmra.mrb[150].mxu1 %v27734_v20  ;;  %11090 = vmatmul.mubr.f32.gmra.mrb[42].mxu0 %v27425_v29 }
 0xa07   : > { %10949 = vmatprep.mubr.f32.mxu1 %v27744_v12  ;;  %11094 = vmatprep.mubr.f32.mxu0 %v27433_v22 }
 0xa0a   : > { %10950 = vmatmul.mubr.f32.gmra.mrb[152].mxu1 %v27754_v59  ;;  %11095 = vmatmul.mubr.f32.gmra.mrb[44].mxu0 %v27443_v36 }
 0xa0b   : > { %10954 = vmatprep.mubr.f32.mxu1 %v27764_v57  ;;  %11099 = vmatprep.mubr.f32.mxu0 %v27451_v7 }
 0xa0e   : > { %10955 = vmatmul.mubr.f32.gmra.mrb[154].mxu1 %v27774_v34  ;;  %11100 = vmatmul.mubr.f32.gmra.mrb[46].mxu0 %v27461_v25 }
 0xa0f   : > { %10959 = vmatprep.mubr.f32.mxu1 %v27784_v10  ;;  %11104 = vmatprep.mubr.f32.mxu0 %v27469_v16 }
 0xa12   : > { %10960 = vmatmul.mubr.f32.gmra.mrb[156].mxu1 %v30977_v54  ;;  %11105 = vmatmul.mubr.f32.gmra.mrb[48].mxu0 %v30978_v0 }
 0xa13   : > { %10964 = vmatprep.mubr.f32.mxu1 %v27804_v30  ;;  %11109 = vmatprep.mubr.f32.mxu0 %v27487_v38 }
 0xa16   : > { %10965 = vmatmul.mubr.f32.gmra.mrb[158].mxu1 %v30979_v15  ;;  %11110 = vmatmul.mubr.f32.gmra.mrb[50].mxu0 %v30980_v5 }
 0xa17   : > { %10969 = vmatprep.mubr.f32.mxu1 %v27824_v35  ;;  %11114 = vmatprep.mubr.f32.mxu0 %v27505_v50 }
 0xa1a   : > { %10970 = vmatmul.mubr.f32.gmra.mrb[160].mxu1 %v30981_v43  ;;  %11115 = vmatmul.mubr.f32.gmra.mrb[52].mxu0 %v30982_v62 }
 0xa1b   : > { %10974 = vmatprep.mubr.f32.mxu1 %v27844_v32  ;;  %11119 = vmatprep.mubr.f32.mxu0 %v27523_v26 }
 0xa1e   : > { %10975 = vmatmul.mubr.f32.gmra.mrb[162].mxu1 %v27854_v37  ;;  %11120 = vmatmul.mubr.f32.gmra.mrb[54].mxu0 %v27533_v6 }
 0xa1f   : > { %10979 = vmatprep.mubr.f32.mxu1 %v27864_v51  ;;  %11124 = vmatprep.mubr.f32.mxu0 %v27541_v19 }
 0xa22   : > { %10980 = vmatmul.mubr.f32.gmra.mrb[164].mxu1 %v27873_v31  ;;  %11125 = vmatmul.mubr.f32.gmra.mrb[56].mxu0 %v27556_v2 }
 0xa23   : > { %11129 = vmatprep.mubr.f32.mxu0 %v27564_v24 }
 0xa26   : > { %11130 = vmatmul.mubr.f32.gmra.mrb[58].mxu0 %v27574_v58 }
 0xa27   : > { %11134 = vmatprep.mubr.f32.mxu0 %v27584_v23 }
 0xa2a   : > { %11135 = vmatmul.mubr.f32.gmra.mrb[60].mxu0 %v27594_v63 }
 0xa2b   : > { %11139 = vmatprep.mubr.f32.mxu0 %v27604_v61 }
 0xa2e   : > { %11140 = vmatmul.mubr.f32.gmra.mrb[62].mxu0 %v27614_v3 }
 0xa2f   : > { %11144 = vmatprep.mubr.f32.mxu0 %v27624_v53 }
 0xa32   : > { %11145 = vmatmul.mubr.f32.gmra.mrb[64].mxu0 %v27634_v27 }
 0xa33   : > { %11149 = vmatprep.mubr.f32.mxu0 %v27644_v55 }
 0xa36   : > { %11150 = vmatmul.mubr.f32.gmra.mrb[66].mxu0 %v27654_v28 }
 0xa37   : > { %11154 = vmatprep.mubr.f32.mxu0 %v27664_v8 }
 0xa39   : > { %v10601_v48 = vpop.f32.mrb[218].mxu0 }
 0xa3a   : > { %v10603_v18 = vpop.f32.mrb[219].mxu0  ;;  %21208 = vmatprep.mubr.msk.f32.mxu1 %vm2041_vm1, %v10601_v48  ;;  %11155 = vmatmul.mubr.f32.gmra.mrb[68].mxu0 %v27674_v60 }
 0xa3b   : > { %11159 = vmatprep.mubr.f32.mxu0 %v27684_v1 }
 0xa3d   : > { %v27957_v4 = vpop.f32.mrb[220].mxu0 }
 0xa3e   : > { %v10608_v9 = vpop.f32.mrb[221].mxu0  ;;  %11160 = vmatmul.mubr.f32.gmra.mrb[70].mxu0 %v27694_v45 }
 0xa3f   : > { %11164 = vmatprep.mubr.f32.mxu0 %v27704_v56 }
 0xa41   : > { %v27961_v21 = vpop.f32.mrb[222].mxu0 }
 0xa42   : > { %v10613_v49 = vpop.f32.mrb[223].mxu0  ;;  %11165 = vmatmul.mubr.f32.gmra.mrb[72].mxu0 %v27714_v42 }
 0xa43   : > { %11169 = vmatprep.mubr.f32.mxu0 %v27724_v11 }
 0xa45   : > { %v27965_v46 = vpop.f32.mrb[224].mxu0 }
 0xa46   : > { %v10618_v52 = vpop.f32.mrb[225].mxu0  ;;  %11170 = vmatmul.mubr.f32.gmra.mrb[74].mxu0 %v27734_v20 }
 0xa47   : > { %11174 = vmatprep.mubr.f32.mxu0 %v27744_v12 }
 0xa49   : > { %v27969_v39 = vpop.f32.mrb[226].mxu0 }
 0xa4a   : > { %v10623_v47 = vpop.f32.mrb[227].mxu0  ;;  %11175 = vmatmul.mubr.f32.gmra.mrb[76].mxu0 %v27754_v59 }
 0xa4b   : > { %11179 = vmatprep.mubr.f32.mxu0 %v27764_v57 }
 0xa4d   : > { %v27973_v29 = vpop.f32.mrb[228].mxu0 }
 0xa4e   : > { %v10628_v22 = vpop.f32.mrb[229].mxu0  ;;  %11180 = vmatmul.mubr.f32.gmra.mrb[78].mxu0 %v27774_v34 }
 0xa4f   : > { %11184 = vmatprep.mubr.f32.mxu0 %v27784_v10 }
 0xa51   : > { %v27977_v36 = vpop.f32.mrb[230].mxu0 }
 0xa52   : > { %v10633_v7 = vpop.f32.mrb[231].mxu0  ;;  %11185 = vmatmul.mubr.f32.gmra.mrb[80].mxu0 %v30977_v54 }
 0xa53   : > { %11189 = vmatprep.mubr.f32.mxu0 %v27804_v30 }
 0xa55   : > { %v27981_v25 = vpop.f32.mrb[232].mxu0 }
 0xa56   : > { %v10638_v16 = vpop.f32.mrb[233].mxu0  ;;  %11190 = vmatmul.mubr.f32.gmra.mrb[82].mxu0 %v30979_v15 }
 0xa57   : > { %11194 = vmatprep.mubr.f32.mxu0 %v27824_v35 }
 0xa59   : > { %v27985_v38 = vpop.f32.mrb[234].mxu0 }
 0xa5a   : > { %v10643_v50 = vpop.f32.mrb[235].mxu0  ;;  %11195 = vmatmul.mubr.f32.gmra.mrb[84].mxu0 %v30981_v43 }
 0xa5b   : > { %11199 = vmatprep.mubr.f32.mxu0 %v27844_v32 }
 0xa5d   : > { %v27989_v40 = vpop.f32.mrb[236].mxu0 }
 0xa5e   : > { %v10648_v26 = vpop.f32.mrb[237].mxu0  ;;  %11200 = vmatmul.mubr.f32.gmra.mrb[86].mxu0 %v27854_v37 }
 0xa5f   : > { %11204 = vmatprep.mubr.f32.mxu0 %v27864_v51 }
 0xa61   : > { %v27993_v2 = vpop.f32.mrb[238].mxu0 }
 0xa62   : > { %v10653_v6 = vpop.f32.mrb[239].mxu0  ;;  %11205 = vmatmul.mubr.f32.gmra.mrb[88].mxu0 %v27873_v31 }
 0xa65   : > { %v27996_v19 = vpop.f32.mrb[240].mxu0 }
 0xa66   : > { %v10658_v24 = vpop.f32.mrb[241].mxu0 }
 0xa69   : > { %v27998_v58 = vpop.f32.mrb[242].mxu0 }
 0xa6a   : > { %v10663_v23 = vpop.f32.mrb[243].mxu0 }
 0xa6d   : > { %v28000_v63 = vpop.f32.mrb[244].mxu0 }
 0xa6e   : > { %v10668_v61 = vpop.f32.mrb[245].mxu0 }
 0xa71   : > { %v28002_v3 = vpop.f32.mrb[246].mxu0 }
 0xa72   : > { %v10673_v53 = vpop.f32.mrb[247].mxu0 }
 0xa75   : > { %v28004_v27 = vpop.f32.mrb[248].mxu0 }
 0xa76   : > { %v10678_v55 = vpop.f32.mrb[249].mxu0 }
 0xa79   : > { %v10826_v28 = vpop.f32.mrb[102].mxu1  ;;  %v28006_v8 = vpop.f32.mrb[250].mxu0 }
 0xa7a   : > { %v10828_v60 = vpop.f32.mrb[103].mxu1  ;;  %v10683_v1 = vpop.f32.mrb[251].mxu0 }
 0xa7d   : > { %v10831_v45 = vpop.f32.mrb[104].mxu1  ;;  %v28008_v56 = vpop.f32.mrb[252].mxu0 }
 0xa7e   : > { %v22404_v42 = vpack.c.bf16 %v10831_v45, %v10826_v28  ;;  %v10833_v11 = vpop.f32.mrb[105].mxu1  ;;  %v10688_v20 = vpop.f32.mrb[253].mxu0 }
 0xa80   : > { %22406 = vmatprep.subr.msk.bf16.mxu1 %vm24652_vm2, %v22404_v42 }
 0xa81   : > { %v10836_v59 = vpop.f32.mrb[106].mxu1  ;;  %22409 = vmatpush3.bf16.xpose.msk.msra.mxu1 %vm24652_vm2, %v22404_v42  ;;  %v28014_v57 = vpop.f32.mrb[254].mxu0 }
 0xa82   : > { %v10838_v34 = vpop.f32.mrb[107].mxu1  ;;  %v10693_v10 = vpop.f32.mrb[255].mxu0 }
 0xa85   : > { %v10841_v30 = vpop.f32.mrb[108].mxu1  ;;  %v28016_v35 = vpop.f32.mrb[0].mxu0 }
 0xa86   : > { %v22410_v33 = vpack.c.bf16 %v10841_v30, %v10836_v59  ;;  %v10843_v32 = vpop.f32.mrb[109].mxu1  ;;  %v10698_v14 = vpop.f32.mrb[1].mxu0 }
 0xa88   : > { %22412 = vmatprep.subr.msk.bf16.mxu1 %vm24652_vm2, %v22410_v33  ;;  %21209 = vmatmul.mubr.msk.f32.vlgmr.msra.gmra.mrb[166].mxu1 %vm2041_vm1, %v27957_v4 }
 0xa89   : > { %v10846_v37 = vpop.f32.mrb[110].mxu1  ;;  %22415 = vmatpush3.bf16.xpose.msk.msra.mxu1 %vm24652_vm2, %v22410_v33  ;;  %21215 = vmatprep.mubr.msk.f32.mxu1 %vm2041_vm1, %v27961_v21  ;;  %v28026_v51 = vpop.f32.mrb[2].mxu0 }
 0xa8a   : > { %v10848_v31 = vpop.f32.mrb[111].mxu1  ;;  %v10703_v44 = vpop.f32.mrb[3].mxu0 }
 0xa8d   : > { %v10851_v54 = vpop.f32.mrb[112].mxu1  ;;  %v28028_v0 = vpop.f32.mrb[4].mxu0 }
 0xa8e   : > { %v22416_v15 = vpack.c.bf16 %v10851_v54, %v10846_v37  ;;  %v10853_v5 = vpop.f32.mrb[113].mxu1  ;;  %v10708_v43 = vpop.f32.mrb[5].mxu0 }
 0xa90   : > { %22418 = vmatprep.subr.msk.bf16.mxu1 %vm24652_vm2, %v22416_v15  ;;  %21216 = vmatmul.mubr.msk.f32.vlgmr.msra.gmra.mrb[168].mxu1 %vm2041_vm1, %v27965_v46 }
 0xa91   : > { %v10856_v62 = vpop.f32.mrb[114].mxu1  ;;  %22421 = vmatpush3.bf16.xpose.msk.msra.mxu1 %vm24652_vm2, %v22416_v15  ;;  %21222 = vmatprep.mubr.msk.f32.mxu1 %vm2041_vm1, %v27969_v39  ;;  %v28038_v48 = vpop.f32.mrb[6].mxu0 }
 0xa92   : > { %v10858_v18 = vpop.f32.mrb[115].mxu1  ;;  %v10713_v4 = vpop.f32.mrb[7].mxu0 }
 0xa95   : > { %v10861_v9 = vpop.f32.mrb[116].mxu1  ;;  %v28040_v21 = vpop.f32.mrb[8].mxu0 }
 0xa96   : > { %v22422_v49 = vpack.c.bf16 %v10861_v9, %v10856_v62  ;;  %v10863_v52 = vpop.f32.mrb[117].mxu1  ;;  %v10718_v47 = vpop.f32.mrb[9].mxu0 }
 0xa98   : > { %22424 = vmatprep.subr.msk.bf16.mxu1 %vm24652_vm2, %v22422_v49  ;;  %21223 = vmatmul.mubr.msk.f32.vlgmr.msra.gmra.mrb[170].mxu1 %vm2041_vm1, %v27973_v29 }
 0xa99   : > { %v10866_v46 = vpop.f32.mrb[118].mxu1  ;;  %22427 = vmatpush3.bf16.xpose.msk.msra.mxu1 %vm24652_vm2, %v22422_v49  ;;  %21229 = vmatprep.mubr.msk.f32.mxu1 %vm2041_vm1, %v27977_v36  ;;  %v28050_v39 = vpop.f32.mrb[10].mxu0 }
 0xa9a   : > { %v10868_v22 = vpop.f32.mrb[119].mxu1  ;;  %v10723_v7 = vpop.f32.mrb[11].mxu0 }
 0xa9d   : > { %v10871_v16 = vpop.f32.mrb[120].mxu1  ;;  %v28052_v50 = vpop.f32.mrb[12].mxu0 }
 0xa9e   : > { %v22428_v26 = vpack.c.bf16 %v10871_v16, %v10866_v46  ;;  %v10873_v6 = vpop.f32.mrb[121].mxu1  ;;  %v10728_v24 = vpop.f32.mrb[13].mxu0 }
 0xaa0   : > { %22430 = vmatprep.subr.msk.bf16.mxu1 %vm24652_vm2, %v22428_v26  ;;  %21230 = vmatmul.mubr.msk.f32.vlgmr.msra.gmra.mrb[172].mxu1 %vm2041_vm1, %v27981_v25 }
 0xaa1   : > { %v10876_v29 = vpop.f32.mrb[122].mxu1  ;;  %22433 = vmatpush3.bf16.xpose.msk.msra.mxu1 %vm24652_vm2, %v22428_v26  ;;  %21236 = vmatprep.mubr.msk.f32.mxu1 %vm2041_vm1, %v27985_v38  ;;  %v28062_v36 = vpop.f32.mrb[14].mxu0 }
 0xaa2   : > { %v10878_v23 = vpop.f32.mrb[123].mxu1  ;;  %v10733_v61 = vpop.f32.mrb[15].mxu0 }
 0xaa5   : > { %v10881_v53 = vpop.f32.mrb[124].mxu1  ;;  %v28064_v55 = vpop.f32.mrb[16].mxu0 }
 0xaa6   : > { %v22434_v28 = vpack.c.bf16 %v10881_v53, %v10876_v29  ;;  %v10883_v60 = vpop.f32.mrb[125].mxu1  ;;  %v10738_v1 = vpop.f32.mrb[17].mxu0 }
 0xaa8   : > { %22436 = vmatprep.subr.msk.bf16.mxu1 %vm24652_vm2, %v22434_v28  ;;  %21237 = vmatmul.mubr.msk.f32.vlgmr.msra.gmra.mrb[174].mxu1 %vm2041_vm1, %v27989_v40 }
 0xaa9   : > { %v10886_v25 = vpop.f32.mrb[126].mxu1  ;;  %22439 = vmatpush3.bf16.xpose.msk.msra.mxu1 %vm24652_vm2, %v22434_v28  ;;  %21243 = vmatprep.mubr.msk.f32.mxu1 %vm2041_vm1, %v27993_v2  ;;  %v10741_v38 = vpop.f32.mrb[18].mxu0 }
 0xaaa   : > { %v10888_v45 = vpop.f32.mrb[127].mxu1  ;;  %v10743_v42 = vpop.f32.mrb[19].mxu0  ;;  %21306 = vmatprep.mubr.msk.f32.mxu0 %vm2041_vm1, %v10741_v38 }
 0xaad   : > { %v10891_v11 = vpop.f32.mrb[128].mxu1  ;;  %v28075_v20 = vpop.f32.mrb[20].mxu0 }
 0xaae   : > { %v22440_v59 = vpack.c.bf16 %v10891_v11, %v10886_v25  ;;  %v10893_v34 = vpop.f32.mrb[129].mxu1  ;;  %v10748_v10 = vpop.f32.mrb[21].mxu0 }
 0xab0   : > { %22442 = vmatprep.subr.msk.bf16.mxu1 %vm24652_vm2, %v22440_v59  ;;  %21244 = vmatmul.mubr.msk.f32.vlgmr.msra.gmra.mrb[176].mxu1 %vm2041_vm1, %v27996_v19 }
 0xab1   : > { %v10896_v40 = vpop.f32.mrb[130].mxu1  ;;  %22445 = vmatpush3.bf16.xpose.msk.msra.mxu1 %vm24652_vm2, %v22440_v59  ;;  %21250 = vmatprep.mubr.msk.f32.mxu1 %vm2041_vm1, %v27998_v58  ;;  %v28085_v2 = vpop.f32.mrb[22].mxu0 }
 0xab2   : > { %v10898_v30 = vpop.f32.mrb[131].mxu1  ;;  %v10753_v33 = vpop.f32.mrb[23].mxu0 }
 0xab5   : > { %v10901_v32 = vpop.f32.mrb[132].mxu1  ;;  %v28087_v14 = vpop.f32.mrb[24].mxu0 }
 0xab6   : > { %v22446_v37 = vpack.c.bf16 %v10901_v32, %v10896_v40  ;;  %v10903_v31 = vpop.f32.mrb[133].mxu1  ;;  %v10758_v44 = vpop.f32.mrb[25].mxu0 }
 0xab8   : > { %22448 = vmatprep.subr.msk.bf16.mxu1 %vm24652_vm2, %v22446_v37  ;;  %21251 = vmatmul.mubr.msk.f32.vlgmr.msra.gmra.mrb[178].mxu1 %vm2041_vm1, %v28000_v63 }
 0xab9   : > { %v10906_v19 = vpop.f32.mrb[134].mxu1  ;;  %22451 = vmatpush3.bf16.xpose.msk.msra.mxu1 %vm24652_vm2, %v22446_v37  ;;  %21257 = vmatprep.mubr.msk.f32.mxu1 %vm2041_vm1, %v28002_v3  ;;  %v11051_v43 = vpop.f32.mrb[26].mxu0 }
 0xaba   : > { %v10908_v58 = vpop.f32.mrb[135].mxu1  ;;  %v11053_v63 = vpop.f32.mrb[27].mxu0 }
 0xabb   : > { %v30984_v63 = vld [vmem:[#allocation7_spill] sm:$0xff] }
 0xabd   : > { %v10911_v54 = vpop.f32.mrb[136].mxu1  ;;  %v11056_v18 = vpop.f32.mrb[28].mxu0 }
 0xabe   : > { %v22452_v15 = vpack.c.bf16 %v10911_v54, %v10906_v19  ;;  %v10913_v5 = vpop.f32.mrb[137].mxu1  ;;  %v28105_v4 = vpack.c.bf16 %v11056_v18, %v11051_v43  ;;  %v11058_v9 = vpop.f32.mrb[29].mxu0 }
 0xac0   : > { %22454 = vmatprep.subr.msk.bf16.mxu1 %vm24652_vm2, %v22452_v15  ;;  %21258 = vmatmul.mubr.msk.f32.vlgmr.msra.gmra.mrb[180].mxu1 %vm2041_vm1, %v28004_v27 }
 0xac1   : > { %v10916_v62 = vpop.f32.mrb[138].mxu1  ;;  %22457 = vmatpush3.bf16.xpose.msk.msra.mxu1 %vm24652_vm2, %v22452_v15  ;;  %21264 = vmatprep.mubr.msk.f32.mxu1 %vm2041_vm1, %v28006_v8  ;;  %v11061_v49 = vpop.f32.mrb[30].mxu0 }
 0xac2   : > { %v10918_v3 = vpop.f32.mrb[139].mxu1  ;;  %v11063_v47 = vpop.f32.mrb[31].mxu0 }
 0xac5   : > { %v10921_v52 = vpop.f32.mrb[140].mxu1 }
 0xac6   : > { %v22458_v46 = vpack.c.bf16 %v10921_v52, %v10916_v62  ;;  %v10923_v22 = vpop.f32.mrb[141].mxu1 }
 0xac7   : > { %v30985_v22 = vld [vmem:[#allocation30_spill] sm:$0xff] }
 0xac8   : > { %22460 = vmatprep.subr.msk.bf16.mxu1 %vm24652_vm2, %v22458_v46  ;;  %21265 = vmatmul.mubr.msk.f32.vlgmr.msra.gmra.mrb[182].mxu1 %vm2041_vm1, %v28008_v56 }
 0xac9   : > { %v10926_v27 = vpop.f32.mrb[142].mxu1  ;;  %22463 = vmatpush3.bf16.xpose.msk.msra.mxu1 %vm24652_vm2, %v22458_v46  ;;  %21271 = vmatprep.mubr.msk.f32.mxu1 %vm2041_vm1, %v28014_v57  ;;  %v11066_v57 = vpop.f32.mrb[32].mxu0 }
 0xaca   : > { %v10928_v8 = vpop.f32.mrb[143].mxu1  ;;  %v28123_v61 = vpack.c.bf16 %v11066_v57, %v11061_v49  ;;  %v11068_v53 = vpop.f32.mrb[33].mxu0  ;;  %v30990_v57 = vld [vmem:[#allocation94_spill] sm:$0xff] }
 0xacb   : > { %v11071_v28 = vpop.f32.mrb[34].mxu0  ;;  %v30987_v8 = vld [vmem:[#allocation19_spill] sm:$0xff] }
 0xacc   : > { %v11073_v1 = vpop.f32.mrb[35].mxu0 }
 0xacd   : > { %v10931_v7 = vpop.f32.mrb[144].mxu1  ;;  %v11076_v45 = vpop.f32.mrb[36].mxu0  ;;  %v30994_v1 = vld [vmem:[#allocation44_spill] sm:$0xff] }
 0xace   : > { %v22464_v16 = vpack.c.bf16 %v10931_v7, %v10926_v27  ;;  %v10933_v26 = vpop.f32.mrb[145].mxu1  ;;  %v28133_v42 = vpack.c.bf16 %v11076_v45, %v11071_v28  ;;  %v11078_v11 = vpop.f32.mrb[37].mxu0  ;;  %v30986_v27 = vld [vmem:[#allocation9_spill] sm:$0xff]  ;;  %v30993_v28 = vld [vmem:[#allocation92_spill] sm:$0xff] }
 0xacf   : > { %v30997_v45 = vld [vmem:[#allocation13_spill] sm:$0xff]  ;;  %v30998_v11 = vld [vmem:[#allocation76_spill] sm:$0xff] }
 0xad0   : > { %22466 = vmatprep.subr.msk.bf16.mxu1 %vm24652_vm2, %v22464_v16  ;;  %21272 = vmatmul.mubr.msk.f32.vlgmr.msra.gmra.mrb[184].mxu1 %vm2041_vm1, %v28016_v35 }
 0xad1   : > { %v10936_v6 = vpop.f32.mrb[146].mxu1  ;;  %22469 = vmatpush3.bf16.xpose.msk.msra.mxu1 %vm24652_vm2, %v22464_v16  ;;  %21278 = vmatprep.mubr.msk.f32.mxu1 %vm2041_vm1, %v28026_v51  ;;  %v11081_v59 = vpop.f32.mrb[38].mxu0 }
 0xad2   : > { %v10938_v56 = vpop.f32.mrb[147].mxu1  ;;  %v11083_v10 = vpop.f32.mrb[39].mxu0 }
 0xad3   : > { %v31000_v10 = vld [vmem:[#allocation38_spill] sm:$0xff] }
 0xad5   : > { %v10941_v24 = vpop.f32.mrb[148].mxu1  ;;  %v11086_v33 = vpop.f32.mrb[40].mxu0 }
 0xad6   : > { %v22470_v29 = vpack.c.bf16 %v10941_v24, %v10936_v6  ;;  %v10943_v23 = vpop.f32.mrb[149].mxu1  ;;  %v28143_v32 = vpack.c.bf16 %v11086_v33, %v11081_v59  ;;  %v11088_v37 = vpop.f32.mrb[41].mxu0  ;;  %v30988_v6 = vld [vmem:[#allocation52_spill] sm:$0xff] }
 0xad7   : > { %v30989_v24 = vld [vmem:[#allocation24_spill] sm:$0xff]  ;;  %v31003_v37 = vld [vmem:[#allocation50_spill] sm:$0xff] }
 0xad8   : > { %22472 = vmatprep.subr.msk.bf16.mxu1 %vm24652_vm2, %v22470_v29  ;;  %21279 = vmatmul.mubr.msk.f32.vlgmr.msra.gmra.mrb[186].mxu1 %vm2041_vm1, %v28028_v0  ;;  %v31002_v33 = vld [vmem:[#allocation36_spill] sm:$0xff] }
 0xad9   : > { %v10946_v35 = vpop.f32.mrb[150].mxu1  ;;  %22475 = vmatpush3.bf16.xpose.msk.msra.mxu1 %vm24652_vm2, %v22470_v29  ;;  %21285 = vmatprep.mubr.msk.f32.mxu1 %vm2041_vm1, %v28038_v48  ;;  %v11091_v31 = vpop.f32.mrb[42].mxu0  ;;  %v30991_v29 = vld [vmem:[#allocation11_spill] sm:$0xff] }
 0xada   : > { %v10948_v51 = vpop.f32.mrb[151].mxu1  ;;  %v11093_v44 = vpop.f32.mrb[43].mxu0 }
 0xadd   : > { %v10951_v60 = vpop.f32.mrb[152].mxu1  ;;  %v11096_v58 = vpop.f32.mrb[44].mxu0 }
 0xade   : > { %v22476_v25 = vpack.c.bf16 %v10951_v60, %v10946_v35  ;;  %v10953_v38 = vpop.f32.mrb[153].mxu1  ;;  %v28153_v5 = vpack.c.bf16 %v11096_v58, %v11091_v31  ;;  %v11098_v43 = vpop.f32.mrb[45].mxu0 }
 0xadf   : > { %v30996_v38 = vld [vmem:[#allocation37_spill] sm:$0xff]  ;;  %v31008_v43 = vld [vmem:[#allocation56_spill] sm:$0xff] }
 0xae0   : > { %22478 = vmatprep.subr.msk.bf16.mxu1 %vm24652_vm2, %v22476_v25  ;;  %21286 = vmatmul.mubr.msk.f32.vlgmr.msra.gmra.mrb[188].mxu1 %vm2041_vm1, %v28040_v21 }
 0xae1   : > { %v10956_v0 = vpop.f32.mrb[154].mxu1  ;;  %22481 = vmatpush3.bf16.xpose.msk.msra.mxu1 %vm24652_vm2, %v22476_v25  ;;  %21292 = vmatprep.mubr.msk.f32.mxu1 %vm2041_vm1, %v28050_v39  ;;  %v11101_v62 = vpop.f32.mrb[46].mxu0  ;;  %v30995_v25 = vld [vmem:[#allocation43_spill] sm:$0xff] }
 0xae2   : > { %v10958_v48 = vpop.f32.mrb[155].mxu1 }
 0xae5   : > { %v10961_v34 = vpop.f32.mrb[156].mxu1 }
 0xae6   : > { %v22482_v40 = vpack.c.bf16 %v10961_v34, %v10956_v0  ;;  %v10963_v30 = vpop.f32.mrb[157].mxu1 }
 0xae7   : > { %v31001_v30 = vld [vmem:[#allocation96_spill] sm:$0xff] }
 0xae8   : > { %22484 = vmatprep.subr.msk.bf16.mxu1 %vm24652_vm2, %v22482_v40  ;;  %21293 = vmatmul.mubr.msk.f32.vlgmr.msra.gmra.mrb[190].mxu1 %vm2041_vm1, %v28052_v50  ;;  %v11103_v50 = vpop.f32.mrb[47].mxu0 }
 0xae9   : > { %v10966_v21 = vpop.f32.mrb[158].mxu1  ;;  %22487 = vmatpush3.bf16.xpose.msk.msra.mxu1 %vm24652_vm2, %v22482_v40  ;;  %21299 = vmatprep.mubr.msk.f32.mxu1 %vm2041_vm1, %v28062_v36  ;;  %v11106_v9 = vpop.f32.mrb[48].mxu0  ;;  %v31010_v50 = vld [vmem:[#allocation51_spill] sm:$0xff] }
 0xaea   : > { %v10968_v39 = vpop.f32.mrb[159].mxu1  ;;  %v28166_v47 = vpack.c.bf16 %v11106_v9, %v11101_v62  ;;  %v31009_v62 = vld [vmem:[#allocation87_spill] sm:$0xff] }
 0xaeb   : > { %v31005_v39 = vld [vmem:[#allocation80_spill] sm:$0xff] }
 0xaed   : > { %v10971_v19 = vpop.f32.mrb[160].mxu1 }
 0xaee   : > { %v22488_v54 = vpack.c.bf16 %v10971_v19, %v10966_v21  ;;  %v10973_v15 = vpop.f32.mrb[161].mxu1  ;;  %v31004_v21 = vld [vmem:[#allocation14_spill] sm:$0xff] }
 0xaf0   : > { %22490 = vmatprep.subr.msk.bf16.mxu0 %vm24652_vm2, %v22488_v54  ;;  %21300 = vmatmul.mubr.msk.f32.vlgmr.msra.gmra.mrb[192].mxu1 %vm2041_vm1, %v28064_v55  ;;  %v11108_v55 = vpop.f32.mrb[49].mxu0 }
 0xaf1   : > { %22493 = vmatpush3.bf16.xpose.msk.msra.mxu0 %vm24652_vm2, %v22488_v54  ;;  %v10976_v36 = vpop.f32.mrb[162].mxu1  ;;  %21313 = vmatprep.mubr.msk.f32.mxu1 %vm2041_vm1, %v28085_v2  ;;  %v11111_v46 = vpop.f32.mrb[50].mxu0  ;;  %v31007_v54 = vld [vmem:[#allocation42_spill] sm:$0xff] }
 0xaf2   : > { %22502 = vmatprep.subr.msk.bf16.mxu0 %vm24652_vm2, %v30984_v63  ;;  %v10978_v3 = vpop.f32.mrb[163].mxu1  ;;  %v11113_v2 = vpop.f32.mrb[51].mxu0 }
 0xaf3   : > { %v31016_v2 = vld [vmem:[#allocation48_spill] sm:$0xff] }
 0xaf5   : > { %v10981_v18 = vpop.f32.mrb[164].mxu1 }
 0xaf6   : > { %v22494_v49 = vpack.c.bf16 %v10981_v18, %v10976_v36  ;;  %v10983_v52 = vpop.f32.mrb[165].mxu1  ;;  %v31011_v36 = vld [vmem:[#allocation69_spill] sm:$0xff] }
 0xaf7   : > { %v31014_v52 = vld [vmem:[#allocation55_spill] sm:$0xff] }
 0xaf8   : > { %21307 = vmatmul.mubr.msk.f32.vlgmr.msra.gmra.mrb[90].mxu0 %vm2041_vm1, %v28075_v20  ;;  %22496 = vmatprep.subr.msk.bf16.mxu1 %vm24652_vm2, %v22494_v49  ;;  %v11116_v20 = vpop.f32.mrb[52].mxu0 }
 0xaf9   : > { %22499 = vmatpush3.bf16.xpose.msk.msra.mxu1 %vm24652_vm2, %v22494_v49  ;;  %22505 = vmatpush3.bf16.xpose.msk.msra.mxu0 %vm24652_vm2, %v30984_v63  ;;  %v28185_v7 = vpack.c.bf16 %v11116_v20, %v11111_v46  ;;  %v11118_v16 = vpop.f32.mrb[53].mxu0  ;;  %v31012_v63 = vld [vmem:[#allocation78_spill] sm:$0xff]  ;;  %v31015_v46 = vld [vmem:[#allocation49_spill] sm:$0xff] }
 0xafa   : > { %21320 = vmatprep.mubr.msk.f32.mxu0 %vm2041_vm1, %v30985_v22  ;;  %22508 = vmatprep.subr.msk.bf16.mxu1 %vm24652_vm2, %v30986_v27  ;;  %v11121_v26 = vpop.f32.mrb[54].mxu0  ;;  %v31017_v22 = vld [vmem:[#allocation62_spill] sm:$0xff] }
 0xafb   : > { %22514 = vmatprep.subr.msk.bf16.mxu0 %vm24652_vm2, %v30987_v8  ;;  %v11123_v56 = vpop.f32.mrb[55].mxu0 }
 0xafc   : > { %v11126_v23 = vpop.f32.mrb[56].mxu0  ;;  %v31021_v56 = vld [vmem:[#allocation89_spill] sm:$0xff] }
 0xafd   : > { %v28207_v53 = vpack.c.bf16 %v11126_v23, %v11121_v26  ;;  %v11128_v35 = vpop.f32.mrb[57].mxu0  ;;  %v31025_v23 = vld [vmem:[#allocation15_spill] sm:$0xff] }
 0xafe   : > { %v11131_v51 = vpop.f32.mrb[58].mxu0  ;;  %v31026_v35 = vld [vmem:[#allocation17_spill] sm:$0xff] }
 0xaff   : > { %v11133_v60 = vpop.f32.mrb[59].mxu0 }
 0xb00   : > { %21314 = vmatmul.mubr.msk.f32.vlgmr.msra.gmra.mrb[194].mxu1 %vm2041_vm1, %v28087_v14  ;;  %21321 = vmatmul.mubr.msk.f32.vlgmr.msra.gmra.mrb[92].mxu0 %vm2041_vm1, %v30988_v6  ;;  %v30992_v14 = vld [vmem:[#allocation68_spill] sm:$0xff]  ;;  %v11136_v0 = vpop.f32.mrb[60].mxu0 }
 0xb01   : > { %22511 = vmatpush3.bf16.xpose.msk.msra.mxu1 %vm24652_vm2, %v30986_v27  ;;  %21327 = vmatprep.mubr.msk.f32.mxu1 %vm2041_vm1, %v30989_v24  ;;  %v28229_v48 = vpack.c.bf16 %v11136_v0, %v11131_v51  ;;  %v11138_v59 = vpop.f32.mrb[61].mxu0  ;;  %v31018_v27 = vld [vmem:[#allocation83_spill] sm:$0xff]  ;;  %v31031_v0 = vld [vmem:[#allocation77_spill] sm:$0xff] }
 0xb02   : > { %22517 = vmatpush3.bf16.xpose.msk.msra.mxu0 %vm24652_vm2, %v30987_v8  ;;  %21334 = vmatprep.mubr.msk.f32.mxu0 %vm2041_vm1, %v30990_v57  ;;  %v11141_v34 = vpop.f32.mrb[62].mxu0  ;;  %v31019_v8 = vld [vmem:[#allocation81_spill] sm:$0xff]  ;;  %v31022_v57 = vld [vmem:[#allocation91_spill] sm:$0xff]  ;;  %v31032_v59 = vld [vmem:[#allocation70_spill] sm:$0xff] }
 0xb03   : > { %22520 = vmatprep.subr.msk.bf16.mxu1 %vm24652_vm2, %v30991_v29  ;;  %22526 = vmatprep.subr.msk.bf16.mxu0 %vm24652_vm2, %v30992_v14  ;;  %30999 = vst [vmem:[#allocation113_spill] sm:$0xff] %v28229_v48  ;;  %v11143_v40 = vpop.f32.mrb[63].mxu0 }
 0xb05   : > { %v11146_v31 = vpop.f32.mrb[64].mxu0 }
 0xb06   : > { %v28251_v44 = vpack.c.bf16 %v11146_v31, %v11141_v34  ;;  %v11148_v19 = vpop.f32.mrb[65].mxu0 }
 0xb08   : > { %21328 = vmatmul.mubr.msk.f32.vlgmr.msra.gmra.mrb[196].mxu1 %vm2041_vm1, %v30993_v28  ;;  %31006 = vst [vmem:[#allocation67_spill] sm:$0xff] %v28251_v44 }
 0xb09   : > { %21335 = vmatmul.mubr.msk.f32.vlgmr.msra.gmra.mrb[94].mxu0 %vm2041_vm1, %v30994_v1  ;;  %22523 = vmatpush3.bf16.xpose.msk.msra.mxu1 %vm24652_vm2, %v30991_v29  ;;  %v11151_v58 = vpop.f32.mrb[66].mxu0  ;;  %v31023_v29 = vld [vmem:[#allocation95_spill] sm:$0xff] }
 0xb0a   : > { %21341 = vmatprep.mubr.msk.f32.mxu1 %vm2041_vm1, %v30995_v25  ;;  %22529 = vmatpush3.bf16.xpose.msk.msra.mxu0 %vm24652_vm2, %v30992_v14  ;;  %v11153_v15 = vpop.f32.mrb[67].mxu0  ;;  %v31024_v14 = vld [vmem:[#allocation6_spill] sm:$0xff]  ;;  %v31028_v25 = vld [vmem:[#allocation93_spill] sm:$0xff] }
 0xb0b   : > { %21348 = vmatprep.mubr.msk.f32.mxu0 %vm2041_vm1, %v30996_v38  ;;  %22532 = vmatprep.subr.msk.bf16.mxu1 %vm24652_vm2, %v30997_v45  ;;  %v31038_v15 = vld [vmem:[#allocation66_spill] sm:$0xff] }
 0xb0c   : > { %22538 = vmatprep.subr.msk.bf16.mxu0 %vm24652_vm2, %v30998_v11 }
 0xb0d   : > { %v11156_v3 = vpop.f32.mrb[68].mxu0 }
 0xb0e   : > { %v28273_v18 = vpack.c.bf16 %v11156_v3, %v11151_v58  ;;  %v11158_v9 = vpop.f32.mrb[69].mxu0 }
 0xb10   : > { %21342 = vmatmul.mubr.msk.f32.vlgmr.msra.gmra.mrb[198].mxu1 %vm2041_vm1, %v31000_v10  ;;  %31013 = vst [vmem:[#allocation115_spill] sm:$0xff] %v28273_v18 }
 0xb11   : > { %21349 = vmatmul.mubr.msk.f32.vlgmr.msra.gmra.mrb[96].mxu0 %vm2041_vm1, %v31001_v30  ;;  %22535 = vmatpush3.bf16.xpose.msk.msra.mxu1 %vm24652_vm2, %v30997_v45  ;;  %v11161_v49 = vpop.f32.mrb[70].mxu0  ;;  %v31029_v45 = vld [vmem:[#allocation97_spill] sm:$0xff] }
 0xb12   : > { %21355 = vmatprep.mubr.msk.f32.mxu1 %vm2041_vm1, %v31002_v33  ;;  %22541 = vmatpush3.bf16.xpose.msk.msra.mxu0 %vm24652_vm2, %v30998_v11  ;;  %v11163_v55 = vpop.f32.mrb[71].mxu0  ;;  %v31030_v11 = vld [vmem:[#allocation10_spill] sm:$0xff]  ;;  %v31034_v33 = vld [vmem:[#allocation8_spill] sm:$0xff] }
 0xb13   : > { %21362 = vmatprep.mubr.msk.f32.mxu0 %vm2041_vm1, %v31003_v37  ;;  %22544 = vmatprep.subr.msk.bf16.mxu1 %vm24652_vm2, %v31004_v21 }
 0xb14   : > { %22550 = vmatprep.subr.msk.bf16.mxu0 %vm24652_vm2, %v31005_v39 }
 0xb15   : > { %v11166_v20 = vpop.f32.mrb[72].mxu0 }
 0xb16   : > { %v28295_v16 = vpack.c.bf16 %v11166_v20, %v11161_v49  ;;  %v11168_v26 = vpop.f32.mrb[73].mxu0 }
 0xb18   : > { %21356 = vmatmul.mubr.msk.f32.vlgmr.msra.gmra.mrb[200].mxu1 %vm2041_vm1, %v31007_v54  ;;  %31020 = vst [vmem:[#allocation26_spill] sm:$0xff] %v28295_v16 }
 0xb19   : > { %21363 = vmatmul.mubr.msk.f32.vlgmr.msra.gmra.mrb[98].mxu0 %vm2041_vm1, %v31008_v43  ;;  %22547 = vmatpush3.bf16.xpose.msk.msra.mxu1 %vm24652_vm2, %v31004_v21  ;;  %v11171_v6 = vpop.f32.mrb[74].mxu0  ;;  %v31035_v21 = vld [vmem:[#allocation12_spill] sm:$0xff] }
 0xb1a   : > { %21369 = vmatprep.mubr.msk.f32.mxu1 %vm2041_vm1, %v31009_v62  ;;  %22553 = vmatpush3.bf16.xpose.msk.msra.mxu0 %vm24652_vm2, %v31005_v39  ;;  %v11173_v24 = vpop.f32.mrb[75].mxu0  ;;  %v31036_v39 = vld [vmem:[#allocation75_spill] sm:$0xff] }
 0xb1b   : > { %21376 = vmatprep.mubr.msk.f32.mxu0 %vm2041_vm1, %v31010_v50  ;;  %22556 = vmatprep.subr.msk.bf16.mxu1 %vm24652_vm2, %v31011_v36 }
 0xb1c   : > { %22562 = vmatprep.subr.msk.bf16.mxu0 %vm24652_vm2, %v31012_v63 }
 0xb1d   : > { %v11176_v51 = vpop.f32.mrb[76].mxu0 }
 0xb1e   : > { %v28317_v28 = vpack.c.bf16 %v11176_v51, %v11171_v6  ;;  %v11178_v60 = vpop.f32.mrb[77].mxu0 }
 0xb20   : > { %21370 = vmatmul.mubr.msk.f32.vlgmr.msra.gmra.mrb[202].mxu1 %vm2041_vm1, %v31014_v52  ;;  %31027 = vst [vmem:[#allocation117_spill] sm:$0xff] %v28317_v28 }
 0xb21   : > { %21377 = vmatmul.mubr.msk.f32.vlgmr.msra.gmra.mrb[100].mxu0 %vm2041_vm1, %v31015_v46  ;;  %22559 = vmatpush3.bf16.xpose.msk.msra.mxu1 %vm24652_vm2, %v31011_v36  ;;  %v11181_v1 = vpop.f32.mrb[78].mxu0  ;;  %v28362_v36 = vld [vmem:[%s30106_s9 + $0x8] sm:$0xff] }
 0xb22   : > { %21383 = vmatprep.mubr.msk.f32.mxu1 %vm2041_vm1, %v31016_v2  ;;  %22565 = vmatpush3.bf16.xpose.msk.msra.mxu0 %vm24652_vm2, %v31012_v63  ;;  %v11183_v38 = vpop.f32.mrb[79].mxu0 }
 0xb23   : > { %21390 = vmatprep.mubr.msk.f32.mxu0 %vm2041_vm1, %v31017_v22  ;;  %22568 = vmatprep.subr.msk.bf16.mxu1 %vm24652_vm2, %v31018_v27 }
 0xb24   : > { %22574 = vmatprep.subr.msk.bf16.mxu0 %vm24652_vm2, %v31019_v8 }
 0xb25   : > { %v11186_v34 = vpop.f32.mrb[80].mxu0 }
 0xb26   : > { %v28337_v10 = vpack.c.bf16 %v11186_v34, %v11181_v1  ;;  %v11188_v40 = vpop.f32.mrb[81].mxu0 }
 0xb28   : > { %21384 = vmatmul.mubr.msk.f32.vlgmr.msra.gmra.mrb[204].mxu1 %vm2041_vm1, %v31021_v56  ;;  %31033 = vst [vmem:[#allocation16_spill] sm:$0xff] %v28337_v10 }
 0xb29   : > { %21391 = vmatmul.mubr.msk.f32.vlgmr.msra.gmra.mrb[102].mxu0 %vm2041_vm1, %v31022_v57  ;;  %22571 = vmatpush3.bf16.xpose.msk.msra.mxu1 %vm24652_vm2, %v31018_v27  ;;  %v11191_v30 = vpop.f32.mrb[82].mxu0 }
 0xb2a   : > { %21397 = vmatprep.mubr.msk.f32.mxu1 %vm2041_vm1, %v31023_v29  ;;  %22577 = vmatpush3.bf16.xpose.msk.msra.mxu0 %vm24652_vm2, %v31019_v8  ;;  %v11193_v37 = vpop.f32.mrb[83].mxu0 }
 0xb2b   : > { %21404 = vmatprep.mubr.msk.f32.mxu0 %vm2041_vm1, %v31024_v14  ;;  %22580 = vmatprep.subr.msk.bf16.mxu1 %vm24652_vm2, %v31025_v23 }
 0xb2c   : > { %22586 = vmatprep.subr.msk.bf16.mxu0 %vm24652_vm2, %v31026_v35 }
 0xb2d   : > { %v11196_v31 = vpop.f32.mrb[84].mxu0 }
 0xb2e   : > { %v28351_v19 = vpack.c.bf16 %v11196_v31, %v11191_v30  ;;  %v11198_v58 = vpop.f32.mrb[85].mxu0 }
 0xb30   : > { %21398 = vmatmul.mubr.msk.f32.vlgmr.msra.gmra.mrb[206].mxu1 %vm2041_vm1, %v31028_v25  ;;  %31037 = vst [vmem:[#allocation98_spill] sm:$0xff] %v28351_v19 }
 0xb31   : > { %21405 = vmatmul.mubr.msk.f32.vlgmr.msra.gmra.mrb[104].mxu0 %vm2041_vm1, %v31029_v45  ;;  %22583 = vmatpush3.bf16.xpose.msk.msra.mxu1 %vm24652_vm2, %v31025_v23  ;;  %v11201_v54 = vpop.f32.mrb[86].mxu0 }
 0xb32   : > { %21411 = vmatprep.mubr.msk.f32.mxu1 %vm2041_vm1, %v31030_v11  ;;  %22589 = vmatpush3.bf16.xpose.msk.msra.mxu0 %vm24652_vm2, %v31026_v35  ;;  %v11203_v43 = vpop.f32.mrb[87].mxu0 }
 0xb33   : > { %21418 = vmatprep.mubr.msk.f32.mxu0 %vm2041_vm1, %v31031_v0  ;;  %22592 = vmatprep.subr.msk.bf16.mxu1 %vm24652_vm2, %v31032_v59 }
 0xb34   : > { %22597 = vmatprep.subr.bf16.mxu0 %v28105_v4 }
 0xb35   : > { %v11206_v12 = vpop.f32.mrb[88].mxu0 }
 0xb36   : > { %v28357_v62 = vpack.c.bf16 %v11206_v12, %v11201_v54 }
 0xb38   : > { %21412 = vmatmul.mubr.msk.f32.vlgmr.msra.gmra.mrb[208].mxu1 %vm2041_vm1, %v31034_v33  ;;  %31039 = vst [vmem:[#allocation7_spill] sm:$0xff] %v28357_v62 }
 0xb39   : > { %21419 = vmatmul.mubr.msk.f32.vlgmr.msra.gmra.mrb[106].mxu0 %vm2041_vm1, %v31035_v21  ;;  %22595 = vmatpush3.bf16.xpose.msk.msra.mxu1 %vm24652_vm2, %v31032_v59 }
 0xb3a   : > { %21425 = vmatprep.mubr.msk.f32.mxu1 %vm2041_vm1, %v31036_v39  ;;  %22599 = vmatpush3.bf16.msra.mxu0 %v28105_v4  ;;  %v11208_v4 = vpop.f32.mrb[89].mxu0 }
 0xb3b   : > { %22601 = vmatprep.subr.bf16.mxu1 %v28123_v61  ;;  %22605 = vmatprep.subr.bf16.mxu0 %v28133_v42 }
 0xb40   : > { %21426 = vmatmul.mubr.msk.f32.vlgmr.msra.gmra.mrb[210].mxu1 %vm2041_vm1, %v31038_v15 }
 0xb41   : > { %22603 = vmatpush3.bf16.msra.mxu1 %v28123_v61  ;;  %v28370_v61 = vld [vmem:[%s30106_s9] sm:$0xff] }
 0xb42   : > { %22609 = vmatprep.subr.bf16.mxu1 %v28143_v32 }
 0xb5b   : > { %v21210_v50 = vpop.f32.mrb[166].mxu1 }
 0xb5c   : > { %v28365_v63 = vadd.f32 %v28362_v36, %v21210_v50  ;;  %v11288_v3 = vpop.f32.mrb[167].mxu1 }
 0xb5d   : > { %v28373_v9 = vadd.f32 %v28370_v61, %v11288_v3 }
 0xb5e   : > { %v13997_v49 = vsel %vm4826_vm3, %v28365_v63, -inf }
 0xb5f   : > { %13998 = vmax.xlane.f32.xlu0 %v13997_v49  ;;  %v13994_v52 = vsel %vm4826_vm3, %v28373_v9, -inf }
 0xb60   : > { %13995 = vmax.xlane.f32.xlu1 %v13994_v52 }
 0xb63   : > { %v21217_v55 = vpop.f32.mrb[168].mxu1 }
 0xb64   : > { %v28380_v46 = vadd.f32 %v28362_v36, %v21217_v55  ;;  %v11375_v2 = vpop.f32.mrb[169].mxu1 }
 0xb65   : > { %v28385_v27 = vadd.f32 %v28370_v61, %v11375_v2 }
 0xb66   : > { %v14003_v22 = vsel %vm4826_vm3, %v28380_v46, -inf }
 0xb67   : > { %14004 = vmax.xlane.f32.xlu0 %v14003_v22  ;;  %v14000_v8 = vsel %vm4826_vm3, %v28385_v27, -inf }
 0xb6b   : > { %14001 = vmax.xlane.f32.xlu0 %v14000_v8  ;;  %v21224_v20 = vpop.f32.mrb[170].mxu1 }
 0xb6c   : > { %v28390_v26 = vadd.f32 %v28362_v36, %v21224_v20  ;;  %v11462_v6 = vpop.f32.mrb[171].mxu1 }
 0xb6d   : > { %v28393_v56 = vadd.f32 %v28370_v61, %v11462_v6 }
 0xb6e   : > { %v14009_v24 = vsel %vm4826_vm3, %v28390_v26, -inf }
 0xb6f   : > { %14010 = vmax.xlane.f32.xlu0 %v14009_v24  ;;  %v14006_v57 = vsel %vm4826_vm3, %v28393_v56, -inf }
 0xb70   : > { %14007 = vmax.xlane.f32.xlu1 %v14006_v57 }
 0xb73   : > { %v21231_v29 = vpop.f32.mrb[172].mxu1 }
 0xb74   : > { %v28400_v14 = vadd.f32 %v28362_v36, %v21231_v29  ;;  %v11549_v23 = vpop.f32.mrb[173].mxu1 }
 0xb75   : > { %v28403_v35 = vadd.f32 %v28370_v61, %v11549_v23 }
 0xb76   : > { %v14015_v51 = vsel %vm4826_vm3, %v28400_v14, -inf }
 0xb77   : > { %14016 = vmax.xlane.f32.xlu0 %v14015_v51  ;;  %v14012_v60 = vsel %vm4826_vm3, %v28403_v35, -inf }
 0xb78   : > { %14013 = vmax.xlane.f32.xlu1 %v14012_v60 }
 0xb7b   : > { %v21238_v1 = vpop.f32.mrb[174].mxu1 }
 0xb7c   : > { %v28410_v25 = vadd.f32 %v28362_v36, %v21238_v1  ;;  %v11636_v38 = vpop.f32.mrb[175].mxu1 }
 0xb7d   : > { %v28413_v45 = vadd.f32 %v28370_v61, %v11636_v38 }
 0xb7e   : > { %v14021_v11 = vsel %vm4826_vm3, %v28410_v25, -inf }
 0xb7f   : > { %14022 = vmax.xlane.f32.xlu0 %v14021_v11  ;;  %v14018_v0 = vsel %vm4826_vm3, %v28413_v45, -inf }
 0xb80   : > { %14019 = vmax.xlane.f32.xlu1 %v14018_v0 }
 0xb83   : > { %v21245_v59 = vpop.f32.mrb[176].mxu1 }
 0xb84   : > { %v28420_v34 = vadd.f32 %v28362_v36, %v21245_v59  ;;  %v11723_v40 = vpop.f32.mrb[177].mxu1 }
 0xb85   : > { %v28423_v30 = vadd.f32 %v28370_v61, %v11723_v40 }
 0xb86   : > { %v14027_v33 = vsel %vm4826_vm3, %v28420_v34, -inf }
 0xb87   : > { %14028 = vmax.xlane.f32.xlu0 %v14027_v33  ;;  %v14024_v37 = vsel %vm4826_vm3, %v28423_v30, -inf }
 0xb88   : > { %14025 = vmax.xlane.f32.xlu1 %v14024_v37 }
 0xb8b   : > { %v21252_v21 = vpop.f32.mrb[178].mxu1 }
 0xb8c   : > { %v28430_v39 = vadd.f32 %v28362_v36, %v21252_v21  ;;  %v11810_v31 = vpop.f32.mrb[179].mxu1 }
 0xb8d   : > { %v28433_v58 = vadd.f32 %v28370_v61, %v11810_v31 }
 0xb8e   : > { %v14033_v54 = vsel %vm4826_vm3, %v28430_v39, -inf }
 0xb8f   : > { %14034 = vmax.xlane.f32.xlu0 %v14033_v54  ;;  %v14030_v15 = vsel %vm4826_vm3, %v28433_v58, -inf }
 0xb90   : > { %14031 = vmax.xlane.f32.xlu1 %v14030_v15 }
 0xb93   : > { %v21259_v43 = vpop.f32.mrb[180].mxu1 }
 0xb94   : > { %v28440_v12 = vadd.f32 %v28362_v36, %v21259_v43  ;;  %v11897_v4 = vpop.f32.mrb[181].mxu1 }
 0xb95   : > { %v28443_v50 = vadd.f32 %v28370_v61, %v11897_v4 }
 0xb96   : > { %v14039_v3 = vsel %vm4826_vm3, %v28440_v12, -inf }
 0xb97   : > { %14040 = vmax.xlane.f32.xlu0 %v14039_v3  ;;  %v14036_v49 = vsel %vm4826_vm3, %v28443_v50, -inf }
 0xb98   : > { %14037 = vmax.xlane.f32.xlu1 %v14036_v49 }
 0xb9b   : > { %v21266_v52 = vpop.f32.mrb[182].mxu1 }
 0xb9c   : > { %v28450_v55 = vadd.f32 %v28362_v36, %v21266_v52  ;;  %v11984_v2 = vpop.f32.mrb[183].mxu1 }
 0xb9d   : > { %v28453_v22 = vadd.f32 %v28370_v61, %v11984_v2 }
 0xb9e   : > { %v14045_v8 = vsel %vm4826_vm3, %v28450_v55, -inf }
 0xb9f   : > { %31040 = vst [vmem:[#allocation30_spill] sm:$0xff] %v28453_v22  ;;  %14046 = vmax.xlane.f32.xlu0 %v14045_v8  ;;  %v14042_v20 = vsel %vm4826_vm3, %v28453_v22, -inf }
 0xba0   : > { %14043 = vmax.xlane.f32.xlu1 %v14042_v20 }
 0xba3   : > { %v21273_v6 = vpop.f32.mrb[184].mxu1 }
 0xba4   : > { %v28460_v24 = vadd.f32 %v28362_v36, %v21273_v6  ;;  %v12071_v57 = vpop.f32.mrb[185].mxu1 }
 0xba5   : > { %v28463_v29 = vadd.f32 %v28370_v61, %v12071_v57 }
 0xba6   : > { %31041 = vst [vmem:[#allocation9_spill] sm:$0xff] %v28460_v24  ;;  %v14051_v23 = vsel %vm4826_vm3, %v28460_v24, -inf }
 0xba7   : > { %31042 = vst [vmem:[#allocation19_spill] sm:$0xff] %v28463_v29  ;;  %14052 = vmax.xlane.f32.xlu0 %v14051_v23  ;;  %v14048_v51 = vsel %vm4826_vm3, %v28463_v29, -inf }
 0xba8   : > { %14049 = vmax.xlane.f32.xlu1 %v14048_v51 }
 0xbab   : > { %v21280_v60 = vpop.f32.mrb[186].mxu1 }
 0xbac   : > { %v28470_v1 = vadd.f32 %v28362_v36, %v21280_v60  ;;  %v12158_v38 = vpop.f32.mrb[187].mxu1 }
 0xbad   : > { %v28473_v11 = vadd.f32 %v28370_v61, %v12158_v38 }
 0xbae   : > { %31043 = vst [vmem:[#allocation52_spill] sm:$0xff] %v28470_v1  ;;  %v14057_v0 = vsel %vm4826_vm3, %v28470_v1, -inf }
 0xbaf   : > { %31044 = vst [vmem:[#allocation24_spill] sm:$0xff] %v28473_v11  ;;  %14058 = vmax.xlane.f32.xlu0 %v14057_v0  ;;  %v14054_v59 = vsel %vm4826_vm3, %v28473_v11, -inf }
 0xbb0   : > { %14055 = vmax.xlane.f32.xlu1 %v14054_v59 }
 0xbb3   : > { %v21287_v40 = vpop.f32.mrb[188].mxu1 }
 0xbb4   : > { %v28480_v33 = vadd.f32 %v28362_v36, %v21287_v40  ;;  %v12245_v37 = vpop.f32.mrb[189].mxu1 }
 0xbb5   : > { %v28483_v21 = vadd.f32 %v28370_v61, %v12245_v37 }
 0xbb6   : > { %31045 = vst [vmem:[#allocation94_spill] sm:$0xff] %v28480_v33  ;;  %v14063_v31 = vsel %vm4826_vm3, %v28480_v33, -inf }
 0xbb7   : > { %31046 = vst [vmem:[#allocation11_spill] sm:$0xff] %v28483_v21  ;;  %14064 = vmax.xlane.f32.xlu0 %v14063_v31  ;;  %v14060_v54 = vsel %vm4826_vm3, %v28483_v21, -inf }
 0xbb8   : > { %14061 = vmax.xlane.f32.xlu1 %v14060_v54 }
 0xbbb   : > { %v21294_v15 = vpop.f32.mrb[190].mxu1 }
 0xbbc   : > { %v28490_v43 = vadd.f32 %v28362_v36, %v21294_v15  ;;  %v12332_v4 = vpop.f32.mrb[191].mxu1 }
 0xbbd   : > { %v28493_v3 = vadd.f32 %v28370_v61, %v12332_v4 }
 0xbbe   : > { %31047 = vst [vmem:[#allocation68_spill] sm:$0xff] %v28490_v43  ;;  %v14069_v49 = vsel %vm4826_vm3, %v28490_v43, -inf }
 0xbbf   : > { %31048 = vst [vmem:[#allocation92_spill] sm:$0xff] %v28493_v3  ;;  %14070 = vmax.xlane.f32.xlu0 %v14069_v49  ;;  %v14066_v52 = vsel %vm4826_vm3, %v28493_v3, -inf }
 0xbc0   : > { %14067 = vmax.xlane.f32.xlu1 %v14066_v52 }
 0xbc3   : > { %v21301_v2 = vpop.f32.mrb[192].mxu1 }
 0xbc4   : > { %v28500_v8 = vadd.f32 %v28362_v36, %v21301_v2  ;;  %v12419_v20 = vpop.f32.mrb[193].mxu1 }
 0xbc5   : > { %v28503_v6 = vadd.f32 %v28370_v61, %v12419_v20 }
 0xbc6   : > { %31049 = vst [vmem:[#allocation44_spill] sm:$0xff] %v28500_v8  ;;  %v14075_v57 = vsel %vm4826_vm3, %v28500_v8, -inf }
 0xbc7   : > { %31050 = vst [vmem:[#allocation43_spill] sm:$0xff] %v28503_v6  ;;  %14076 = vmax.xlane.f32.xlu0 %v14075_v57  ;;  %v14072_v23 = vsel %vm4826_vm3, %v28503_v6, -inf }
 0xbc8   : > { %14073 = vmax.xlane.f32.xlu1 %v14072_v23 }
 0xbcb   : > { %v21308_v51 = vpop.f32.mrb[90].mxu0 }
 0xbcc   : > { %v28510_v60 = vadd.f32 %v28362_v36, %v21308_v51  ;;  %v12506_v38 = vpop.f32.mrb[91].mxu0 }
 0xbcd   : > { %v28513_v0 = vadd.f32 %v28370_v61, %v12506_v38 }
 0xbce   : > { %31051 = vst [vmem:[#allocation37_spill] sm:$0xff] %v28510_v60  ;;  %v14081_v59 = vsel %vm4826_vm3, %v28510_v60, -inf }
 0xbcf   : > { %31052 = vst [vmem:[#allocation13_spill] sm:$0xff] %v28513_v0  ;;  %14082 = vmax.xlane.f32.xlu0 %v14081_v59  ;;  %v14078_v40 = vsel %vm4826_vm3, %v28513_v0, -inf }
 0xbd0   : > { %14079 = vmax.xlane.f32.xlu1 %v14078_v40 }
 0xbd3   : > { %v28519_v37 = vpop.f32.mrb[92].mxu0  ;;  %v21315_v31 = vpop.f32.mrb[194].mxu1 }
 0xbd4   : > { %31053 = vst [vmem:[#allocation76_spill] sm:$0xff] %v28519_v37  ;;  %v28521_v54 = vpop.f32.mrb[93].mxu0  ;;  %v28524_v15 = vadd.f32 %v28362_v36, %v21315_v31  ;;  %v14317_v4 = vsel %vm4826_vm3, %v28519_v37, -inf  ;;  %v12593_v49 = vpop.f32.mrb[195].mxu1 }
 0xbd5   : > { %31054 = vst [vmem:[#allocation38_spill] sm:$0xff] %v28521_v54  ;;  %14318 = vmax.xlane.f32.xlu0 %v14317_v4  ;;  %v28529_v52 = vadd.f32 %v28370_v61, %v12593_v49  ;;  %v14314_v2 = vsel %vm4826_vm3, %v28521_v54, -inf }
 0xbd6   : > { %31055 = vst [vmem:[#allocation96_spill] sm:$0xff] %v28524_v15  ;;  %14315 = vmax.xlane.f32.xlu1 %v14314_v2  ;;  %v14087_v20 = vsel %vm4826_vm3, %v28524_v15, -inf }
 0xbd7   : > { %31056 = vst [vmem:[#allocation36_spill] sm:$0xff] %v28529_v52  ;;  %v14084_v57 = vsel %vm4826_vm3, %v28529_v52, -inf  ;;  %v31088_v52 = vld [vmem:[#allocation58_spill] sm:$0xff] }
 0xbd9   : > { %14088 = vmax.xlane.f32.xlu0 %v14087_v20 }
 0xbda   : > { %14085 = vmax.xlane.f32.xlu1 %v14084_v57 }
 0xbdb   : > { %v28537_v36 = vpop.f32.mrb[196].mxu1 }
 0xbdc   : > { %31057 = vst [vmem:[#allocation50_spill] sm:$0xff] %v28537_v36  ;;  %v28539_v23 = vpop.f32.mrb[94].mxu0  ;;  %v28541_v51 = vpop.f32.mrb[197].mxu1  ;;  %v14323_v61 = vsel %vm4826_vm3, %v28537_v36, -inf }
 0xbdd   : > { %31058 = vst [vmem:[#allocation14_spill] sm:$0xff] %v28539_v23  ;;  %31059 = vst [vmem:[#allocation80_spill] sm:$0xff] %v28541_v51  ;;  %v28545_v38 = vpop.f32.mrb[95].mxu0  ;;  %14324 = vmax.xlane.f32.xlu0 %v14323_v61  ;;  %v14320_v59 = vsel %vm4826_vm3, %v28541_v51, -inf  ;;  %v14329_v40 = vsel %vm4826_vm3, %v28539_v23, -inf }
 0xbde   : > { %31060 = vst [vmem:[#allocation42_spill] sm:$0xff] %v28545_v38  ;;  %14321 = vmax.xlane.f32.xlu1 %v14320_v59  ;;  %v14326_v31 = vsel %vm4826_vm3, %v28545_v38, -inf }
 0xbe1   : > { %14330 = vmax.xlane.f32.xlu0 %v14329_v40 }
 0xbe2   : > { %14327 = vmax.xlane.f32.xlu1 %v14326_v31 }
 0xbe3   : > { %v28553_v4 = vpop.f32.mrb[198].mxu1 }
 0xbe4   : > { %31061 = vst [vmem:[#allocation56_spill] sm:$0xff] %v28553_v4  ;;  %v28555_v49 = vpop.f32.mrb[96].mxu0  ;;  %v28557_v2 = vpop.f32.mrb[199].mxu1  ;;  %v14335_v20 = vsel %vm4826_vm3, %v28553_v4, -inf }
 0xbe5   : > { %31062 = vst [vmem:[#allocation87_spill] sm:$0xff] %v28555_v49  ;;  %31063 = vst [vmem:[#allocation51_spill] sm:$0xff] %v28557_v2  ;;  %v28561_v57 = vpop.f32.mrb[97].mxu0  ;;  %14336 = vmax.xlane.f32.xlu0 %v14335_v20  ;;  %v14332_v61 = vsel %vm4826_vm3, %v28557_v2, -inf  ;;  %v14341_v59 = vsel %vm4826_vm3, %v28555_v49, -inf }
 0xbe6   : > { %31064 = vst [vmem:[#allocation69_spill] sm:$0xff] %v28561_v57  ;;  %14333 = vmax.xlane.f32.xlu1 %v14332_v61  ;;  %v14338_v40 = vsel %vm4826_vm3, %v28561_v57, -inf }
 0xbe9   : > { %14342 = vmax.xlane.f32.xlu0 %v14341_v59 }
 0xbea   : > { %14339 = vmax.xlane.f32.xlu1 %v14338_v40 }
 0xbeb   : > { %v28569_v31 = vpop.f32.mrb[200].mxu1 }
 0xbec   : > { %31065 = vst [vmem:[#allocation78_spill] sm:$0xff] %v28569_v31  ;;  %v28571_v17 = vpop.f32.mrb[98].mxu0  ;;  %v28573_v13 = vpop.f32.mrb[201].mxu1  ;;  %v14347_v20 = vsel %vm4826_vm3, %v28569_v31, -inf }
 0xbed   : > { %31066 = vst [vmem:[#allocation55_spill] sm:$0xff] %v28571_v17  ;;  %31067 = vst [vmem:[#allocation49_spill] sm:$0xff] %v28573_v13  ;;  %v28577_v41 = vpop.f32.mrb[99].mxu0  ;;  %14348 = vmax.xlane.f32.xlu0 %v14347_v20  ;;  %v14344_v61 = vsel %vm4826_vm3, %v28573_v13, -inf  ;;  %v14353_v59 = vsel %vm4826_vm3, %v28571_v17, -inf }
 0xbee   : > { %31068 = vst [vmem:[#allocation48_spill] sm:$0xff] %v28577_v41  ;;  %14345 = vmax.xlane.f32.xlu1 %v14344_v61  ;;  %v14350_v40 = vsel %vm4826_vm3, %v28577_v41, -inf }
 0xbf1   : > { %14354 = vmax.xlane.f32.xlu0 %v14353_v59 }
 0xbf2   : > { %14351 = vmax.xlane.f32.xlu1 %v14350_v40 }
 0xbf3   : > { %v28585_v2 = vpop.f32.mrb[202].mxu1 }
 0xbf4   : > { %31069 = vst [vmem:[#allocation62_spill] sm:$0xff] %v28585_v2  ;;  %v28587_v4 = vpop.f32.mrb[100].mxu0  ;;  %v28589_v31 = vpop.f32.mrb[203].mxu1  ;;  %v14359_v59 = vsel %vm4826_vm3, %v28585_v2, -inf }
 0xbf5   : > { %31070 = vst [vmem:[#allocation83_spill] sm:$0xff] %v28587_v4  ;;  %31071 = vst [vmem:[#allocation81_spill] sm:$0xff] %v28589_v31  ;;  %v28591_v51 = vpop.f32.mrb[101].mxu0  ;;  %v14365_v20 = vsel %vm4826_vm3, %v28587_v4, -inf  ;;  %v14356_v40 = vsel %vm4826_vm3, %v28589_v31, -inf }
 0xbf6   : > { %31072 = vst [vmem:[#allocation89_spill] sm:$0xff] %v28591_v51  ;;  %14366 = vmax.xlane.f32.xlu0 %v14365_v20  ;;  %v14362_v61 = vsel %vm4826_vm3, %v28591_v51, -inf }
 0xbf7   : > { %14363 = vmax.xlane.f32.xlu1 %v14362_v61 }
 0xbfa   : > { %14360 = vmax.xlane.f32.xlu0 %v14359_v59 }
 0xbfb   : > { %14357 = vmax.xlane.f32.xlu1 %v14356_v40  ;;  %v28601_v13 = vpop.f32.mrb[204].mxu1 }
 0xbfc   : > { %31073 = vst [vmem:[#allocation91_spill] sm:$0xff] %v28601_v13  ;;  %v28603_v36 = vpop.f32.mrb[102].mxu0  ;;  %v28605_v41 = vpop.f32.mrb[205].mxu1  ;;  %v14371_v20 = vsel %vm4826_vm3, %v28601_v13, -inf }
 0xbfd   : > { %31074 = vst [vmem:[#allocation95_spill] sm:$0xff] %v28603_v36  ;;  %31075 = vst [vmem:[#allocation6_spill] sm:$0xff] %v28605_v41  ;;  %v28609_v4 = vpop.f32.mrb[103].mxu0  ;;  %v14368_v61 = vsel %vm4826_vm3, %v28605_v41, -inf  ;;  %v14377_v59 = vsel %vm4826_vm3, %v28603_v36, -inf }
 0xbfe   : > { %31076 = vst [vmem:[#allocation15_spill] sm:$0xff] %v28609_v4  ;;  %14372 = vmax.xlane.f32.xlu0 %v14371_v20  ;;  %v14374_v40 = vsel %vm4826_vm3, %v28609_v4, -inf }
 0xbff   : > { %14369 = vmax.xlane.f32.xlu1 %v14368_v61 }
 0xc02   : > { %14378 = vmax.xlane.f32.xlu0 %v14377_v59 }
 0xc03   : > { %14375 = vmax.xlane.f32.xlu1 %v14374_v40  ;;  %v28617_v31 = vpop.f32.mrb[206].mxu1 }
 0xc04   : > { %31077 = vst [vmem:[#allocation17_spill] sm:$0xff] %v28617_v31  ;;  %v28619_v2 = vpop.f32.mrb[104].mxu0  ;;  %v28621_v13 = vpop.f32.mrb[207].mxu1  ;;  %v14383_v51 = vsel %vm4826_vm3, %v28617_v31, -inf }
 0xc05   : > { %31078 = vst [vmem:[#allocation93_spill] sm:$0xff] %v28619_v2  ;;  %31079 = vst [vmem:[#allocation97_spill] sm:$0xff] %v28621_v13  ;;  %v28625_v41 = vpop.f32.mrb[105].mxu0  ;;  %v14380_v20 = vsel %vm4826_vm3, %v28621_v13, -inf  ;;  %v14389_v61 = vsel %vm4826_vm3, %v28619_v2, -inf }
 0xc06   : > { %31080 = vst [vmem:[#allocation10_spill] sm:$0xff] %v28625_v41  ;;  %14384 = vmax.xlane.f32.xlu0 %v14383_v51  ;;  %v14386_v59 = vsel %vm4826_vm3, %v28625_v41, -inf }
 0xc07   : > { %14381 = vmax.xlane.f32.xlu1 %v14380_v20 }
 0xc0a   : > { %14390 = vmax.xlane.f32.xlu0 %v14389_v61 }
 0xc0b   : > { %14387 = vmax.xlane.f32.xlu1 %v14386_v59  ;;  %v28633_v40 = vpop.f32.mrb[208].mxu1 }
 0xc0c   : > { %31081 = vst [vmem:[#allocation77_spill] sm:$0xff] %v28633_v40  ;;  %v28635_v4 = vpop.f32.mrb[106].mxu0  ;;  %v28637_v31 = vpop.f32.mrb[209].mxu1  ;;  %v14395_v36 = vsel %vm4826_vm3, %v28633_v40, -inf }
 0xc0d   : > { %31082 = vst [vmem:[#allocation70_spill] sm:$0xff] %v28635_v4  ;;  %31083 = vst [vmem:[#allocation8_spill] sm:$0xff] %v28637_v31  ;;  %v28641_v13 = vpop.f32.mrb[107].mxu0  ;;  %v14392_v51 = vsel %vm4826_vm3, %v28637_v31, -inf  ;;  %v14401_v20 = vsel %vm4826_vm3, %v28635_v4, -inf }
 0xc0e   : > { %31084 = vst [vmem:[#allocation12_spill] sm:$0xff] %v28641_v13  ;;  %14396 = vmax.xlane.f32.xlu0 %v14395_v36  ;;  %v14398_v61 = vsel %vm4826_vm3, %v28641_v13, -inf  ;;  %v13999_v36 = vpop.xlane.xlu0 %13998 }
 0xc0f   : > { %14393 = vmax.xlane.f32.xlu1 %v14392_v51 }
 0xc12   : > { %14402 = vmax.xlane.f32.xlu0 %v14401_v20  ;;  %v14005_v51 = vpop.xlane.xlu0 %14004  ;;  %v13996_v20 = vpop.xlane.xlu1 %13995 }
 0xc13   : > { %14399 = vmax.xlane.f32.xlu1 %v14398_v61  ;;  %v28649_v59 = vpop.f32.mrb[210].mxu1  ;;  %v14138_v19 = vrot.slane %v14005_v51, %v31088_v52 }
 0xc14   : > { %31085 = vst [vmem:[#allocation75_spill] sm:$0xff] %v28649_v59  ;;  %v28651_v41 = vpop.f32.mrb[211].mxu1  ;;  %v14407_v40 = vsel %vm4826_vm3, %v28649_v59, -inf  ;;  %v31087_v59 = vld [vmem:[#allocation54_spill] sm:$0xff] }
 0xc15   : > { %31086 = vst [vmem:[#allocation66_spill] sm:$0xff] %v28651_v41  ;;  %v14404_v31 = vsel %vm4826_vm3, %v28651_v41, -inf  ;;  %v14129_v41 = vrot.slane %v13999_v36, %v31088_v52  ;;  %v14125_v15 = vrot.slane %v13996_v20, %v31087_v59 }
 0xc16   : > { %14408 = vmax.xlane.f32.xlu0 %v14407_v40  ;;  %v14002_v4 = vpop.xlane.xlu0 %14001  ;;  %v14008_v57 = vpop.xlane.xlu1 %14007 }
 0xc17   : > { %14405 = vmax.xlane.f32.xlu1 %v14404_v31  ;;  %v14134_v37 = vrot.slane %v14002_v4, %v31087_v59  ;;  %v14143_v40 = vrot.slane %v14008_v57, %v31087_v59 }
 0xc19   : > { %v14139_v36 = vsel %vm4966_vm4, %v14138_v19, %v14134_v37 }
 0xc1a   : > { %v14011_v2 = vpop.xlane.xlu0 %14010  ;;  %v14014_v61 = vpop.xlane.xlu1 %14013 }
 0xc1b   : > { %v14147_v31 = vrot.slane %v14011_v2, %v31088_v52  ;;  %v14152_v10 = vrot.slane %v14014_v61, %v31087_v59  ;;  %v14130_v61 = vsel %vm4966_vm4, %v14129_v41, %v14125_v15 }
 0xc1c   : > { %v14266_v19 = vsel %vm5103_vm5, %v14139_v36, %v14130_v61 }
 0xc1d   : > { %v14148_v51 = vsel %vm4966_vm4, %v14147_v31, %v14143_v40 }
 0xc1e   : > { %v14017_v13 = vpop.xlane.xlu0 %14016  ;;  %v14020_v17 = vpop.xlane.xlu1 %14019 }
 0xc1f   : > { %v14156_v0 = vrot.slane %v14017_v13, %v31088_v52  ;;  %v14161_v6 = vrot.slane %v14020_v17, %v31087_v59 }
 0xc22   : > { %v14023_v49 = vpop.xlane.xlu0 %14022  ;;  %v14026_v54 = vpop.xlane.xlu1 %14025 }
 0xc23   : > { %v14165_v60 = vrot.slane %v14023_v49, %v31088_v52  ;;  %v14170_v57 = vrot.slane %v14026_v54, %v31087_v59  ;;  %v14157_v49 = vsel %vm4966_vm4, %v14156_v0, %v14152_v10  ;;  %v14267_v54 = vsel %vm5105_vm6, %v14148_v51, %v14266_v19 }
 0xc25   : > { %v14166_v37 = vsel %vm4966_vm4, %v14165_v60, %v14161_v6 }
 0xc26   : > { %v14029_v38 = vpop.xlane.xlu0 %14028  ;;  %v14032_v62 = vpop.xlane.xlu1 %14031 }
 0xc27   : > { %v14174_v2 = vrot.slane %v14029_v38, %v31088_v52  ;;  %v14179_v13 = vrot.slane %v14032_v62, %v31087_v59 }
 0xc29   : > { %v14175_v38 = vsel %vm4966_vm4, %v14174_v2, %v14170_v57 }
 0xc2a   : > { %v14035_v23 = vpop.xlane.xlu0 %14034  ;;  %v14038_v4 = vpop.xlane.xlu1 %14037 }
 0xc2b   : > { %v14183_v20 = vrot.slane %v14035_v23, %v31088_v52  ;;  %v14188_v8 = vrot.slane %v14038_v4, %v31087_v59  ;;  %v14268_v23 = vsel %vm5107_vm7, %v14157_v49, %v14267_v54 }
 0xc2c   : > { %v14269_v41 = vsel %vm5109_vm8, %v14166_v37, %v14268_v23 }
 0xc2d   : > { %v14184_v62 = vsel %vm4966_vm4, %v14183_v20, %v14179_v13  ;;  %v14270_v0 = vsel %vm5111_vm9, %v14175_v38, %v14269_v41 }
 0xc2e   : > { %v14041_v28 = vpop.xlane.xlu0 %14040  ;;  %v14271_v40 = vsel %vm5113_vm10, %v14184_v62, %v14270_v0 }
 0xc2f   : > { %v14192_v17 = vrot.slane %v14041_v28, %v31088_v52  ;;  %v14044_v28 = vpop.xlane.xlu1 %14043 }
 0xc30   : > { %v14197_v23 = vrot.slane %v14044_v28, %v31087_v59 }
 0xc31   : > { %v14193_v10 = vsel %vm4966_vm4, %v14192_v17, %v14188_v8 }
 0xc32   : > { %v14047_v31 = vpop.xlane.xlu0 %14046  ;;  %v14272_v6 = vsel %vm5115_vm11, %v14193_v10, %v14271_v40 }
 0xc33   : > { %v14201_v38 = vrot.slane %v14047_v31, %v31088_v52 }
 0xc35   : > { %v14050_v60 = vpop.xlane.xlu1 %14049 }
 0xc36   : > { %v14053_v15 = vpop.xlane.xlu0 %14052  ;;  %v14206_v17 = vrot.slane %v14050_v60, %v31087_v59 }
 0xc37   : > { %v14210_v8 = vrot.slane %v14053_v15, %v31088_v52 }
 0xc39   : > { %v14211_v15 = vsel %vm4966_vm4, %v14210_v8, %v14206_v17 }
 0xc3c   : > { %v14059_v4 = vpop.xlane.xlu0 %14058 }
 0xc3d   : > { %v14056_v36 = vpop.xlane.xlu1 %14055  ;;  %v14219_v19 = vrot.slane %v14059_v4, %v31088_v52 }
 0xc3e   : > { %v14215_v37 = vrot.slane %v14056_v36, %v31087_v59 }
 0xc40   : > { %v14220_v31 = vsel %vm4966_vm4, %v14219_v19, %v14215_v37 }
 0xc44   : > { %v14065_v2 = vpop.xlane.xlu0 %14064 }
 0xc45   : > { %v14062_v57 = vpop.xlane.xlu1 %14061  ;;  %v14228_v62 = vrot.slane %v14065_v2, %v31088_v52  ;;  %v14202_v2 = vsel %vm4966_vm4, %v14201_v38, %v14197_v23 }
 0xc46   : > { %v14224_v41 = vrot.slane %v14062_v57, %v31087_v59 }
 0xc48   : > { %v14229_v57 = vsel %vm4966_vm4, %v14228_v62, %v14224_v41 }
 0xc4a   : > { %14282 = vxpose.xlu1.b32.start [1/2] (short) (narrow) %v14272_v6, 16 }
 0xc4c   : > { %v14071_v51 = vpop.xlane.xlu0 %14070 }
 0xc4d   : > { %v14068_v20 = vpop.xlane.xlu1 %14067  ;;  %v14237_v10 = vrot.slane %v14071_v51, %v31088_v52  ;;  %v14273_v51 = vsel %vm5103_vm5, %v14211_v15, %v14202_v2 }
 0xc4e   : > { %v14233_v0 = vrot.slane %v14068_v20, %v31087_v59 }
 0xc50   : > { %v14238_v20 = vsel %vm4966_vm4, %v14237_v10, %v14233_v0 }
 0xc54   : > { %v14077_v13 = vpop.xlane.xlu0 %14076 }
 0xc55   : > { %v14074_v61 = vpop.xlane.xlu1 %14073  ;;  %v14246_v40 = vrot.slane %v14077_v13, %v31088_v52  ;;  %v14274_v13 = vsel %vm5105_vm6, %v14220_v31, %v14273_v51 }
 0xc56   : > { %v14242_v6 = vrot.slane %v14074_v61, %v31087_v59  ;;  %v14275_v17 = vsel %vm5107_vm7, %v14229_v57, %v14274_v13 }
 0xc58   : > { %v14247_v61 = vsel %vm4966_vm4, %v14246_v40, %v14242_v6 }
 0xc5c   : > { %v14083_v49 = vpop.xlane.xlu0 %14082 }
 0xc5d   : > { %v14080_v54 = vpop.xlane.xlu1 %14079  ;;  %v14255_v28 = vrot.slane %v14083_v49, %v31088_v52 }
 0xc5e   : > { %v14251_v4 = vrot.slane %v14080_v54, %v31087_v59  ;;  %v14276_v54 = vsel %vm5109_vm8, %v14238_v20, %v14275_v17 }
 0xc5f   : > { %v14277_v23 = vsel %vm5111_vm9, %v14247_v61, %v14276_v54 }
 0xc60   : > { %v14256_v49 = vsel %vm4966_vm4, %v14255_v28, %v14251_v4 }
 0xc61   : > { %v14278_v41 = vsel %vm5113_vm10, %v14256_v49, %v14277_v23 }
 0xc62   : > { %v28701_v60 = vpop.xlane.xlu0 %14318 }
 0xc63   : > { %v14316_v36 = vpop.xlane.xlu1 %14315  ;;  %v14449_v11 = vrot.slane %v28701_v60, %v31088_v52 }
 0xc64   : > { %v14445_v44 = vrot.slane %v14316_v36, %v31087_v59 }
 0xc66   : > { %v14089_v8 = vpop.xlane.xlu0 %14088 }
 0xc67   : > { %v14264_v19 = vrot.slane %v14089_v8, %v31088_v52  ;;  %v14086_v37 = vpop.xlane.xlu1 %14085 }
 0xc68   : > { %v14260_v38 = vrot.slane %v14086_v37, %v31087_v59 }
 0xc6a   : > { %v14265_v62 = vsel %vm4966_vm4, %v14264_v19, %v14260_v38  ;;  %v14325_v0 = vpop.xlane.xlu0 %14324 }
 0xc6b   : > { %v14279_v10 = vsel %vm5115_vm11, %v14265_v62, %v14278_v41  ;;  %v14322_v15 = vpop.xlane.xlu1 %14321  ;;  %v14458_v3 = vrot.slane %v14325_v0, %v31088_v52 }
 0xc6c   : > { %14283 = vxpose.xlu1.b32.end [2/2] (short) (narrow) %v14279_v10, 16  ;;  %v14454_v16 = vrot.slane %v14322_v15, %v31087_v59 }
 0xc6e   : > { %v14331_v40 = vpop.xlane.xlu0 %14330  ;;  %v14459_v48 = vsel %vm4966_vm4, %v14458_v3, %v14454_v16 }
 0xc6f   : > { %v14328_v6 = vpop.xlane.xlu1 %14327  ;;  %v14467_v43 = vrot.slane %v14331_v40, %v31088_v52 }
 0xc70   : > { %v14463_v21 = vrot.slane %v14328_v6, %v31087_v59  ;;  %v14450_v6 = vsel %vm4966_vm4, %v14449_v11, %v14445_v44 }
 0xc71   : > { %v14586_v60 = vsel %vm5103_vm5, %v14459_v48, %v14450_v6 }
 0xc72   : > { %v14337_v31 = vpop.xlane.xlu0 %14336  ;;  %v14468_v0 = vsel %vm4966_vm4, %v14467_v43, %v14463_v21 }
 0xc73   : > { %v14334_v28 = vpop.xlane.xlu1 %14333  ;;  %v14476_v1 = vrot.slane %v14337_v31, %v31088_v52  ;;  %v14587_v31 = vsel %vm5105_vm6, %v14468_v0, %v14586_v60 }
 0xc74   : > { %v14472_v29 = vrot.slane %v14334_v28, %v31087_v59 }
 0xc76   : > { %v14343_v4 = vpop.xlane.xlu0 %14342  ;;  %v14477_v24 = vsel %vm4966_vm4, %v14476_v1, %v14472_v29 }
 0xc77   : > { %v14340_v2 = vpop.xlane.xlu1 %14339  ;;  %v14485_v15 = vrot.slane %v14343_v4, %v31088_v52  ;;  %v14588_v28 = vsel %vm5107_vm7, %v14477_v24, %v14587_v31 }
 0xc78   : > { %v14481_v40 = vrot.slane %v14340_v2, %v31087_v59 }
 0xc7a   : > { %v14349_v57 = vpop.xlane.xlu0 %14348  ;;  %v14486_v16 = vsel %vm4966_vm4, %v14485_v15, %v14481_v40 }
 0xc7b   : > { %v14346_v51 = vpop.xlane.xlu1 %14345  ;;  %v14494_v21 = vrot.slane %v14349_v57, %v31088_v52 }
 0xc7c   : > { %v14490_v43 = vrot.slane %v14346_v51, %v31087_v59 }
 0xc7e   : > { %v14355_v20 = vpop.xlane.xlu0 %14354 }
 0xc7f   : > { %v14352_v13 = vpop.xlane.xlu1 %14351  ;;  %v14503_v3 = vrot.slane %v14355_v20, %v31088_v52 }
 0xc80   : > { %v14499_v44 = vrot.slane %v14352_v13, %v31087_v59  ;;  %v14589_v13 = vsel %vm5109_vm8, %v14486_v16, %v14588_v28 }
 0xc83   : > { %v14367_v61 = vpop.xlane.xlu0 %14366 }
 0xc84   : > { %v14364_v8 = vpop.xlane.xlu1 %14363  ;;  %v14521_v1 = vrot.slane %v14367_v61, %v31088_v52  ;;  %v14495_v61 = vsel %vm4966_vm4, %v14494_v21, %v14490_v43 }
 0xc85   : > { %v14517_v11 = vrot.slane %v14364_v8, %v31087_v59  ;;  %v14590_v31 = vsel %vm5111_vm9, %v14495_v61, %v14589_v13  ;;  %v31090_v13 = vld [vmem:[#allocation65_spill] sm:$0xff] }
 0xc87   : > { %v28721_v17 = vpop.xlane.xlu0 %14360 }
 0xc88   : > { %v28723_v49 = vpop.xlane.xlu1 %14357  ;;  %v14512_v2 = vrot.slane %v28721_v17, %v31088_v52 }
 0xc89   : > { %v14508_v57 = vrot.slane %v28723_v49, %v31087_v59 }
 0xc8b   : > { %v14373_v19 = vpop.xlane.xlu0 %14372  ;;  %v14513_v60 = vsel %vm4966_vm4, %v14512_v2, %v14508_v57 }
 0xc8c   : > { %v14370_v37 = vpop.xlane.xlu1 %14369  ;;  %v14530_v29 = vrot.slane %v14373_v19, %v31088_v52 }
 0xc8d   : > { %v14526_v48 = vrot.slane %v14370_v37, %v31087_v59 }
 0xc8f   : > { %v14379_v54 = vpop.xlane.xlu0 %14378  ;;  %v14531_v17 = vsel %vm4966_vm4, %v14530_v29, %v14526_v48 }
 0xc90   : > { %v14376_v38 = vpop.xlane.xlu1 %14375  ;;  %v14539_v24 = vrot.slane %v14379_v54, %v31088_v52 }
 0xc91   : > { %v14535_v4 = vrot.slane %v14376_v38, %v31087_v59  ;;  %v14504_v38 = vsel %vm4966_vm4, %v14503_v3, %v14499_v44 }
 0xc93   : > { %v14385_v23 = vpop.xlane.xlu0 %14384  ;;  %v14540_v0 = vsel %vm4966_vm4, %v14539_v24, %v14535_v4 }
 0xc94   : > { %v14382_v62 = vpop.xlane.xlu1 %14381  ;;  %v14548_v51 = vrot.slane %v14385_v23, %v31088_v52 }
 0xc95   : > { %v14544_v20 = vrot.slane %v14382_v62, %v31087_v59  ;;  %v14522_v62 = vsel %vm4966_vm4, %v14521_v1, %v14517_v11 }
 0xc97   : > { %v14391_v41 = vpop.xlane.xlu0 %14390 }
 0xc98   : > { %v14388_v10 = vpop.xlane.xlu1 %14387  ;;  %v14557_v8 = vrot.slane %v14391_v41, %v31088_v52 }
 0xc99   : > { %v14553_v19 = vrot.slane %v14388_v10, %v31087_v59  ;;  %v14549_v10 = vsel %vm4966_vm4, %v14548_v51, %v14544_v20  ;;  %v31089_v51 = vld [vmem:[#allocation61_spill] sm:$0xff] }
 0xc9b   : > { %v14397_v18 = vpop.xlane.xlu0 %14396 }
 0xc9c   : > { %v14394_v33 = vpop.xlane.xlu1 %14393  ;;  %v14566_v49 = vrot.slane %v14397_v18, %v31088_v52  ;;  %v14593_v18 = vsel %vm5103_vm5, %v14531_v17, %v14522_v62  ;;  %v31095_v62 = vld [vmem:[#allocation99_spill] sm:$0xff] }
 0xc9d   : > { %v14562_v23 = vrot.slane %v14394_v33, %v31087_v59  ;;  %v14558_v33 = vsel %vm4966_vm4, %v14557_v8, %v14553_v19  ;;  %v14594_v28 = vsel %vm5105_vm6, %v14540_v0, %v14593_v18  ;;  %v31091_v8 = vld [vmem:[#allocation57_spill] sm:$0xff] }
 0xc9e   : > { %v14595_v16 = vsel %vm5107_vm7, %v14549_v10, %v14594_v28 }
 0xc9f   : > { %v14403_v22 = vpop.xlane.xlu0 %14402  ;;  %v14596_v44 = vsel %vm5109_vm8, %v14558_v33, %v14595_v16 }
 0xca0   : > { %v14400_v36 = vpop.xlane.xlu1 %14399  ;;  %v14575_v15 = vrot.slane %v14403_v22, %v31088_v52  ;;  %v14567_v22 = vsel %vm4966_vm4, %v14566_v49, %v14562_v23  ;;  %v31094_v49 = vld [vmem:[#allocation63_spill] sm:$0xff] }
 0xca1   : > { %v14571_v41 = vrot.slane %v14400_v36, %v31087_v59  ;;  %v14591_v36 = vsel %vm5113_vm10, %v14504_v38, %v14590_v31  ;;  %v14597_v1 = vsel %vm5111_vm9, %v14567_v22, %v14596_v44  ;;  %v31093_v38 = vld [vmem:[#allocation64_spill] sm:$0xff] }
 0xca2   : > { %v14592_v43 = vsel %vm5115_vm11, %v14513_v60, %v14591_v36 }
 0xca3   : > { %v14409_v37 = vpop.xlane.xlu0 %14408  ;;  %v14576_v21 = vsel %vm4966_vm4, %v14575_v15, %v14571_v41  ;;  %v31096_v41 = vld [vmem:[#allocation100_spill] sm:$0xff] }
 0xca4   : > { %v14406_v54 = vpop.xlane.xlu1 %14405  ;;  %v14584_v40 = vrot.slane %v14409_v37, %v31088_v52  ;;  %v14598_v11 = vsel %vm5113_vm10, %v14576_v21, %v14597_v1  ;;  %v31092_v37 = vld [vmem:[#allocation60_spill] sm:$0xff] }
 0xca5   : > { %v14580_v6 = vrot.slane %v14406_v54, %v31087_v59 }
 0xca7   : > { %v14585_v48 = vsel %vm4966_vm4, %v14584_v40, %v14580_v6 }
 0xca8   : > { %v14599_v24 = vsel %vm5115_vm11, %v14585_v48, %v14598_v11 }
 0xce8   : > { %v14298_v3 = vpop.trf.xlu1 }
 0xce9   : > { %v28786_v29 = vmax.f32 %v14298_v3, %v14592_v43 }
 0xceb   : > { %14604 = vxpose.xlu0.b32.start [1/2] (short) (narrow) %v28786_v29, 16  ;;  %v14911_v36 = vrot.slane %v28786_v29, %v31089_v51  ;;  %v14933_v16 = vrot.slane %v28786_v29, %v31091_v8  ;;  %v14955_v21 = vrot.slane %v28786_v29, %v31093_v38  ;;  %v14977_v43 = vrot.slane %v28786_v29, %v31095_v62 }
 0xcec   : > { %v14299_v4 = vpop.trf.xlu1  ;;  %v14922_v11 = vrot.slane %v28786_v29, %v31090_v13 }
 0xced   : > { %v28793_v2 = vmax.f32 %v14299_v4, %v14599_v24  ;;  %v14944_v24 = vrot.slane %v28786_v29, %v31092_v37  ;;  %v14966_v4 = vrot.slane %v28786_v29, %v31094_v49 }
 0xcef   : > { %14605 = vxpose.xlu0.b32.end [2/2] (short) (narrow) %v28793_v2, 16  ;;  %v14999_v3 = vrot.slane %v28793_v2, %v31089_v51  ;;  %v15021_v44 = vrot.slane %v28793_v2, %v31091_v8  ;;  %v15043_v48 = vrot.slane %v28793_v2, %v31093_v38  ;;  %v15065_v1 = vrot.slane %v28793_v2, %v31095_v62 }
 0xd6b   : > { %v14620_v57 = vpop.trf.xlu0 }
 0xd6c   : > { %v14639_v20 = vrot.slane %v14620_v57, %v31089_v51  ;;  %v14650_v61 = vrot.slane %v14620_v57, %v31090_v13  ;;  %v14661_v19 = vrot.slane %v14620_v57, %v31091_v8  ;;  %v14672_v54 = vrot.slane %v14620_v57, %v31092_v37 }
 0xd6d   : > { %v14683_v17 = vrot.slane %v14620_v57, %v31093_v38  ;;  %v14694_v23 = vrot.slane %v14620_v57, %v31094_v49  ;;  %v14705_v0 = vrot.slane %v14620_v57, %v31095_v62  ;;  %v14716_v10 = vrot.slane %v14620_v57, %v31096_v41 }
 0xd6e   : > { %14645 = vbcast.lane.b32.xlu1 %v14639_v20, 264  ;;  %14641 = vbcast.lane.b32.xlu0 %v14639_v20, 256  ;;  %v14988_v57 = vrot.slane %v28786_v29, %v31096_v41  ;;  %v15010_v20 = vrot.slane %v28793_v2, %v31090_v13 }
 0xd6f   : > { %v14621_v15 = vpop.trf.xlu0 }
 0xd70   : > { %v14727_v40 = vrot.slane %v14621_v15, %v31089_v51  ;;  %v14738_v6 = vrot.slane %v14621_v15, %v31090_v13  ;;  %v14749_v60 = vrot.slane %v14621_v15, %v31091_v8  ;;  %v14760_v18 = vrot.slane %v14621_v15, %v31092_v37 }
 0xd71   : > { %v14771_v33 = vrot.slane %v14621_v15, %v31093_v38  ;;  %v14782_v31 = vrot.slane %v14621_v15, %v31094_v49  ;;  %v14793_v28 = vrot.slane %v14621_v15, %v31095_v62  ;;  %v14804_v22 = vrot.slane %v14621_v15, %v31096_v41 }
 0xd72   : > { %14652 = vbcast.lane.b32.xlu1 %v14650_v61, 256  ;;  %14667 = vbcast.lane.b32.xlu0 %v14661_v19, 264 }
 0xd76   : > { %14656 = vbcast.lane.b32.xlu1 %v14650_v61, 264  ;;  %14678 = vbcast.lane.b32.xlu0 %v14672_v54, 264  ;;  %v15032_v61 = vrot.slane %v28793_v2, %v31092_v37 }
 0xd7a   : > { %14663 = vbcast.lane.b32.xlu1 %v14661_v19, 256  ;;  %14689 = vbcast.lane.b32.xlu0 %v14683_v17, 264 }
 0xd7e   : > { %14674 = vbcast.lane.b32.xlu1 %v14672_v54, 256  ;;  %14700 = vbcast.lane.b32.xlu0 %v14694_v23, 264 }
 0xd82   : > { %14685 = vbcast.lane.b32.xlu1 %v14683_v17, 256  ;;  %14711 = vbcast.lane.b32.xlu0 %v14705_v0, 264  ;;  %v15054_v17 = vrot.slane %v28793_v2, %v31094_v49 }
 0xd86   : > { %14696 = vbcast.lane.b32.xlu1 %v14694_v23, 256  ;;  %14722 = vbcast.lane.b32.xlu0 %v14716_v10, 264 }
 0xd8a   : > { %14707 = vbcast.lane.b32.xlu1 %v14705_v0, 256  ;;  %14733 = vbcast.lane.b32.xlu0 %v14727_v40, 264 }
 0xd8e   : > { %14718 = vbcast.lane.b32.xlu1 %v14716_v10, 256  ;;  %14744 = vbcast.lane.b32.xlu0 %v14738_v6, 264 }
 0xd92   : > { %14755 = vbcast.lane.b32.xlu0 %v14749_v60, 264  ;;  %14729 = vbcast.lane.b32.xlu1 %v14727_v40, 256 }
 0xd96   : > { %14766 = vbcast.lane.b32.xlu0 %v14760_v18, 264  ;;  %14740 = vbcast.lane.b32.xlu1 %v14738_v6, 256  ;;  %v15076_v6 = vrot.slane %v28793_v2, %v31096_v41  ;;  %v31142_v41 = vld [vmem:[#allocation12_spill] sm:$0xff] }
 0xd9a   : > { %14777 = vbcast.lane.b32.xlu0 %v14771_v33, 264  ;;  %14751 = vbcast.lane.b32.xlu1 %v14749_v60, 256 }
 0xd9e   : > { %14788 = vbcast.lane.b32.xlu0 %v14782_v31, 264  ;;  %14762 = vbcast.lane.b32.xlu1 %v14760_v18, 256 }
 0xda2   : > { %14799 = vbcast.lane.b32.xlu0 %v14793_v28, 264  ;;  %14773 = vbcast.lane.b32.xlu1 %v14771_v33, 256 }
 0xda6   : > { %14810 = vbcast.lane.b32.xlu0 %v14804_v22, 264  ;;  %14784 = vbcast.lane.b32.xlu1 %v14782_v31, 256 }
 0xdaa   : > { %14917 = vbcast.lane.b32.xlu0 %v14911_v36, 264  ;;  %14795 = vbcast.lane.b32.xlu1 %v14793_v28, 256 }
 0xdae   : > { %14939 = vbcast.lane.b32.xlu0 %v14933_v16, 264  ;;  %14806 = vbcast.lane.b32.xlu1 %v14804_v22, 256 }
 0xdb2   : > { %14961 = vbcast.lane.b32.xlu0 %v14955_v21, 264  ;;  %14913 = vbcast.lane.b32.xlu1 %v14911_v36, 256 }
 0xdb6   : > { %14983 = vbcast.lane.b32.xlu0 %v14977_v43, 264  ;;  %14935 = vbcast.lane.b32.xlu1 %v14933_v16, 256 }
 0xdba   : > { %14957 = vbcast.lane.b32.xlu1 %v14955_v21, 256  ;;  %15005 = vbcast.lane.b32.xlu0 %v14999_v3, 264 }
 0xdbe   : > { %14979 = vbcast.lane.b32.xlu1 %v14977_v43, 256  ;;  %15027 = vbcast.lane.b32.xlu0 %v15021_v44, 264 }
 0xdc2   : > { %15049 = vbcast.lane.b32.xlu0 %v15043_v48, 264  ;;  %15001 = vbcast.lane.b32.xlu1 %v14999_v3, 256 }
 0xdc6   : > { %15071 = vbcast.lane.b32.xlu0 %v15065_v1, 264  ;;  %15023 = vbcast.lane.b32.xlu1 %v15021_v44, 256 }
 0xdca   : > { %14928 = vbcast.lane.b32.xlu0 %v14922_v11, 264  ;;  %15045 = vbcast.lane.b32.xlu1 %v15043_v48, 256 }
 0xdce   : > { %14950 = vbcast.lane.b32.xlu0 %v14944_v24, 264  ;;  %15067 = vbcast.lane.b32.xlu1 %v15065_v1, 256 }
 0xdd2   : > { %14972 = vbcast.lane.b32.xlu0 %v14966_v4, 264  ;;  %14924 = vbcast.lane.b32.xlu1 %v14922_v11, 256 }
 0xdd6   : > { %14994 = vbcast.lane.b32.xlu0 %v14988_v57, 264  ;;  %14946 = vbcast.lane.b32.xlu1 %v14944_v24, 256 }
 0xdda   : > { %15016 = vbcast.lane.b32.xlu0 %v15010_v20, 264  ;;  %14968 = vbcast.lane.b32.xlu1 %v14966_v4, 256 }
 0xdde   : > { %15038 = vbcast.lane.b32.xlu0 %v15032_v61, 264  ;;  %14990 = vbcast.lane.b32.xlu1 %v14988_v57, 256 }
 0xde0   : > { %v14646_v19 = vpop.permute.xlu1 %14645  ;;  %v14642_v54 = vpop.permute.xlu0 %14641 }
 0xde1   : > { %v14813_v23 = vsub.f32 %v28365_v63, %v14646_v19  ;;  %v14812_v29 = vsub.f32 %v28373_v9, %v14642_v54 }
 0xde2   : > { %15060 = vbcast.lane.b32.xlu0 %v15054_v17, 264  ;;  %15012 = vbcast.lane.b32.xlu1 %v15010_v20, 256 }
 0xde3   : > { %v14846_v0 = vmul.f32 1.442695, %v14813_v23  ;;  %v14844_v15 = vmul.f32 1.442695, %v14812_v29 }
 0xde4   : > { %v14653_v10 = vpop.permute.xlu1 %14652  ;;  %v14668_v40 = vpop.permute.xlu0 %14667 }
 0xde5   : > { %22979 = vpow2.f32 %v14846_v0  ;;  %v14814_v60 = vsub.f32 %v28385_v27, %v14653_v10  ;;  %v14817_v31 = vsub.f32 %v28390_v26, %v14668_v40 }
 0xde6   : > { %22981 = vpow2.f32 %v14844_v15  ;;  %15082 = vbcast.lane.b32.xlu0 %v15076_v6, 264  ;;  %15034 = vbcast.lane.b32.xlu1 %v15032_v61, 256 }
 0xde7   : > { %v14848_v18 = vmul.f32 1.442695, %v14814_v60  ;;  %v14854_v16 = vmul.f32 1.442695, %v14817_v31  ;;  %v31097_v31 = vld [vmem:[#allocation30_spill] sm:$0xff] }
 0xde8   : > { %v14657_v33 = vpop.permute.xlu1 %14656  ;;  %v14679_v63 = vpop.permute.xlu0 %14678 }
 0xde9   : > { %22983 = vpow2.f32 %v14848_v18  ;;  %v14815_v9 = vsub.f32 %v28380_v46, %v14657_v33  ;;  %v14819_v27 = vsub.f32 %v28400_v14, %v14679_v63 }
 0xdea   : > { %15056 = vbcast.lane.b32.xlu1 %v15054_v17, 256 }
 0xdeb   : > { %v14850_v28 = vmul.f32 1.442695, %v14815_v9  ;;  %v14858_v48 = vmul.f32 1.442695, %v14819_v27 }
 0xdec   : > { %v14664_v22 = vpop.permute.xlu1 %14663  ;;  %v14690_v36 = vpop.permute.xlu0 %14689 }
 0xded   : > { %22985 = vpow2.f32 %v14850_v28  ;;  %v14816_v2 = vsub.f32 %v28393_v56, %v14664_v22  ;;  %v14821_v56 = vsub.f32 %v28410_v25, %v14690_v36 }
 0xdee   : > { %15078 = vbcast.lane.b32.xlu1 %v15076_v6, 256 }
 0xdef   : > { %v28851_v21 = vpop.eup %22979  ;;  %v14852_v43 = vmul.f32 1.442695, %v14816_v2  ;;  %v14862_v25 = vmul.f32 1.442695, %v14821_v56 }
 0xdf0   : > { %v28853_v3 = vpop.eup %22981  ;;  %v14675_v44 = vpop.permute.xlu1 %14674 }
 0xdf1   : > { %v14701_v46 = vpop.permute.xlu0 %14700  ;;  %22987 = vpow2.f32 %v14852_v43  ;;  %v14818_v26 = vsub.f32 %v28403_v35, %v14675_v44  ;;  %21432 = vmatprep.mubr.msk.f32.mxu0 %vm4826_vm3, %v28853_v3 }
 0xdf2   : > { %22989 = vpow2.f32 %v14854_v16  ;;  %21433 = vmatmul.mubr.msk.f32.vlgmr.msra.gmra.mrb[108].mxu0 %vm4826_vm3, %v28851_v21  ;;  %v14823_v4 = vsub.f32 %v28420_v34, %v14701_v46  ;;  %v31099_v16 = vld [vmem:[#allocation113_spill] sm:$0xff]  ;;  %v31100_v46 = vld [vmem:[#allocation19_spill] sm:$0xff] }
 0xdf3   : > { %v28861_v14 = vpop.eup %22983  ;;  %v14856_v1 = vmul.f32 1.442695, %v14818_v26  ;;  %22607 = vmatpush3.bf16.msra.mxu0 %v28133_v42 }
 0xdf4   : > { %22613 = vmatprep.subr.bf16.mxu0 %v28153_v5  ;;  %21439 = vmatprep.mubr.msk.f32.mxu1 %vm4826_vm3, %v28861_v14  ;;  %v14686_v35 = vpop.permute.xlu1 %14685  ;;  %v14866_v54 = vmul.f32 1.442695, %v14823_v4 }
 0xdf5   : > { %v14712_v11 = vpop.permute.xlu0 %14711  ;;  %22991 = vpow2.f32 %v14856_v1  ;;  %v14820_v24 = vsub.f32 %v28413_v45, %v14686_v35 }
 0xdf6   : > { %22993 = vpow2.f32 %v14858_v48  ;;  %v14825_v45 = vsub.f32 %v28430_v39, %v14712_v11  ;;  %v31101_v48 = vld [vmem:[#allocation52_spill] sm:$0xff]  ;;  %v31102_v11 = vld [vmem:[#allocation67_spill] sm:$0xff] }
 0xdf7   : > { %v28869_v57 = vpop.eup %22985  ;;  %v14860_v20 = vmul.f32 1.442695, %v14820_v24 }
 0xdf8   : > { %21440 = vmatmul.mubr.msk.f32.vlgmr.msra.gmra.mrb[212].mxu1 %vm4826_vm3, %v28869_v57  ;;  %v14697_v42 = vpop.permute.xlu1 %14696 }
 0xdf9   : > { %v14723_v61 = vpop.permute.xlu0 %14722  ;;  %22995 = vpow2.f32 %v14860_v20  ;;  %22611 = vmatpush3.bf16.msra.mxu1 %v28143_v32  ;;  %v14822_v19 = vsub.f32 %v28423_v30, %v14697_v42  ;;  %v14870_v30 = vmul.f32 1.442695, %v14825_v45  ;;  %v31103_v20 = vld [vmem:[#allocation24_spill] sm:$0xff] }
 0xdfa   : > { %22997 = vpow2.f32 %v14862_v25  ;;  %22617 = vmatprep.subr.bf16.mxu1 %v28166_v47  ;;  %v14827_v39 = vsub.f32 %v28440_v12, %v14723_v61  ;;  %v31104_v61 = vld [vmem:[#allocation94_spill] sm:$0xff] }
 0xdfb   : > { %v28877_v34 = vpop.eup %22987  ;;  %v14864_v17 = vmul.f32 1.442695, %v14822_v19 }
 0xdfc   : > { %v28879_v23 = vpop.eup %22989  ;;  %v14708_v29 = vpop.permute.xlu1 %14707  ;;  %21446 = vmatprep.mubr.msk.f32.mxu0 %vm4826_vm3, %v28877_v34 }
 0xdfd   : > { %v14734_v0 = vpop.permute.xlu0 %14733  ;;  %22999 = vpow2.f32 %v14864_v17  ;;  %v14824_v32 = vsub.f32 %v28433_v58, %v14708_v29  ;;  %21447 = vmatmul.mubr.msk.f32.vlgmr.msra.gmra.mrb[110].mxu0 %vm4826_vm3, %v28879_v23  ;;  %v31105_v17 = vld [vmem:[#allocation115_spill] sm:$0xff] }
 0xdfe   : > { %23001 = vpow2.f32 %v14866_v54  ;;  %22615 = vmatpush3.bf16.msra.mxu0 %v28153_v5  ;;  %v14874_v5 = vmul.f32 1.442695, %v14827_v39  ;;  %v14829_v12 = vsub.f32 %v28450_v55, %v14734_v0  ;;  %v31098_v55 = vld [vmem:[#allocation9_spill] sm:$0xff] }
 0xdff   : > { %v28888_v15 = vpop.eup %22991  ;;  %v14868_v10 = vmul.f32 1.442695, %v14824_v32  ;;  %22621 = vmatprep.subr.bf16.mxu0 %v28185_v7 }
 0xe00   : > { %v28891_v40 = vpop.eup %22993  ;;  %21453 = vmatprep.mubr.msk.f32.mxu1 %vm4826_vm3, %v28888_v15  ;;  %v14719_v58 = vpop.permute.xlu1 %14718 }
 0xe01   : > { %v14745_v6 = vpop.permute.xlu0 %14744  ;;  %23003 = vpow2.f32 %v14868_v10  ;;  %v14826_v60 = vsub.f32 %v28443_v50, %v14719_v58  ;;  %21454 = vmatmul.mubr.msk.f32.vlgmr.msra.gmra.mrb[214].mxu1 %vm4826_vm3, %v28891_v40  ;;  %v31107_v58 = vld [vmem:[#allocation68_spill] sm:$0xff] }
 0xe02   : > { %23005 = vpow2.f32 %v14870_v30  ;;  %22619 = vmatpush3.bf16.msra.mxu1 %v28166_v47  ;;  %v14878_v47 = vmul.f32 1.442695, %v14829_v12  ;;  %v14831_v22 = vsub.f32 %v31098_v55, %v14745_v6  ;;  %v31106_v30 = vld [vmem:[#allocation11_spill] sm:$0xff]  ;;  %v31108_v12 = vld [vmem:[#allocation26_spill] sm:$0xff]  ;;  %v31110_v55 = vld [vmem:[#allocation44_spill] sm:$0xff] }
 0xe03   : > { %v28900_v18 = vpop.eup %22995  ;;  %v14872_v33 = vmul.f32 1.442695, %v14826_v60  ;;  %22625 = vmatprep.subr.bf16.mxu1 %v28207_v53 }
 0xe04   : > { %v28903_v63 = vpop.eup %22997  ;;  %v14730_v9 = vpop.permute.xlu1 %14729  ;;  %21460 = vmatprep.mubr.msk.f32.mxu0 %vm4826_vm3, %v28900_v18 }
 0xe05   : > { %v14756_v50 = vpop.permute.xlu0 %14755  ;;  %23007 = vpow2.f32 %v14872_v33  ;;  %v14828_v28 = vsub.f32 %v31097_v31, %v14730_v9  ;;  %21461 = vmatmul.mubr.msk.f32.vlgmr.msra.gmra.mrb[112].mxu0 %vm4826_vm3, %v28903_v63  ;;  %v31109_v31 = vld [vmem:[#allocation92_spill] sm:$0xff] }
 0xe06   : > { %23009 = vpow2.f32 %v14874_v5  ;;  %22623 = vmatpush3.bf16.msra.mxu0 %v28185_v7  ;;  %v14882_v7 = vmul.f32 1.442695, %v14831_v22  ;;  %v14833_v56 = vsub.f32 %v31101_v48, %v14756_v50 }
 0xe07   : > { %v28912_v36 = vpop.eup %22999  ;;  %v14876_v2 = vmul.f32 1.442695, %v14828_v28  ;;  %22629 = vmatprep.subr.bf16.mxu0 %v31099_v16 }
 0xe08   : > { %v28915_v27 = vpop.eup %23001  ;;  %v14741_v43 = vpop.permute.xlu1 %14740  ;;  %21467 = vmatprep.mubr.msk.f32.mxu1 %vm4826_vm3, %v28912_v36 }
 0xe09   : > { %v14767_v44 = vpop.permute.xlu0 %14766  ;;  %23011 = vpow2.f32 %v14876_v2  ;;  %v14830_v26 = vsub.f32 %v31100_v46, %v14741_v43  ;;  %21468 = vmatmul.mubr.msk.f32.vlgmr.msra.gmra.mrb[216].mxu1 %vm4826_vm3, %v28915_v27  ;;  %v31111_v43 = vld [vmem:[#allocation117_spill] sm:$0xff] }
 0xe0a   : > { %23013 = vpow2.f32 %v14878_v47  ;;  %22627 = vmatpush3.bf16.msra.mxu1 %v28207_v53  ;;  %v14886_v53 = vmul.f32 1.442695, %v14833_v56  ;;  %v14835_v19 = vsub.f32 %v31104_v61, %v14767_v44 }
 0xe0b   : > { %v28924_v1 = vpop.eup %23003  ;;  %v14880_v35 = vmul.f32 1.442695, %v14830_v26  ;;  %22633 = vmatprep.subr.bf16.mxu1 %v31102_v11 }
 0xe0c   : > { %v28927_v24 = vpop.eup %23005  ;;  %v14752_v25 = vpop.permute.xlu1 %14751  ;;  %21474 = vmatprep.mubr.msk.f32.mxu0 %vm4826_vm3, %v28924_v1  ;;  %v14890_v10 = vmul.f32 1.442695, %v14835_v19  ;;  %v31115_v19 = vld [vmem:[#allocation13_spill] sm:$0xff] }
 0xe0d   : > { %v14778_v4 = vpop.permute.xlu0 %14777  ;;  %23015 = vpow2.f32 %v14880_v35  ;;  %v14832_v42 = vsub.f32 %v31103_v20, %v14752_v25  ;;  %21475 = vmatmul.mubr.msk.f32.vlgmr.msra.gmra.mrb[114].mxu0 %vm4826_vm3, %v28927_v24  ;;  %v31113_v35 = vld [vmem:[#allocation37_spill] sm:$0xff]  ;;  %v31114_v20 = vld [vmem:[#allocation16_spill] sm:$0xff] }
 0xe0e   : > { %23017 = vpow2.f32 %v14882_v7  ;;  %22631 = vmatpush3.bf16.msra.mxu0 %v31099_v16  ;;  %v14837_v6 = vsub.f32 %v31107_v58, %v14778_v4  ;;  %v31112_v7 = vld [vmem:[#allocation43_spill] sm:$0xff] }
 0xe0f   : > { %v28936_v54 = vpop.eup %23007  ;;  %v14884_v45 = vmul.f32 1.442695, %v14832_v42  ;;  %22637 = vmatprep.subr.bf16.mxu0 %v31105_v17 }
 0xe10   : > { %v28939_v29 = vpop.eup %23009  ;;  %v14763_v0 = vpop.permute.xlu1 %14762  ;;  %21481 = vmatprep.mubr.msk.f32.mxu1 %vm4826_vm3, %v28936_v54  ;;  %v14894_v47 = vmul.f32 1.442695, %v14837_v6 }
 0xe11   : > { %v14789_v32 = vpop.permute.xlu0 %14788  ;;  %23019 = vpow2.f32 %v14884_v45  ;;  %v14834_v39 = vsub.f32 %v31106_v30, %v14763_v0  ;;  %21482 = vmatmul.mubr.msk.f32.vlgmr.msra.gmra.mrb[218].mxu1 %vm4826_vm3, %v28939_v29  ;;  %v31116_v0 = vld [vmem:[#allocation96_spill] sm:$0xff] }
 0xe12   : > { %23021 = vpow2.f32 %v14886_v53  ;;  %22635 = vmatpush3.bf16.msra.mxu1 %v31102_v11  ;;  %v14839_v22 = vsub.f32 %v31110_v55, %v14789_v32 }
 0xe13   : > { %v28948_v60 = vpop.eup %23011  ;;  %v14888_v5 = vmul.f32 1.442695, %v14834_v39  ;;  %22641 = vmatprep.subr.bf16.mxu1 %v31108_v12 }
 0xe14   : > { %v28951_v33 = vpop.eup %23013  ;;  %v14774_v9 = vpop.permute.xlu1 %14773  ;;  %21488 = vmatprep.mubr.msk.f32.mxu0 %vm4826_vm3, %v28948_v60  ;;  %v14898_v56 = vmul.f32 1.442695, %v14839_v22  ;;  %v31120_v22 = vld [vmem:[#allocation7_spill] sm:$0xff] }
 0xe15   : > { %v14800_v50 = vpop.permute.xlu0 %14799  ;;  %23023 = vpow2.f32 %v14888_v5  ;;  %v14836_v28 = vsub.f32 %v31109_v31, %v14774_v9  ;;  %21489 = vmatmul.mubr.msk.f32.vlgmr.msra.gmra.mrb[116].mxu0 %vm4826_vm3, %v28951_v33  ;;  %v31119_v31 = vld [vmem:[#allocation76_spill] sm:$0xff] }
 0xe16   : > { %23025 = vpow2.f32 %v14890_v10  ;;  %22639 = vmatpush3.bf16.msra.mxu0 %v31105_v17  ;;  %v14841_v11 = vsub.f32 %v31113_v35, %v14800_v50  ;;  %v31117_v10 = vld [vmem:[#allocation98_spill] sm:$0xff] }
 0xe17   : > { %v28960_v2 = vpop.eup %23015  ;;  %v14892_v16 = vmul.f32 1.442695, %v14836_v28  ;;  %22645 = vmatprep.subr.bf16.mxu0 %v31111_v43 }
 0xe18   : > { %v28963_v44 = vpop.eup %23017  ;;  %v14785_v46 = vpop.permute.xlu1 %14784  ;;  %21495 = vmatprep.mubr.msk.f32.mxu1 %vm4826_vm3, %v28960_v2  ;;  %v14902_v17 = vmul.f32 1.442695, %v14841_v11 }
 0xe19   : > { %v14811_v26 = vpop.permute.xlu0 %14810  ;;  %23027 = vpow2.f32 %v14892_v16  ;;  %v14838_v48 = vsub.f32 %v31112_v7, %v14785_v46  ;;  %21496 = vmatmul.mubr.msk.f32.vlgmr.msra.gmra.mrb[220].mxu1 %vm4826_vm3, %v28963_v44 }
 0xe1a   : > { %23029 = vpow2.f32 %v14894_v47  ;;  %22643 = vmatpush3.bf16.msra.mxu1 %v31108_v12  ;;  %v14843_v32 = vsub.f32 %v31116_v0, %v14811_v26  ;;  %v31118_v12 = vld [vmem:[#allocation36_spill] sm:$0xff] }
 0xe1b   : > { %v28972_v25 = vpop.eup %23019  ;;  %v14896_v4 = vmul.f32 1.442695, %v14838_v48  ;;  %22649 = vmatprep.subr.bf16.mxu1 %v31114_v20  ;;  %v31122_v48 = vld [vmem:[#allocation38_spill] sm:$0xff] }
 0xe1c   : > { %v28975_v42 = vpop.eup %23021  ;;  %v14796_v53 = vpop.permute.xlu1 %14795  ;;  %21502 = vmatprep.mubr.msk.f32.mxu0 %vm4826_vm3, %v28972_v25  ;;  %v14906_v50 = vmul.f32 1.442695, %v14843_v32  ;;  %v31125_v32 = vld [vmem:[#allocation55_spill] sm:$0xff] }
 0xe1d   : > { %v14918_v61 = vpop.permute.xlu0 %14917  ;;  %23031 = vpow2.f32 %v14896_v4  ;;  %v14840_v45 = vsub.f32 %v31115_v19, %v14796_v53  ;;  %21503 = vmatmul.mubr.msk.f32.vlgmr.msra.gmra.mrb[118].mxu0 %vm4826_vm3, %v28975_v42 }
 0xe1e   : > { %23033 = vpow2.f32 %v14898_v56  ;;  %22647 = vmatpush3.bf16.msra.mxu0 %v31111_v43  ;;  %v15085_v28 = vsub.f32 %v31119_v31, %v14918_v61  ;;  %v31121_v43 = vld [vmem:[#allocation14_spill] sm:$0xff] }
 0xe1f   : > { %v28984_v30 = vpop.eup %23023  ;;  %v14900_v39 = vmul.f32 1.442695, %v14840_v45  ;;  %22653 = vmatprep.subr.bf16.mxu0 %v31117_v10 }
 0xe20   : > { %v28987_v58 = vpop.eup %23025  ;;  %v14807_v6 = vpop.permute.xlu1 %14806  ;;  %21509 = vmatprep.mubr.msk.f32.mxu1 %vm4826_vm3, %v28984_v30  ;;  %v15118_v35 = vmul.f32 1.442695, %v15085_v28 }
 0xe21   : > { %v14940_v5 = vpop.permute.xlu0 %14939  ;;  %23035 = vpow2.f32 %v14900_v39  ;;  %v14842_v9 = vsub.f32 %v31118_v12, %v14807_v6  ;;  %21510 = vmatmul.mubr.msk.f32.vlgmr.msra.gmra.mrb[222].mxu1 %vm4826_vm3, %v28987_v58 }
 0xe22   : > { %23037 = vpow2.f32 %v14902_v17  ;;  %22651 = vmatpush3.bf16.msra.mxu1 %v31114_v20  ;;  %v15089_v46 = vsub.f32 %v31121_v43, %v14940_v5  ;;  %v31123_v20 = vld [vmem:[#allocation101_spill] sm:$0xff]  ;;  %v31124_v17 = vld [vmem:[#allocation42_spill] sm:$0xff] }
 0xe23   : > { %v28996_v47 = vpop.eup %23027  ;;  %v14904_v55 = vmul.f32 1.442695, %v14842_v9  ;;  %22657 = vmatprep.subr.bf16.mxu1 %v31120_v22  ;;  %v31128_v43 = vld [vmem:[#allocation69_spill] sm:$0xff] }
 0xe24   : > { %v28999_v16 = vpop.eup %23029  ;;  %v14914_v26 = vpop.permute.xlu1 %14913  ;;  %21516 = vmatprep.mubr.msk.f32.mxu0 %vm4826_vm3, %v28996_v47  ;;  %v15126_v61 = vmul.f32 1.442695, %v15089_v46 }
 0xe25   : > { %v14962_v7 = vpop.permute.xlu0 %14961  ;;  %23039 = vpow2.f32 %v14904_v55  ;;  %v15084_v56 = vsub.f32 %v31122_v48, %v14914_v26  ;;  %21517 = vmatmul.mubr.msk.f32.vlgmr.msra.gmra.mrb[120].mxu0 %vm4826_vm3, %v28999_v16  ;;  %v31129_v48 = vld [vmem:[#allocation103_spill] sm:$0xff] }
 0xe26   : > { %23041 = vpow2.f32 %v14906_v50  ;;  %22655 = vmatpush3.bf16.msra.mxu0 %v31117_v10  ;;  %v31126_v10 = vld [vmem:[#allocation87_spill] sm:$0xff]  ;;  %v31127_v50 = vld [vmem:[#allocation102_spill] sm:$0xff] }
 0xe27   : > { %v29008_v11 = vpop.eup %23031  ;;  %v15116_v4 = vmul.f32 1.442695, %v15084_v56  ;;  %22661 = vmatprep.subr.bf16.mxu0 %v31123_v20  ;;  %v15093_v6 = vsub.f32 %v31126_v10, %v14962_v7 }
 0xe28   : > { %v29011_v53 = vpop.eup %23033  ;;  %v14936_v19 = vpop.permute.xlu1 %14935  ;;  %21523 = vmatprep.mubr.msk.f32.mxu1 %vm4826_vm3, %v29008_v11 }
 0xe29   : > { %v14984_v45 = vpop.permute.xlu0 %14983  ;;  %23043 = vpow2.f32 %v15116_v4  ;;  %v15088_v0 = vsub.f32 %v31124_v17, %v14936_v19  ;;  %21524 = vmatmul.mubr.msk.f32.vlgmr.msra.gmra.mrb[224].mxu1 %vm4826_vm3, %v29011_v53 }
 0xe2a   : > { %v15097_v39 = vsub.f32 %v31125_v32, %v14984_v45  ;;  %23045 = vpow2.f32 %v15118_v35  ;;  %22659 = vmatpush3.bf16.msra.mxu1 %v31120_v22  ;;  %v15134_v22 = vmul.f32 1.442695, %v15093_v6  ;;  %v31131_v45 = vld [vmem:[#allocation83_spill] sm:$0xff]  ;;  %v31132_v32 = vld [vmem:[#allocation104_spill] sm:$0xff] }
 0xe2b   : > { %v29021_v5 = vpop.eup %23035  ;;  %v15124_v12 = vmul.f32 1.442695, %v15088_v0  ;;  %22665 = vmatprep.subr.bf16.mxu1 %v31127_v50  ;;  %23047 = vpow2.f32 %v15126_v61  ;;  %v31130_v61 = vld [vmem:[#allocation48_spill] sm:$0xff] }
 0xe2c   : > { %v15142_v9 = vmul.f32 1.442695, %v15097_v39  ;;  %v29024_v31 = vpop.eup %23037  ;;  %v14958_v28 = vpop.permute.xlu1 %14957  ;;  %21530 = vmatprep.mubr.msk.f32.mxu0 %vm4826_vm3, %v29021_v5 }
 0xe2d   : > { %v15006_v55 = vpop.permute.xlu0 %15005  ;;  %23049 = vpow2.f32 %v15124_v12  ;;  %v15092_v46 = vsub.f32 %v31128_v43, %v14958_v28  ;;  %21531 = vmatmul.mubr.msk.f32.vlgmr.msra.gmra.mrb[122].mxu0 %vm4826_vm3, %v29024_v31 }
 0xe2e   : > { %23051 = vpow2.f32 %v15142_v9  ;;  %22663 = vmatpush3.bf16.msra.mxu0 %v31123_v20  ;;  %v15101_v17 = vsub.f32 %v31131_v45, %v15006_v55  ;;  %v31133_v9 = vld [vmem:[#allocation89_spill] sm:$0xff] }
 0xe2f   : > { %v29032_v26 = vpop.eup %23039  ;;  %v15132_v7 = vmul.f32 1.442695, %v15092_v46  ;;  %22669 = vmatprep.subr.bf16.mxu0 %v31129_v48  ;;  %v31134_v46 = vld [vmem:[#allocation95_spill] sm:$0xff] }
 0xe30   : > { %v29035_v56 = vpop.eup %23041  ;;  %v14980_v35 = vpop.permute.xlu1 %14979  ;;  %21537 = vmatprep.mubr.msk.f32.mxu1 %vm4826_vm3, %v29032_v26  ;;  %v15150_v43 = vmul.f32 1.442695, %v15101_v17 }
 0xe31   : > { %v15028_v4 = vpop.permute.xlu0 %15027  ;;  %23053 = vpow2.f32 %v15132_v7  ;;  %v15096_v19 = vsub.f32 %v31130_v61, %v14980_v35  ;;  %21538 = vmatmul.mubr.msk.f32.vlgmr.msra.gmra.mrb[226].mxu1 %vm4826_vm3, %v29035_v56  ;;  %v31135_v35 = vld [vmem:[#allocation105_spill] sm:$0xff] }
 0xe32   : > { %23055 = vpow2.f32 %v15134_v22  ;;  %22667 = vmatpush3.bf16.msra.mxu1 %v31127_v50  ;;  %v15105_v22 = vsub.f32 %v31134_v46, %v15028_v4 }
 0xe33   : > { %v23044_v20 = vpop.eup %23043  ;;  %v15140_v0 = vmul.f32 1.442695, %v15096_v19  ;;  %22673 = vmatprep.subr.bf16.mxu1 %v31132_v32 }
 0xe34   : > { %v23046_v39 = vpop.eup %23045  ;;  %21544 = vmatprep.mubr.msk.f32.mxu0 %vm4826_vm3, %v23044_v20  ;;  %v15002_v6 = vpop.permute.xlu1 %15001  ;;  %v15500_v12 = vsel %vm4826_vm3, %v23044_v20, 0.0  ;;  %v15158_v17 = vmul.f32 1.442695, %v15105_v22 }
 0xe35   : > { %v15050_v10 = vpop.permute.xlu0 %15049  ;;  %23057 = vpow2.f32 %v15140_v0  ;;  %v15100_v28 = vsub.f32 %v31133_v9, %v15002_v6  ;;  %21545 = vmatmul.mubr.msk.f32.vlgmr.msra.gmra.mrb[124].mxu0 %vm4826_vm3, %v23046_v39  ;;  %15501 = vadd.xlane.f32.xlu0 %v15500_v12  ;;  %v29049_v50 = vpop.eup %23047  ;;  %v15503_v45 = vsel %vm4826_vm3, %v23046_v39, 0.0  ;;  %v31136_v0 = vld [vmem:[#allocation15_spill] sm:$0xff]  ;;  %v31137_v12 = vld [vmem:[#allocation93_spill] sm:$0xff] }
 0xe36   : > { %22671 = vmatpush3.bf16.msra.mxu0 %v31129_v48  ;;  %v15109_v9 = vsub.f32 %v31137_v12, %v15050_v10  ;;  %v31138_v39 = vld [vmem:[#allocation107_spill] sm:$0xff]  ;;  %v31141_v12 = vld [vmem:[#allocation109_spill] sm:$0xff] }
 0xe37   : > { %v29052_v55 = vpop.eup %23049  ;;  %v15148_v7 = vmul.f32 1.442695, %v15100_v28  ;;  %22677 = vmatprep.subr.bf16.mxu0 %v31135_v35 }
 0xe38   : > { %v23052_v61 = vpop.eup %23051  ;;  %21558 = vmatprep.mubr.msk.f32.mxu0 %vm4826_vm3, %v29052_v55  ;;  %v15024_v20 = vpop.permute.xlu1 %15023  ;;  %v15166_v22 = vmul.f32 1.442695, %v15109_v9 }
 0xe39   : > { %v15072_v19 = vpop.permute.xlu0 %15071  ;;  %v15104_v6 = vsub.f32 %v31136_v0, %v15024_v20  ;;  %21559 = vmatmul.mubr.msk.f32.vlgmr.msra.gmra.mrb[126].mxu0 %vm4826_vm3, %v29049_v50  ;;  %15504 = vadd.xlane.f32.xlu0 %v15503_v45  ;;  %v15539_v48 = vsel %vm4826_vm3, %v23052_v61, 0.0  ;;  %23059 = vpow2.f32 %v15148_v7  ;;  %v31139_v7 = vld [vmem:[#allocation10_spill] sm:$0xff] }
 0xe3a   : > { %22679 = vmatpush3.bf16.msra.mxu0 %v31135_v35  ;;  %15540 = vadd.xlane.f32.xlu1 %v15539_v48  ;;  %23061 = vpow2.f32 %v15150_v43  ;;  %v15180_v43 = vsel %vm4826_vm3, %v28853_v3, 0.0  ;;  %v31140_v35 = vld [vmem:[#allocation70_spill] sm:$0xff] }
 0xe3b   : > { %v29064_v4 = vpop.eup %23053  ;;  %v15156_v28 = vmul.f32 1.442695, %v15104_v6  ;;  %22685 = vmatprep.subr.bf16.mxu0 %v31138_v39  ;;  %v15113_v6 = vsub.f32 %v31140_v35, %v15072_v19 }
 0xe3c   : > { %v29068_v46 = vpop.eup %23055  ;;  %21572 = vmatprep.mubr.msk.f32.mxu0 %vm4826_vm3, %v29064_v4  ;;  %v15046_v45 = vpop.permute.xlu1 %15045 }
 0xe3d   : > { %v14929_v20 = vpop.permute.xlu0 %14928  ;;  %v15108_v0 = vsub.f32 %v31139_v7, %v15046_v45  ;;  %21573 = vmatmul.mubr.msk.f32.vlgmr.msra.gmra.mrb[128].mxu0 %vm4826_vm3, %v29068_v46  ;;  %23063 = vpow2.f32 %v15156_v28  ;;  %v15192_v28 = vsel %vm4826_vm3, %v28877_v34, 0.0  ;;  %v15174_v19 = vmul.f32 1.442695, %v15113_v6  ;;  %v31145_v34 = vld [vmem:[#allocation80_spill] sm:$0xff] }
 0xe3e   : > { %22687 = vmatpush3.bf16.msra.mxu0 %v31138_v39  ;;  %15181 = vadd.xlane.f32.xlu1 %v15180_v43  ;;  %23065 = vpow2.f32 %v15158_v17  ;;  %v31143_v17 = vld [vmem:[#allocation50_spill] sm:$0xff]  ;;  %v31146_v6 = vld [vmem:[#allocation56_spill] sm:$0xff] }
 0xe3f   : > { %v29078_v10 = vpop.eup %23057  ;;  %v15164_v48 = vmul.f32 1.442695, %v15108_v0  ;;  %22693 = vmatprep.subr.bf16.mxu0 %v31141_v12  ;;  %v15087_v9 = vsub.f32 %v31143_v17, %v14929_v20  ;;  %v31144_v0 = vld [vmem:[#allocation111_spill] sm:$0xff] }
 0xe40   : > { %21586 = vmatprep.mubr.msk.f32.mxu0 %vm4826_vm3, %v29078_v10  ;;  %v15068_v7 = vpop.permute.xlu1 %15067 }
 0xe41   : > { %v14951_v45 = vpop.permute.xlu0 %14950  ;;  %v15112_v3 = vsub.f32 %v31142_v41, %v15068_v7  ;;  %21587 = vmatmul.mubr.msk.f32.vlgmr.msra.gmra.mrb[130].mxu0 %vm4826_vm3, %v23052_v61  ;;  %23067 = vpow2.f32 %v15164_v48  ;;  %v15122_v20 = vmul.f32 1.442695, %v15087_v9  ;;  %v31149_v9 = vld [vmem:[#allocation78_spill] sm:$0xff] }
 0xe42   : > { %22695 = vmatpush3.bf16.msra.mxu0 %v31141_v12  ;;  %15193 = vadd.xlane.f32.xlu1 %v15192_v28  ;;  %23069 = vpow2.f32 %v15166_v22  ;;  %v15198_v22 = vsel %vm4826_vm3, %v28888_v15, 0.0  ;;  %v15091_v48 = vsub.f32 %v31146_v6, %v14951_v45  ;;  %v31147_v28 = vld [vmem:[#allocation114_spill] sm:$0xff]  ;;  %v31148_v15 = vld [vmem:[#allocation51_spill] sm:$0xff] }
 0xe43   : > { %v15172_v39 = vmul.f32 1.442695, %v15112_v3  ;;  %22701 = vmatprep.subr.bf16.mxu0 %v31144_v0  ;;  %v29091_v43 = vpop.eup %23059  ;;  %v31150_v6 = vld [vmem:[#allocation118_spill] sm:$0xff] }
 0xe44   : > { %v14925_v41 = vpop.permute.xlu1 %14924  ;;  %v29093_v7 = vpop.eup %23061  ;;  %21600 = vmatprep.mubr.msk.f32.mxu0 %vm4826_vm3, %v29091_v43  ;;  %v15130_v45 = vmul.f32 1.442695, %v15091_v48  ;;  %v31152_v48 = vld [vmem:[#allocation62_spill] sm:$0xff] }
 0xe45   : > { %v14973_v35 = vpop.permute.xlu0 %14972  ;;  %v15086_v61 = vsub.f32 %v31145_v34, %v14925_v41  ;;  %23071 = vpow2.f32 %v15172_v39  ;;  %21601 = vmatmul.mubr.msk.f32.vlgmr.msra.gmra.mrb[132].mxu0 %vm4826_vm3, %v29093_v7 }
 0xe46   : > { %15199 = vadd.xlane.f32.xlu1 %v15198_v22  ;;  %23073 = vpow2.f32 %v15174_v19  ;;  %22703 = vmatpush3.bf16.msra.mxu0 %v31144_v0  ;;  %v15204_v19 = vsel %vm4826_vm3, %v28900_v18, 0.0  ;;  %v15095_v0 = vsub.f32 %v31149_v9, %v14973_v35  ;;  %v31151_v18 = vld [vmem:[#allocation49_spill] sm:$0xff] }
 0xe47   : > { %v15120_v12 = vmul.f32 1.442695, %v15086_v61  ;;  %v29104_v3 = vpop.eup %23063  ;;  %22709 = vmatprep.subr.bf16.mxu0 %v31147_v28 }
 0xe48   : > { %v14947_v41 = vpop.permute.xlu1 %14946  ;;  %v29107_v34 = vpop.eup %23065  ;;  %21614 = vmatprep.mubr.msk.f32.mxu0 %vm4826_vm3, %v29104_v3  ;;  %v15138_v35 = vmul.f32 1.442695, %v15095_v0  ;;  %v31155_v0 = vld [vmem:[#allocation91_spill] sm:$0xff] }
 0xe49   : > { %v14995_v17 = vpop.permute.xlu0 %14994  ;;  %v15090_v39 = vsub.f32 %v31148_v15, %v14947_v41  ;;  %23075 = vpow2.f32 %v15120_v12  ;;  %21615 = vmatmul.mubr.msk.f32.vlgmr.msra.gmra.mrb[134].mxu0 %vm4826_vm3, %v29107_v34 }
 0xe4a   : > { %15205 = vadd.xlane.f32.xlu1 %v15204_v19  ;;  %23077 = vpow2.f32 %v15122_v20  ;;  %22711 = vmatpush3.bf16.msra.mxu0 %v31147_v28  ;;  %v15210_v20 = vsel %vm4826_vm3, %v28912_v36, 0.0  ;;  %v15099_v28 = vsub.f32 %v31152_v48, %v14995_v17  ;;  %v31154_v36 = vld [vmem:[#allocation81_spill] sm:$0xff] }
 0xe4b   : > { %v15128_v61 = vmul.f32 1.442695, %v15090_v39  ;;  %v29118_v22 = vpop.eup %23067  ;;  %22717 = vmatprep.subr.bf16.mxu0 %v31150_v6 }
 0xe4c   : > { %v14969_v15 = vpop.permute.xlu1 %14968  ;;  %v29121_v62 = vpop.eup %23069  ;;  %21628 = vmatprep.mubr.msk.f32.mxu0 %vm4826_vm3, %v29118_v22  ;;  %v15146_v17 = vmul.f32 1.442695, %v15099_v28 }
 0xe4d   : > { %v15017_v41 = vpop.permute.xlu0 %15016  ;;  %v15094_v12 = vsub.f32 %v31151_v18, %v14969_v15  ;;  %23079 = vpow2.f32 %v15128_v61  ;;  %21629 = vmatmul.mubr.msk.f32.vlgmr.msra.gmra.mrb[136].mxu0 %vm4826_vm3, %v29121_v62  ;;  %v31153_v15 = vmov 0.0|0.0  }
 0xe4e   : > { %15211 = vadd.xlane.f32.xlu1 %v15210_v20  ;;  %23081 = vpow2.f32 %v15130_v45  ;;  %22719 = vmatpush3.bf16.msra.mxu0 %v31150_v6  ;;  %v15216_v45 = vsel %vm4826_vm3, %v28924_v1, 0.0  ;;  %v15103_v6 = vsub.f32 %v31155_v0, %v15017_v41  ;;  %v23214_v20 = vld [vmem:[%s30105_s8 + $0x8] sm:$0xff]  ;;  %v31156_v1 = vld [vmem:[#allocation6_spill] sm:$0xff] }
 0xe4f   : > { %v15136_v39 = vmul.f32 1.442695, %v15094_v12  ;;  %v29132_v19 = vpop.eup %23071  ;;  %22724 = vmatprep.subr.bf16.mxu0 %v31153_v15 }
 0xe50   : > { %v14991_v49 = vpop.permute.xlu1 %14990  ;;  %v29135_v18 = vpop.eup %23073  ;;  %21642 = vmatprep.mubr.msk.f32.mxu0 %vm4826_vm3, %v29132_v19  ;;  %v15154_v28 = vmul.f32 1.442695, %v15103_v6  ;;  %v31160_v6 = vld [vmem:[#allocation77_spill] sm:$0xff] }
 0xe51   : > { %v15039_v9 = vpop.permute.xlu0 %15038  ;;  %v15098_v61 = vsub.f32 %v31154_v36, %v14991_v49  ;;  %23083 = vpow2.f32 %v15136_v39  ;;  %21643 = vmatmul.mubr.msk.f32.vlgmr.msra.gmra.mrb[138].mxu0 %vm4826_vm3, %v29135_v18 }
 0xe52   : > { %15217 = vadd.xlane.f32.xlu1 %v15216_v45  ;;  %23085 = vpow2.f32 %v15138_v35  ;;  %18454 = vmatprep.mubr.f32.mxu0 %v23214_v20  ;;  %v15222_v45 = vsel %vm4826_vm3, %v28936_v54, 0.0 }
 0xe53   : > { %v15144_v12 = vmul.f32 1.442695, %v15098_v61  ;;  %v23076_v48 = vpop.eup %23075  ;;  %v31157_v61 = vld [vmem:[#allocation17_spill] sm:$0xff] }
 0xe54   : > { %v15013_v49 = vpop.permute.xlu1 %15012  ;;  %v23078_v36 = vpop.eup %23077  ;;  %21551 = vmatprep.mubr.msk.f32.mxu1 %vm4826_vm3, %v23076_v48  ;;  %v15506_v35 = vsel %vm4826_vm3, %v23076_v48, 0.0  ;;  %v15107_v0 = vsub.f32 %v31157_v61, %v15039_v9 }
 0xe55   : > { %v15102_v39 = vsub.f32 %v31156_v1, %v15013_v49  ;;  %23087 = vpow2.f32 %v15144_v12  ;;  %v15061_v41 = vpop.permute.xlu0 %15060  ;;  %21552 = vmatmul.mubr.msk.f32.vlgmr.msra.gmra.mrb[228].mxu1 %vm4826_vm3, %v23078_v36  ;;  %15507 = vadd.xlane.f32.xlu0 %v15506_v35  ;;  %v31158_v49 = vld [vmem:[#allocation106_spill] sm:$0xff]  ;;  %v31159_v12 = vld [vmem:[#allocation97_spill] sm:$0xff]  ;;  %v15509_v9 = vsel %vm4826_vm3, %v23078_v36, 0.0  ;;  %v31162_v36 = vld [vmem:[#allocation8_spill] sm:$0xff] }
 0xe56   : > { %15223 = vadd.xlane.f32.xlu1 %v15222_v45  ;;  %23089 = vpow2.f32 %v15146_v17  ;;  %22675 = vmatpush3.bf16.msra.mxu1 %v31132_v32  ;;  %v15228_v17 = vsel %vm4826_vm3, %v28948_v60, 0.0  ;;  %v15162_v32 = vmul.f32 1.442695, %v15107_v0  ;;  %v15512_v0 = vsel %vm4826_vm3, %v29052_v55, 0.0  ;;  %v31165_v55 = vld [vmem:[#allocation66_spill] sm:$0xff] }
 0xe57   : > { %v15152_v20 = vmul.f32 1.442695, %v15102_v39  ;;  %v23080_v38 = vpop.eup %23079  ;;  %22681 = vmatprep.subr.bf16.mxu1 %v31158_v49  ;;  %v15111_v39 = vsub.f32 %v31160_v6, %v15061_v41  ;;  %v15234_v41 = vsel %vm4826_vm3, %v28960_v2, 0.0  ;;  %v31164_v6 = vld [vmem:[#allocation110_spill] sm:$0xff] }
 0xe58   : > { %v15035_v1 = vpop.permute.xlu1 %15034  ;;  %v29157_v54 = vpop.eup %23081  ;;  %21565 = vmatprep.mubr.msk.f32.mxu1 %vm4826_vm3, %v23080_v38 }
 0xe59   : > { %v15106_v48 = vsub.f32 %v31159_v12, %v15035_v1  ;;  %23091 = vpow2.f32 %v15152_v20  ;;  %21566 = vmatmul.mubr.msk.f32.vlgmr.msra.gmra.mrb[230].mxu1 %vm4826_vm3, %v29157_v54  ;;  %15510 = vadd.xlane.f32.xlu0 %v15509_v9  ;;  %v15083_v61 = vpop.permute.xlu0 %15082  ;;  %v31161_v1 = vld [vmem:[#allocation108_spill] sm:$0xff]  ;;  %v31163_v12 = vld [vmem:[#allocation75_spill] sm:$0xff] }
 0xe5a   : > { %15229 = vadd.xlane.f32.xlu1 %v15228_v17  ;;  %23093 = vpow2.f32 %v15154_v28  ;;  %22683 = vmatpush3.bf16.msra.mxu1 %v31158_v49  ;;  %v15170_v49 = vmul.f32 1.442695, %v15111_v39  ;;  %v15240_v39 = vsel %vm4826_vm3, %v28972_v25, 0.0  ;;  %v15246_v25 = vsel %vm4826_vm3, %v28984_v30, 0.0 }
 0xe5b   : > { %v15160_v45 = vmul.f32 1.442695, %v15106_v48  ;;  %v29168_v35 = vpop.eup %23083  ;;  %22689 = vmatprep.subr.bf16.mxu1 %v31161_v1  ;;  %v15115_v48 = vsub.f32 %v31163_v12, %v15083_v61  ;;  %v15515_v61 = vsel %vm4826_vm3, %v29049_v50, 0.0  ;;  %v15518_v50 = vsel %vm4826_vm3, %v23080_v38, 0.0 }
 0xe5c   : > { %v15057_v60 = vpop.permute.xlu1 %15056  ;;  %v29171_v20 = vpop.eup %23085  ;;  %21579 = vmatprep.mubr.msk.f32.mxu1 %vm4826_vm3, %v29168_v35  ;;  %v15252_v30 = vsel %vm4826_vm3, %v28996_v47, 0.0  ;;  %v15521_v38 = vsel %vm4826_vm3, %v29157_v54, 0.0  ;;  %v15258_v47 = vsel %vm4826_vm3, %v29008_v11, 0.0  ;;  %v15524_v54 = vsel %vm4826_vm3, %v29064_v4, 0.0 }
 0xe5d   : > { %v15110_v28 = vsub.f32 %v31162_v36, %v15057_v60  ;;  %23095 = vpow2.f32 %v15160_v45  ;;  %21580 = vmatmul.mubr.msk.f32.vlgmr.msra.gmra.mrb[232].mxu1 %vm4826_vm3, %v29171_v20  ;;  %15513 = vadd.xlane.f32.xlu0 %v15512_v0  ;;  %v15527_v11 = vsel %vm4826_vm3, %v29068_v46, 0.0  ;;  %v15270_v4 = vsel %vm4826_vm3, %v29032_v26, 0.0 }
 0xe5e   : > { %15235 = vadd.xlane.f32.xlu1 %v15234_v41  ;;  %23097 = vpow2.f32 %v15162_v32  ;;  %22691 = vmatpush3.bf16.msra.mxu1 %v31161_v1  ;;  %v15178_v1 = vmul.f32 1.442695, %v15115_v48  ;;  %v15584_v26 = vsel %vm4826_vm3, %v29132_v19, 0.0  ;;  %v15183_v19 = vsel %vm4826_vm3, %v28851_v21, 0.0 }
 0xe5f   : > { %v15168_v17 = vmul.f32 1.442695, %v15110_v28  ;;  %v29184_v9 = vpop.eup %23087  ;;  %22697 = vmatprep.subr.bf16.mxu1 %v31164_v6  ;;  %v31166_v28 = vld [vmem:[#allocation112_spill] sm:$0xff]  ;;  %v15207_v21 = vsel %vm4826_vm3, %v28903_v63, 0.0  ;;  %v15237_v63 = vsel %vm4826_vm3, %v28963_v44, 0.0 }
 0xe60   : > { %v15079_v2 = vpop.permute.xlu1 %15078  ;;  %v29187_v45 = vpop.eup %23089  ;;  %21593 = vmatprep.mubr.msk.f32.mxu1 %vm4826_vm3, %v29184_v9 }
 0xe61   : > { %23099 = vpow2.f32 %v15168_v17  ;;  %v15114_v32 = vsub.f32 %v31165_v55, %v15079_v2  ;;  %21594 = vmatmul.mubr.msk.f32.vlgmr.msra.gmra.mrb[234].mxu1 %vm4826_vm3, %v29187_v45  ;;  %15516 = vadd.xlane.f32.xlu0 %v15515_v61  ;;  %v31168_v17 = vld [vmem:[#allocation119_spill] sm:$0xff]  ;;  %v15572_v61 = vsel %vm4826_vm3, %v29118_v22, 0.0 }
 0xe62   : > { %15241 = vadd.xlane.f32.xlu1 %v15240_v39  ;;  %23101 = vpow2.f32 %v15170_v49  ;;  %22699 = vmatpush3.bf16.msra.mxu1 %v31164_v6  ;;  %v31167_v49 = vld [vmem:[#allocation116_spill] sm:$0xff]  ;;  %v15530_v39 = vsel %vm4826_vm3, %v29168_v35, 0.0  ;;  %v15542_v35 = vsel %vm4826_vm3, %v29184_v9, 0.0  ;;  %v15186_v9 = vsel %vm4826_vm3, %v28861_v14, 0.0 }
 0xe63   : > { %v15176_v60 = vmul.f32 1.442695, %v15114_v32  ;;  %v29199_v36 = vpop.eup %23091  ;;  %22705 = vmatprep.subr.bf16.mxu1 %v31166_v28  ;;  %v15264_v32 = vsel %vm4826_vm3, %v29021_v5, 0.0  ;;  %v15533_v5 = vsel %vm4826_vm3, %v29171_v20, 0.0  ;;  %v15545_v20 = vsel %vm4826_vm3, %v29187_v45, 0.0 }
 0xe64   : > { %v29202_v41 = vpop.eup %23093  ;;  %21607 = vmatprep.mubr.msk.f32.mxu1 %vm4826_vm3, %v29199_v36  ;;  %v15189_v45 = vsel %vm4826_vm3, %v28869_v57, 0.0  ;;  %v15213_v14 = vsel %vm4826_vm3, %v28915_v27, 0.0  ;;  %v15219_v57 = vsel %vm4826_vm3, %v28927_v24, 0.0  ;;  %v15243_v27 = vsel %vm4826_vm3, %v28975_v42, 0.0 }
 0xe65   : > { %23103 = vpow2.f32 %v15176_v60  ;;  %21608 = vmatmul.mubr.msk.f32.vlgmr.msra.gmra.mrb[236].mxu1 %vm4826_vm3, %v29202_v41  ;;  %15519 = vadd.xlane.f32.xlu0 %v15518_v50  ;;  %v15551_v60 = vsel %vm4826_vm3, %v29093_v7, 0.0  ;;  %v15201_v7 = vsel %vm4826_vm3, %v28891_v40, 0.0  ;;  %v15231_v40 = vsel %vm4826_vm3, %v28951_v33, 0.0 }
 0xe66   : > { %15247 = vadd.xlane.f32.xlu1 %v15246_v25  ;;  %23105 = vpow2.f32 %v15178_v1  ;;  %22707 = vmatpush3.bf16.msra.mxu1 %v31166_v28  ;;  %v15536_v1 = vsel %vm4826_vm3, %v29078_v10, 0.0  ;;  %v15548_v10 = vsel %vm4826_vm3, %v29091_v43, 0.0  ;;  %v15195_v43 = vsel %vm4826_vm3, %v28879_v23, 0.0 }
 0xe67   : > { %v29212_v0 = vpop.eup %23095  ;;  %22713 = vmatprep.subr.bf16.mxu1 %v31167_v49  ;;  %v15225_v23 = vsel %vm4826_vm3, %v28939_v29, 0.0  ;;  %v15249_v24 = vsel %vm4826_vm3, %v28987_v58, 0.0  ;;  %v15255_v29 = vsel %vm4826_vm3, %v28999_v16, 0.0  ;;  %v15261_v33 = vsel %vm4826_vm3, %v29011_v53, 0.0 }
 0xe68   : > { %v29215_v12 = vpop.eup %23097  ;;  %21621 = vmatprep.mubr.msk.f32.mxu1 %vm4826_vm3, %v29212_v0  ;;  %v15267_v58 = vsel %vm4826_vm3, %v29024_v31, 0.0  ;;  %v15554_v31 = vsel %vm4826_vm3, %v29199_v36, 0.0  ;;  %v15560_v36 = vsel %vm4826_vm3, %v29104_v3, 0.0 }
 0xe69   : > { %21622 = vmatmul.mubr.msk.f32.vlgmr.msra.gmra.mrb[238].mxu1 %vm4826_vm3, %v29215_v12  ;;  %15522 = vadd.xlane.f32.xlu0 %v15521_v38 }
 0xe6a   : > { %15253 = vadd.xlane.f32.xlu1 %v15252_v30  ;;  %22715 = vmatpush3.bf16.msra.mxu1 %v31167_v49 }
 0xe6b   : > { %v23100_v48 = vpop.eup %23099  ;;  %22721 = vmatprep.subr.bf16.mxu1 %v31168_v17 }
 0xe6c   : > { %21635 = vmatprep.mubr.msk.f32.mxu1 %vm4826_vm3, %v23100_v48  ;;  %v29228_v6 = vpop.eup %23101  ;;  %v15578_v46 = vsel %vm4826_vm3, %v23100_v48, 0.0  ;;  %v15273_v48 = vsel %vm4826_vm3, %v29035_v56, 0.0  ;;  %v15557_v56 = vsel %vm4826_vm3, %v29202_v41, 0.0  ;;  %v15563_v41 = vsel %vm4826_vm3, %v29107_v34, 0.0 }
 0xe6d   : > { %21636 = vmatmul.mubr.msk.f32.vlgmr.msra.gmra.mrb[240].mxu1 %vm4826_vm3, %v29228_v6  ;;  %15525 = vadd.xlane.f32.xlu0 %v15524_v54 }
 0xe6e   : > { %15259 = vadd.xlane.f32.xlu1 %v15258_v47  ;;  %22723 = vmatpush3.bf16.msra.mxu1 %v31168_v17 }
 0xe6f   : > { %v23104_v2 = vpop.eup %23103 }
 0xe70   : > { %21649 = vmatprep.mubr.msk.f32.mxu1 %vm4826_vm3, %v23104_v2  ;;  %v29238_v55 = vpop.eup %23105  ;;  %v15590_v22 = vsel %vm4826_vm3, %v23104_v2, 0.0 }
 0xe71   : > { %21650 = vmatmul.mubr.msk.f32.vlgmr.msra.gmra.mrb[242].mxu1 %vm4826_vm3, %v29238_v55  ;;  %15528 = vadd.xlane.f32.xlu0 %v15527_v11 }
 0xe72   : > { %15265 = vadd.xlane.f32.xlu1 %v15264_v32 }
 0xe75   : > { %15531 = vadd.xlane.f32.xlu0 %v15530_v39 }
 0xe76   : > { %15271 = vadd.xlane.f32.xlu1 %v15270_v4 }
 0xe79   : > { %15534 = vadd.xlane.f32.xlu0 %v15533_v5 }
 0xe7a   : > { %15573 = vadd.xlane.f32.xlu1 %v15572_v61 }
 0xe7d   : > { %15537 = vadd.xlane.f32.xlu0 %v15536_v1 }
 0xe7e   : > { %15579 = vadd.xlane.f32.xlu1 %v15578_v46 }
 0xe81   : > { %15543 = vadd.xlane.f32.xlu0 %v15542_v35 }
 0xe82   : > { %15585 = vadd.xlane.f32.xlu1 %v15584_v26 }
 0xe85   : > { %15546 = vadd.xlane.f32.xlu0 %v15545_v20 }
 0xe86   : > { %15591 = vadd.xlane.f32.xlu1 %v15590_v22 }
 0xe89   : > { %15549 = vadd.xlane.f32.xlu0 %v15548_v10  ;;  %v15566_v10 = vsel %vm4826_vm3, %v29212_v0, 0.0 }
 0xe8d   : > { %15552 = vadd.xlane.f32.xlu0 %v15551_v60 }
 0xe91   : > { %15184 = vadd.xlane.f32.xlu0 %v15183_v19 }
 0xe95   : > { %15187 = vadd.xlane.f32.xlu0 %v15186_v9 }
 0xe99   : > { %15190 = vadd.xlane.f32.xlu0 %v15189_v45  ;;  %v15569_v45 = vsel %vm4826_vm3, %v29215_v12, 0.0 }
 0xe9d   : > { %15196 = vadd.xlane.f32.xlu0 %v15195_v43 }
 0xea1   : > { %15202 = vadd.xlane.f32.xlu0 %v15201_v7 }
 0xea5   : > { %15208 = vadd.xlane.f32.xlu0 %v15207_v21 }
 0xea9   : > { %15214 = vadd.xlane.f32.xlu0 %v15213_v14  ;;  %v15575_v14 = vsel %vm4826_vm3, %v29121_v62, 0.0  ;;  %v15587_v62 = vsel %vm4826_vm3, %v29135_v18, 0.0 }
 0xead   : > { %15220 = vadd.xlane.f32.xlu0 %v15219_v57 }
 0xeb1   : > { %15226 = vadd.xlane.f32.xlu0 %v15225_v23 }
 0xeb5   : > { %15232 = vadd.xlane.f32.xlu0 %v15231_v40 }
 0xeb9   : > { %15238 = vadd.xlane.f32.xlu0 %v15237_v63  ;;  %v15581_v63 = vsel %vm4826_vm3, %v29228_v6, 0.0  ;;  %v15593_v6 = vsel %vm4826_vm3, %v29238_v55, 0.0 }
 0xebd   : > { %15244 = vadd.xlane.f32.xlu0 %v15243_v27 }
 0xec1   : > { %15250 = vadd.xlane.f32.xlu0 %v15249_v24 }
 0xec2   : > { %v29308_v32 = vpop.xlane.xlu0 %15501 }
 0xec5   : > { %v21434_v28 = vpop.f32.mrb[108].mxu0  ;;  %15256 = vadd.xlane.f32.xlu0 %v15255_v29 }
 0xec6   : > { %v15870_v25 = vpop.f32.mrb[109].mxu0  ;;  %v29315_v5 = vpop.xlane.xlu0 %15504 }
 0xec7   : > { %v22725_v50 = vpack.c.bf16 %v21434_v28, %v15870_v25 }
 0xec9   : > { %22726 = vmatpush1.bf16.msra.mxu0 %v22725_v50  ;;  %15262 = vadd.xlane.f32.xlu0 %v15261_v33 }
 0xeca   : > { %22727 = vmatprep.subr.bf16.mxu0 %v31153_v15 }
 0xecb   : > { %v21441_v44 = vpop.f32.mrb[212].mxu1 }
 0xecc   : > { %v15951_v42 = vpop.f32.mrb[213].mxu1 }
 0xecd   : > { %v22728_v49 = vpack.c.bf16 %v21441_v44, %v15951_v42  ;;  %15268 = vadd.xlane.f32.xlu0 %v15267_v58 }
 0xecf   : > { %22729 = vmatpush1.bf16.msra.mxu0 %v22728_v49 }
 0xed0   : > { %v21448_v30 = vpop.f32.mrb[110].mxu0  ;;  %22730 = vmatprep.subr.bf16.mxu0 %v31153_v15 }
 0xed1   : > { %v16032_v16 = vpop.f32.mrb[111].mxu0  ;;  %15274 = vadd.xlane.f32.xlu0 %v15273_v48 }
 0xed2   : > { %v22731_v38 = vpack.c.bf16 %v21448_v30, %v16032_v16 }
 0xed4   : > { %v21455_v53 = vpop.f32.mrb[214].mxu1  ;;  %22732 = vmatpush1.bf16.msra.mxu0 %v22731_v38 }
 0xed5   : > { %v16113_v17 = vpop.f32.mrb[215].mxu1  ;;  %22733 = vmatprep.subr.bf16.mxu0 %v31153_v15  ;;  %15555 = vadd.xlane.f32.xlu0 %v15554_v31 }
 0xed6   : > { %v22734_v47 = vpack.c.bf16 %v21455_v53, %v16113_v17  ;;  %v15541_v53 = vpop.xlane.xlu1 %15540 }
 0xed8   : > { %v21462_v54 = vpop.f32.mrb[112].mxu0  ;;  %22735 = vmatpush1.bf16.msra.mxu0 %v22734_v47 }
 0xed9   : > { %v16194_v2 = vpop.f32.mrb[113].mxu0  ;;  %22736 = vmatprep.subr.bf16.mxu0 %v31153_v15  ;;  %15558 = vadd.xlane.f32.xlu0 %v15557_v56 }
 0xeda   : > { %v22737_v11 = vpack.c.bf16 %v21462_v54, %v16194_v2  ;;  %v15635_v2 = vrot.slane %v29315_v5, %v31088_v52 }
 0xedc   : > { %v21469_v4 = vpop.f32.mrb[216].mxu1  ;;  %22738 = vmatpush1.bf16.msra.mxu0 %v22737_v11 }
 0xedd   : > { %v16275_v39 = vpop.f32.mrb[217].mxu1  ;;  %22739 = vmatprep.subr.bf16.mxu0 %v31153_v15  ;;  %15561 = vadd.xlane.f32.xlu0 %v15560_v36  ;;  %v15631_v36 = vrot.slane %v29308_v32, %v31087_v59 }
 0xede   : > { %v22740_v61 = vpack.c.bf16 %v21469_v4, %v16275_v39 }
 0xedf   : > { %v15636_v32 = vsel %vm4966_vm4, %v15635_v2, %v15631_v36 }
 0xee0   : > { %v21476_v46 = vpop.f32.mrb[114].mxu0  ;;  %22741 = vmatpush1.bf16.msra.mxu0 %v22740_v61 }
 0xee1   : > { %v16356_v1 = vpop.f32.mrb[115].mxu0  ;;  %22742 = vmatprep.subr.bf16.mxu0 %v31153_v15  ;;  %15564 = vadd.xlane.f32.xlu0 %v15563_v41 }
 0xee2   : > { %v22743_v26 = vpack.c.bf16 %v21476_v46, %v16356_v1  ;;  %v29320_v35 = vpop.xlane.xlu0 %15507 }
 0xee3   : > { %v15640_v11 = vrot.slane %v29320_v35, %v31087_v59 }
 0xee4   : > { %v21483_v22 = vpop.f32.mrb[218].mxu1  ;;  %22744 = vmatpush1.bf16.msra.mxu0 %v22743_v26  ;;  %v29364_v26 = vpop.xlane.xlu1 %15181 }
 0xee5   : > { %v16437_v20 = vpop.f32.mrb[219].mxu1  ;;  %22745 = vmatprep.subr.bf16.mxu0 %v31153_v15  ;;  %15567 = vadd.xlane.f32.xlu0 %v15566_v10 }
 0xee6   : > { %v22746_v3 = vpack.c.bf16 %v21483_v22, %v16437_v20  ;;  %v29325_v60 = vpop.xlane.xlu0 %15510 }
 0xee7   : > { %v15644_v17 = vrot.slane %v29325_v60, %v31088_v52 }
 0xee8   : > { %v21490_v19 = vpop.f32.mrb[116].mxu0  ;;  %22747 = vmatpush1.bf16.msra.mxu0 %v22746_v3 }
 0xee9   : > { %v16518_v9 = vpop.f32.mrb[117].mxu0  ;;  %22748 = vmatprep.subr.bf16.mxu0 %v31153_v15  ;;  %15570 = vadd.xlane.f32.xlu0 %v15569_v45  ;;  %v15645_v46 = vsel %vm4966_vm4, %v15644_v17, %v15640_v11  ;;  %v23224_v11 = vld [vmem:[%s30105_s8 + $0x58] sm:$0xff] }
 0xeea   : > { %v22749_v34 = vpack.c.bf16 %v21490_v19, %v16518_v9  ;;  %v29330_v43 = vpop.xlane.xlu0 %15513  ;;  %v15772_v60 = vsel %vm5103_vm5, %v15645_v46, %v15636_v32  ;;  %v23225_v46 = vld [vmem:[%s30105_s8 + $0x50] sm:$0xff] }
 0xeeb   : > { %v15649_v39 = vrot.slane %v29330_v43, %v31087_v59 }
 0xeec   : > { %v21497_v7 = vpop.f32.mrb[220].mxu1  ;;  %22750 = vmatpush1.bf16.msra.mxu0 %v22749_v34  ;;  %v23215_v34 = vld [vmem:[%s30105_s8] sm:$0xff] }
 0xeed   : > { %v16599_v21 = vpop.f32.mrb[221].mxu1  ;;  %22751 = vmatprep.subr.bf16.mxu0 %v31153_v15  ;;  %15576 = vadd.xlane.f32.xlu0 %v15575_v14 }
 0xeee   : > { %v22752_v0 = vpack.c.bf16 %v21497_v7, %v16599_v21  ;;  %v15517_v57 = vpop.xlane.xlu0 %15516  ;;  %v23216_v21 = vld [vmem:[%s30105_s8 + $0x18] sm:$0xff] }
 0xeef   : > { %v15653_v31 = vrot.slane %v15517_v57, %v31088_v52 }
 0xef0   : > { %v21504_v23 = vpop.f32.mrb[118].mxu0  ;;  %22753 = vmatpush1.bf16.msra.mxu0 %v22752_v0  ;;  %v15689_v0 = vrot.slane %v15541_v53, %v31088_v52  ;;  %v23222_v53 = vld [vmem:[%s30105_s8 + $0x48] sm:$0xff] }
 0xef1   : > { %v16680_v40 = vpop.f32.mrb[119].mxu0  ;;  %22754 = vmatprep.subr.bf16.mxu0 %v31153_v15  ;;  %15582 = vadd.xlane.f32.xlu0 %v15581_v63  ;;  %v15654_v41 = vsel %vm4966_vm4, %v15653_v31, %v15649_v39  ;;  %v23223_v31 = vld [vmem:[%s30105_s8 + $0x40] sm:$0xff] }
 0xef2   : > { %v22755_v12 = vpack.c.bf16 %v21504_v23, %v16680_v40  ;;  %v15520_v27 = vpop.xlane.xlu0 %15519  ;;  %v15773_v45 = vsel %vm5105_vm6, %v15654_v41, %v15772_v60 }
 0xef4   : > { %v21511_v24 = vpop.f32.mrb[222].mxu1  ;;  %22756 = vmatpush1.bf16.msra.mxu0 %v22755_v12  ;;  %v29392_v12 = vpop.xlane.xlu1 %15193 }
 0xef5   : > { %v16761_v28 = vpop.f32.mrb[223].mxu1  ;;  %22757 = vmatprep.subr.bf16.mxu0 %v31153_v15  ;;  %15588 = vadd.xlane.f32.xlu0 %v15587_v62  ;;  %v23218_v62 = vld [vmem:[%s30105_s8 + $0x28] sm:$0xff] }
 0xef6   : > { %v22758_v25 = vpack.c.bf16 %v21511_v24, %v16761_v28  ;;  %v15523_v29 = vpop.xlane.xlu0 %15522 }
 0xef7   : > { %v15662_v56 = vrot.slane %v15523_v29, %v31088_v52 }
 0xef8   : > { %v21518_v50 = vpop.f32.mrb[120].mxu0  ;;  %22759 = vmatpush1.bf16.msra.mxu0 %v22758_v25 }
 0xef9   : > { %v16842_v33 = vpop.f32.mrb[121].mxu0  ;;  %22760 = vmatprep.subr.bf16.mxu0 %v31153_v15  ;;  %15594 = vadd.xlane.f32.xlu0 %v15593_v6 }
 0xefa   : > { %v22761_v44 = vpack.c.bf16 %v21518_v50, %v16842_v33  ;;  %v15526_v42 = vpop.xlane.xlu0 %15525  ;;  %v23219_v33 = vld [vmem:[%s30105_s8 + $0x20] sm:$0xff] }
 0xefb   : > { %v15667_v35 = vrot.slane %v15526_v42, %v31087_v59  ;;  %v23220_v42 = vld [vmem:[%s30105_s8 + $0x38] sm:$0xff] }
 0xefc   : > { %v21525_v49 = vpop.f32.mrb[224].mxu1  ;;  %22762 = vmatpush1.bf16.msra.mxu0 %v22761_v44 }
 0xefd   : > { %v16923_v58 = vpop.f32.mrb[225].mxu1  ;;  %22763 = vmatprep.subr.bf16.mxu0 %v31153_v15 }
 0xefe   : > { %v22764_v30 = vpack.c.bf16 %v21525_v49, %v16923_v58  ;;  %v15529_v18 = vpop.xlane.xlu0 %15528 }
 0xeff   : > { %v15671_v61 = vrot.slane %v15529_v18, %v31088_v52  ;;  %v29419_v18 = vpop.xlane.xlu1 %15199 }
 0xf00   : > { %v21532_v16 = vpop.f32.mrb[122].mxu0  ;;  %22765 = vmatpush1.bf16.msra.mxu0 %v22764_v30 }
 0xf01   : > { %v17004_v38 = vpop.f32.mrb[123].mxu0  ;;  %22766 = vmatprep.subr.bf16.mxu0 %v31153_v15  ;;  %v15672_v19 = vsel %vm4966_vm4, %v15671_v61, %v15667_v35 }
 0xf02   : > { %v22767_v48 = vpack.c.bf16 %v21532_v16, %v17004_v38  ;;  %v15532_v55 = vpop.xlane.xlu0 %15531  ;;  %v23221_v16 = vld [vmem:[%s30105_s8 + $0x30] sm:$0xff] }
 0xf03   : > { %v15676_v22 = vrot.slane %v15532_v55, %v31087_v59 }
 0xf04   : > { %v21539_v47 = vpop.f32.mrb[226].mxu1  ;;  %22768 = vmatpush1.bf16.msra.mxu0 %v22767_v48 }
 0xf05   : > { %v17085_v54 = vpop.f32.mrb[227].mxu1  ;;  %22769 = vmatprep.subr.bf16.mxu0 %v31153_v15  ;;  %v15658_v15 = vrot.slane %v15520_v27, %v31087_v59  ;;  %v23217_v27 = vld [vmem:[%s30105_s8 + $0x10] sm:$0xff] }
 0xf06   : > { %v22770_v4 = vpack.c.bf16 %v21539_v47, %v17085_v54  ;;  %v15535_v1 = vpop.xlane.xlu0 %15534  ;;  %v29438_v54 = vpop.xlane.xlu1 %15205 }
 0xf07   : > { %v15680_v20 = vrot.slane %v15535_v1, %v31088_v52  ;;  %v15663_v10 = vsel %vm4966_vm4, %v15662_v56, %v15658_v15  ;;  %v23226_v1 = vld [vmem:[%s30105_s8 + $0x68] sm:$0xff] }
 0xf08   : > { %v29362_v5 = vpop.f32.mrb[124].mxu0  ;;  %22771 = vmatpush1.bf16.msra.mxu0 %v22770_v4  ;;  %v15774_v14 = vsel %vm5107_vm7, %v15663_v10, %v15773_v45  ;;  %v23228_v10 = vld [vmem:[%s30105_s8 + $0x78] sm:$0xff] }
 0xf09   : > { %v29370_v3 = vpop.f32.mrb[125].mxu0  ;;  %v15681_v9 = vsel %vm4966_vm4, %v15680_v20, %v15676_v22  ;;  %v15775_v40 = vsel %vm5109_vm8, %v15672_v19, %v15774_v14  ;;  %v23227_v20 = vld [vmem:[%s30105_s8 + $0x60] sm:$0xff] }
 0xf0a   : > { %v15538_v43 = vpop.xlane.xlu0 %15537  ;;  %v15776_v24 = vsel %vm5111_vm9, %v15681_v9, %v15775_v40  ;;  %v29462_v35 = vpop.xlane.xlu1 %15211  ;;  %v23229_v9 = vld [vmem:[%s30105_s8 + $0x70] sm:$0xff]  ;;  %v23231_v14 = vld [vmem:[%s30105_s8 + $0x80] sm:$0xff]  ;;  %v23232_v40 = vld [vmem:[%s30105_s8 + $0x98] sm:$0xff] }
 0xf0b   : > { %18455 = vmatmul.mubr.f32.vlgmr.msra.gmra.mrb[140].mxu0 %v23215_v34  ;;  %v15685_v57 = vrot.slane %v15538_v43, %v31087_v59  ;;  %v23230_v43 = vld [vmem:[%s30105_s8 + $0x88] sm:$0xff] }
 0xf0c   : > { %v29381_v7 = vpop.f32.mrb[126].mxu0  ;;  %18459 = vmatprep.mubr.f32.mxu0 %v23216_v21 }
 0xf0d   : > { %v29389_v23 = vpop.f32.mrb[127].mxu0  ;;  %v15690_v63 = vsel %vm4966_vm4, %v15689_v0, %v15685_v57 }
 0xf0e   : > { %v15544_v28 = vpop.xlane.xlu0 %15543  ;;  %v15777_v29 = vsel %vm5113_vm10, %v15690_v63, %v15776_v24  ;;  %v29479_v34 = vpop.xlane.xlu1 %15217 }
 0xf0f   : > { %18460 = vmatmul.mubr.f32.gmra.mrb[142].mxu0 %v23217_v27  ;;  %v15694_v49 = vrot.slane %v15544_v28, %v31087_v59  ;;  %v23233_v28 = vld [vmem:[%s30105_s8 + $0x90] sm:$0xff] }
 0xf10   : > { %v29399_v25 = vpop.f32.mrb[128].mxu0  ;;  %18464 = vmatprep.mubr.f32.mxu0 %v23218_v62 }
 0xf11   : > { %v29405_v50 = vpop.f32.mrb[129].mxu0 }
 0xf12   : > { %v15547_v44 = vpop.xlane.xlu0 %15546  ;;  %v29496_v27 = vpop.xlane.xlu1 %15223 }
 0xf13   : > { %18465 = vmatmul.mubr.f32.gmra.mrb[144].mxu0 %v23219_v33  ;;  %v15698_v58 = vrot.slane %v15547_v44, %v31088_v52 }
 0xf14   : > { %v29410_v6 = vpop.f32.mrb[130].mxu0  ;;  %18469 = vmatprep.mubr.f32.mxu0 %v23220_v42  ;;  %v23235_v42 = vld [vmem:[%s30105_s8 + $0xa0] sm:$0xff] }
 0xf15   : > { %v29417_v30 = vpop.f32.mrb[131].mxu0  ;;  %v15699_v38 = vsel %vm4966_vm4, %v15698_v58, %v15694_v49 }
 0xf16   : > { %v15550_v48 = vpop.xlane.xlu0 %15549  ;;  %v29429_v17 = vsel %vm5115_vm11, %v15699_v38, %v15777_v29  ;;  %v23234_v29 = vld [vmem:[%s30105_s8 + $0xa8] sm:$0xff]  ;;  %v29513_v49 = vpop.xlane.xlu1 %15229 }
 0xf17   : > { %18470 = vmatmul.mubr.f32.gmra.mrb[146].mxu0 %v23221_v16  ;;  %v15703_v56 = vrot.slane %v15550_v48, %v31087_v59  ;;  %v23236_v16 = vld [vmem:[%s30105_s8 + $0xb8] sm:$0xff] }
 0xf18   : > { %18474 = vmatprep.mubr.f32.mxu0 %v23222_v53  ;;  %v29431_v55 = vpop.f32.mrb[132].mxu0 }
 0xf19   : > { %v29433_v47 = vpop.f32.mrb[133].mxu0 }
 0xf1a   : > { %v15553_v2 = vpop.xlane.xlu0 %15552 }
 0xf1b   : > { %18475 = vmatmul.mubr.f32.gmra.mrb[148].mxu0 %v23223_v31  ;;  %v15707_v4 = vrot.slane %v15553_v2, %v31088_v52  ;;  %v23237_v31 = vld [vmem:[%s30105_s8 + $0xb0] sm:$0xff] }
 0xf1c   : > { %18479 = vmatprep.mubr.f32.mxu0 %v23224_v11  ;;  %v29445_v39 = vpop.f32.mrb[134].mxu0 }
 0xf1d   : > { %v29447_v61 = vpop.f32.mrb[135].mxu0  ;;  %v29450_v36 = vsel %vm4966_vm4, %v15707_v4, %v15703_v56  ;;  %v23238_v56 = vld [vmem:[%s30105_s8 + $0xc8] sm:$0xff] }
 0xf1e   : > { %v29455_v15 = vpop.xlane.xlu0 %15184 }
 0xf1f   : > { %18480 = vmatmul.mubr.f32.gmra.mrb[150].mxu0 %v23225_v46  ;;  %v15315_v4 = vrot.slane %v29455_v15, %v31088_v52  ;;  %v15338_v15 = vrot.slane %v29419_v18, %v31087_v59  ;;  %v15356_v18 = vrot.slane %v29462_v35, %v31087_v59 }
 0xf20   : > { %18484 = vmatprep.mubr.f32.mxu0 %v23226_v1  ;;  %v29460_v41 = vpop.f32.mrb[136].mxu0 }
 0xf21   : > { %v29464_v22 = vpop.f32.mrb[137].mxu0 }
 0xf22   : > { %v15188_v32 = vpop.xlane.xlu0 %15187 }
 0xf23   : > { %18485 = vmatmul.mubr.f32.gmra.mrb[152].mxu0 %v23227_v20  ;;  %v15320_v46 = vrot.slane %v15188_v32, %v31087_v59 }
 0xf24   : > { %18489 = vmatprep.mubr.f32.mxu0 %v23228_v10  ;;  %v29472_v60 = vpop.f32.mrb[138].mxu0  ;;  %v15329_v10 = vrot.slane %v29392_v12, %v31087_v59  ;;  %v23239_v12 = vld [vmem:[%s30105_s8 + $0xc0] sm:$0xff] }
 0xf25   : > { %v29474_v19 = vpop.f32.mrb[139].mxu0 }
 0xf26   : > { %v15191_v45 = vpop.xlane.xlu0 %15190 }
 0xf27   : > { %18490 = vmatmul.mubr.f32.gmra.mrb[154].mxu0 %v23229_v9  ;;  %v15324_v53 = vrot.slane %v15191_v45, %v31088_v52  ;;  %v29538_v9 = vpop.xlane.xlu1 %15235 }
 0xf28   : > { %18494 = vmatprep.mubr.f32.mxu0 %v23230_v43  ;;  %v29484_v21 = vpop.f32.mrb[228].mxu1 }
 0xf29   : > { %v29486_v0 = vpop.f32.mrb[229].mxu1  ;;  %v15325_v32 = vsel %vm4966_vm4, %v15324_v53, %v15320_v46 }
 0xf2a   : > { %v15197_v57 = vpop.xlane.xlu0 %15196 }
 0xf2b   : > { %18495 = vmatmul.mubr.f32.gmra.mrb[156].mxu0 %v23231_v14  ;;  %v15333_v2 = vrot.slane %v15197_v57, %v31088_v52  ;;  %v15311_v14 = vrot.slane %v29364_v26, %v31087_v59  ;;  %v23240_v26 = vld [vmem:[%s30105_s8 + $0xd8] sm:$0xff] }
 0xf2c   : > { %18499 = vmatprep.mubr.f32.mxu0 %v23232_v40  ;;  %v29494_v63 = vpop.f32.mrb[230].mxu1  ;;  %v15347_v40 = vrot.slane %v29438_v54, %v31087_v59  ;;  %v15365_v54 = vrot.slane %v29479_v34, %v31087_v59 }
 0xf2d   : > { %v29498_v24 = vpop.f32.mrb[231].mxu1 }
 0xf2e   : > { %v15203_v62 = vpop.xlane.xlu0 %15202 }
 0xf2f   : > { %18500 = vmatmul.mubr.f32.gmra.mrb[158].mxu0 %v23233_v28  ;;  %v15342_v1 = vrot.slane %v15203_v62, %v31088_v52  ;;  %v15334_v28 = vsel %vm4966_vm4, %v15333_v2, %v15329_v10  ;;  %v23242_v10 = vld [vmem:[%s30105_s8 + $0xe8] sm:$0xff] }
 0xf30   : > { %18504 = vmatprep.mubr.f32.mxu0 %v23234_v29  ;;  %v29506_v33 = vpop.f32.mrb[232].mxu1  ;;  %v15316_v29 = vsel %vm4966_vm4, %v15315_v4, %v15311_v14  ;;  %v29576_v4 = vpop.xlane.xlu1 %15241 }
 0xf31   : > { %v29508_v44 = vpop.f32.mrb[233].mxu1  ;;  %v15452_v53 = vsel %vm5103_vm5, %v15325_v32, %v15316_v29 }
 0xf32   : > { %v15209_v58 = vpop.xlane.xlu0 %15208 }
 0xf33   : > { %18505 = vmatmul.mubr.f32.gmra.mrb[160].mxu0 %v23235_v42  ;;  %v15351_v45 = vrot.slane %v15209_v58, %v31088_v52  ;;  %v15343_v42 = vsel %vm4966_vm4, %v15342_v1, %v15338_v15 }
 0xf34   : > { %18509 = vmatprep.mubr.f32.mxu0 %v23236_v16  ;;  %v29518_v38 = vpop.f32.mrb[234].mxu1 }
 0xf35   : > { %v29520_v48 = vpop.f32.mrb[235].mxu1 }
 0xf36   : > { %v15215_v11 = vpop.xlane.xlu0 %15214 }
 0xf37   : > { %18510 = vmatmul.mubr.f32.gmra.mrb[162].mxu0 %v23237_v31  ;;  %v15360_v57 = vrot.slane %v15215_v11, %v31088_v52  ;;  %v15352_v31 = vsel %vm4966_vm4, %v15351_v45, %v15347_v40  ;;  %v15453_v11 = vsel %vm5105_vm6, %v15334_v28, %v15452_v53  ;;  %v15374_v45 = vrot.slane %v29496_v27, %v31087_v59  ;;  %v23243_v28 = vld [vmem:[%s30105_s8 + $0xe0] sm:$0xff] }
 0xf38   : > { %18514 = vmatprep.mubr.f32.mxu0 %v23238_v56  ;;  %v29534_v20 = vpop.f32.mrb[236].mxu1  ;;  %v23241_v56 = vld [vmem:[%s30105_s8 + $0xd0] sm:$0xff]  ;;  %v15454_v46 = vsel %vm5107_vm7, %v15343_v42, %v15453_v11  ;;  %v15248_v42 = vpop.xlane.xlu1 %15247  ;;  %v23247_v11 = vld [vmem:[%s30105_s8 + $0x100] sm:$0xff] }
 0xf39   : > { %v29541_v43 = vpop.f32.mrb[237].mxu1  ;;  %v15361_v35 = vsel %vm4966_vm4, %v15360_v57, %v15356_v18  ;;  %v15455_v14 = vsel %vm5109_vm8, %v15352_v31, %v15454_v46  ;;  %v23244_v18 = vld [vmem:[%s30105_s8 + $0xf8] sm:$0xff]  ;;  %v23246_v31 = vld [vmem:[%s30105_s8 + $0x108] sm:$0xff] }
 0xf3a   : > { %v15221_v62 = vpop.xlane.xlu0 %15220  ;;  %v15456_v57 = vsel %vm5111_vm9, %v15361_v35, %v15455_v14  ;;  %v23248_v46 = vld [vmem:[%s30105_s8 + $0x118] sm:$0xff]  ;;  %v23251_v14 = vld [vmem:[%s30105_s8 + $0x120] sm:$0xff] }
 0xf3b   : > { %18515 = vmatmul.mubr.f32.gmra.mrb[164].mxu0 %v23239_v12  ;;  %v15369_v58 = vrot.slane %v15221_v62, %v31088_v52 }
 0xf3c   : > { %18519 = vmatprep.mubr.f32.mxu0 %v23240_v26  ;;  %v29563_v16 = vpop.f32.mrb[238].mxu1  ;;  %v15254_v35 = vpop.xlane.xlu1 %15253 }
 0xf3d   : > { %v29569_v2 = vpop.f32.mrb[239].mxu1  ;;  %v15370_v34 = vsel %vm4966_vm4, %v15369_v58, %v15365_v54  ;;  %v23245_v54 = vld [vmem:[%s30105_s8 + $0xf0] sm:$0xff] }
 0xf3e   : > { %v15227_v1 = vpop.xlane.xlu0 %15226  ;;  %v15457_v62 = vsel %vm5113_vm10, %v15370_v34, %v15456_v57  ;;  %v23249_v34 = vld [vmem:[%s30105_s8 + $0x110] sm:$0xff]  ;;  %v23252_v57 = vld [vmem:[%s30105_s8 + $0x138] sm:$0xff] }
 0xf3f   : > { %18520 = vmatmul.mubr.f32.gmra.mrb[166].mxu0 %v23241_v56  ;;  %v15378_v15 = vrot.slane %v15227_v1, %v31088_v52 }
 0xf40   : > { %18524 = vmatprep.mubr.f32.mxu0 %v23242_v10  ;;  %v29587_v32 = vpop.f32.mrb[240].mxu1  ;;  %v23250_v10 = vld [vmem:[%s30105_s8 + $0x128] sm:$0xff] }
 0xf41   : > { %v29590_v12 = vpop.f32.mrb[241].mxu1  ;;  %v15379_v40 = vsel %vm4966_vm4, %v15378_v15, %v15374_v45  ;;  %v15260_v45 = vpop.xlane.xlu1 %15259 }
 0xf42   : > { %v15233_v27 = vpop.xlane.xlu0 %15232  ;;  %v15458_v26 = vsel %vm5115_vm11, %v15379_v40, %v15457_v62 }
 0xf43   : > { %18525 = vmatmul.mubr.f32.gmra.mrb[168].mxu0 %v23243_v28  ;;  %15468 = vxpose.xlu1.b32.start [1/2] (short) (narrow) %v15458_v26, 16  ;;  %v23253_v28 = vld [vmem:[%s30105_s8 + $0x130] sm:$0xff] }
 0xf44   : > { %18529 = vmatprep.mubr.f32.mxu0 %v23244_v18  ;;  %v29601_v29 = vpop.f32.mrb[242].mxu1 }
 0xf45   : > { %31169 = vst [vmem:[#allocation54_spill] sm:$0xff] %v29601_v29  ;;  %v29603_v58 = vpop.f32.mrb[243].mxu1  ;;  %v15266_v62 = vpop.xlane.xlu1 %15265 }
 0xf46   : > { %v15239_v53 = vpop.xlane.xlu0 %15238 }
 0xf47   : > { %18530 = vmatmul.mubr.f32.gmra.mrb[170].mxu0 %v23245_v54  ;;  %v15396_v40 = vrot.slane %v15239_v53, %v31088_v52  ;;  %v23254_v54 = vld [vmem:[%s30105_s8 + $0x148] sm:$0xff] }
 0xf48   : > { %18534 = vmatprep.mubr.f32.mxu0 %v23246_v31  ;;  %v15392_v31 = vrot.slane %v29538_v9, %v31087_v59  ;;  %v23255_v9 = vld [vmem:[%s30105_s8 + $0x140] sm:$0xff] }
 0xf4a   : > { %v15245_v56 = vpop.xlane.xlu0 %15244 }
 0xf4b   : > { %18535 = vmatmul.mubr.f32.gmra.mrb[172].mxu0 %v23247_v11  ;;  %v15405_v26 = vrot.slane %v15245_v56, %v31088_v52  ;;  %v15387_v11 = vrot.slane %v15233_v27, %v31088_v52  ;;  %v15383_v56 = vrot.slane %v29513_v49, %v31087_v59  ;;  %v15419_v27 = vrot.slane %v15254_v35, %v31087_v59  ;;  %v23256_v49 = vld [vmem:[%s30105_s8 + $0x158] sm:$0xff] }
 0xf4c   : > { %18539 = vmatprep.mubr.f32.mxu0 %v23248_v46  ;;  %v15401_v46 = vrot.slane %v29576_v4, %v31087_v59 }
 0xf4e   : > { %v15251_v1 = vpop.xlane.xlu0 %15250  ;;  %v15406_v4 = vsel %vm4966_vm4, %v15405_v26, %v15401_v46 }
 0xf4f   : > { %18540 = vmatmul.mubr.f32.gmra.mrb[174].mxu0 %v23249_v34  ;;  %v15414_v53 = vrot.slane %v15251_v1, %v31088_v52 }
 0xf50   : > { %18544 = vmatprep.mubr.f32.mxu0 %v23250_v10  ;;  %v15410_v10 = vrot.slane %v15248_v42, %v31087_v59  ;;  %v15428_v42 = vrot.slane %v15260_v45, %v31087_v59  ;;  %v23257_v45 = vld [vmem:[%s30105_s8 + $0x150] sm:$0xff] }
 0xf52   : > { %v15257_v15 = vpop.xlane.xlu0 %15256 }
 0xf53   : > { %18545 = vmatmul.mubr.f32.gmra.mrb[176].mxu0 %v23251_v14  ;;  %v15423_v34 = vrot.slane %v15257_v15, %v31088_v52  ;;  %v15397_v14 = vsel %vm4966_vm4, %v15396_v40, %v15392_v31  ;;  %v15388_v15 = vsel %vm4966_vm4, %v15387_v11, %v15383_v56  ;;  %v15415_v40 = vsel %vm4966_vm4, %v15414_v53, %v15410_v10 }
 0xf54   : > { %18549 = vmatprep.mubr.f32.mxu0 %v23252_v57  ;;  %v15459_v35 = vsel %vm5103_vm5, %v15397_v14, %v15388_v15  ;;  %v23262_v15 = vld [vmem:[%s30105_s8 + $0x188] sm:$0xff] }
 0xf55   : > { %v15424_v26 = vsel %vm4966_vm4, %v15423_v34, %v15419_v27  ;;  %v15460_v31 = vsel %vm5105_vm6, %v15406_v4, %v15459_v35  ;;  %v23259_v27 = vld [vmem:[%s30105_s8 + $0x160] sm:$0xff] }
 0xf56   : > { %v15263_v18 = vpop.xlane.xlu0 %15262  ;;  %v15461_v11 = vsel %vm5107_vm7, %v15415_v40, %v15460_v31  ;;  %v23263_v40 = vld [vmem:[%s30105_s8 + $0x180] sm:$0xff]  ;;  %v23269_v31 = vld [vmem:[%s30105_s8 + $0x1b0] sm:$0xff] }
 0xf57   : > { %18550 = vmatmul.mubr.f32.gmra.mrb[178].mxu0 %v23253_v28  ;;  %v15432_v57 = vrot.slane %v15263_v18, %v31088_v52  ;;  %v15437_v18 = vrot.slane %v15266_v62, %v31087_v59  ;;  %v23258_v62 = vld [vmem:[%s30105_s8 + $0x168] sm:$0xff]  ;;  %v15462_v10 = vsel %vm5109_vm8, %v15424_v26, %v15461_v11  ;;  %v23267_v35 = vld [vmem:[%s30105_s8 + $0x1a0] sm:$0xff]  ;;  %v23268_v26 = vld [vmem:[%s30105_s8 + $0x1b8] sm:$0xff] }
 0xf58   : > { %18554 = vmatprep.mubr.f32.mxu0 %v23254_v54  ;;  %v15272_v54 = vpop.xlane.xlu1 %15271  ;;  %v23272_v11 = vld [vmem:[%s30105_s8 + $0x1d8] sm:$0xff] }
 0xf59   : > { %v15433_v46 = vsel %vm4966_vm4, %v15432_v57, %v15428_v42  ;;  %v15446_v34 = vrot.slane %v15272_v54, %v31087_v59  ;;  %v23261_v42 = vld [vmem:[%s30105_s8 + $0x170] sm:$0xff]  ;;  %v23266_v54 = vld [vmem:[%s30105_s8 + $0x1a8] sm:$0xff] }
 0xf5a   : > { %v15269_v1 = vpop.xlane.xlu0 %15268  ;;  %v15463_v57 = vsel %vm5111_vm9, %v15433_v46, %v15462_v10  ;;  %v23270_v46 = vld [vmem:[%s30105_s8 + $0x1c8] sm:$0xff]  ;;  %v23277_v10 = vld [vmem:[%s30105_s8 + $0x1f0] sm:$0xff] }
 0xf5b   : > { %18555 = vmatmul.mubr.f32.gmra.mrb[180].mxu0 %v23255_v9  ;;  %v15441_v28 = vrot.slane %v15269_v1, %v31088_v52 }
 0xf5c   : > { %18559 = vmatprep.mubr.f32.mxu0 %v23256_v49  ;;  %v23260_v49 = vld [vmem:[%s30105_s8 + $0x178] sm:$0xff] }
 0xf5d   : > { %v15442_v53 = vsel %vm4966_vm4, %v15441_v28, %v15437_v18  ;;  %v23264_v28 = vld [vmem:[%s30105_s8 + $0x198] sm:$0xff]  ;;  %v23265_v18 = vld [vmem:[%s30105_s8 + $0x190] sm:$0xff] }
 0xf5e   : > { %v15275_v56 = vpop.xlane.xlu0 %15274  ;;  %v15464_v4 = vsel %vm5113_vm10, %v15442_v53, %v15463_v57  ;;  %v23273_v53 = vld [vmem:[%s30105_s8 + $0x1d0] sm:$0xff] }
 0xf5f   : > { %18560 = vmatmul.mubr.f32.gmra.mrb[182].mxu0 %v23257_v45  ;;  %v15450_v14 = vrot.slane %v15275_v56, %v31088_v52  ;;  %v23271_v45 = vld [vmem:[%s30105_s8 + $0x1c0] sm:$0xff]  ;;  %v23274_v56 = vld [vmem:[%s30105_s8 + $0x1e8] sm:$0xff] }
 0xf60   : > { %18564 = vmatprep.mubr.f32.mxu0 %v23258_v62  ;;  %v23275_v62 = vld [vmem:[%s30105_s8 + $0x1e0] sm:$0xff] }
 0xf61   : > { %v15451_v9 = vsel %vm4966_vm4, %v15450_v14, %v15446_v34  ;;  %v23276_v34 = vld [vmem:[%s30105_s8 + $0x1f8] sm:$0xff] }
 0xf62   : > { %v15465_v1 = vsel %vm5115_vm11, %v15451_v9, %v15464_v4  ;;  %v15556_v14 = vpop.xlane.xlu0 %15555  ;;  %v15574_v4 = vpop.xlane.xlu1 %15573 }
 0xf63   : > { %18565 = vmatmul.mubr.f32.gmra.mrb[184].mxu0 %v23259_v27  ;;  %15469 = vxpose.xlu1.b32.end [2/2] (short) (narrow) %v15465_v1, 16 }
 0xf64   : > { %18569 = vmatprep.mubr.f32.mxu0 %v23260_v49 }
 0xf66   : > { %v15559_v57 = vpop.xlane.xlu0 %15558  ;;  %v15580_v49 = vpop.xlane.xlu1 %15579 }
 0xf67   : > { %18570 = vmatmul.mubr.f32.gmra.mrb[186].mxu0 %v23261_v42 }
 0xf68   : > { %18574 = vmatprep.mubr.f32.mxu0 %v23262_v15 }
 0xf6a   : > { %v15562_v9 = vpop.xlane.xlu0 %15561  ;;  %v15586_v15 = vpop.xlane.xlu1 %15585 }
 0xf6b   : > { %18575 = vmatmul.mubr.f32.gmra.mrb[188].mxu0 %v23263_v40 }
 0xf6c   : > { %18579 = vmatprep.mubr.f32.mxu0 %v23264_v28 }
 0xf6e   : > { %v15565_v27 = vpop.xlane.xlu0 %15564  ;;  %v15592_v28 = vpop.xlane.xlu1 %15591 }
 0xf6f   : > { %18580 = vmatmul.mubr.f32.gmra.mrb[190].mxu0 %v23265_v18 }
 0xf70   : > { %18584 = vmatprep.mubr.f32.mxu0 %v23266_v54 }
 0xf72   : > { %v15568_v1 = vpop.xlane.xlu0 %15567 }
 0xf73   : > { %18585 = vmatmul.mubr.f32.gmra.mrb[192].mxu0 %v23267_v35 }
 0xf74   : > { %18589 = vmatprep.mubr.f32.mxu0 %v23268_v26 }
 0xf76   : > { %v15571_v42 = vpop.xlane.xlu0 %15570 }
 0xf77   : > { %18590 = vmatmul.mubr.f32.gmra.mrb[194].mxu0 %v23269_v31 }
 0xf78   : > { %18594 = vmatprep.mubr.f32.mxu0 %v23270_v46 }
 0xf7a   : > { %v15577_v40 = vpop.xlane.xlu0 %15576 }
 0xf7b   : > { %18595 = vmatmul.mubr.f32.gmra.mrb[196].mxu0 %v23271_v45 }
 0xf7c   : > { %18599 = vmatprep.mubr.f32.mxu0 %v23272_v11 }
 0xf7e   : > { %v15583_v18 = vpop.xlane.xlu0 %15582 }
 0xf7f   : > { %18600 = vmatmul.mubr.f32.gmra.mrb[198].mxu0 %v23273_v53 }
 0xf80   : > { %18604 = vmatprep.mubr.f32.mxu0 %v23274_v56 }
 0xf82   : > { %v15589_v11 = vpop.xlane.xlu0 %15588 }
 0xf83   : > { %18605 = vmatmul.mubr.f32.gmra.mrb[200].mxu0 %v23275_v62  ;;  %v15716_v62 = vrot.slane %v15559_v57, %v31088_v52  ;;  %v15730_v57 = vrot.slane %v15568_v1, %v31087_v59  ;;  %v15757_v1 = vrot.slane %v15586_v15, %v31087_v59 }
 0xf84   : > { %18609 = vmatprep.mubr.f32.mxu0 %v23276_v34 }
 0xf87   : > { %18610 = vmatmul.mubr.f32.gmra.mrb[202].mxu0 %v23277_v10  ;;  %v15725_v10 = vrot.slane %v15565_v27, %v31088_v52 }
 0xfde   : > { %v18456_v54 = vpop.f32.mrb[140].mxu0 }
 0xfdf   : > { %v29739_v35 = vadd.f32 %v18456_v54, %v29370_v3  ;;  %v18458_v26 = vpop.f32.mrb[141].mxu0  ;;  %v15484_v31 = vpop.trf.xlu1  ;;  %v15712_v54 = vrot.slane %v15556_v14, %v31087_v59  ;;  %v15761_v14 = vrot.slane %v15589_v11, %v31088_v52  ;;  %v15766_v11 = vrot.slane %v15592_v28, %v31087_v59 }
 0xfe0   : > { %v15788_v46 = vadd.f32 %v29429_v17, %v15484_v31  ;;  %v15734_v17 = vrot.slane %v15571_v42, %v31088_v52  ;;  %v15721_v26 = vrot.slane %v15562_v9, %v31087_v59  ;;  %v15595_v31 = vpop.xlane.xlu0 %15594 }
 0xfe2   : > { %v18461_v45 = vpop.f32.mrb[142].mxu0  ;;  %23107 = vrcp.f32 %v15788_v46 }
 0xfe3   : > { %v29743_v53 = vadd.f32 %v29362_v5, %v18461_v45  ;;  %v18463_v56 = vpop.f32.mrb[143].mxu0  ;;  %v15743_v5 = vrot.slane %v15577_v40, %v31088_v52  ;;  %v15717_v45 = vsel %vm4966_vm4, %v15716_v62, %v15712_v54  ;;  %v15748_v40 = vrot.slane %v15580_v49, %v31087_v59  ;;  %v15485_v28 = vpop.trf.xlu1 }
 0xfe4   : > { %v15752_v56 = vrot.slane %v15583_v18, %v31088_v52  ;;  %v15770_v62 = vrot.slane %v15595_v31, %v31088_v52  ;;  %v15779_v18 = vsel %vm5103_vm5, %v15717_v45, %v29450_v36 }
 0xfe6   : > { %v18466_v34 = vpop.f32.mrb[144].mxu0  ;;  %v15753_v54 = vsel %vm4966_vm4, %v15752_v56, %v15748_v40 }
 0xfe7   : > { %v29748_v29 = vadd.f32 %v18466_v34, %v29486_v0  ;;  %v18468_v3 = vpop.f32.mrb[145].mxu0  ;;  %v15739_v0 = vrot.slane %v15574_v4, %v31087_v59  ;;  %v15726_v34 = vsel %vm4966_vm4, %v15725_v10, %v15721_v26 }
 0xfe8   : > { %v15735_v3 = vsel %vm4966_vm4, %v15734_v17, %v15730_v57  ;;  %v15762_v17 = vsel %vm4966_vm4, %v15761_v14, %v15757_v1 }
 0xfe9   : > { %v15744_v4 = vsel %vm4966_vm4, %v15743_v5, %v15739_v0  ;;  %v15771_v5 = vsel %vm4966_vm4, %v15770_v62, %v15766_v11 }
 0xfea   : > { %v18471_v27 = vpop.f32.mrb[146].mxu0 }
 0xfeb   : > { %v29761_v42 = vadd.f32 %v29484_v21, %v18471_v27  ;;  %v18473_v9 = vpop.f32.mrb[147].mxu0  ;;  %v15780_v21 = vsel %vm5105_vm6, %v15726_v34, %v15779_v18 }
 0xfec   : > { %v23108_v10 = vpop.eup %23107  ;;  %v15781_v49 = vsel %vm5107_vm7, %v15735_v3, %v15780_v21 }
 0xfed   : > { %v15792_v52 = vmul.f32 %v23108_v10, %v15788_v46  ;;  %v15782_v36 = vsel %vm5109_vm8, %v15744_v4, %v15781_v49 }
 0xfee   : > { %v18476_v26 = vpop.f32.mrb[148].mxu0  ;;  %v15783_v59 = vsel %vm5111_vm9, %v15753_v54, %v15782_v36  ;;  %v31170_v54 = vld [vmem:[#allocation64_spill] sm:$0xff]  ;;  %v31171_v36 = vld [vmem:[#allocation63_spill] sm:$0xff] }
 0xfef   : > { %v29776_v15 = vadd.f32 %v18476_v26, %v29389_v23  ;;  %v18478_v31 = vpop.f32.mrb[149].mxu0  ;;  %v15794_v45 = vsub.f32 2.0, %v15792_v52  ;;  %v15784_v57 = vsel %vm5113_vm10, %v15762_v17, %v15783_v59 }
 0xff0   : > { %v15785_v0 = vsel %vm5115_vm11, %v15771_v5, %v15784_v57  ;;  %v31172_v57 = vld [vmem:[#allocation99_spill] sm:$0xff] }
 0xff1   : > { %v15796_v27 = vmul.f32 %v23108_v10, %v15794_v45  ;;  %v15789_v34 = vadd.f32 %v15785_v0, %v15485_v28 }
 0xff2   : > { %v18481_v56 = vpop.f32.mrb[150].mxu0 }
 0xff3   : > { %v29784_v46 = vadd.f32 %v29381_v7, %v18481_v56  ;;  %v18483_v23 = vpop.f32.mrb[151].mxu0  ;;  %v18650_v14 = vrot.slane %v15796_v27, %v31089_v51  ;;  %23109 = vrcp.f32 %v15789_v34  ;;  %v18672_v62 = vrot.slane %v15796_v27, %v31091_v8 }
 0xff4   : > { %v18661_v1 = vrot.slane %v15796_v27, %v31090_v13  ;;  %v18683_v10 = vrot.slane %v15796_v27, %v31092_v37  ;;  %v18694_v26 = vrot.slane %v15796_v27, %v31170_v54  ;;  %v18705_v5 = vrot.slane %v15796_v27, %v31171_v36 }
 0xff5   : > { %18656 = vbcast.lane.b32.xlu0 %v18650_v14, 264  ;;  %18652 = vbcast.lane.b32.xlu1 %v18650_v14, 256  ;;  %v18716_v56 = vrot.slane %v15796_v27, %v31172_v57  ;;  %v31173_v14 = vld [vmem:[#allocation100_spill] sm:$0xff] }
 0xff6   : > { %v18486_v9 = vpop.f32.mrb[152].mxu0 }
 0xff7   : > { %v29788_v40 = vadd.f32 %v18486_v9, %v29498_v24  ;;  %v18488_v3 = vpop.f32.mrb[153].mxu0  ;;  %v18727_v9 = vrot.slane %v15796_v27, %v31173_v14 }
 0xff9   : > { %18674 = vbcast.lane.b32.xlu0 %v18672_v62, 256  ;;  %18663 = vbcast.lane.b32.xlu1 %v18661_v1, 256 }
 0xffa   : > { %v18491_v18 = vpop.f32.mrb[154].mxu0 }
 0xffb   : > { %v29793_v7 = vadd.f32 %v29494_v63, %v18491_v18  ;;  %v18493_v4 = vpop.f32.mrb[155].mxu0 }
 0xffd   : > { %18685 = vbcast.lane.b32.xlu0 %v18683_v10, 256  ;;  %18667 = vbcast.lane.b32.xlu1 %v18661_v1, 264  ;;  %v23110_v49 = vpop.eup %23109 }
 0xffe   : > { %v18496_v11 = vpop.f32.mrb[156].mxu0  ;;  %v15793_v31 = vmul.f32 %v23110_v49, %v15789_v34 }
 0xfff   : > { %v29797_v24 = vadd.f32 %v18496_v11, %v29405_v50  ;;  %v18498_v21 = vpop.f32.mrb[157].mxu0 }
0x1000   : > { %v15795_v28 = vsub.f32 2.0, %v15793_v31 }
0x1001   : > { %18696 = vbcast.lane.b32.xlu0 %v18694_v26, 256  ;;  %18678 = vbcast.lane.b32.xlu1 %v18672_v62, 264 }
0x1002   : > { %v18501_v17 = vpop.f32.mrb[158].mxu0  ;;  %v15797_v34 = vmul.f32 %v23110_v49, %v15795_v28 }
0x1003   : > { %v29801_v52 = vadd.f32 %v29399_v25, %v18501_v17  ;;  %v18503_v63 = vpop.f32.mrb[159].mxu0 }
0x1004   : > { %v18738_v1 = vrot.slane %v15797_v34, %v31089_v51  ;;  %v18760_v21 = vrot.slane %v15797_v34, %v31091_v8  ;;  %v18771_v49 = vrot.slane %v15797_v34, %v31092_v37  ;;  %v18782_v63 = vrot.slane %v15797_v34, %v31170_v54 }
0x1005   : > { %18707 = vbcast.lane.b32.xlu0 %v18705_v5, 256  ;;  %18689 = vbcast.lane.b32.xlu1 %v18683_v10, 264  ;;  %v18749_v10 = vrot.slane %v15797_v34, %v31090_v13 }
0x1006   : > { %v18506_v45 = vpop.f32.mrb[160].mxu0 }
0x1007   : > { %v29805_v50 = vadd.f32 %v18506_v45, %v29508_v44  ;;  %v18508_v59 = vpop.f32.mrb[161].mxu0 }
0x1008   : > { %v18804_v59 = vrot.slane %v15797_v34, %v31172_v57 }
0x1009   : > { %18718 = vbcast.lane.b32.xlu0 %v18716_v56, 256  ;;  %18700 = vbcast.lane.b32.xlu1 %v18694_v26, 264 }
0x100a   : > { %v18511_v0 = vpop.f32.mrb[162].mxu0 }
0x100b   : > { %v29809_v25 = vadd.f32 %v29506_v33, %v18511_v0  ;;  %v18513_v23 = vpop.f32.mrb[163].mxu0 }
0x100d   : > { %18729 = vbcast.lane.b32.xlu0 %v18727_v9, 256  ;;  %18711 = vbcast.lane.b32.xlu1 %v18705_v5, 264  ;;  %v18793_v5 = vrot.slane %v15797_v34, %v31171_v36 }
0x100e   : > { %v18516_v3 = vpop.f32.mrb[164].mxu0 }
0x100f   : > { %v29813_v44 = vadd.f32 %v18516_v3, %v29417_v30  ;;  %v18518_v62 = vpop.f32.mrb[165].mxu0 }
0x1011   : > { %18722 = vbcast.lane.b32.xlu1 %v18716_v56, 264  ;;  %18740 = vbcast.lane.b32.xlu0 %v18738_v1, 256  ;;  %v18815_v56 = vrot.slane %v15797_v34, %v31173_v14 }
0x1012   : > { %v18521_v18 = vpop.f32.mrb[166].mxu0 }
0x1013   : > { %v29817_v4 = vadd.f32 %v29410_v6, %v18521_v18  ;;  %v18523_v33 = vpop.f32.mrb[167].mxu0 }
0x1015   : > { %18733 = vbcast.lane.b32.xlu1 %v18727_v9, 264  ;;  %18751 = vbcast.lane.b32.xlu0 %v18749_v10, 256 }
0x1016   : > { %v18526_v11 = vpop.f32.mrb[168].mxu0 }
0x1017   : > { %v29821_v27 = vadd.f32 %v18526_v11, %v29520_v48  ;;  %v18528_v30 = vpop.f32.mrb[169].mxu0 }
0x1019   : > { %18744 = vbcast.lane.b32.xlu1 %v18738_v1, 264  ;;  %18762 = vbcast.lane.b32.xlu0 %v18760_v21, 256 }
0x101a   : > { %v18531_v26 = vpop.f32.mrb[170].mxu0 }
0x101b   : > { %v29825_v51 = vadd.f32 %v29518_v38, %v18531_v26  ;;  %v18533_v6 = vpop.f32.mrb[171].mxu0 }
0x101d   : > { %18755 = vbcast.lane.b32.xlu1 %v18749_v10, 264  ;;  %18773 = vbcast.lane.b32.xlu0 %v18771_v49, 256 }
0x101e   : > { %v18536_v17 = vpop.f32.mrb[172].mxu0 }
0x101f   : > { %v29829_v13 = vadd.f32 %v18536_v17, %v29433_v47  ;;  %v18538_v48 = vpop.f32.mrb[173].mxu0 }
0x1021   : > { %18766 = vbcast.lane.b32.xlu1 %v18760_v21, 264  ;;  %18784 = vbcast.lane.b32.xlu0 %v18782_v63, 256 }
0x1022   : > { %v18541_v31 = vpop.f32.mrb[174].mxu0 }
0x1023   : > { %v29833_v8 = vadd.f32 %v29431_v55, %v18541_v31  ;;  %v18543_v38 = vpop.f32.mrb[175].mxu0 }
0x1025   : > { %18777 = vbcast.lane.b32.xlu1 %v18771_v49, 264  ;;  %18795 = vbcast.lane.b32.xlu0 %v18793_v5, 256 }
0x1026   : > { %v18546_v45 = vpop.f32.mrb[176].mxu0 }
0x1027   : > { %v29837_v37 = vadd.f32 %v18546_v45, %v29541_v43  ;;  %v18548_v47 = vpop.f32.mrb[177].mxu0 }
0x1029   : > { %18788 = vbcast.lane.b32.xlu1 %v18782_v63, 264  ;;  %18806 = vbcast.lane.b32.xlu0 %v18804_v59, 256 }
0x102a   : > { %v18551_v28 = vpop.f32.mrb[178].mxu0 }
0x102b   : > { %v29841_v54 = vadd.f32 %v29534_v20, %v18551_v28  ;;  %v18553_v55 = vpop.f32.mrb[179].mxu0 }
0x102c   : > { %v31175_v55 = vld [vmem:[#allocation22_spill] sm:$0xff] }
0x102d   : > { %18799 = vbcast.lane.b32.xlu1 %v18793_v5, 264  ;;  %18817 = vbcast.lane.b32.xlu0 %v18815_v56, 256 }
0x102e   : > { %v18556_v0 = vpop.f32.mrb[180].mxu0 }
0x102f   : > { %v29845_v36 = vadd.f32 %v18556_v0, %v29447_v61  ;;  %v18558_v43 = vpop.f32.mrb[181].mxu0 }
0x1031   : > { %18810 = vbcast.lane.b32.xlu1 %v18804_v59, 264 }
0x1032   : > { %v18561_v23 = vpop.f32.mrb[182].mxu0 }
0x1033   : > { %v29848_v57 = vadd.f32 %v29445_v39, %v18561_v23  ;;  %v18563_v9 = vpop.f32.mrb[183].mxu0  ;;  %v31176_v23 = vld [vmem:[#allocation71_spill] sm:$0xff] }
0x1035   : > { %18821 = vbcast.lane.b32.xlu1 %v18815_v56, 264 }
0x1036   : > { %v18566_v3 = vpop.f32.mrb[184].mxu0 }
0x1037   : > { %v29851_v20 = vadd.f32 %v18566_v3, %v29569_v2  ;;  %v18568_v62 = vpop.f32.mrb[185].mxu0  ;;  %v31177_v3 = vld [vmem:[#allocation20_spill] sm:$0xff] }
0x103a   : > { %v18571_v34 = vpop.f32.mrb[186].mxu0 }
0x103b   : > { %v29854_v14 = vadd.f32 %v29563_v16, %v18571_v34  ;;  %v18573_v1 = vpop.f32.mrb[187].mxu0 }
0x103e   : > { %v18576_v61 = vpop.f32.mrb[188].mxu0 }
0x103f   : > { %v29857_v18 = vadd.f32 %v18576_v61, %v29464_v22  ;;  %v18578_v33 = vpop.f32.mrb[189].mxu0 }
0x1042   : > { %v18581_v10 = vpop.f32.mrb[190].mxu0 }
0x1043   : > { %v29860_v39 = vadd.f32 %v29460_v41, %v18581_v10  ;;  %v18583_v11 = vpop.f32.mrb[191].mxu0  ;;  %v31179_v10 = vld [vmem:[#allocation21_spill] sm:$0xff] }
0x1046   : > { %v18586_v30 = vpop.f32.mrb[192].mxu0 }
0x1047   : > { %v29863_v2 = vadd.f32 %v18586_v30, %v29590_v12  ;;  %v18588_v21 = vpop.f32.mrb[193].mxu0 }
0x104a   : > { %v18591_v26 = vpop.f32.mrb[194].mxu0 }
0x104b   : > { %v29866_v16 = vadd.f32 %v29587_v32, %v18591_v26  ;;  %v18593_v6 = vpop.f32.mrb[195].mxu0  ;;  %v31174_v32 = vld [vmem:[#allocation54_spill] sm:$0xff] }
0x104e   : > { %v18596_v22 = vpop.f32.mrb[196].mxu0 }
0x104f   : > { %v29869_v49 = vadd.f32 %v18596_v22, %v29474_v19  ;;  %v18598_v17 = vpop.f32.mrb[197].mxu0 }
0x1052   : > { %v18601_v41 = vpop.f32.mrb[198].mxu0 }
0x1053   : > { %v29872_v48 = vadd.f32 %v29472_v60, %v18601_v41  ;;  %v18603_v63 = vpop.f32.mrb[199].mxu0  ;;  %v31180_v41 = vld [vmem:[#allocation18_spill] sm:$0xff] }
0x1056   : > { %v18606_v12 = vpop.f32.mrb[200].mxu0 }
0x1057   : > { %v29875_v31 = vadd.f32 %v18606_v12, %v29603_v58  ;;  %v18608_v38 = vpop.f32.mrb[201].mxu0  ;;  %v31181_v12 = vld [vmem:[#allocation23_spill] sm:$0xff] }
0x105a   : > { %v18611_v5 = vpop.f32.mrb[202].mxu0 }
0x105b   : > { %v29878_v45 = vadd.f32 %v31174_v32, %v18611_v5  ;;  %v18613_v47 = vpop.f32.mrb[203].mxu0 }
0x1067   : > { %v18657_v59 = vpop.permute.xlu0 %18656  ;;  %v18653_v19 = vpop.permute.xlu1 %18652 }
0x1068   : > { %v18824_v28 = vmul.f32 %v18657_v59, %v29743_v53  ;;  %v18823_v60 = vmul.f32 %v18653_v19, %v29739_v35  ;;  %v31182_v19 = vld [vmem:[#allocation32_spill] sm:$0xff] }
0x106a   : > { %v18856_v56 = vmul.f32 %v18824_v28, %v31175_v55  ;;  %v18855_v58 = vmul.f32 %v18823_v60, %v31175_v55  ;;  %v31183_v60 = vld [vmem:[#allocation29_spill] sm:$0xff] }
0x106b   : > { %v18675_v0 = vpop.permute.xlu0 %18674  ;;  %v18664_v43 = vpop.permute.xlu1 %18663 }
0x106c   : > { %v18888_v9 = vadd.f32 %v18856_v56, %v31176_v23  ;;  %v18887_v62 = vadd.f32 %v18855_v58, %v31177_v3  ;;  %v18827_v34 = vmul.f32 %v18675_v0, %v29776_v15  ;;  %v18825_v1 = vmul.f32 %v18664_v43, %v29748_v29  ;;  %v31178_v15 = vld [vmem:[#allocation72_spill] sm:$0xff] }
0x106e   : > { %18920 = vst.msk [vmem:[%s29891_s15 + $0x8] sm:$0xff] %vm582_vm0, %v18888_v9  ;;  %18919 = vst.msk [vmem:[%s29891_s15] sm:$0xff] %vm582_vm0, %v18887_v62  ;;  %v18859_v35 = vmul.f32 %v18827_v34, %v31175_v55  ;;  %v18857_v53 = vmul.f32 %v18825_v1, %v31175_v55  ;;  %v31184_v9 = vld [vmem:[#allocation74_spill] sm:$0xff]  ;;  %v31185_v62 = vld [vmem:[#allocation73_spill] sm:$0xff] }
0x106f   : > { %v18686_v61 = vpop.permute.xlu0 %18685  ;;  %v18668_v33 = vpop.permute.xlu1 %18667 }
0x1070   : > { %v18891_v29 = vadd.f32 %v18859_v35, %v31178_v15  ;;  %v18889_v11 = vadd.f32 %v18857_v53, %v31179_v10  ;;  %v18829_v30 = vmul.f32 %v18686_v61, %v29788_v40  ;;  %v18826_v21 = vmul.f32 %v18668_v33, %v29761_v42  ;;  %v31186_v33 = vld [vmem:[#allocation34_spill] sm:$0xff] }
0x1072   : > { %18923 = vst.msk [vmem:[%s29891_s15 + $0x20] sm:$0xff] %vm582_vm0, %v18891_v29  ;;  %18921 = vst.msk [vmem:[%s29891_s15 + $0x10] sm:$0xff] %vm582_vm0, %v18889_v11  ;;  %v18861_v26 = vmul.f32 %v18829_v30, %v31175_v55  ;;  %v18858_v6 = vmul.f32 %v18826_v21, %v31175_v55  ;;  %v31187_v29 = vld [vmem:[#allocation35_spill] sm:$0xff] }
0x1073   : > { %v18697_v22 = vpop.permute.xlu0 %18696  ;;  %v18679_v17 = vpop.permute.xlu1 %18678 }
0x1074   : > { %v18893_v63 = vadd.f32 %v18861_v26, %v31180_v41  ;;  %v18890_v38 = vadd.f32 %v18858_v6, %v31181_v12  ;;  %v18831_v40 = vmul.f32 %v18697_v22, %v29797_v24  ;;  %v18828_v42 = vmul.f32 %v18679_v17, %v29784_v46  ;;  %v31188_v6 = vld [vmem:[#allocation28_spill] sm:$0xff]  ;;  %v31189_v17 = vld [vmem:[#allocation25_spill] sm:$0xff] }
0x1076   : > { %18925 = vst.msk [vmem:[%s29891_s15 + $0x30] sm:$0xff] %vm582_vm0, %v18893_v63  ;;  %18922 = vst.msk [vmem:[%s29891_s15 + $0x18] sm:$0xff] %vm582_vm0, %v18890_v38  ;;  %v18863_v5 = vmul.f32 %v18831_v40, %v31175_v55  ;;  %v18860_v32 = vmul.f32 %v18828_v42, %v31175_v55  ;;  %v31190_v42 = vld [vmem:[#allocation82_spill] sm:$0xff] }
0x1077   : > { %v18708_v47 = vpop.permute.xlu0 %18707  ;;  %v18690_v59 = vpop.permute.xlu1 %18689 }
0x1078   : > { %v18895_v28 = vadd.f32 %v18863_v5, %v31182_v19  ;;  %v18892_v56 = vadd.f32 %v18860_v32, %v31183_v60  ;;  %v18833_v24 = vmul.f32 %v18708_v47, %v29805_v50  ;;  %v18830_v46 = vmul.f32 %v18690_v59, %v29793_v7  ;;  %v31191_v32 = vld [vmem:[#allocation79_spill] sm:$0xff] }
0x107a   : > { %18927 = vst.msk [vmem:[%s29891_s15 + $0x40] sm:$0xff] %vm582_vm0, %v18895_v28  ;;  %18924 = vst.msk [vmem:[%s29891_s15 + $0x28] sm:$0xff] %vm582_vm0, %v18892_v56  ;;  %v18865_v58 = vmul.f32 %v18833_v24, %v31175_v55  ;;  %v18862_v0 = vmul.f32 %v18830_v46, %v31175_v55  ;;  %v31192_v56 = vld [vmem:[#allocation47_spill] sm:$0xff]  ;;  %v31193_v46 = vld [vmem:[#allocation33_spill] sm:$0xff] }
0x107b   : > { %v18719_v43 = vpop.permute.xlu0 %18718  ;;  %v18701_v23 = vpop.permute.xlu1 %18700 }
0x107c   : > { %v18897_v3 = vadd.f32 %v18865_v58, %v31184_v9  ;;  %v18894_v34 = vadd.f32 %v18862_v0, %v31185_v62  ;;  %v18835_v50 = vmul.f32 %v18719_v43, %v29813_v44  ;;  %v18832_v7 = vmul.f32 %v18701_v23, %v29801_v52 }
0x107e   : > { %18929 = vst.msk [vmem:[%s29891_s15 + $0x50] sm:$0xff] %vm582_vm0, %v18897_v3  ;;  %18926 = vst.msk [vmem:[%s29891_s15 + $0x38] sm:$0xff] %vm582_vm0, %v18894_v34  ;;  %v18867_v1 = vmul.f32 %v18835_v50, %v31175_v55  ;;  %v18864_v35 = vmul.f32 %v18832_v7, %v31175_v55  ;;  %v31194_v3 = vld [vmem:[#allocation41_spill] sm:$0xff]  ;;  %v31195_v34 = vld [vmem:[#allocation27_spill] sm:$0xff] }
0x107f   : > { %v18730_v53 = vpop.permute.xlu0 %18729  ;;  %v18712_v61 = vpop.permute.xlu1 %18711 }
0x1080   : > { %v18899_v15 = vadd.f32 %v18867_v1, %v31186_v33  ;;  %v18896_v10 = vadd.f32 %v18864_v35, %v31187_v29  ;;  %v18837_v44 = vmul.f32 %v18730_v53, %v29821_v27  ;;  %v18834_v52 = vmul.f32 %v18712_v61, %v29809_v25  ;;  %v31196_v61 = vld [vmem:[#allocation85_spill] sm:$0xff] }
0x1082   : > { %18931 = vst.msk [vmem:[%s29891_s15 + $0x60] sm:$0xff] %vm582_vm0, %v18899_v15  ;;  %18928 = vst.msk [vmem:[%s29891_s15 + $0x48] sm:$0xff] %vm582_vm0, %v18896_v10  ;;  %v18869_v11 = vmul.f32 %v18837_v44, %v31175_v55  ;;  %v18866_v30 = vmul.f32 %v18834_v52, %v31175_v55  ;;  %v31197_v15 = vld [vmem:[#allocation84_spill] sm:$0xff] }
0x1083   : > { %v18741_v21 = vpop.permute.xlu0 %18740  ;;  %v18723_v26 = vpop.permute.xlu1 %18722 }
0x1084   : > { %v18901_v22 = vadd.f32 %v18869_v11, %v31188_v6  ;;  %v18898_v41 = vadd.f32 %v18866_v30, %v31189_v17  ;;  %v18839_v27 = vmul.f32 %v18741_v21, %v29829_v13  ;;  %v18836_v25 = vmul.f32 %v18723_v26, %v29817_v4  ;;  %v31198_v30 = vld [vmem:[#allocation45_spill] sm:$0xff]  ;;  %v31199_v26 = vld [vmem:[#allocation46_spill] sm:$0xff] }
0x1086   : > { %18933 = vst.msk [vmem:[%s29891_s15 + $0x70] sm:$0xff] %vm582_vm0, %v18901_v22  ;;  %18930 = vst.msk [vmem:[%s29891_s15 + $0x58] sm:$0xff] %vm582_vm0, %v18898_v41  ;;  %v18871_v63 = vmul.f32 %v18839_v27, %v31175_v55  ;;  %v18868_v12 = vmul.f32 %v18836_v25, %v31175_v55  ;;  %v31200_v25 = vld [vmem:[#allocation39_spill] sm:$0xff] }
0x1087   : > { %v18752_v38 = vpop.permute.xlu0 %18751  ;;  %v18734_v40 = vpop.permute.xlu1 %18733 }
0x1088   : > { %v18903_v5 = vadd.f32 %v18871_v63, %v31190_v42  ;;  %v18900_v47 = vadd.f32 %v18868_v12, %v31191_v32  ;;  %v18841_v13 = vmul.f32 %v18752_v38, %v29837_v37  ;;  %v18838_v4 = vmul.f32 %v18734_v40, %v29825_v51  ;;  %v31201_v12 = vld [vmem:[#allocation40_spill] sm:$0xff] }
0x108a   : > { %18935 = vst.msk [vmem:[%s29891_s15 + $0x80] sm:$0xff] %vm582_vm0, %v18903_v5  ;;  %18932 = vst.msk [vmem:[%s29891_s15 + $0x68] sm:$0xff] %vm582_vm0, %v18900_v47  ;;  %v18873_v59 = vmul.f32 %v18841_v13, %v31175_v55  ;;  %v18870_v19 = vmul.f32 %v18838_v4, %v31175_v55  ;;  %v31202_v47 = vld [vmem:[#allocation88_spill] sm:$0xff]  ;;  %v31203_v4 = vld [vmem:[#allocation86_spill] sm:$0xff] }
0x108b   : > { %v18763_v28 = vpop.permute.xlu0 %18762  ;;  %v18745_v60 = vpop.permute.xlu1 %18744 }
0x108c   : > { %v18905_v24 = vadd.f32 %v18873_v59, %v31192_v56  ;;  %v18902_v58 = vadd.f32 %v18870_v19, %v31193_v46  ;;  %v18843_v37 = vmul.f32 %v18763_v28, %v29845_v36  ;;  %v18840_v51 = vmul.f32 %v18745_v60, %v29833_v8  ;;  %v31204_v56 = vld [vmem:[#allocation31_spill] sm:$0xff] }
0x108d   : > { %v31205_v46 = vld [vmem:[#allocation59_spill] sm:$0xff] }
0x108e   : > { %18937 = vst.msk [vmem:[%s29891_s15 + $0x90] sm:$0xff] %vm582_vm0, %v18905_v24  ;;  %18934 = vst.msk [vmem:[%s29891_s15 + $0x78] sm:$0xff] %vm582_vm0, %v18902_v58  ;;  %v18875_v0 = vmul.f32 %v18843_v37, %v31175_v55  ;;  %v18872_v43 = vmul.f32 %v18840_v51, %v31175_v55  ;;  %v31206_v51 = vld [vmem:[#allocation53_spill] sm:$0xff] }
0x108f   : > { %v18774_v23 = vpop.permute.xlu0 %18773  ;;  %v18756_v9 = vpop.permute.xlu1 %18755 }
0x1090   : > { %v18907_v62 = vadd.f32 %v18875_v0, %v31194_v3  ;;  %v18904_v50 = vadd.f32 %v18872_v43, %v31195_v34  ;;  %v18845_v36 = vmul.f32 %v18774_v23, %v29851_v20  ;;  %v18842_v8 = vmul.f32 %v18756_v9, %v29841_v54 }
0x1092   : > { %18939 = vst.msk [vmem:[%s29891_s15 + $0xa0] sm:$0xff] %vm582_vm0, %v18907_v62  ;;  %18936 = vst.msk [vmem:[%s29891_s15 + $0x88] sm:$0xff] %vm582_vm0, %v18904_v50  ;;  %v18877_v7 = vmul.f32 %v18845_v36, %v31175_v55  ;;  %v18874_v1 = vmul.f32 %v18842_v8, %v31175_v55 }
0x1093   : > { %v18785_v35 = vpop.permute.xlu0 %18784  ;;  %v18767_v53 = vpop.permute.xlu1 %18766 }
0x1094   : > { %v18909_v33 = vadd.f32 %v18877_v7, %v31196_v61  ;;  %v18906_v29 = vadd.f32 %v18874_v1, %v31197_v15  ;;  %v18847_v20 = vmul.f32 %v18785_v35, %v29857_v18  ;;  %v18844_v54 = vmul.f32 %v18767_v53, %v29848_v57 }
0x1096   : > { %18941 = vst.msk [vmem:[%s29891_s15 + $0xb0] sm:$0xff] %vm582_vm0, %v18909_v33  ;;  %18938 = vst.msk [vmem:[%s29891_s15 + $0x98] sm:$0xff] %vm582_vm0, %v18906_v29  ;;  %v18879_v10 = vmul.f32 %v18847_v20, %v31175_v55  ;;  %v18876_v44 = vmul.f32 %v18844_v54, %v31175_v55 }
0x1097   : > { %v18796_v52 = vpop.permute.xlu0 %18795  ;;  %v18778_v11 = vpop.permute.xlu1 %18777 }
0x1098   : > { %v18911_v21 = vadd.f32 %v18879_v10, %v31198_v30  ;;  %v18908_v6 = vadd.f32 %v18876_v44, %v31199_v26  ;;  %v18849_v18 = vmul.f32 %v18796_v52, %v29863_v2  ;;  %v18846_v57 = vmul.f32 %v18778_v11, %v29854_v14 }
0x109a   : > { %18943 = vst.msk [vmem:[%s29891_s15 + $0xc0] sm:$0xff] %vm582_vm0, %v18911_v21  ;;  %18940 = vst.msk [vmem:[%s29891_s15 + $0xa8] sm:$0xff] %vm582_vm0, %v18908_v6  ;;  %v18881_v22 = vmul.f32 %v18849_v18, %v31175_v55  ;;  %v18878_v17 = vmul.f32 %v18846_v57, %v31175_v55 }
0x109b   : > { %v18807_v41 = vpop.permute.xlu0 %18806  ;;  %v18789_v27 = vpop.permute.xlu1 %18788 }
0x109c   : > { %v18913_v63 = vadd.f32 %v18881_v22, %v31200_v25  ;;  %v18910_v38 = vadd.f32 %v18878_v17, %v31201_v12  ;;  %v18851_v2 = vmul.f32 %v18807_v41, %v29869_v49  ;;  %v18848_v14 = vmul.f32 %v18789_v27, %v29860_v39 }
0x109e   : > { %18945 = vst.msk [vmem:[%s29891_s15 + $0xd0] sm:$0xff] %vm582_vm0, %v18913_v63  ;;  %18942 = vst.msk [vmem:[%s29891_s15 + $0xb8] sm:$0xff] %vm582_vm0, %v18910_v38  ;;  %v18883_v40 = vmul.f32 %v18851_v2, %v31175_v55  ;;  %v18880_v42 = vmul.f32 %v18848_v14, %v31175_v55 }
0x109f   : > { %v18818_v5 = vpop.permute.xlu0 %18817  ;;  %v18800_v32 = vpop.permute.xlu1 %18799 }
0x10a0   : > { %v18915_v13 = vadd.f32 %v18883_v40, %v31202_v47  ;;  %v18912_v59 = vadd.f32 %v18880_v42, %v31203_v4  ;;  %v18853_v49 = vmul.f32 %v18818_v5, %v29875_v31  ;;  %v18850_v39 = vmul.f32 %v18800_v32, %v29866_v16 }
0x10a2   : > { %18947 = vst.msk [vmem:[%s29891_s15 + $0xe0] sm:$0xff] %vm582_vm0, %v18915_v13  ;;  %18944 = vst.msk [vmem:[%s29891_s15 + $0xc8] sm:$0xff] %vm582_vm0, %v18912_v59  ;;  %v18885_v19 = vmul.f32 %v18853_v49, %v31175_v55  ;;  %v18882_v28 = vmul.f32 %v18850_v39, %v31175_v55 }
0x10a3   : > { %v18811_v60 = vpop.permute.xlu1 %18810 }
0x10a4   : > { %v18917_v24 = vadd.f32 %v18885_v19, %v31204_v56  ;;  %v18914_v58 = vadd.f32 %v18882_v28, %v31205_v46  ;;  %v18852_v31 = vmul.f32 %v18811_v60, %v29872_v48  ;;  %v31207_v48 = vld [vmem:[#allocation90_spill] sm:$0xff] }
0x10a6   : > { %18949 = vst.msk [vmem:[%s29891_s15 + $0xf0] sm:$0xff] %vm582_vm0, %v18917_v24  ;;  %18946 = vst.msk [vmem:[%s29891_s15 + $0xd8] sm:$0xff] %vm582_vm0, %v18914_v58  ;;  %v18884_v16 = vmul.f32 %v18852_v31, %v31175_v55 }
0x10a7   : > { %v18822_v37 = vpop.permute.xlu1 %18821 }
0x10a8   : > { %v18916_v0 = vadd.f32 %v18884_v16, %v31206_v51  ;;  %v18854_v43 = vmul.f32 %v18822_v37, %v29878_v45 }
0x10aa   : > { %18948 = vst.msk [vmem:[%s29891_s15 + $0xe8] sm:$0xff] %vm582_vm0, %v18916_v0  ;;  %v18886_v23 = vmul.f32 %v18854_v43, %v31175_v55 }
0x10ac   : > { %v18918_v9 = vadd.f32 %v18886_v23, %v31207_v48 }
0x10ae   : > { %18950 = vst.msk [vmem:[%s29891_s15 + $0xf8] sm:$0xff] %vm582_vm0, %v18918_v9 }
0x10af   : > { %23291 = shalt.err (!%p23288_p3)
}
0x10b0   : > { %s23292_s13 = scalar_lea.hbm %s30047_s26, 4096  ;;  %s23296_s25 = scalar_lea.hbm %s30108_s11, 8192 }
0x10b1   : > { %p23293_p4 = scmp.ne.s32.totalorder %s30047_s26, %s23292_s13  ;;  %p23297_p9 = scmp.lt.u32.totalorder %s30047_s26, %s30108_s11 }
0x10b2   : > { %p23298_p10 = scmp.lt.u32.totalorder %s23296_s25, %s23292_s13  ;;  %p23300_p12 = scmp.lt.u32.totalorder %s23292_s13, %s30047_s26 }
0x10b3   : > { %p23294_p7 = pnand %p23293_p4, %p23447_p5 }
0x10b4   : > { %p23299_p11 = por %p23298_p10, %p23297_p9 }
0x10b5   : > { %p23295_p8 = pneg %p23294_p7 }
0x10b6   : > { %p23301_p13 = por %p23300_p12, %p23299_p11 }
0x10b8   : > { %p23302_p0 = pnand %p23301_p13, %p23295_p8 }
0x10ba   : > { %23305 = shalt.err (!%p23302_p0)
}
0x10bb   : > { %s23344_s30 = smov 128   ;;  %s23345_s12 = smov 8  }
0x10bc   : > { %22804 = dma.vmem_to_hbm [thread:$0]  (%p23447_p5), %s30049_s23, 4096, %s30047_s26, %s30056_s10, %s23344_s30, %s23344_s30, %s23345_s12  }
0x10bd PF: > { %p22810_p1 = scmp.ge.s32.totalorder %s23340_s22, 2  ;;  %s18980_s14 = sand.u32 1, %s23328_s19  }
0x10be   : > { %s18981_s13 = scalar_lea.sflag [#allocation4], %s18980_s14 }
0x10bf   : > { %p22807_p2 = pnand %p22810_p1, %p23451_p6 }
0x10c1   : > { %23323 = dma.done.wait (!%p22807_p2), %s18981_s13, 4096  }
0x10c2   : > { %23325 = vsyncadd (!%p22807_p2), %s18981_s13, 4294963200  ;;  %p22_p3 = scmp.ge.s32.totalorder %s23434_s24, 4   ;;  %s31208_s19 = smov %s23332_s20 }
0x10c3   : > { %s31209_s20 = smov %s23336_s21  ;;  %s31210_s21 = smov %s23445_s27 }
0x10c4   : > { %s31211_s22 = smov %s23434_s24  ;;  %24 = sbr.rel (!%p22_p3) target bundleno = 5 (0x5), region = 99 }
0x10cb   :  { %18986 = vsyncpa [#allocation4], 1 }
0x10cc   :  { %18988 = vsyncpa [#allocation4 + $0x1], 1 }

</bundles_post_ra>
